<compile_context>
chip_gen: v7x
topology: tpu7x:2x2x1
jax: 0.10.0
libtpu: 0.0.40
codegen_flags: <defaults>
</compile_context>

<pallas_src>
import functools
import math

import jax
import jax.numpy as jnp
from jax import lax
from jax.experimental import pallas as pl
from jax.experimental.pallas import tpu as pltpu


MXU_DTYPE = jnp.bfloat16   # matmul operand dtype; accumulation stays float32


# -----------------------------------------------------------------------------
# The single fused Pallas kernel (encoder once + batched siamese decoder)
# -----------------------------------------------------------------------------

def _siamese_kernel(src_ref, tgt_ref, src_bias_ref, tgt_bias_ref,
                    w_qkv_ref, b_qkv_ref, w_out_ref, w_ff1_ref, w_ff2_ref,
                    vec_d_ref, vec_f_ref, out_ref, *, num_heads, eps):
    f32 = jnp.float32

    src = src_ref[...].astype(f32)          # [B,  Ss, D]
    tgt = tgt_ref[...].astype(f32)          # [2B, St, D]   (tgt1 ++ tgt2)
    src_bias = src_bias_ref[...]            # [B, 1, Ss]    additive (0 / -1e9)
    tgt_bias = tgt_bias_ref[...]            # [B, St, St]

    B, Ss, D = src.shape
    B2, St, _ = tgt.shape
    H = num_heads
    Dh = D // H
    scale = 1.0 / math.sqrt(Dh)

    def row_d(i):                           # [1, D] bias / LN row
        return vec_d_ref[i:i + 1, :]

    def row_f(i):                           # [1, Dff] FFN hidden bias row
        return vec_f_ref[i:i + 1, :]

    def mm(x, w):                           # bf16 MXU operands, f32 accumulation
        return jnp.dot(x.astype(MXU_DTYPE), w.astype(MXU_DTYPE),
                       preferred_element_type=f32)

    def layernorm(x, g, b):
        mu = jnp.mean(x, axis=-1, keepdims=True)
        var = jnp.mean((x - mu) ** 2, axis=-1, keepdims=True)
        return (x - mu) * lax.rsqrt(var + eps) * g + b

    def mha(xq, xkv, bias, blk, rep):
        """Multi-head attention.  All weight slabs are indexed on leading axes
        only (no sub-128 lane slices); heads are combined by accumulating
        o_h @ Wo_h (no lane concat).  `rep = Bq // Bkv` handles the siamese
        targets sharing one encoder memory without duplicating it."""
        Bq, Sq, _ = xq.shape
        Bkv, Sk, _ = xkv.shape
        xq2 = xq.reshape(Bq * Sq, D)
        xk2 = xkv.reshape(Bkv * Sk, D)

        # Hoist the bias broadcast out of the head loop (no CSE of broadcasts).
        bias_b = jnp.broadcast_to(bias, (Bq, Sq, Sk))

        acc = jnp.zeros((Bq * Sq, D), f32)
        for h in range(H):                                   # static, H small
            iq = (blk * 3 + 0) * H + h
            ik = (blk * 3 + 1) * H + h
            iv = (blk * 3 + 2) * H + h
            qh = mm(xq2, w_qkv_ref[iq]) + b_qkv_ref[iq:iq + 1, :]   # [Bq*Sq, Dh]
            kh = mm(xk2, w_qkv_ref[ik]) + b_qkv_ref[ik:ik + 1, :]   # [Bkv*Sk, Dh]
            vh = mm(xk2, w_qkv_ref[iv]) + b_qkv_ref[iv:iv + 1, :]

            qh3 = (qh * scale).reshape(Bq, Sq, Dh)
            kh3 = kh.reshape(Bkv, Sk, Dh)
            vh3 = vh.reshape(Bkv, Sk, Dh)
            if rep > 1:
                # Replicate only the tiny per-head K/V tiles (not the memory).
                kh3 = jnp.concatenate([kh3] * rep, axis=0)
                vh3 = jnp.concatenate([vh3] * rep, axis=0)

            s = jnp.einsum("bqd,bkd->bqk", qh3.astype(MXU_DTYPE),
                           kh3.astype(MXU_DTYPE), preferred_element_type=f32)
            s = s + bias_b
            m = jnp.max(s, axis=-1, keepdims=True)
            p = jnp.exp(s - m)
            l = jnp.sum(p, axis=-1, keepdims=True)
            oh = jnp.einsum("bqk,bkd->bqd", p.astype(MXU_DTYPE),
                            vh3.astype(MXU_DTYPE), preferred_element_type=f32)
            # Normalize the [., Dh] output instead of the [., Sk] probabilities.
            oh = oh * pl.reciprocal(l, approx=True)
            acc = acc + mm(oh.reshape(Bq * Sq, Dh), w_out_ref[blk * H + h])
        return acc

    def ffn(x2, idx):
        hidden = jnp.maximum(mm(x2, w_ff1_ref[idx]) + row_f(idx), 0.0)
        return mm(hidden, w_ff2_ref[idx]) + row_d(3 + idx)

    # ---- encoder layer: runs exactly once; memory shared by both targets ----
    x = src.reshape(B * Ss, D)
    x = layernorm(x + mha(src, src, src_bias, blk=0, rep=1) + row_d(0),
                  row_d(5), row_d(6))
    x = layernorm(x + ffn(x, 0), row_d(7), row_d(8))
    memory = x.reshape(B, Ss, D)

    # ---- decoder layer: tgt1 ++ tgt2 stacked along the leading (batch) axis --
    self_bias = jnp.concatenate([tgt_bias, tgt_bias], axis=0)     # [2B, St, St]
    cross_bias = jnp.concatenate([src_bias, src_bias], axis=0)    # [2B, 1,  Ss]

    y = tgt.reshape(B2 * St, D)
    y = layernorm(y + mha(tgt, tgt, self_bias, blk=1, rep=1) + row_d(1),
                  row_d(9), row_d(10))
    y = layernorm(y + mha(y.reshape(B2, St, D), memory, cross_bias,
                          blk=2, rep=B2 // B) + row_d(2),
                  row_d(11), row_d(12))
    y = layernorm(y + ffn(y, 1), row_d(13), row_d(14))

    # TODO(synk): a lane-dense (2B, St*D) output would need an in-kernel
    # sublane->lane relayout; at D=32 the 4 KB store is negligible so we keep
    # the natural [2B, St, D] layout.
    out_ref[...] = y.reshape(B2, St, D).astype(out_ref.dtype)


# -----------------------------------------------------------------------------
# Wrapper: pack weights into a few leading-axis-indexed slabs + pallas_call
# -----------------------------------------------------------------------------

def _pack_params(params, num_heads):
    """Pack the per-module weights into lane-friendly slabs that the kernel
    indexes on leading axes only (no in-kernel lane slicing)."""
    e, d = params["encoder"], params["decoder"]
    blocks = [e["self_attn"], d["self_attn"], d["cross_attn"]]
    D = blocks[0]["wq"].shape[0]
    H = num_heads
    Dh = D // H

    def heads_in(w):                 # [D, D] -> [H, D, Dh]  (head h = w[:, h*Dh:(h+1)*Dh])
        return w.reshape(D, H, Dh).transpose(1, 0, 2)

    def heads_out(w):                # [D, D] -> [H, Dh, D]  (head h = w[h*Dh:(h+1)*Dh, :])
        return w.reshape(H, Dh, D)

    w_qkv = jnp.concatenate(
        [heads_in(blk[n]) for blk in blocks for n in ("wq", "wk", "wv")],
        axis=0)                                                     # [9H, D, Dh]
    b_qkv = jnp.concatenate(
        [blk[n].reshape(H, Dh) for blk in blocks for n in ("bq", "bk", "bv")],
        axis=0)                                                     # [9H, Dh]
    w_out = jnp.concatenate([heads_out(blk["wo"]) for blk in blocks],
                            axis=0)                                 # [3H, Dh, D]
    w_ff1 = jnp.stack([e["ffn"]["w1"], d["ffn"]["w1"]], axis=0)     # [2, D, Dff]
    w_ff2 = jnp.stack([e["ffn"]["w2"], d["ffn"]["w2"]], axis=0)     # [2, Dff, D]
    vec_d = jnp.concatenate(
        [blk["bo"].reshape(1, D) for blk in blocks]                 # rows 0..2
        + [e["ffn"]["b2"].reshape(1, D), d["ffn"]["b2"].reshape(1, D)]  # 3,4
        + [v.reshape(1, D) for v in
           (e["ln1_g"], e["ln1_b"], e["ln2_g"], e["ln2_b"],         # 5..8
            d["ln1_g"], d["ln1_b"], d["ln2_g"], d["ln2_b"],         # 9..12
            d["ln3_g"], d["ln3_b"])],                               # 13,14
        axis=0)                                                     # [15, D]
    vec_f = jnp.concatenate([e["ffn"]["b1"].reshape(1, -1),
                             d["ffn"]["b1"].reshape(1, -1)], axis=0)  # [2, Dff]
    return w_qkv, b_qkv, w_out, w_ff1, w_ff2, vec_d, vec_f


def siamese_forward(params, src, tgt1, tgt2, src_mask, tgt_mask, num_heads):
    """Mirrors SiameseModel.forward: the same subnet (same params) applied to
    (src, tgt1) and (src, tgt2).  One fused pallas_call: the encoder runs once
    and the siamese pair is batched along the decoder's leading axis."""
    B, Ss, D = src.shape
    _, St, _ = tgt1.shape

    tgt_both = jnp.concatenate([tgt1, tgt2], axis=0)                  # [2B, St, D]

    # Compact additive masks only; query-position broadcast and siamese
    # duplication happen inside the kernel.
    neg = jnp.float32(-1e9)
    src_bias = jnp.where(src_mask, 0.0, neg).astype(jnp.float32)      # [B, 1, Ss]
    tgt_bias = jnp.where(tgt_mask, 0.0, neg).astype(jnp.float32)      # [B, St, St]

    slabs = _pack_params(params, num_heads)

    out_both = pl.pallas_call(
        functools.partial(_siamese_kernel, num_heads=num_heads, eps=1e-5),
        out_shape=jax.ShapeDtypeStruct((2 * B, St, D), src.dtype),
        compiler_params=pltpu.CompilerParams(vmem_limit_bytes=32 * 1024 * 1024),
    )(src, tgt_both, src_bias, tgt_bias, *slabs)

    return out_both[:B], out_both[B:]


# -----------------------------------------------------------------------------
# Pure-JAX reference (subnet applied twice, exact softmax) for a cross-check
# -----------------------------------------------------------------------------

def _matmul(x, w, b=None):
    y = jnp.dot(x.astype(MXU_DTYPE), w.astype(MXU_DTYPE),
                preferred_element_type=jnp.float32)
    return y if b is None else y + b


def _ref_layernorm(x, g, b, eps):
    mu = jnp.mean(x, axis=-1, keepdims=True)
    var = jnp.mean((x - mu) ** 2, axis=-1, keepdims=True)
    return (x - mu) * lax.rsqrt(var + eps) * g + b


def _ref_mha(xq, xkv, bias, a, num_heads):
    Bq, Sq, D = xq.shape
    _, Sk, _ = xkv.shape
    Dh = D // num_heads
    scale = 1.0 / math.sqrt(Dh)
    q = _matmul(xq.reshape(-1, D), a["wq"], a["bq"]).reshape(Bq, Sq, num_heads, Dh)
    k = _matmul(xkv.reshape(-1, D), a["wk"], a["bk"]).reshape(Bq, Sk, num_heads, Dh)
    v = _matmul(xkv.reshape(-1, D), a["wv"], a["bv"]).reshape(Bq, Sk, num_heads, Dh)
    s = jnp.einsum("bqhd,bkhd->bhqk", q.astype(MXU_DTYPE), k.astype(MXU_DTYPE),
                   preferred_element_type=jnp.float32) * scale
    s = s + bias[:, None]
    p = jax.nn.softmax(s, axis=-1)
    o = jnp.einsum("bhqk,bkhd->bqhd", p.astype(MXU_DTYPE), v.astype(MXU_DTYPE),
                   preferred_element_type=jnp.float32).reshape(Bq * Sq, D)
    return _matmul(o, a["wo"], a["bo"])


def _ref_ffn(x2, f):
    h = jnp.maximum(_matmul(x2, f["w1"], f["b1"]), 0.0)
    return _matmul(h, f["w2"], f["b2"])


def _ref_encoder(src, src_bias, p, num_heads, eps):
    B, S, D = src.shape
    x = src.reshape(B * S, D)
    x = _ref_layernorm(x + _ref_mha(src, src, src_bias, p["self_attn"], num_heads),
                       p["ln1_g"], p["ln1_b"], eps)
    x = _ref_layernorm(x + _ref_ffn(x, p["ffn"]), p["ln2_g"], p["ln2_b"], eps)
    return x.reshape(B, S, D)


def _ref_decoder(tgt, memory, self_bias, cross_bias, p, num_heads, eps):
    B, S, D = tgt.shape
    y = tgt.reshape(B * S, D)
    y = _ref_layernorm(y + _ref_mha(tgt, tgt, self_bias, p["self_attn"], num_heads),
                       p["ln1_g"], p["ln1_b"], eps)
    y = _ref_layernorm(
        y + _ref_mha(y.reshape(B, S, D), memory, cross_bias, p["cross_attn"],
                     num_heads),
        p["ln2_g"], p["ln2_b"], eps)
    y = _ref_layernorm(y + _ref_ffn(y, p["ffn"]), p["ln3_g"], p["ln3_b"], eps)
    return y.reshape(B, S, D)


def reference_forward(params, src, tgt1, tgt2, src_mask, tgt_mask, num_heads,
                      eps=1e-5):
    src_bias = jnp.where(src_mask, 0.0, -1e9).astype(jnp.float32)   # [B, 1, Ss]
    tgt_bias = jnp.where(tgt_mask, 0.0, -1e9).astype(jnp.float32)   # [B, St, St]
    memory = _ref_encoder(src, src_bias, params["encoder"], num_heads, eps)
    outs = []
    for tgt in (tgt1, tgt2):   # subnet applied twice, as in SiameseModel.forward
        outs.append(_ref_decoder(tgt, memory, tgt_bias, src_bias,
                                 params["decoder"], num_heads, eps))
    return tuple(outs)


# -----------------------------------------------------------------------------
# Deterministic parameter init (small random biases/LN so packing is exercised)
# -----------------------------------------------------------------------------

def init_params(key, d_model, d_ff):
    keys = iter(jax.random.split(key, 64))

    def dense(din, dout):
        return (0.02 * jax.random.normal(next(keys), (din, dout))).astype(jnp.float32)

    def vec(n, s=0.01):
        return (s * jax.random.normal(next(keys), (1, n))).astype(jnp.float32)

    def attn():
        return {"wq": dense(d_model, d_model), "bq": vec(d_model),
                "wk": dense(d_model, d_model), "bk": vec(d_model),
                "wv": dense(d_model, d_model), "bv": vec(d_model),
                "wo": dense(d_model, d_model), "bo": vec(d_model)}

    def ffn():
        return {"w1": dense(d_model, d_ff), "b1": vec(d_ff),
                "w2": dense(d_ff, d_model), "b2": vec(d_model)}

    def ln():
        g = (1.0 + 0.01 * jax.random.normal(next(keys), (1, d_model))).astype(jnp.float32)
        b = (0.01 * jax.random.normal(next(keys), (1, d_model))).astype(jnp.float32)
        return g, b

    e1, e2 = ln(), ln()
    d1, d2, d3 = ln(), ln(), ln()
    return {
        "encoder": {"self_attn": attn(), "ffn": ffn(),
                    "ln1_g": e1[0], "ln1_b": e1[1],
                    "ln2_g": e2[0], "ln2_b": e2[1]},
        "decoder": {"self_attn": attn(), "cross_attn": attn(), "ffn": ffn(),
                    "ln1_g": d1[0], "ln1_b": d1[1],
                    "ln2_g": d2[0], "ln2_b": d2[1],
                    "ln3_g": d3[0], "ln3_b": d3[1]},
    }


# -----------------------------------------------------------------------------
# Main
# -----------------------------------------------------------------------------

if __name__ == "__main__":
    B, S_SRC, S_TGT, D, H, D_FF = 2, 8, 8, 32, 4, 64

    root = jax.random.PRNGKey(0)
    k_src, k_t1, k_t2, k_par = jax.random.split(root, 4)

    # TODO(synk): the original subtransformer is unspecified; inputs here are
    # pre-embedded float sequences (no token embedding / vocab projection).
    src = jax.random.normal(k_src, (B, S_SRC, D), jnp.float32)
    tgt1 = jax.random.normal(k_t1, (B, S_TGT, D), jnp.float32)
    tgt2 = jax.random.normal(k_t2, (B, S_TGT, D), jnp.float32)

    # src_mask: [B, 1, S_src], True = keep (mask last src position of batch 1).
    src_mask = jnp.ones((B, 1, S_SRC), dtype=bool).at[1, 0, -1].set(False)
    # tgt_mask: [B, S_tgt, S_tgt] causal mask.
    tgt_mask = jnp.broadcast_to(
        jnp.tril(jnp.ones((S_TGT, S_TGT), dtype=bool))[None], (B, S_TGT, S_TGT))

    params = init_params(k_par, D, D_FF)

    fwd = jax.jit(functools.partial(siamese_forward, num_heads=H))
    out1, out2 = fwd(params, src, tgt1, tgt2, src_mask, tgt_mask)
    jax.block_until_ready((out1, out2))

    assert out1.shape == (B, S_TGT, D) and out2.shape == (B, S_TGT, D)
    assert jnp.all(jnp.isfinite(out1)) and jnp.all(jnp.isfinite(out2))

    # Cross-check against a pure-JAX reference that applies the subnet twice
    # (exact softmax divide); loose tol covers approx reciprocal + bf16 MXU ops.
    ref1, ref2 = jax.jit(functools.partial(reference_forward, num_heads=H))(
        params, src, tgt1, tgt2, src_mask, tgt_mask)
    err = max(float(jnp.max(jnp.abs(out1 - ref1))),
              float(jnp.max(jnp.abs(out2 - ref2))))
    assert err < 5e-2, f"kernel vs reference mismatch: {err}"

    print("KERNEL_OK")
</pallas_src>

<mosaic_0001>
module attributes {stable_mosaic.version = 11 : i64} {
  func.func @_siamese_kernel(%arg0: memref<2x8x32xf32, #tpu.memory_space<vmem>>, %arg1: memref<4x8x32xf32, #tpu.memory_space<vmem>>, %arg2: memref<2x1x8xf32, #tpu.memory_space<vmem>>, %arg3: memref<2x8x8xf32, #tpu.memory_space<vmem>>, %arg4: memref<36x32x8xf32, #tpu.memory_space<vmem>>, %arg5: memref<36x8xf32, #tpu.memory_space<vmem>>, %arg6: memref<12x8x32xf32, #tpu.memory_space<vmem>>, %arg7: memref<2x32x64xf32, #tpu.memory_space<vmem>>, %arg8: memref<2x64x32xf32, #tpu.memory_space<vmem>>, %arg9: memref<15x32xf32, #tpu.memory_space<vmem>>, %arg10: memref<2x64xf32, #tpu.memory_space<vmem>>, %arg11: memref<4x8x32xf32, #tpu.memory_space<vmem>>) attributes {dimension_semantics = [], scalar_prefetch = 0 : i64, scratch_operands = 0 : i64, tpu.core_type = #tpu.core_type<tc>} {
    %c0 = arith.constant 0 : index
    %c0_0 = arith.constant 0 : index
    %c0_1 = arith.constant 0 : index
    %0 = vector.load %arg0[%c0, %c0_0, %c0_1] : memref<2x8x32xf32, #tpu.memory_space<vmem>>, vector<2x8x32xf32>
    %c0_2 = arith.constant 0 : index
    %c0_3 = arith.constant 0 : index
    %c0_4 = arith.constant 0 : index
    %1 = vector.load %arg1[%c0_2, %c0_3, %c0_4] : memref<4x8x32xf32, #tpu.memory_space<vmem>>, vector<4x8x32xf32>
    %c0_5 = arith.constant 0 : index
    %c0_6 = arith.constant 0 : index
    %c0_7 = arith.constant 0 : index
    %2 = vector.load %arg2[%c0_5, %c0_6, %c0_7] : memref<2x1x8xf32, #tpu.memory_space<vmem>>, vector<2x1x8xf32>
    %c0_8 = arith.constant 0 : index
    %c0_9 = arith.constant 0 : index
    %c0_10 = arith.constant 0 : index
    %3 = vector.load %arg3[%c0_8, %c0_9, %c0_10] : memref<2x8x8xf32, #tpu.memory_space<vmem>>, vector<2x8x8xf32>
    %4 = vector.shape_cast %0 : vector<2x8x32xf32> to vector<16x32xf32>
    %5 = vector.shape_cast %0 : vector<2x8x32xf32> to vector<16x32xf32>
    %6 = vector.shape_cast %0 : vector<2x8x32xf32> to vector<16x32xf32>
    %7 = vector.shape_cast %2 : vector<2x1x8xf32> to vector<2x1x8xf32>
    %8 = vector.broadcast %7 : vector<2x1x8xf32> to vector<2x8x8xf32>
    %cst = arith.constant 0.000000e+00 : f32
    %9 = vector.broadcast %cst : f32 to vector<16x32xf32>
    %c0_11 = arith.constant 0 : index
    %c0_12 = arith.constant 0 : index
    %c0_13 = arith.constant 0 : index
    %10 = vector.load %arg4[%c0_11, %c0_12, %c0_13] : memref<36x32x8xf32, #tpu.memory_space<vmem>>, vector<1x32x8xf32>
    %11 = vector.shape_cast %10 : vector<1x32x8xf32> to vector<32x8xf32>
    %12 = arith.truncf %5 : vector<16x32xf32> to vector<16x32xbf16>
    %13 = arith.truncf %11 : vector<32x8xf32> to vector<32x8xbf16>
    %cst_14 = arith.constant dense<0.000000e+00> : vector<16x8xf32>
    %14 = tpu.matmul %12, %13, %cst_14 {dimension_numbers = #tpu.dot_dimension_numbers<[1], [0], [0], [1], [0, 0, 1, 1], [], []>} : vector<16x32xbf16>, vector<32x8xbf16>, vector<16x8xf32> -> vector<16x8xf32>
    %c0_15 = arith.constant 0 : index
    %c0_16 = arith.constant 0 : index
    %15 = vector.load %arg5[%c0_15, %c0_16] : memref<36x8xf32, #tpu.memory_space<vmem>>, vector<1x8xf32>
    %16 = vector.broadcast %15 : vector<1x8xf32> to vector<16x8xf32>
    %17 = arith.addf %14, %16 : vector<16x8xf32>
    %c4 = arith.constant 4 : index
    %c0_17 = arith.constant 0 : index
    %c0_18 = arith.constant 0 : index
    %18 = vector.load %arg4[%c4, %c0_17, %c0_18] : memref<36x32x8xf32, #tpu.memory_space<vmem>>, vector<1x32x8xf32>
    %19 = vector.shape_cast %18 : vector<1x32x8xf32> to vector<32x8xf32>
    %20 = arith.truncf %6 : vector<16x32xf32> to vector<16x32xbf16>
    %21 = arith.truncf %19 : vector<32x8xf32> to vector<32x8xbf16>
    %cst_19 = arith.constant dense<0.000000e+00> : vector<16x8xf32>
    %22 = tpu.matmul %20, %21, %cst_19 {dimension_numbers = #tpu.dot_dimension_numbers<[1], [0], [0], [1], [0, 0, 1, 1], [], []>} : vector<16x32xbf16>, vector<32x8xbf16>, vector<16x8xf32> -> vector<16x8xf32>
    %c4_20 = arith.constant 4 : index
    %c0_21 = arith.constant 0 : index
    %23 = vector.load %arg5[%c4_20, %c0_21] : memref<36x8xf32, #tpu.memory_space<vmem>>, vector<1x8xf32>
    %24 = vector.broadcast %23 : vector<1x8xf32> to vector<16x8xf32>
    %25 = arith.addf %22, %24 : vector<16x8xf32>
    %c8 = arith.constant 8 : index
    %c0_22 = arith.constant 0 : index
    %c0_23 = arith.constant 0 : index
    %26 = vector.load %arg4[%c8, %c0_22, %c0_23] : memref<36x32x8xf32, #tpu.memory_space<vmem>>, vector<1x32x8xf32>
    %27 = vector.shape_cast %26 : vector<1x32x8xf32> to vector<32x8xf32>
    %28 = arith.truncf %6 : vector<16x32xf32> to vector<16x32xbf16>
    %29 = arith.truncf %27 : vector<32x8xf32> to vector<32x8xbf16>
    %cst_24 = arith.constant dense<0.000000e+00> : vector<16x8xf32>
    %30 = tpu.matmul %28, %29, %cst_24 {dimension_numbers = #tpu.dot_dimension_numbers<[1], [0], [0], [1], [0, 0, 1, 1], [], []>} : vector<16x32xbf16>, vector<32x8xbf16>, vector<16x8xf32> -> vector<16x8xf32>
    %c8_25 = arith.constant 8 : index
    %c0_26 = arith.constant 0 : index
    %31 = vector.load %arg5[%c8_25, %c0_26] : memref<36x8xf32, #tpu.memory_space<vmem>>, vector<1x8xf32>
    %32 = vector.broadcast %31 : vector<1x8xf32> to vector<16x8xf32>
    %33 = arith.addf %30, %32 : vector<16x8xf32>
    %cst_27 = arith.constant 0.353553385 : f32
    %34 = vector.broadcast %cst_27 : f32 to vector<16x8xf32>
    %35 = arith.mulf %17, %34 : vector<16x8xf32>
    %36 = vector.shape_cast %35 : vector<16x8xf32> to vector<2x8x8xf32>
    %37 = vector.shape_cast %25 : vector<16x8xf32> to vector<2x8x8xf32>
    %38 = vector.shape_cast %33 : vector<16x8xf32> to vector<2x8x8xf32>
    %39 = arith.truncf %36 : vector<2x8x8xf32> to vector<2x8x8xbf16>
    %40 = arith.truncf %37 : vector<2x8x8xf32> to vector<2x8x8xbf16>
    "tpu.trace_start"() <{level = 10 : i32, message = "bqd,bkd->bqk"}> : () -> ()
    %cst_28 = arith.constant dense<0.000000e+00> : vector<2x8x8xf32>
    %41 = tpu.matmul %39, %40, %cst_28 {dimension_numbers = #tpu.dot_dimension_numbers<[2], [2], [1], [1], [0, 0, 0, 1, 1, 1], [0], [0]>} : vector<2x8x8xbf16>, vector<2x8x8xbf16>, vector<2x8x8xf32> -> vector<2x8x8xf32>
    "tpu.trace_stop"() : () -> ()
    %42 = arith.addf %41, %8 : vector<2x8x8xf32>
    %cst_29 = arith.constant dense<0xFF800000> : vector<2x8xf32>
    %43 = vector.multi_reduction <maximumf>, %42, %cst_29 [2] : vector<2x8x8xf32> to vector<2x8xf32>
    %44 = vector.shape_cast %43 : vector<2x8xf32> to vector<2x8x1xf32>
    %45 = vector.broadcast %44 : vector<2x8x1xf32> to vector<2x8x8xf32>
    %46 = arith.subf %42, %45 : vector<2x8x8xf32>
    %47 = math.exp %46 : vector<2x8x8xf32>
    %cst_30 = arith.constant dense<0.000000e+00> : vector<2x8xf32>
    %48 = vector.multi_reduction <add>, %47, %cst_30 [2] : vector<2x8x8xf32> to vector<2x8xf32>
    %49 = vector.shape_cast %48 : vector<2x8xf32> to vector<2x8x1xf32>
    %50 = arith.truncf %47 : vector<2x8x8xf32> to vector<2x8x8xbf16>
    %51 = arith.truncf %38 : vector<2x8x8xf32> to vector<2x8x8xbf16>
    "tpu.trace_start"() <{level = 10 : i32, message = "bqk,bkd->bqd"}> : () -> ()
    %cst_31 = arith.constant dense<0.000000e+00> : vector<2x8x8xf32>
    %52 = tpu.matmul %50, %51, %cst_31 {dimension_numbers = #tpu.dot_dimension_numbers<[2], [1], [1], [2], [0, 0, 0, 1, 1, 2], [0], [0]>} : vector<2x8x8xbf16>, vector<2x8x8xbf16>, vector<2x8x8xf32> -> vector<2x8x8xf32>
    "tpu.trace_stop"() : () -> ()
    %53 = tpu.reciprocal %49 {approx = true} : vector<2x8x1xf32> -> vector<2x8x1xf32>
    %54 = vector.broadcast %53 : vector<2x8x1xf32> to vector<2x8x8xf32>
    %55 = arith.mulf %52, %54 : vector<2x8x8xf32>
    %56 = vector.shape_cast %55 : vector<2x8x8xf32> to vector<16x8xf32>
    %c0_32 = arith.constant 0 : index
    %c0_33 = arith.constant 0 : index
    %c0_34 = arith.constant 0 : index
    %57 = vector.load %arg6[%c0_32, %c0_33, %c0_34] : memref<12x8x32xf32, #tpu.memory_space<vmem>>, vector<1x8x32xf32>
    %58 = vector.shape_cast %57 : vector<1x8x32xf32> to vector<8x32xf32>
    %59 = arith.truncf %56 : vector<16x8xf32> to vector<16x8xbf16>
    %60 = arith.truncf %58 : vector<8x32xf32> to vector<8x32xbf16>
    %cst_35 = arith.constant dense<0.000000e+00> : vector<16x32xf32>
    %61 = tpu.matmul %59, %60, %cst_35 {dimension_numbers = #tpu.dot_dimension_numbers<[1], [0], [0], [1], [0, 0, 1, 1], [], []>} : vector<16x8xbf16>, vector<8x32xbf16>, vector<16x32xf32> -> vector<16x32xf32>
    %62 = arith.addf %9, %61 : vector<16x32xf32>
    %c1 = arith.constant 1 : index
    %c0_36 = arith.constant 0 : index
    %c0_37 = arith.constant 0 : index
    %63 = vector.load %arg4[%c1, %c0_36, %c0_37] : memref<36x32x8xf32, #tpu.memory_space<vmem>>, vector<1x32x8xf32>
    %64 = vector.shape_cast %63 : vector<1x32x8xf32> to vector<32x8xf32>
    %65 = arith.truncf %5 : vector<16x32xf32> to vector<16x32xbf16>
    %66 = arith.truncf %64 : vector<32x8xf32> to vector<32x8xbf16>
    %cst_38 = arith.constant dense<0.000000e+00> : vector<16x8xf32>
    %67 = tpu.matmul %65, %66, %cst_38 {dimension_numbers = #tpu.dot_dimension_numbers<[1], [0], [0], [1], [0, 0, 1, 1], [], []>} : vector<16x32xbf16>, vector<32x8xbf16>, vector<16x8xf32> -> vector<16x8xf32>
    %c1_39 = arith.constant 1 : index
    %c0_40 = arith.constant 0 : index
    %68 = vector.load %arg5[%c1_39, %c0_40] : memref<36x8xf32, #tpu.memory_space<vmem>>, vector<1x8xf32>
    %69 = vector.broadcast %68 : vector<1x8xf32> to vector<16x8xf32>
    %70 = arith.addf %67, %69 : vector<16x8xf32>
    %c5 = arith.constant 5 : index
    %c0_41 = arith.constant 0 : index
    %c0_42 = arith.constant 0 : index
    %71 = vector.load %arg4[%c5, %c0_41, %c0_42] : memref<36x32x8xf32, #tpu.memory_space<vmem>>, vector<1x32x8xf32>
    %72 = vector.shape_cast %71 : vector<1x32x8xf32> to vector<32x8xf32>
    %73 = arith.truncf %6 : vector<16x32xf32> to vector<16x32xbf16>
    %74 = arith.truncf %72 : vector<32x8xf32> to vector<32x8xbf16>
    %cst_43 = arith.constant dense<0.000000e+00> : vector<16x8xf32>
    %75 = tpu.matmul %73, %74, %cst_43 {dimension_numbers = #tpu.dot_dimension_numbers<[1], [0], [0], [1], [0, 0, 1, 1], [], []>} : vector<16x32xbf16>, vector<32x8xbf16>, vector<16x8xf32> -> vector<16x8xf32>
    %c5_44 = arith.constant 5 : index
    %c0_45 = arith.constant 0 : index
    %76 = vector.load %arg5[%c5_44, %c0_45] : memref<36x8xf32, #tpu.memory_space<vmem>>, vector<1x8xf32>
    %77 = vector.broadcast %76 : vector<1x8xf32> to vector<16x8xf32>
    %78 = arith.addf %75, %77 : vector<16x8xf32>
    %c9 = arith.constant 9 : index
    %c0_46 = arith.constant 0 : index
    %c0_47 = arith.constant 0 : index
    %79 = vector.load %arg4[%c9, %c0_46, %c0_47] : memref<36x32x8xf32, #tpu.memory_space<vmem>>, vector<1x32x8xf32>
    %80 = vector.shape_cast %79 : vector<1x32x8xf32> to vector<32x8xf32>
    %81 = arith.truncf %6 : vector<16x32xf32> to vector<16x32xbf16>
    %82 = arith.truncf %80 : vector<32x8xf32> to vector<32x8xbf16>
    %cst_48 = arith.constant dense<0.000000e+00> : vector<16x8xf32>
    %83 = tpu.matmul %81, %82, %cst_48 {dimension_numbers = #tpu.dot_dimension_numbers<[1], [0], [0], [1], [0, 0, 1, 1], [], []>} : vector<16x32xbf16>, vector<32x8xbf16>, vector<16x8xf32> -> vector<16x8xf32>
    %c9_49 = arith.constant 9 : index
    %c0_50 = arith.constant 0 : index
    %84 = vector.load %arg5[%c9_49, %c0_50] : memref<36x8xf32, #tpu.memory_space<vmem>>, vector<1x8xf32>
    %85 = vector.broadcast %84 : vector<1x8xf32> to vector<16x8xf32>
    %86 = arith.addf %83, %85 : vector<16x8xf32>
    %cst_51 = arith.constant 0.353553385 : f32
    %87 = vector.broadcast %cst_51 : f32 to vector<16x8xf32>
    %88 = arith.mulf %70, %87 : vector<16x8xf32>
    %89 = vector.shape_cast %88 : vector<16x8xf32> to vector<2x8x8xf32>
    %90 = vector.shape_cast %78 : vector<16x8xf32> to vector<2x8x8xf32>
    %91 = vector.shape_cast %86 : vector<16x8xf32> to vector<2x8x8xf32>
    %92 = arith.truncf %89 : vector<2x8x8xf32> to vector<2x8x8xbf16>
    %93 = arith.truncf %90 : vector<2x8x8xf32> to vector<2x8x8xbf16>
    "tpu.trace_start"() <{level = 10 : i32, message = "bqd,bkd->bqk"}> : () -> ()
    %cst_52 = arith.constant dense<0.000000e+00> : vector<2x8x8xf32>
    %94 = tpu.matmul %92, %93, %cst_52 {dimension_numbers = #tpu.dot_dimension_numbers<[2], [2], [1], [1], [0, 0, 0, 1, 1, 1], [0], [0]>} : vector<2x8x8xbf16>, vector<2x8x8xbf16>, vector<2x8x8xf32> -> vector<2x8x8xf32>
    "tpu.trace_stop"() : () -> ()
    %95 = arith.addf %94, %8 : vector<2x8x8xf32>
    %cst_53 = arith.constant dense<0xFF800000> : vector<2x8xf32>
    %96 = vector.multi_reduction <maximumf>, %95, %cst_53 [2] : vector<2x8x8xf32> to vector<2x8xf32>
    %97 = vector.shape_cast %96 : vector<2x8xf32> to vector<2x8x1xf32>
    %98 = vector.broadcast %97 : vector<2x8x1xf32> to vector<2x8x8xf32>
    %99 = arith.subf %95, %98 : vector<2x8x8xf32>
    %100 = math.exp %99 : vector<2x8x8xf32>
    %cst_54 = arith.constant dense<0.000000e+00> : vector<2x8xf32>
    %101 = vector.multi_reduction <add>, %100, %cst_54 [2] : vector<2x8x8xf32> to vector<2x8xf32>
    %102 = vector.shape_cast %101 : vector<2x8xf32> to vector<2x8x1xf32>
    %103 = arith.truncf %100 : vector<2x8x8xf32> to vector<2x8x8xbf16>
    %104 = arith.truncf %91 : vector<2x8x8xf32> to vector<2x8x8xbf16>
    "tpu.trace_start"() <{level = 10 : i32, message = "bqk,bkd->bqd"}> : () -> ()
    %cst_55 = arith.constant dense<0.000000e+00> : vector<2x8x8xf32>
    %105 = tpu.matmul %103, %104, %cst_55 {dimension_numbers = #tpu.dot_dimension_numbers<[2], [1], [1], [2], [0, 0, 0, 1, 1, 2], [0], [0]>} : vector<2x8x8xbf16>, vector<2x8x8xbf16>, vector<2x8x8xf32> -> vector<2x8x8xf32>
    "tpu.trace_stop"() : () -> ()
    %106 = tpu.reciprocal %102 {approx = true} : vector<2x8x1xf32> -> vector<2x8x1xf32>
    %107 = vector.broadcast %106 : vector<2x8x1xf32> to vector<2x8x8xf32>
    %108 = arith.mulf %105, %107 : vector<2x8x8xf32>
    %109 = vector.shape_cast %108 : vector<2x8x8xf32> to vector<16x8xf32>
    %c1_56 = arith.constant 1 : index
    %c0_57 = arith.constant 0 : index
    %c0_58 = arith.constant 0 : index
    %110 = vector.load %arg6[%c1_56, %c0_57, %c0_58] : memref<12x8x32xf32, #tpu.memory_space<vmem>>, vector<1x8x32xf32>
    %111 = vector.shape_cast %110 : vector<1x8x32xf32> to vector<8x32xf32>
    %112 = arith.truncf %109 : vector<16x8xf32> to vector<16x8xbf16>
    %113 = arith.truncf %111 : vector<8x32xf32> to vector<8x32xbf16>
    %cst_59 = arith.constant dense<0.000000e+00> : vector<16x32xf32>
    %114 = tpu.matmul %112, %113, %cst_59 {dimension_numbers = #tpu.dot_dimension_numbers<[1], [0], [0], [1], [0, 0, 1, 1], [], []>} : vector<16x8xbf16>, vector<8x32xbf16>, vector<16x32xf32> -> vector<16x32xf32>
    %115 = arith.addf %62, %114 : vector<16x32xf32>
    %c2 = arith.constant 2 : index
    %c0_60 = arith.constant 0 : index
    %c0_61 = arith.constant 0 : index
    %116 = vector.load %arg4[%c2, %c0_60, %c0_61] : memref<36x32x8xf32, #tpu.memory_space<vmem>>, vector<1x32x8xf32>
    %117 = vector.shape_cast %116 : vector<1x32x8xf32> to vector<32x8xf32>
    %118 = arith.truncf %5 : vector<16x32xf32> to vector<16x32xbf16>
    %119 = arith.truncf %117 : vector<32x8xf32> to vector<32x8xbf16>
    %cst_62 = arith.constant dense<0.000000e+00> : vector<16x8xf32>
    %120 = tpu.matmul %118, %119, %cst_62 {dimension_numbers = #tpu.dot_dimension_numbers<[1], [0], [0], [1], [0, 0, 1, 1], [], []>} : vector<16x32xbf16>, vector<32x8xbf16>, vector<16x8xf32> -> vector<16x8xf32>
    %c2_63 = arith.constant 2 : index
    %c0_64 = arith.constant 0 : index
    %121 = vector.load %arg5[%c2_63, %c0_64] : memref<36x8xf32, #tpu.memory_space<vmem>>, vector<1x8xf32>
    %122 = vector.broadcast %121 : vector<1x8xf32> to vector<16x8xf32>
    %123 = arith.addf %120, %122 : vector<16x8xf32>
    %c6 = arith.constant 6 : index
    %c0_65 = arith.constant 0 : index
    %c0_66 = arith.constant 0 : index
    %124 = vector.load %arg4[%c6, %c0_65, %c0_66] : memref<36x32x8xf32, #tpu.memory_space<vmem>>, vector<1x32x8xf32>
    %125 = vector.shape_cast %124 : vector<1x32x8xf32> to vector<32x8xf32>
    %126 = arith.truncf %6 : vector<16x32xf32> to vector<16x32xbf16>
    %127 = arith.truncf %125 : vector<32x8xf32> to vector<32x8xbf16>
    %cst_67 = arith.constant dense<0.000000e+00> : vector<16x8xf32>
    %128 = tpu.matmul %126, %127, %cst_67 {dimension_numbers = #tpu.dot_dimension_numbers<[1], [0], [0], [1], [0, 0, 1, 1], [], []>} : vector<16x32xbf16>, vector<32x8xbf16>, vector<16x8xf32> -> vector<16x8xf32>
    %c6_68 = arith.constant 6 : index
    %c0_69 = arith.constant 0 : index
    %129 = vector.load %arg5[%c6_68, %c0_69] : memref<36x8xf32, #tpu.memory_space<vmem>>, vector<1x8xf32>
    %130 = vector.broadcast %129 : vector<1x8xf32> to vector<16x8xf32>
    %131 = arith.addf %128, %130 : vector<16x8xf32>
    %c10 = arith.constant 10 : index
    %c0_70 = arith.constant 0 : index
    %c0_71 = arith.constant 0 : index
    %132 = vector.load %arg4[%c10, %c0_70, %c0_71] : memref<36x32x8xf32, #tpu.memory_space<vmem>>, vector<1x32x8xf32>
    %133 = vector.shape_cast %132 : vector<1x32x8xf32> to vector<32x8xf32>
    %134 = arith.truncf %6 : vector<16x32xf32> to vector<16x32xbf16>
    %135 = arith.truncf %133 : vector<32x8xf32> to vector<32x8xbf16>
    %cst_72 = arith.constant dense<0.000000e+00> : vector<16x8xf32>
    %136 = tpu.matmul %134, %135, %cst_72 {dimension_numbers = #tpu.dot_dimension_numbers<[1], [0], [0], [1], [0, 0, 1, 1], [], []>} : vector<16x32xbf16>, vector<32x8xbf16>, vector<16x8xf32> -> vector<16x8xf32>
    %c10_73 = arith.constant 10 : index
    %c0_74 = arith.constant 0 : index
    %137 = vector.load %arg5[%c10_73, %c0_74] : memref<36x8xf32, #tpu.memory_space<vmem>>, vector<1x8xf32>
    %138 = vector.broadcast %137 : vector<1x8xf32> to vector<16x8xf32>
    %139 = arith.addf %136, %138 : vector<16x8xf32>
    %cst_75 = arith.constant 0.353553385 : f32
    %140 = vector.broadcast %cst_75 : f32 to vector<16x8xf32>
    %141 = arith.mulf %123, %140 : vector<16x8xf32>
    %142 = vector.shape_cast %141 : vector<16x8xf32> to vector<2x8x8xf32>
    %143 = vector.shape_cast %131 : vector<16x8xf32> to vector<2x8x8xf32>
    %144 = vector.shape_cast %139 : vector<16x8xf32> to vector<2x8x8xf32>
    %145 = arith.truncf %142 : vector<2x8x8xf32> to vector<2x8x8xbf16>
    %146 = arith.truncf %143 : vector<2x8x8xf32> to vector<2x8x8xbf16>
    "tpu.trace_start"() <{level = 10 : i32, message = "bqd,bkd->bqk"}> : () -> ()
    %cst_76 = arith.constant dense<0.000000e+00> : vector<2x8x8xf32>
    %147 = tpu.matmul %145, %146, %cst_76 {dimension_numbers = #tpu.dot_dimension_numbers<[2], [2], [1], [1], [0, 0, 0, 1, 1, 1], [0], [0]>} : vector<2x8x8xbf16>, vector<2x8x8xbf16>, vector<2x8x8xf32> -> vector<2x8x8xf32>
    "tpu.trace_stop"() : () -> ()
    %148 = arith.addf %147, %8 : vector<2x8x8xf32>
    %cst_77 = arith.constant dense<0xFF800000> : vector<2x8xf32>
    %149 = vector.multi_reduction <maximumf>, %148, %cst_77 [2] : vector<2x8x8xf32> to vector<2x8xf32>
    %150 = vector.shape_cast %149 : vector<2x8xf32> to vector<2x8x1xf32>
    %151 = vector.broadcast %150 : vector<2x8x1xf32> to vector<2x8x8xf32>
    %152 = arith.subf %148, %151 : vector<2x8x8xf32>
    %153 = math.exp %152 : vector<2x8x8xf32>
    %cst_78 = arith.constant dense<0.000000e+00> : vector<2x8xf32>
    %154 = vector.multi_reduction <add>, %153, %cst_78 [2] : vector<2x8x8xf32> to vector<2x8xf32>
    %155 = vector.shape_cast %154 : vector<2x8xf32> to vector<2x8x1xf32>
    %156 = arith.truncf %153 : vector<2x8x8xf32> to vector<2x8x8xbf16>
    %157 = arith.truncf %144 : vector<2x8x8xf32> to vector<2x8x8xbf16>
    "tpu.trace_start"() <{level = 10 : i32, message = "bqk,bkd->bqd"}> : () -> ()
    %cst_79 = arith.constant dense<0.000000e+00> : vector<2x8x8xf32>
    %158 = tpu.matmul %156, %157, %cst_79 {dimension_numbers = #tpu.dot_dimension_numbers<[2], [1], [1], [2], [0, 0, 0, 1, 1, 2], [0], [0]>} : vector<2x8x8xbf16>, vector<2x8x8xbf16>, vector<2x8x8xf32> -> vector<2x8x8xf32>
    "tpu.trace_stop"() : () -> ()
    %159 = tpu.reciprocal %155 {approx = true} : vector<2x8x1xf32> -> vector<2x8x1xf32>
    %160 = vector.broadcast %159 : vector<2x8x1xf32> to vector<2x8x8xf32>
    %161 = arith.mulf %158, %160 : vector<2x8x8xf32>
    %162 = vector.shape_cast %161 : vector<2x8x8xf32> to vector<16x8xf32>
    %c2_80 = arith.constant 2 : index
    %c0_81 = arith.constant 0 : index
    %c0_82 = arith.constant 0 : index
    %163 = vector.load %arg6[%c2_80, %c0_81, %c0_82] : memref<12x8x32xf32, #tpu.memory_space<vmem>>, vector<1x8x32xf32>
    %164 = vector.shape_cast %163 : vector<1x8x32xf32> to vector<8x32xf32>
    %165 = arith.truncf %162 : vector<16x8xf32> to vector<16x8xbf16>
    %166 = arith.truncf %164 : vector<8x32xf32> to vector<8x32xbf16>
    %cst_83 = arith.constant dense<0.000000e+00> : vector<16x32xf32>
    %167 = tpu.matmul %165, %166, %cst_83 {dimension_numbers = #tpu.dot_dimension_numbers<[1], [0], [0], [1], [0, 0, 1, 1], [], []>} : vector<16x8xbf16>, vector<8x32xbf16>, vector<16x32xf32> -> vector<16x32xf32>
    %168 = arith.addf %115, %167 : vector<16x32xf32>
    %c3 = arith.constant 3 : index
    %c0_84 = arith.constant 0 : index
    %c0_85 = arith.constant 0 : index
    %169 = vector.load %arg4[%c3, %c0_84, %c0_85] : memref<36x32x8xf32, #tpu.memory_space<vmem>>, vector<1x32x8xf32>
    %170 = vector.shape_cast %169 : vector<1x32x8xf32> to vector<32x8xf32>
    %171 = arith.truncf %5 : vector<16x32xf32> to vector<16x32xbf16>
    %172 = arith.truncf %170 : vector<32x8xf32> to vector<32x8xbf16>
    %cst_86 = arith.constant dense<0.000000e+00> : vector<16x8xf32>
    %173 = tpu.matmul %171, %172, %cst_86 {dimension_numbers = #tpu.dot_dimension_numbers<[1], [0], [0], [1], [0, 0, 1, 1], [], []>} : vector<16x32xbf16>, vector<32x8xbf16>, vector<16x8xf32> -> vector<16x8xf32>
    %c3_87 = arith.constant 3 : index
    %c0_88 = arith.constant 0 : index
    %174 = vector.load %arg5[%c3_87, %c0_88] : memref<36x8xf32, #tpu.memory_space<vmem>>, vector<1x8xf32>
    %175 = vector.broadcast %174 : vector<1x8xf32> to vector<16x8xf32>
    %176 = arith.addf %173, %175 : vector<16x8xf32>
    %c7 = arith.constant 7 : index
    %c0_89 = arith.constant 0 : index
    %c0_90 = arith.constant 0 : index
    %177 = vector.load %arg4[%c7, %c0_89, %c0_90] : memref<36x32x8xf32, #tpu.memory_space<vmem>>, vector<1x32x8xf32>
    %178 = vector.shape_cast %177 : vector<1x32x8xf32> to vector<32x8xf32>
    %179 = arith.truncf %6 : vector<16x32xf32> to vector<16x32xbf16>
    %180 = arith.truncf %178 : vector<32x8xf32> to vector<32x8xbf16>
    %cst_91 = arith.constant dense<0.000000e+00> : vector<16x8xf32>
    %181 = tpu.matmul %179, %180, %cst_91 {dimension_numbers = #tpu.dot_dimension_numbers<[1], [0], [0], [1], [0, 0, 1, 1], [], []>} : vector<16x32xbf16>, vector<32x8xbf16>, vector<16x8xf32> -> vector<16x8xf32>
    %c7_92 = arith.constant 7 : index
    %c0_93 = arith.constant 0 : index
    %182 = vector.load %arg5[%c7_92, %c0_93] : memref<36x8xf32, #tpu.memory_space<vmem>>, vector<1x8xf32>
    %183 = vector.broadcast %182 : vector<1x8xf32> to vector<16x8xf32>
    %184 = arith.addf %181, %183 : vector<16x8xf32>
    %c11 = arith.constant 11 : index
    %c0_94 = arith.constant 0 : index
    %c0_95 = arith.constant 0 : index
    %185 = vector.load %arg4[%c11, %c0_94, %c0_95] : memref<36x32x8xf32, #tpu.memory_space<vmem>>, vector<1x32x8xf32>
    %186 = vector.shape_cast %185 : vector<1x32x8xf32> to vector<32x8xf32>
    %187 = arith.truncf %6 : vector<16x32xf32> to vector<16x32xbf16>
    %188 = arith.truncf %186 : vector<32x8xf32> to vector<32x8xbf16>
    %cst_96 = arith.constant dense<0.000000e+00> : vector<16x8xf32>
    %189 = tpu.matmul %187, %188, %cst_96 {dimension_numbers = #tpu.dot_dimension_numbers<[1], [0], [0], [1], [0, 0, 1, 1], [], []>} : vector<16x32xbf16>, vector<32x8xbf16>, vector<16x8xf32> -> vector<16x8xf32>
    %c11_97 = arith.constant 11 : index
    %c0_98 = arith.constant 0 : index
    %190 = vector.load %arg5[%c11_97, %c0_98] : memref<36x8xf32, #tpu.memory_space<vmem>>, vector<1x8xf32>
    %191 = vector.broadcast %190 : vector<1x8xf32> to vector<16x8xf32>
    %192 = arith.addf %189, %191 : vector<16x8xf32>
    %cst_99 = arith.constant 0.353553385 : f32
    %193 = vector.broadcast %cst_99 : f32 to vector<16x8xf32>
    %194 = arith.mulf %176, %193 : vector<16x8xf32>
    %195 = vector.shape_cast %194 : vector<16x8xf32> to vector<2x8x8xf32>
    %196 = vector.shape_cast %184 : vector<16x8xf32> to vector<2x8x8xf32>
    %197 = vector.shape_cast %192 : vector<16x8xf32> to vector<2x8x8xf32>
    %198 = arith.truncf %195 : vector<2x8x8xf32> to vector<2x8x8xbf16>
    %199 = arith.truncf %196 : vector<2x8x8xf32> to vector<2x8x8xbf16>
    "tpu.trace_start"() <{level = 10 : i32, message = "bqd,bkd->bqk"}> : () -> ()
    %cst_100 = arith.constant dense<0.000000e+00> : vector<2x8x8xf32>
    %200 = tpu.matmul %198, %199, %cst_100 {dimension_numbers = #tpu.dot_dimension_numbers<[2], [2], [1], [1], [0, 0, 0, 1, 1, 1], [0], [0]>} : vector<2x8x8xbf16>, vector<2x8x8xbf16>, vector<2x8x8xf32> -> vector<2x8x8xf32>
    "tpu.trace_stop"() : () -> ()
    %201 = arith.addf %200, %8 : vector<2x8x8xf32>
    %cst_101 = arith.constant dense<0xFF800000> : vector<2x8xf32>
    %202 = vector.multi_reduction <maximumf>, %201, %cst_101 [2] : vector<2x8x8xf32> to vector<2x8xf32>
    %203 = vector.shape_cast %202 : vector<2x8xf32> to vector<2x8x1xf32>
    %204 = vector.broadcast %203 : vector<2x8x1xf32> to vector<2x8x8xf32>
    %205 = arith.subf %201, %204 : vector<2x8x8xf32>
    %206 = math.exp %205 : vector<2x8x8xf32>
    %cst_102 = arith.constant dense<0.000000e+00> : vector<2x8xf32>
    %207 = vector.multi_reduction <add>, %206, %cst_102 [2] : vector<2x8x8xf32> to vector<2x8xf32>
    %208 = vector.shape_cast %207 : vector<2x8xf32> to vector<2x8x1xf32>
    %209 = arith.truncf %206 : vector<2x8x8xf32> to vector<2x8x8xbf16>
    %210 = arith.truncf %197 : vector<2x8x8xf32> to vector<2x8x8xbf16>
    "tpu.trace_start"() <{level = 10 : i32, message = "bqk,bkd->bqd"}> : () -> ()
    %cst_103 = arith.constant dense<0.000000e+00> : vector<2x8x8xf32>
    %211 = tpu.matmul %209, %210, %cst_103 {dimension_numbers = #tpu.dot_dimension_numbers<[2], [1], [1], [2], [0, 0, 0, 1, 1, 2], [0], [0]>} : vector<2x8x8xbf16>, vector<2x8x8xbf16>, vector<2x8x8xf32> -> vector<2x8x8xf32>
    "tpu.trace_stop"() : () -> ()
    %212 = tpu.reciprocal %208 {approx = true} : vector<2x8x1xf32> -> vector<2x8x1xf32>
    %213 = vector.broadcast %212 : vector<2x8x1xf32> to vector<2x8x8xf32>
    %214 = arith.mulf %211, %213 : vector<2x8x8xf32>
    %215 = vector.shape_cast %214 : vector<2x8x8xf32> to vector<16x8xf32>
    %c3_104 = arith.constant 3 : index
    %c0_105 = arith.constant 0 : index
    %c0_106 = arith.constant 0 : index
    %216 = vector.load %arg6[%c3_104, %c0_105, %c0_106] : memref<12x8x32xf32, #tpu.memory_space<vmem>>, vector<1x8x32xf32>
    %217 = vector.shape_cast %216 : vector<1x8x32xf32> to vector<8x32xf32>
    %218 = arith.truncf %215 : vector<16x8xf32> to vector<16x8xbf16>
    %219 = arith.truncf %217 : vector<8x32xf32> to vector<8x32xbf16>
    %cst_107 = arith.constant dense<0.000000e+00> : vector<16x32xf32>
    %220 = tpu.matmul %218, %219, %cst_107 {dimension_numbers = #tpu.dot_dimension_numbers<[1], [0], [0], [1], [0, 0, 1, 1], [], []>} : vector<16x8xbf16>, vector<8x32xbf16>, vector<16x32xf32> -> vector<16x32xf32>
    %221 = arith.addf %168, %220 : vector<16x32xf32>
    %222 = arith.addf %4, %221 : vector<16x32xf32>
    %c0_108 = arith.constant 0 : index
    %c0_109 = arith.constant 0 : index
    %223 = vector.load %arg9[%c0_108, %c0_109] : memref<15x32xf32, #tpu.memory_space<vmem>>, vector<1x32xf32>
    %224 = vector.broadcast %223 : vector<1x32xf32> to vector<16x32xf32>
    %225 = arith.addf %222, %224 : vector<16x32xf32>
    %c5_110 = arith.constant 5 : index
    %c0_111 = arith.constant 0 : index
    %226 = vector.load %arg9[%c5_110, %c0_111] : memref<15x32xf32, #tpu.memory_space<vmem>>, vector<1x32xf32>
    %c6_112 = arith.constant 6 : index
    %c0_113 = arith.constant 0 : index
    %227 = vector.load %arg9[%c6_112, %c0_113] : memref<15x32xf32, #tpu.memory_space<vmem>>, vector<1x32xf32>
    %cst_114 = arith.constant dense<0.000000e+00> : vector<16xf32>
    %228 = vector.multi_reduction <add>, %225, %cst_114 [1] : vector<16x32xf32> to vector<16xf32>
    %229 = vector.shape_cast %228 : vector<16xf32> to vector<16x1xf32>
    %cst_115 = arith.constant 3.200000e+01 : f32
    %230 = vector.broadcast %cst_115 : f32 to vector<16x1xf32>
    %231 = arith.divf %229, %230 : vector<16x1xf32>
    %232 = vector.broadcast %231 : vector<16x1xf32> to vector<16x32xf32>
    %233 = arith.subf %225, %232 : vector<16x32xf32>
    %234 = arith.mulf %233, %233 : vector<16x32xf32>
    %cst_116 = arith.constant dense<0.000000e+00> : vector<16xf32>
    %235 = vector.multi_reduction <add>, %234, %cst_116 [1] : vector<16x32xf32> to vector<16xf32>
    %236 = vector.shape_cast %235 : vector<16xf32> to vector<16x1xf32>
    %cst_117 = arith.constant 3.200000e+01 : f32
    %237 = vector.broadcast %cst_117 : f32 to vector<16x1xf32>
    %238 = arith.divf %236, %237 : vector<16x1xf32>
    %239 = vector.broadcast %231 : vector<16x1xf32> to vector<16x32xf32>
    %240 = arith.subf %225, %239 : vector<16x32xf32>
    %cst_118 = arith.constant 9.99999974E-6 : f32
    %241 = vector.broadcast %cst_118 : f32 to vector<16x1xf32>
    %242 = arith.addf %238, %241 : vector<16x1xf32>
    %243 = math.rsqrt %242 : vector<16x1xf32>
    %244 = vector.broadcast %243 : vector<16x1xf32> to vector<16x32xf32>
    %245 = arith.mulf %240, %244 : vector<16x32xf32>
    %246 = vector.broadcast %226 : vector<1x32xf32> to vector<16x32xf32>
    %247 = arith.mulf %245, %246 : vector<16x32xf32>
    %248 = vector.broadcast %227 : vector<1x32xf32> to vector<16x32xf32>
    %249 = arith.addf %247, %248 : vector<16x32xf32>
    %c0_119 = arith.constant 0 : index
    %c0_120 = arith.constant 0 : index
    %c0_121 = arith.constant 0 : index
    %250 = vector.load %arg7[%c0_119, %c0_120, %c0_121] : memref<2x32x64xf32, #tpu.memory_space<vmem>>, vector<1x32x64xf32>
    %251 = vector.shape_cast %250 : vector<1x32x64xf32> to vector<32x64xf32>
    %252 = arith.truncf %249 : vector<16x32xf32> to vector<16x32xbf16>
    %253 = arith.truncf %251 : vector<32x64xf32> to vector<32x64xbf16>
    %cst_122 = arith.constant dense<0.000000e+00> : vector<16x64xf32>
    %254 = tpu.matmul %252, %253, %cst_122 {dimension_numbers = #tpu.dot_dimension_numbers<[1], [0], [0], [1], [0, 0, 1, 1], [], []>} : vector<16x32xbf16>, vector<32x64xbf16>, vector<16x64xf32> -> vector<16x64xf32>
    %c0_123 = arith.constant 0 : index
    %c0_124 = arith.constant 0 : index
    %255 = vector.load %arg10[%c0_123, %c0_124] : memref<2x64xf32, #tpu.memory_space<vmem>>, vector<1x64xf32>
    %256 = vector.broadcast %255 : vector<1x64xf32> to vector<16x64xf32>
    %257 = arith.addf %254, %256 : vector<16x64xf32>
    %cst_125 = arith.constant 0.000000e+00 : f32
    %258 = vector.broadcast %cst_125 : f32 to vector<16x64xf32>
    %259 = arith.maximumf %257, %258 : vector<16x64xf32>
    %c0_126 = arith.constant 0 : index
    %c0_127 = arith.constant 0 : index
    %c0_128 = arith.constant 0 : index
    %260 = vector.load %arg8[%c0_126, %c0_127, %c0_128] : memref<2x64x32xf32, #tpu.memory_space<vmem>>, vector<1x64x32xf32>
    %261 = vector.shape_cast %260 : vector<1x64x32xf32> to vector<64x32xf32>
    %262 = arith.truncf %259 : vector<16x64xf32> to vector<16x64xbf16>
    %263 = arith.truncf %261 : vector<64x32xf32> to vector<64x32xbf16>
    %cst_129 = arith.constant dense<0.000000e+00> : vector<16x32xf32>
    %264 = tpu.matmul %262, %263, %cst_129 {dimension_numbers = #tpu.dot_dimension_numbers<[1], [0], [0], [1], [0, 0, 1, 1], [], []>} : vector<16x64xbf16>, vector<64x32xbf16>, vector<16x32xf32> -> vector<16x32xf32>
    %c3_130 = arith.constant 3 : index
    %c0_131 = arith.constant 0 : index
    %265 = vector.load %arg9[%c3_130, %c0_131] : memref<15x32xf32, #tpu.memory_space<vmem>>, vector<1x32xf32>
    %266 = vector.broadcast %265 : vector<1x32xf32> to vector<16x32xf32>
    %267 = arith.addf %264, %266 : vector<16x32xf32>
    %268 = arith.addf %249, %267 : vector<16x32xf32>
    %c7_132 = arith.constant 7 : index
    %c0_133 = arith.constant 0 : index
    %269 = vector.load %arg9[%c7_132, %c0_133] : memref<15x32xf32, #tpu.memory_space<vmem>>, vector<1x32xf32>
    %c8_134 = arith.constant 8 : index
    %c0_135 = arith.constant 0 : index
    %270 = vector.load %arg9[%c8_134, %c0_135] : memref<15x32xf32, #tpu.memory_space<vmem>>, vector<1x32xf32>
    %cst_136 = arith.constant dense<0.000000e+00> : vector<16xf32>
    %271 = vector.multi_reduction <add>, %268, %cst_136 [1] : vector<16x32xf32> to vector<16xf32>
    %272 = vector.shape_cast %271 : vector<16xf32> to vector<16x1xf32>
    %cst_137 = arith.constant 3.200000e+01 : f32
    %273 = vector.broadcast %cst_137 : f32 to vector<16x1xf32>
    %274 = arith.divf %272, %273 : vector<16x1xf32>
    %275 = vector.broadcast %274 : vector<16x1xf32> to vector<16x32xf32>
    %276 = arith.subf %268, %275 : vector<16x32xf32>
    %277 = arith.mulf %276, %276 : vector<16x32xf32>
    %cst_138 = arith.constant dense<0.000000e+00> : vector<16xf32>
    %278 = vector.multi_reduction <add>, %277, %cst_138 [1] : vector<16x32xf32> to vector<16xf32>
    %279 = vector.shape_cast %278 : vector<16xf32> to vector<16x1xf32>
    %cst_139 = arith.constant 3.200000e+01 : f32
    %280 = vector.broadcast %cst_139 : f32 to vector<16x1xf32>
    %281 = arith.divf %279, %280 : vector<16x1xf32>
    %282 = vector.broadcast %274 : vector<16x1xf32> to vector<16x32xf32>
    %283 = arith.subf %268, %282 : vector<16x32xf32>
    %cst_140 = arith.constant 9.99999974E-6 : f32
    %284 = vector.broadcast %cst_140 : f32 to vector<16x1xf32>
    %285 = arith.addf %281, %284 : vector<16x1xf32>
    %286 = math.rsqrt %285 : vector<16x1xf32>
    %287 = vector.broadcast %286 : vector<16x1xf32> to vector<16x32xf32>
    %288 = arith.mulf %283, %287 : vector<16x32xf32>
    %289 = vector.broadcast %269 : vector<1x32xf32> to vector<16x32xf32>
    %290 = arith.mulf %288, %289 : vector<16x32xf32>
    %291 = vector.broadcast %270 : vector<1x32xf32> to vector<16x32xf32>
    %292 = arith.addf %290, %291 : vector<16x32xf32>
    %293 = vector.shape_cast %292 : vector<16x32xf32> to vector<2x8x32xf32>
    %294 = tpu.concatenate %3, %3 in 0 : vector<2x8x8xf32>, vector<2x8x8xf32> -> vector<4x8x8xf32>
    %295 = tpu.concatenate %2, %2 in 0 : vector<2x1x8xf32>, vector<2x1x8xf32> -> vector<4x1x8xf32>
    %296 = vector.shape_cast %1 : vector<4x8x32xf32> to vector<32x32xf32>
    %297 = vector.shape_cast %1 : vector<4x8x32xf32> to vector<32x32xf32>
    %298 = vector.shape_cast %1 : vector<4x8x32xf32> to vector<32x32xf32>
    %cst_141 = arith.constant 0.000000e+00 : f32
    %299 = vector.broadcast %cst_141 : f32 to vector<32x32xf32>
    %c12 = arith.constant 12 : index
    %c0_142 = arith.constant 0 : index
    %c0_143 = arith.constant 0 : index
    %300 = vector.load %arg4[%c12, %c0_142, %c0_143] : memref<36x32x8xf32, #tpu.memory_space<vmem>>, vector<1x32x8xf32>
    %301 = vector.shape_cast %300 : vector<1x32x8xf32> to vector<32x8xf32>
    %302 = arith.truncf %297 : vector<32x32xf32> to vector<32x32xbf16>
    %303 = arith.truncf %301 : vector<32x8xf32> to vector<32x8xbf16>
    %cst_144 = arith.constant dense<0.000000e+00> : vector<32x8xf32>
    %304 = tpu.matmul %302, %303, %cst_144 {dimension_numbers = #tpu.dot_dimension_numbers<[1], [0], [0], [1], [0, 0, 1, 1], [], []>} : vector<32x32xbf16>, vector<32x8xbf16>, vector<32x8xf32> -> vector<32x8xf32>
    %c12_145 = arith.constant 12 : index
    %c0_146 = arith.constant 0 : index
    %305 = vector.load %arg5[%c12_145, %c0_146] : memref<36x8xf32, #tpu.memory_space<vmem>>, vector<1x8xf32>
    %306 = vector.broadcast %305 : vector<1x8xf32> to vector<32x8xf32>
    %307 = arith.addf %304, %306 : vector<32x8xf32>
    %c16 = arith.constant 16 : index
    %c0_147 = arith.constant 0 : index
    %c0_148 = arith.constant 0 : index
    %308 = vector.load %arg4[%c16, %c0_147, %c0_148] : memref<36x32x8xf32, #tpu.memory_space<vmem>>, vector<1x32x8xf32>
    %309 = vector.shape_cast %308 : vector<1x32x8xf32> to vector<32x8xf32>
    %310 = arith.truncf %298 : vector<32x32xf32> to vector<32x32xbf16>
    %311 = arith.truncf %309 : vector<32x8xf32> to vector<32x8xbf16>
    %cst_149 = arith.constant dense<0.000000e+00> : vector<32x8xf32>
    %312 = tpu.matmul %310, %311, %cst_149 {dimension_numbers = #tpu.dot_dimension_numbers<[1], [0], [0], [1], [0, 0, 1, 1], [], []>} : vector<32x32xbf16>, vector<32x8xbf16>, vector<32x8xf32> -> vector<32x8xf32>
    %c16_150 = arith.constant 16 : index
    %c0_151 = arith.constant 0 : index
    %313 = vector.load %arg5[%c16_150, %c0_151] : memref<36x8xf32, #tpu.memory_space<vmem>>, vector<1x8xf32>
    %314 = vector.broadcast %313 : vector<1x8xf32> to vector<32x8xf32>
    %315 = arith.addf %312, %314 : vector<32x8xf32>
    %c20 = arith.constant 20 : index
    %c0_152 = arith.constant 0 : index
    %c0_153 = arith.constant 0 : index
    %316 = vector.load %arg4[%c20, %c0_152, %c0_153] : memref<36x32x8xf32, #tpu.memory_space<vmem>>, vector<1x32x8xf32>
    %317 = vector.shape_cast %316 : vector<1x32x8xf32> to vector<32x8xf32>
    %318 = arith.truncf %298 : vector<32x32xf32> to vector<32x32xbf16>
    %319 = arith.truncf %317 : vector<32x8xf32> to vector<32x8xbf16>
    %cst_154 = arith.constant dense<0.000000e+00> : vector<32x8xf32>
    %320 = tpu.matmul %318, %319, %cst_154 {dimension_numbers = #tpu.dot_dimension_numbers<[1], [0], [0], [1], [0, 0, 1, 1], [], []>} : vector<32x32xbf16>, vector<32x8xbf16>, vector<32x8xf32> -> vector<32x8xf32>
    %c20_155 = arith.constant 20 : index
    %c0_156 = arith.constant 0 : index
    %321 = vector.load %arg5[%c20_155, %c0_156] : memref<36x8xf32, #tpu.memory_space<vmem>>, vector<1x8xf32>
    %322 = vector.broadcast %321 : vector<1x8xf32> to vector<32x8xf32>
    %323 = arith.addf %320, %322 : vector<32x8xf32>
    %cst_157 = arith.constant 0.353553385 : f32
    %324 = vector.broadcast %cst_157 : f32 to vector<32x8xf32>
    %325 = arith.mulf %307, %324 : vector<32x8xf32>
    %326 = vector.shape_cast %325 : vector<32x8xf32> to vector<4x8x8xf32>
    %327 = vector.shape_cast %315 : vector<32x8xf32> to vector<4x8x8xf32>
    %328 = vector.shape_cast %323 : vector<32x8xf32> to vector<4x8x8xf32>
    %329 = arith.truncf %326 : vector<4x8x8xf32> to vector<4x8x8xbf16>
    %330 = arith.truncf %327 : vector<4x8x8xf32> to vector<4x8x8xbf16>
    "tpu.trace_start"() <{level = 10 : i32, message = "bqd,bkd->bqk"}> : () -> ()
    %cst_158 = arith.constant dense<0.000000e+00> : vector<4x8x8xf32>
    %331 = tpu.matmul %329, %330, %cst_158 {dimension_numbers = #tpu.dot_dimension_numbers<[2], [2], [1], [1], [0, 0, 0, 1, 1, 1], [0], [0]>} : vector<4x8x8xbf16>, vector<4x8x8xbf16>, vector<4x8x8xf32> -> vector<4x8x8xf32>
    "tpu.trace_stop"() : () -> ()
    %332 = arith.addf %331, %294 : vector<4x8x8xf32>
    %cst_159 = arith.constant dense<0xFF800000> : vector<4x8xf32>
    %333 = vector.multi_reduction <maximumf>, %332, %cst_159 [2] : vector<4x8x8xf32> to vector<4x8xf32>
    %334 = vector.shape_cast %333 : vector<4x8xf32> to vector<4x8x1xf32>
    %335 = vector.broadcast %334 : vector<4x8x1xf32> to vector<4x8x8xf32>
    %336 = arith.subf %332, %335 : vector<4x8x8xf32>
    %337 = math.exp %336 : vector<4x8x8xf32>
    %cst_160 = arith.constant dense<0.000000e+00> : vector<4x8xf32>
    %338 = vector.multi_reduction <add>, %337, %cst_160 [2] : vector<4x8x8xf32> to vector<4x8xf32>
    %339 = vector.shape_cast %338 : vector<4x8xf32> to vector<4x8x1xf32>
    %340 = arith.truncf %337 : vector<4x8x8xf32> to vector<4x8x8xbf16>
    %341 = arith.truncf %328 : vector<4x8x8xf32> to vector<4x8x8xbf16>
    "tpu.trace_start"() <{level = 10 : i32, message = "bqk,bkd->bqd"}> : () -> ()
    %cst_161 = arith.constant dense<0.000000e+00> : vector<4x8x8xf32>
    %342 = tpu.matmul %340, %341, %cst_161 {dimension_numbers = #tpu.dot_dimension_numbers<[2], [1], [1], [2], [0, 0, 0, 1, 1, 2], [0], [0]>} : vector<4x8x8xbf16>, vector<4x8x8xbf16>, vector<4x8x8xf32> -> vector<4x8x8xf32>
    "tpu.trace_stop"() : () -> ()
    %343 = tpu.reciprocal %339 {approx = true} : vector<4x8x1xf32> -> vector<4x8x1xf32>
    %344 = vector.broadcast %343 : vector<4x8x1xf32> to vector<4x8x8xf32>
    %345 = arith.mulf %342, %344 : vector<4x8x8xf32>
    %346 = vector.shape_cast %345 : vector<4x8x8xf32> to vector<32x8xf32>
    %c4_162 = arith.constant 4 : index
    %c0_163 = arith.constant 0 : index
    %c0_164 = arith.constant 0 : index
    %347 = vector.load %arg6[%c4_162, %c0_163, %c0_164] : memref<12x8x32xf32, #tpu.memory_space<vmem>>, vector<1x8x32xf32>
    %348 = vector.shape_cast %347 : vector<1x8x32xf32> to vector<8x32xf32>
    %349 = arith.truncf %346 : vector<32x8xf32> to vector<32x8xbf16>
    %350 = arith.truncf %348 : vector<8x32xf32> to vector<8x32xbf16>
    %cst_165 = arith.constant dense<0.000000e+00> : vector<32x32xf32>
    %351 = tpu.matmul %349, %350, %cst_165 {dimension_numbers = #tpu.dot_dimension_numbers<[1], [0], [0], [1], [0, 0, 1, 1], [], []>} : vector<32x8xbf16>, vector<8x32xbf16>, vector<32x32xf32> -> vector<32x32xf32>
    %352 = arith.addf %299, %351 : vector<32x32xf32>
    %c13 = arith.constant 13 : index
    %c0_166 = arith.constant 0 : index
    %c0_167 = arith.constant 0 : index
    %353 = vector.load %arg4[%c13, %c0_166, %c0_167] : memref<36x32x8xf32, #tpu.memory_space<vmem>>, vector<1x32x8xf32>
    %354 = vector.shape_cast %353 : vector<1x32x8xf32> to vector<32x8xf32>
    %355 = arith.truncf %297 : vector<32x32xf32> to vector<32x32xbf16>
    %356 = arith.truncf %354 : vector<32x8xf32> to vector<32x8xbf16>
    %cst_168 = arith.constant dense<0.000000e+00> : vector<32x8xf32>
    %357 = tpu.matmul %355, %356, %cst_168 {dimension_numbers = #tpu.dot_dimension_numbers<[1], [0], [0], [1], [0, 0, 1, 1], [], []>} : vector<32x32xbf16>, vector<32x8xbf16>, vector<32x8xf32> -> vector<32x8xf32>
    %c13_169 = arith.constant 13 : index
    %c0_170 = arith.constant 0 : index
    %358 = vector.load %arg5[%c13_169, %c0_170] : memref<36x8xf32, #tpu.memory_space<vmem>>, vector<1x8xf32>
    %359 = vector.broadcast %358 : vector<1x8xf32> to vector<32x8xf32>
    %360 = arith.addf %357, %359 : vector<32x8xf32>
    %c17 = arith.constant 17 : index
    %c0_171 = arith.constant 0 : index
    %c0_172 = arith.constant 0 : index
    %361 = vector.load %arg4[%c17, %c0_171, %c0_172] : memref<36x32x8xf32, #tpu.memory_space<vmem>>, vector<1x32x8xf32>
    %362 = vector.shape_cast %361 : vector<1x32x8xf32> to vector<32x8xf32>
    %363 = arith.truncf %298 : vector<32x32xf32> to vector<32x32xbf16>
    %364 = arith.truncf %362 : vector<32x8xf32> to vector<32x8xbf16>
    %cst_173 = arith.constant dense<0.000000e+00> : vector<32x8xf32>
    %365 = tpu.matmul %363, %364, %cst_173 {dimension_numbers = #tpu.dot_dimension_numbers<[1], [0], [0], [1], [0, 0, 1, 1], [], []>} : vector<32x32xbf16>, vector<32x8xbf16>, vector<32x8xf32> -> vector<32x8xf32>
    %c17_174 = arith.constant 17 : index
    %c0_175 = arith.constant 0 : index
    %366 = vector.load %arg5[%c17_174, %c0_175] : memref<36x8xf32, #tpu.memory_space<vmem>>, vector<1x8xf32>
    %367 = vector.broadcast %366 : vector<1x8xf32> to vector<32x8xf32>
    %368 = arith.addf %365, %367 : vector<32x8xf32>
    %c21 = arith.constant 21 : index
    %c0_176 = arith.constant 0 : index
    %c0_177 = arith.constant 0 : index
    %369 = vector.load %arg4[%c21, %c0_176, %c0_177] : memref<36x32x8xf32, #tpu.memory_space<vmem>>, vector<1x32x8xf32>
    %370 = vector.shape_cast %369 : vector<1x32x8xf32> to vector<32x8xf32>
    %371 = arith.truncf %298 : vector<32x32xf32> to vector<32x32xbf16>
    %372 = arith.truncf %370 : vector<32x8xf32> to vector<32x8xbf16>
    %cst_178 = arith.constant dense<0.000000e+00> : vector<32x8xf32>
    %373 = tpu.matmul %371, %372, %cst_178 {dimension_numbers = #tpu.dot_dimension_numbers<[1], [0], [0], [1], [0, 0, 1, 1], [], []>} : vector<32x32xbf16>, vector<32x8xbf16>, vector<32x8xf32> -> vector<32x8xf32>
    %c21_179 = arith.constant 21 : index
    %c0_180 = arith.constant 0 : index
    %374 = vector.load %arg5[%c21_179, %c0_180] : memref<36x8xf32, #tpu.memory_space<vmem>>, vector<1x8xf32>
    %375 = vector.broadcast %374 : vector<1x8xf32> to vector<32x8xf32>
    %376 = arith.addf %373, %375 : vector<32x8xf32>
    %cst_181 = arith.constant 0.353553385 : f32
    %377 = vector.broadcast %cst_181 : f32 to vector<32x8xf32>
    %378 = arith.mulf %360, %377 : vector<32x8xf32>
    %379 = vector.shape_cast %378 : vector<32x8xf32> to vector<4x8x8xf32>
    %380 = vector.shape_cast %368 : vector<32x8xf32> to vector<4x8x8xf32>
    %381 = vector.shape_cast %376 : vector<32x8xf32> to vector<4x8x8xf32>
    %382 = arith.truncf %379 : vector<4x8x8xf32> to vector<4x8x8xbf16>
    %383 = arith.truncf %380 : vector<4x8x8xf32> to vector<4x8x8xbf16>
    "tpu.trace_start"() <{level = 10 : i32, message = "bqd,bkd->bqk"}> : () -> ()
    %cst_182 = arith.constant dense<0.000000e+00> : vector<4x8x8xf32>
    %384 = tpu.matmul %382, %383, %cst_182 {dimension_numbers = #tpu.dot_dimension_numbers<[2], [2], [1], [1], [0, 0, 0, 1, 1, 1], [0], [0]>} : vector<4x8x8xbf16>, vector<4x8x8xbf16>, vector<4x8x8xf32> -> vector<4x8x8xf32>
    "tpu.trace_stop"() : () -> ()
    %385 = arith.addf %384, %294 : vector<4x8x8xf32>
    %cst_183 = arith.constant dense<0xFF800000> : vector<4x8xf32>
    %386 = vector.multi_reduction <maximumf>, %385, %cst_183 [2] : vector<4x8x8xf32> to vector<4x8xf32>
    %387 = vector.shape_cast %386 : vector<4x8xf32> to vector<4x8x1xf32>
    %388 = vector.broadcast %387 : vector<4x8x1xf32> to vector<4x8x8xf32>
    %389 = arith.subf %385, %388 : vector<4x8x8xf32>
    %390 = math.exp %389 : vector<4x8x8xf32>
    %cst_184 = arith.constant dense<0.000000e+00> : vector<4x8xf32>
    %391 = vector.multi_reduction <add>, %390, %cst_184 [2] : vector<4x8x8xf32> to vector<4x8xf32>
    %392 = vector.shape_cast %391 : vector<4x8xf32> to vector<4x8x1xf32>
    %393 = arith.truncf %390 : vector<4x8x8xf32> to vector<4x8x8xbf16>
    %394 = arith.truncf %381 : vector<4x8x8xf32> to vector<4x8x8xbf16>
    "tpu.trace_start"() <{level = 10 : i32, message = "bqk,bkd->bqd"}> : () -> ()
    %cst_185 = arith.constant dense<0.000000e+00> : vector<4x8x8xf32>
    %395 = tpu.matmul %393, %394, %cst_185 {dimension_numbers = #tpu.dot_dimension_numbers<[2], [1], [1], [2], [0, 0, 0, 1, 1, 2], [0], [0]>} : vector<4x8x8xbf16>, vector<4x8x8xbf16>, vector<4x8x8xf32> -> vector<4x8x8xf32>
    "tpu.trace_stop"() : () -> ()
    %396 = tpu.reciprocal %392 {approx = true} : vector<4x8x1xf32> -> vector<4x8x1xf32>
    %397 = vector.broadcast %396 : vector<4x8x1xf32> to vector<4x8x8xf32>
    %398 = arith.mulf %395, %397 : vector<4x8x8xf32>
    %399 = vector.shape_cast %398 : vector<4x8x8xf32> to vector<32x8xf32>
    %c5_186 = arith.constant 5 : index
    %c0_187 = arith.constant 0 : index
    %c0_188 = arith.constant 0 : index
    %400 = vector.load %arg6[%c5_186, %c0_187, %c0_188] : memref<12x8x32xf32, #tpu.memory_space<vmem>>, vector<1x8x32xf32>
    %401 = vector.shape_cast %400 : vector<1x8x32xf32> to vector<8x32xf32>
    %402 = arith.truncf %399 : vector<32x8xf32> to vector<32x8xbf16>
    %403 = arith.truncf %401 : vector<8x32xf32> to vector<8x32xbf16>
    %cst_189 = arith.constant dense<0.000000e+00> : vector<32x32xf32>
    %404 = tpu.matmul %402, %403, %cst_189 {dimension_numbers = #tpu.dot_dimension_numbers<[1], [0], [0], [1], [0, 0, 1, 1], [], []>} : vector<32x8xbf16>, vector<8x32xbf16>, vector<32x32xf32> -> vector<32x32xf32>
    %405 = arith.addf %352, %404 : vector<32x32xf32>
    %c14 = arith.constant 14 : index
    %c0_190 = arith.constant 0 : index
    %c0_191 = arith.constant 0 : index
    %406 = vector.load %arg4[%c14, %c0_190, %c0_191] : memref<36x32x8xf32, #tpu.memory_space<vmem>>, vector<1x32x8xf32>
    %407 = vector.shape_cast %406 : vector<1x32x8xf32> to vector<32x8xf32>
    %408 = arith.truncf %297 : vector<32x32xf32> to vector<32x32xbf16>
    %409 = arith.truncf %407 : vector<32x8xf32> to vector<32x8xbf16>
    %cst_192 = arith.constant dense<0.000000e+00> : vector<32x8xf32>
    %410 = tpu.matmul %408, %409, %cst_192 {dimension_numbers = #tpu.dot_dimension_numbers<[1], [0], [0], [1], [0, 0, 1, 1], [], []>} : vector<32x32xbf16>, vector<32x8xbf16>, vector<32x8xf32> -> vector<32x8xf32>
    %c14_193 = arith.constant 14 : index
    %c0_194 = arith.constant 0 : index
    %411 = vector.load %arg5[%c14_193, %c0_194] : memref<36x8xf32, #tpu.memory_space<vmem>>, vector<1x8xf32>
    %412 = vector.broadcast %411 : vector<1x8xf32> to vector<32x8xf32>
    %413 = arith.addf %410, %412 : vector<32x8xf32>
    %c18 = arith.constant 18 : index
    %c0_195 = arith.constant 0 : index
    %c0_196 = arith.constant 0 : index
    %414 = vector.load %arg4[%c18, %c0_195, %c0_196] : memref<36x32x8xf32, #tpu.memory_space<vmem>>, vector<1x32x8xf32>
    %415 = vector.shape_cast %414 : vector<1x32x8xf32> to vector<32x8xf32>
    %416 = arith.truncf %298 : vector<32x32xf32> to vector<32x32xbf16>
    %417 = arith.truncf %415 : vector<32x8xf32> to vector<32x8xbf16>
    %cst_197 = arith.constant dense<0.000000e+00> : vector<32x8xf32>
    %418 = tpu.matmul %416, %417, %cst_197 {dimension_numbers = #tpu.dot_dimension_numbers<[1], [0], [0], [1], [0, 0, 1, 1], [], []>} : vector<32x32xbf16>, vector<32x8xbf16>, vector<32x8xf32> -> vector<32x8xf32>
    %c18_198 = arith.constant 18 : index
    %c0_199 = arith.constant 0 : index
    %419 = vector.load %arg5[%c18_198, %c0_199] : memref<36x8xf32, #tpu.memory_space<vmem>>, vector<1x8xf32>
    %420 = vector.broadcast %419 : vector<1x8xf32> to vector<32x8xf32>
    %421 = arith.addf %418, %420 : vector<32x8xf32>
    %c22 = arith.constant 22 : index
    %c0_200 = arith.constant 0 : index
    %c0_201 = arith.constant 0 : index
    %422 = vector.load %arg4[%c22, %c0_200, %c0_201] : memref<36x32x8xf32, #tpu.memory_space<vmem>>, vector<1x32x8xf32>
    %423 = vector.shape_cast %422 : vector<1x32x8xf32> to vector<32x8xf32>
    %424 = arith.truncf %298 : vector<32x32xf32> to vector<32x32xbf16>
    %425 = arith.truncf %423 : vector<32x8xf32> to vector<32x8xbf16>
    %cst_202 = arith.constant dense<0.000000e+00> : vector<32x8xf32>
    %426 = tpu.matmul %424, %425, %cst_202 {dimension_numbers = #tpu.dot_dimension_numbers<[1], [0], [0], [1], [0, 0, 1, 1], [], []>} : vector<32x32xbf16>, vector<32x8xbf16>, vector<32x8xf32> -> vector<32x8xf32>
    %c22_203 = arith.constant 22 : index
    %c0_204 = arith.constant 0 : index
    %427 = vector.load %arg5[%c22_203, %c0_204] : memref<36x8xf32, #tpu.memory_space<vmem>>, vector<1x8xf32>
    %428 = vector.broadcast %427 : vector<1x8xf32> to vector<32x8xf32>
    %429 = arith.addf %426, %428 : vector<32x8xf32>
    %cst_205 = arith.constant 0.353553385 : f32
    %430 = vector.broadcast %cst_205 : f32 to vector<32x8xf32>
    %431 = arith.mulf %413, %430 : vector<32x8xf32>
    %432 = vector.shape_cast %431 : vector<32x8xf32> to vector<4x8x8xf32>
    %433 = vector.shape_cast %421 : vector<32x8xf32> to vector<4x8x8xf32>
    %434 = vector.shape_cast %429 : vector<32x8xf32> to vector<4x8x8xf32>
    %435 = arith.truncf %432 : vector<4x8x8xf32> to vector<4x8x8xbf16>
    %436 = arith.truncf %433 : vector<4x8x8xf32> to vector<4x8x8xbf16>
    "tpu.trace_start"() <{level = 10 : i32, message = "bqd,bkd->bqk"}> : () -> ()
    %cst_206 = arith.constant dense<0.000000e+00> : vector<4x8x8xf32>
    %437 = tpu.matmul %435, %436, %cst_206 {dimension_numbers = #tpu.dot_dimension_numbers<[2], [2], [1], [1], [0, 0, 0, 1, 1, 1], [0], [0]>} : vector<4x8x8xbf16>, vector<4x8x8xbf16>, vector<4x8x8xf32> -> vector<4x8x8xf32>
    "tpu.trace_stop"() : () -> ()
    %438 = arith.addf %437, %294 : vector<4x8x8xf32>
    %cst_207 = arith.constant dense<0xFF800000> : vector<4x8xf32>
    %439 = vector.multi_reduction <maximumf>, %438, %cst_207 [2] : vector<4x8x8xf32> to vector<4x8xf32>
    %440 = vector.shape_cast %439 : vector<4x8xf32> to vector<4x8x1xf32>
    %441 = vector.broadcast %440 : vector<4x8x1xf32> to vector<4x8x8xf32>
    %442 = arith.subf %438, %441 : vector<4x8x8xf32>
    %443 = math.exp %442 : vector<4x8x8xf32>
    %cst_208 = arith.constant dense<0.000000e+00> : vector<4x8xf32>
    %444 = vector.multi_reduction <add>, %443, %cst_208 [2] : vector<4x8x8xf32> to vector<4x8xf32>
    %445 = vector.shape_cast %444 : vector<4x8xf32> to vector<4x8x1xf32>
    %446 = arith.truncf %443 : vector<4x8x8xf32> to vector<4x8x8xbf16>
    %447 = arith.truncf %434 : vector<4x8x8xf32> to vector<4x8x8xbf16>
    "tpu.trace_start"() <{level = 10 : i32, message = "bqk,bkd->bqd"}> : () -> ()
    %cst_209 = arith.constant dense<0.000000e+00> : vector<4x8x8xf32>
    %448 = tpu.matmul %446, %447, %cst_209 {dimension_numbers = #tpu.dot_dimension_numbers<[2], [1], [1], [2], [0, 0, 0, 1, 1, 2], [0], [0]>} : vector<4x8x8xbf16>, vector<4x8x8xbf16>, vector<4x8x8xf32> -> vector<4x8x8xf32>
    "tpu.trace_stop"() : () -> ()
    %449 = tpu.reciprocal %445 {approx = true} : vector<4x8x1xf32> -> vector<4x8x1xf32>
    %450 = vector.broadcast %449 : vector<4x8x1xf32> to vector<4x8x8xf32>
    %451 = arith.mulf %448, %450 : vector<4x8x8xf32>
    %452 = vector.shape_cast %451 : vector<4x8x8xf32> to vector<32x8xf32>
    %c6_210 = arith.constant 6 : index
    %c0_211 = arith.constant 0 : index
    %c0_212 = arith.constant 0 : index
    %453 = vector.load %arg6[%c6_210, %c0_211, %c0_212] : memref<12x8x32xf32, #tpu.memory_space<vmem>>, vector<1x8x32xf32>
    %454 = vector.shape_cast %453 : vector<1x8x32xf32> to vector<8x32xf32>
    %455 = arith.truncf %452 : vector<32x8xf32> to vector<32x8xbf16>
    %456 = arith.truncf %454 : vector<8x32xf32> to vector<8x32xbf16>
    %cst_213 = arith.constant dense<0.000000e+00> : vector<32x32xf32>
    %457 = tpu.matmul %455, %456, %cst_213 {dimension_numbers = #tpu.dot_dimension_numbers<[1], [0], [0], [1], [0, 0, 1, 1], [], []>} : vector<32x8xbf16>, vector<8x32xbf16>, vector<32x32xf32> -> vector<32x32xf32>
    %458 = arith.addf %405, %457 : vector<32x32xf32>
    %c15 = arith.constant 15 : index
    %c0_214 = arith.constant 0 : index
    %c0_215 = arith.constant 0 : index
    %459 = vector.load %arg4[%c15, %c0_214, %c0_215] : memref<36x32x8xf32, #tpu.memory_space<vmem>>, vector<1x32x8xf32>
    %460 = vector.shape_cast %459 : vector<1x32x8xf32> to vector<32x8xf32>
    %461 = arith.truncf %297 : vector<32x32xf32> to vector<32x32xbf16>
    %462 = arith.truncf %460 : vector<32x8xf32> to vector<32x8xbf16>
    %cst_216 = arith.constant dense<0.000000e+00> : vector<32x8xf32>
    %463 = tpu.matmul %461, %462, %cst_216 {dimension_numbers = #tpu.dot_dimension_numbers<[1], [0], [0], [1], [0, 0, 1, 1], [], []>} : vector<32x32xbf16>, vector<32x8xbf16>, vector<32x8xf32> -> vector<32x8xf32>
    %c15_217 = arith.constant 15 : index
    %c0_218 = arith.constant 0 : index
    %464 = vector.load %arg5[%c15_217, %c0_218] : memref<36x8xf32, #tpu.memory_space<vmem>>, vector<1x8xf32>
    %465 = vector.broadcast %464 : vector<1x8xf32> to vector<32x8xf32>
    %466 = arith.addf %463, %465 : vector<32x8xf32>
    %c19 = arith.constant 19 : index
    %c0_219 = arith.constant 0 : index
    %c0_220 = arith.constant 0 : index
    %467 = vector.load %arg4[%c19, %c0_219, %c0_220] : memref<36x32x8xf32, #tpu.memory_space<vmem>>, vector<1x32x8xf32>
    %468 = vector.shape_cast %467 : vector<1x32x8xf32> to vector<32x8xf32>
    %469 = arith.truncf %298 : vector<32x32xf32> to vector<32x32xbf16>
    %470 = arith.truncf %468 : vector<32x8xf32> to vector<32x8xbf16>
    %cst_221 = arith.constant dense<0.000000e+00> : vector<32x8xf32>
    %471 = tpu.matmul %469, %470, %cst_221 {dimension_numbers = #tpu.dot_dimension_numbers<[1], [0], [0], [1], [0, 0, 1, 1], [], []>} : vector<32x32xbf16>, vector<32x8xbf16>, vector<32x8xf32> -> vector<32x8xf32>
    %c19_222 = arith.constant 19 : index
    %c0_223 = arith.constant 0 : index
    %472 = vector.load %arg5[%c19_222, %c0_223] : memref<36x8xf32, #tpu.memory_space<vmem>>, vector<1x8xf32>
    %473 = vector.broadcast %472 : vector<1x8xf32> to vector<32x8xf32>
    %474 = arith.addf %471, %473 : vector<32x8xf32>
    %c23 = arith.constant 23 : index
    %c0_224 = arith.constant 0 : index
    %c0_225 = arith.constant 0 : index
    %475 = vector.load %arg4[%c23, %c0_224, %c0_225] : memref<36x32x8xf32, #tpu.memory_space<vmem>>, vector<1x32x8xf32>
    %476 = vector.shape_cast %475 : vector<1x32x8xf32> to vector<32x8xf32>
    %477 = arith.truncf %298 : vector<32x32xf32> to vector<32x32xbf16>
    %478 = arith.truncf %476 : vector<32x8xf32> to vector<32x8xbf16>
    %cst_226 = arith.constant dense<0.000000e+00> : vector<32x8xf32>
    %479 = tpu.matmul %477, %478, %cst_226 {dimension_numbers = #tpu.dot_dimension_numbers<[1], [0], [0], [1], [0, 0, 1, 1], [], []>} : vector<32x32xbf16>, vector<32x8xbf16>, vector<32x8xf32> -> vector<32x8xf32>
    %c23_227 = arith.constant 23 : index
    %c0_228 = arith.constant 0 : index
    %480 = vector.load %arg5[%c23_227, %c0_228] : memref<36x8xf32, #tpu.memory_space<vmem>>, vector<1x8xf32>
    %481 = vector.broadcast %480 : vector<1x8xf32> to vector<32x8xf32>
    %482 = arith.addf %479, %481 : vector<32x8xf32>
    %cst_229 = arith.constant 0.353553385 : f32
    %483 = vector.broadcast %cst_229 : f32 to vector<32x8xf32>
    %484 = arith.mulf %466, %483 : vector<32x8xf32>
    %485 = vector.shape_cast %484 : vector<32x8xf32> to vector<4x8x8xf32>
    %486 = vector.shape_cast %474 : vector<32x8xf32> to vector<4x8x8xf32>
    %487 = vector.shape_cast %482 : vector<32x8xf32> to vector<4x8x8xf32>
    %488 = arith.truncf %485 : vector<4x8x8xf32> to vector<4x8x8xbf16>
    %489 = arith.truncf %486 : vector<4x8x8xf32> to vector<4x8x8xbf16>
    "tpu.trace_start"() <{level = 10 : i32, message = "bqd,bkd->bqk"}> : () -> ()
    %cst_230 = arith.constant dense<0.000000e+00> : vector<4x8x8xf32>
    %490 = tpu.matmul %488, %489, %cst_230 {dimension_numbers = #tpu.dot_dimension_numbers<[2], [2], [1], [1], [0, 0, 0, 1, 1, 1], [0], [0]>} : vector<4x8x8xbf16>, vector<4x8x8xbf16>, vector<4x8x8xf32> -> vector<4x8x8xf32>
    "tpu.trace_stop"() : () -> ()
    %491 = arith.addf %490, %294 : vector<4x8x8xf32>
    %cst_231 = arith.constant dense<0xFF800000> : vector<4x8xf32>
    %492 = vector.multi_reduction <maximumf>, %491, %cst_231 [2] : vector<4x8x8xf32> to vector<4x8xf32>
    %493 = vector.shape_cast %492 : vector<4x8xf32> to vector<4x8x1xf32>
    %494 = vector.broadcast %493 : vector<4x8x1xf32> to vector<4x8x8xf32>
    %495 = arith.subf %491, %494 : vector<4x8x8xf32>
    %496 = math.exp %495 : vector<4x8x8xf32>
    %cst_232 = arith.constant dense<0.000000e+00> : vector<4x8xf32>
    %497 = vector.multi_reduction <add>, %496, %cst_232 [2] : vector<4x8x8xf32> to vector<4x8xf32>
    %498 = vector.shape_cast %497 : vector<4x8xf32> to vector<4x8x1xf32>
    %499 = arith.truncf %496 : vector<4x8x8xf32> to vector<4x8x8xbf16>
    %500 = arith.truncf %487 : vector<4x8x8xf32> to vector<4x8x8xbf16>
    "tpu.trace_start"() <{level = 10 : i32, message = "bqk,bkd->bqd"}> : () -> ()
    %cst_233 = arith.constant dense<0.000000e+00> : vector<4x8x8xf32>
    %501 = tpu.matmul %499, %500, %cst_233 {dimension_numbers = #tpu.dot_dimension_numbers<[2], [1], [1], [2], [0, 0, 0, 1, 1, 2], [0], [0]>} : vector<4x8x8xbf16>, vector<4x8x8xbf16>, vector<4x8x8xf32> -> vector<4x8x8xf32>
    "tpu.trace_stop"() : () -> ()
    %502 = tpu.reciprocal %498 {approx = true} : vector<4x8x1xf32> -> vector<4x8x1xf32>
    %503 = vector.broadcast %502 : vector<4x8x1xf32> to vector<4x8x8xf32>
    %504 = arith.mulf %501, %503 : vector<4x8x8xf32>
    %505 = vector.shape_cast %504 : vector<4x8x8xf32> to vector<32x8xf32>
    %c7_234 = arith.constant 7 : index
    %c0_235 = arith.constant 0 : index
    %c0_236 = arith.constant 0 : index
    %506 = vector.load %arg6[%c7_234, %c0_235, %c0_236] : memref<12x8x32xf32, #tpu.memory_space<vmem>>, vector<1x8x32xf32>
    %507 = vector.shape_cast %506 : vector<1x8x32xf32> to vector<8x32xf32>
    %508 = arith.truncf %505 : vector<32x8xf32> to vector<32x8xbf16>
    %509 = arith.truncf %507 : vector<8x32xf32> to vector<8x32xbf16>
    %cst_237 = arith.constant dense<0.000000e+00> : vector<32x32xf32>
    %510 = tpu.matmul %508, %509, %cst_237 {dimension_numbers = #tpu.dot_dimension_numbers<[1], [0], [0], [1], [0, 0, 1, 1], [], []>} : vector<32x8xbf16>, vector<8x32xbf16>, vector<32x32xf32> -> vector<32x32xf32>
    %511 = arith.addf %458, %510 : vector<32x32xf32>
    %512 = arith.addf %296, %511 : vector<32x32xf32>
    %c1_238 = arith.constant 1 : index
    %c0_239 = arith.constant 0 : index
    %513 = vector.load %arg9[%c1_238, %c0_239] : memref<15x32xf32, #tpu.memory_space<vmem>>, vector<1x32xf32>
    %514 = vector.broadcast %513 : vector<1x32xf32> to vector<32x32xf32>
    %515 = arith.addf %512, %514 : vector<32x32xf32>
    %c9_240 = arith.constant 9 : index
    %c0_241 = arith.constant 0 : index
    %516 = vector.load %arg9[%c9_240, %c0_241] : memref<15x32xf32, #tpu.memory_space<vmem>>, vector<1x32xf32>
    %c10_242 = arith.constant 10 : index
    %c0_243 = arith.constant 0 : index
    %517 = vector.load %arg9[%c10_242, %c0_243] : memref<15x32xf32, #tpu.memory_space<vmem>>, vector<1x32xf32>
    %cst_244 = arith.constant dense<0.000000e+00> : vector<32xf32>
    %518 = vector.multi_reduction <add>, %515, %cst_244 [1] : vector<32x32xf32> to vector<32xf32>
    %519 = vector.shape_cast %518 : vector<32xf32> to vector<32x1xf32>
    %cst_245 = arith.constant 3.200000e+01 : f32
    %520 = vector.broadcast %cst_245 : f32 to vector<32x1xf32>
    %521 = arith.divf %519, %520 : vector<32x1xf32>
    %522 = vector.broadcast %521 : vector<32x1xf32> to vector<32x32xf32>
    %523 = arith.subf %515, %522 : vector<32x32xf32>
    %524 = arith.mulf %523, %523 : vector<32x32xf32>
    %cst_246 = arith.constant dense<0.000000e+00> : vector<32xf32>
    %525 = vector.multi_reduction <add>, %524, %cst_246 [1] : vector<32x32xf32> to vector<32xf32>
    %526 = vector.shape_cast %525 : vector<32xf32> to vector<32x1xf32>
    %cst_247 = arith.constant 3.200000e+01 : f32
    %527 = vector.broadcast %cst_247 : f32 to vector<32x1xf32>
    %528 = arith.divf %526, %527 : vector<32x1xf32>
    %529 = vector.broadcast %521 : vector<32x1xf32> to vector<32x32xf32>
    %530 = arith.subf %515, %529 : vector<32x32xf32>
    %cst_248 = arith.constant 9.99999974E-6 : f32
    %531 = vector.broadcast %cst_248 : f32 to vector<32x1xf32>
    %532 = arith.addf %528, %531 : vector<32x1xf32>
    %533 = math.rsqrt %532 : vector<32x1xf32>
    %534 = vector.broadcast %533 : vector<32x1xf32> to vector<32x32xf32>
    %535 = arith.mulf %530, %534 : vector<32x32xf32>
    %536 = vector.broadcast %516 : vector<1x32xf32> to vector<32x32xf32>
    %537 = arith.mulf %535, %536 : vector<32x32xf32>
    %538 = vector.broadcast %517 : vector<1x32xf32> to vector<32x32xf32>
    %539 = arith.addf %537, %538 : vector<32x32xf32>
    %540 = vector.shape_cast %539 : vector<32x32xf32> to vector<4x8x32xf32>
    %541 = vector.shape_cast %540 : vector<4x8x32xf32> to vector<32x32xf32>
    %542 = vector.shape_cast %293 : vector<2x8x32xf32> to vector<16x32xf32>
    %543 = vector.shape_cast %295 : vector<4x1x8xf32> to vector<4x1x8xf32>
    %544 = vector.broadcast %543 : vector<4x1x8xf32> to vector<4x8x8xf32>
    %cst_249 = arith.constant 0.000000e+00 : f32
    %545 = vector.broadcast %cst_249 : f32 to vector<32x32xf32>
    %c24 = arith.constant 24 : index
    %c0_250 = arith.constant 0 : index
    %c0_251 = arith.constant 0 : index
    %546 = vector.load %arg4[%c24, %c0_250, %c0_251] : memref<36x32x8xf32, #tpu.memory_space<vmem>>, vector<1x32x8xf32>
    %547 = vector.shape_cast %546 : vector<1x32x8xf32> to vector<32x8xf32>
    %548 = arith.truncf %541 : vector<32x32xf32> to vector<32x32xbf16>
    %549 = arith.truncf %547 : vector<32x8xf32> to vector<32x8xbf16>
    %cst_252 = arith.constant dense<0.000000e+00> : vector<32x8xf32>
    %550 = tpu.matmul %548, %549, %cst_252 {dimension_numbers = #tpu.dot_dimension_numbers<[1], [0], [0], [1], [0, 0, 1, 1], [], []>} : vector<32x32xbf16>, vector<32x8xbf16>, vector<32x8xf32> -> vector<32x8xf32>
    %c24_253 = arith.constant 24 : index
    %c0_254 = arith.constant 0 : index
    %551 = vector.load %arg5[%c24_253, %c0_254] : memref<36x8xf32, #tpu.memory_space<vmem>>, vector<1x8xf32>
    %552 = vector.broadcast %551 : vector<1x8xf32> to vector<32x8xf32>
    %553 = arith.addf %550, %552 : vector<32x8xf32>
    %c28 = arith.constant 28 : index
    %c0_255 = arith.constant 0 : index
    %c0_256 = arith.constant 0 : index
    %554 = vector.load %arg4[%c28, %c0_255, %c0_256] : memref<36x32x8xf32, #tpu.memory_space<vmem>>, vector<1x32x8xf32>
    %555 = vector.shape_cast %554 : vector<1x32x8xf32> to vector<32x8xf32>
    %556 = arith.truncf %542 : vector<16x32xf32> to vector<16x32xbf16>
    %557 = arith.truncf %555 : vector<32x8xf32> to vector<32x8xbf16>
    %cst_257 = arith.constant dense<0.000000e+00> : vector<16x8xf32>
    %558 = tpu.matmul %556, %557, %cst_257 {dimension_numbers = #tpu.dot_dimension_numbers<[1], [0], [0], [1], [0, 0, 1, 1], [], []>} : vector<16x32xbf16>, vector<32x8xbf16>, vector<16x8xf32> -> vector<16x8xf32>
    %c28_258 = arith.constant 28 : index
    %c0_259 = arith.constant 0 : index
    %559 = vector.load %arg5[%c28_258, %c0_259] : memref<36x8xf32, #tpu.memory_space<vmem>>, vector<1x8xf32>
    %560 = vector.broadcast %559 : vector<1x8xf32> to vector<16x8xf32>
    %561 = arith.addf %558, %560 : vector<16x8xf32>
    %c32 = arith.constant 32 : index
    %c0_260 = arith.constant 0 : index
    %c0_261 = arith.constant 0 : index
    %562 = vector.load %arg4[%c32, %c0_260, %c0_261] : memref<36x32x8xf32, #tpu.memory_space<vmem>>, vector<1x32x8xf32>
    %563 = vector.shape_cast %562 : vector<1x32x8xf32> to vector<32x8xf32>
    %564 = arith.truncf %542 : vector<16x32xf32> to vector<16x32xbf16>
    %565 = arith.truncf %563 : vector<32x8xf32> to vector<32x8xbf16>
    %cst_262 = arith.constant dense<0.000000e+00> : vector<16x8xf32>
    %566 = tpu.matmul %564, %565, %cst_262 {dimension_numbers = #tpu.dot_dimension_numbers<[1], [0], [0], [1], [0, 0, 1, 1], [], []>} : vector<16x32xbf16>, vector<32x8xbf16>, vector<16x8xf32> -> vector<16x8xf32>
    %c32_263 = arith.constant 32 : index
    %c0_264 = arith.constant 0 : index
    %567 = vector.load %arg5[%c32_263, %c0_264] : memref<36x8xf32, #tpu.memory_space<vmem>>, vector<1x8xf32>
    %568 = vector.broadcast %567 : vector<1x8xf32> to vector<16x8xf32>
    %569 = arith.addf %566, %568 : vector<16x8xf32>
    %cst_265 = arith.constant 0.353553385 : f32
    %570 = vector.broadcast %cst_265 : f32 to vector<32x8xf32>
    %571 = arith.mulf %553, %570 : vector<32x8xf32>
    %572 = vector.shape_cast %571 : vector<32x8xf32> to vector<4x8x8xf32>
    %573 = vector.shape_cast %561 : vector<16x8xf32> to vector<2x8x8xf32>
    %574 = vector.shape_cast %569 : vector<16x8xf32> to vector<2x8x8xf32>
    %575 = tpu.concatenate %573, %573 in 0 : vector<2x8x8xf32>, vector<2x8x8xf32> -> vector<4x8x8xf32>
    %576 = tpu.concatenate %574, %574 in 0 : vector<2x8x8xf32>, vector<2x8x8xf32> -> vector<4x8x8xf32>
    %577 = arith.truncf %572 : vector<4x8x8xf32> to vector<4x8x8xbf16>
    %578 = arith.truncf %575 : vector<4x8x8xf32> to vector<4x8x8xbf16>
    "tpu.trace_start"() <{level = 10 : i32, message = "bqd,bkd->bqk"}> : () -> ()
    %cst_266 = arith.constant dense<0.000000e+00> : vector<4x8x8xf32>
    %579 = tpu.matmul %577, %578, %cst_266 {dimension_numbers = #tpu.dot_dimension_numbers<[2], [2], [1], [1], [0, 0, 0, 1, 1, 1], [0], [0]>} : vector<4x8x8xbf16>, vector<4x8x8xbf16>, vector<4x8x8xf32> -> vector<4x8x8xf32>
    "tpu.trace_stop"() : () -> ()
    %580 = arith.addf %579, %544 : vector<4x8x8xf32>
    %cst_267 = arith.constant dense<0xFF800000> : vector<4x8xf32>
    %581 = vector.multi_reduction <maximumf>, %580, %cst_267 [2] : vector<4x8x8xf32> to vector<4x8xf32>
    %582 = vector.shape_cast %581 : vector<4x8xf32> to vector<4x8x1xf32>
    %583 = vector.broadcast %582 : vector<4x8x1xf32> to vector<4x8x8xf32>
    %584 = arith.subf %580, %583 : vector<4x8x8xf32>
    %585 = math.exp %584 : vector<4x8x8xf32>
    %cst_268 = arith.constant dense<0.000000e+00> : vector<4x8xf32>
    %586 = vector.multi_reduction <add>, %585, %cst_268 [2] : vector<4x8x8xf32> to vector<4x8xf32>
    %587 = vector.shape_cast %586 : vector<4x8xf32> to vector<4x8x1xf32>
    %588 = arith.truncf %585 : vector<4x8x8xf32> to vector<4x8x8xbf16>
    %589 = arith.truncf %576 : vector<4x8x8xf32> to vector<4x8x8xbf16>
    "tpu.trace_start"() <{level = 10 : i32, message = "bqk,bkd->bqd"}> : () -> ()
    %cst_269 = arith.constant dense<0.000000e+00> : vector<4x8x8xf32>
    %590 = tpu.matmul %588, %589, %cst_269 {dimension_numbers = #tpu.dot_dimension_numbers<[2], [1], [1], [2], [0, 0, 0, 1, 1, 2], [0], [0]>} : vector<4x8x8xbf16>, vector<4x8x8xbf16>, vector<4x8x8xf32> -> vector<4x8x8xf32>
    "tpu.trace_stop"() : () -> ()
    %591 = tpu.reciprocal %587 {approx = true} : vector<4x8x1xf32> -> vector<4x8x1xf32>
    %592 = vector.broadcast %591 : vector<4x8x1xf32> to vector<4x8x8xf32>
    %593 = arith.mulf %590, %592 : vector<4x8x8xf32>
    %594 = vector.shape_cast %593 : vector<4x8x8xf32> to vector<32x8xf32>
    %c8_270 = arith.constant 8 : index
    %c0_271 = arith.constant 0 : index
    %c0_272 = arith.constant 0 : index
    %595 = vector.load %arg6[%c8_270, %c0_271, %c0_272] : memref<12x8x32xf32, #tpu.memory_space<vmem>>, vector<1x8x32xf32>
    %596 = vector.shape_cast %595 : vector<1x8x32xf32> to vector<8x32xf32>
    %597 = arith.truncf %594 : vector<32x8xf32> to vector<32x8xbf16>
    %598 = arith.truncf %596 : vector<8x32xf32> to vector<8x32xbf16>
    %cst_273 = arith.constant dense<0.000000e+00> : vector<32x32xf32>
    %599 = tpu.matmul %597, %598, %cst_273 {dimension_numbers = #tpu.dot_dimension_numbers<[1], [0], [0], [1], [0, 0, 1, 1], [], []>} : vector<32x8xbf16>, vector<8x32xbf16>, vector<32x32xf32> -> vector<32x32xf32>
    %600 = arith.addf %545, %599 : vector<32x32xf32>
    %c25 = arith.constant 25 : index
    %c0_274 = arith.constant 0 : index
    %c0_275 = arith.constant 0 : index
    %601 = vector.load %arg4[%c25, %c0_274, %c0_275] : memref<36x32x8xf32, #tpu.memory_space<vmem>>, vector<1x32x8xf32>
    %602 = vector.shape_cast %601 : vector<1x32x8xf32> to vector<32x8xf32>
    %603 = arith.truncf %541 : vector<32x32xf32> to vector<32x32xbf16>
    %604 = arith.truncf %602 : vector<32x8xf32> to vector<32x8xbf16>
    %cst_276 = arith.constant dense<0.000000e+00> : vector<32x8xf32>
    %605 = tpu.matmul %603, %604, %cst_276 {dimension_numbers = #tpu.dot_dimension_numbers<[1], [0], [0], [1], [0, 0, 1, 1], [], []>} : vector<32x32xbf16>, vector<32x8xbf16>, vector<32x8xf32> -> vector<32x8xf32>
    %c25_277 = arith.constant 25 : index
    %c0_278 = arith.constant 0 : index
    %606 = vector.load %arg5[%c25_277, %c0_278] : memref<36x8xf32, #tpu.memory_space<vmem>>, vector<1x8xf32>
    %607 = vector.broadcast %606 : vector<1x8xf32> to vector<32x8xf32>
    %608 = arith.addf %605, %607 : vector<32x8xf32>
    %c29 = arith.constant 29 : index
    %c0_279 = arith.constant 0 : index
    %c0_280 = arith.constant 0 : index
    %609 = vector.load %arg4[%c29, %c0_279, %c0_280] : memref<36x32x8xf32, #tpu.memory_space<vmem>>, vector<1x32x8xf32>
    %610 = vector.shape_cast %609 : vector<1x32x8xf32> to vector<32x8xf32>
    %611 = arith.truncf %542 : vector<16x32xf32> to vector<16x32xbf16>
    %612 = arith.truncf %610 : vector<32x8xf32> to vector<32x8xbf16>
    %cst_281 = arith.constant dense<0.000000e+00> : vector<16x8xf32>
    %613 = tpu.matmul %611, %612, %cst_281 {dimension_numbers = #tpu.dot_dimension_numbers<[1], [0], [0], [1], [0, 0, 1, 1], [], []>} : vector<16x32xbf16>, vector<32x8xbf16>, vector<16x8xf32> -> vector<16x8xf32>
    %c29_282 = arith.constant 29 : index
    %c0_283 = arith.constant 0 : index
    %614 = vector.load %arg5[%c29_282, %c0_283] : memref<36x8xf32, #tpu.memory_space<vmem>>, vector<1x8xf32>
    %615 = vector.broadcast %614 : vector<1x8xf32> to vector<16x8xf32>
    %616 = arith.addf %613, %615 : vector<16x8xf32>
    %c33 = arith.constant 33 : index
    %c0_284 = arith.constant 0 : index
    %c0_285 = arith.constant 0 : index
    %617 = vector.load %arg4[%c33, %c0_284, %c0_285] : memref<36x32x8xf32, #tpu.memory_space<vmem>>, vector<1x32x8xf32>
    %618 = vector.shape_cast %617 : vector<1x32x8xf32> to vector<32x8xf32>
    %619 = arith.truncf %542 : vector<16x32xf32> to vector<16x32xbf16>
    %620 = arith.truncf %618 : vector<32x8xf32> to vector<32x8xbf16>
    %cst_286 = arith.constant dense<0.000000e+00> : vector<16x8xf32>
    %621 = tpu.matmul %619, %620, %cst_286 {dimension_numbers = #tpu.dot_dimension_numbers<[1], [0], [0], [1], [0, 0, 1, 1], [], []>} : vector<16x32xbf16>, vector<32x8xbf16>, vector<16x8xf32> -> vector<16x8xf32>
    %c33_287 = arith.constant 33 : index
    %c0_288 = arith.constant 0 : index
    %622 = vector.load %arg5[%c33_287, %c0_288] : memref<36x8xf32, #tpu.memory_space<vmem>>, vector<1x8xf32>
    %623 = vector.broadcast %622 : vector<1x8xf32> to vector<16x8xf32>
    %624 = arith.addf %621, %623 : vector<16x8xf32>
    %cst_289 = arith.constant 0.353553385 : f32
    %625 = vector.broadcast %cst_289 : f32 to vector<32x8xf32>
    %626 = arith.mulf %608, %625 : vector<32x8xf32>
    %627 = vector.shape_cast %626 : vector<32x8xf32> to vector<4x8x8xf32>
    %628 = vector.shape_cast %616 : vector<16x8xf32> to vector<2x8x8xf32>
    %629 = vector.shape_cast %624 : vector<16x8xf32> to vector<2x8x8xf32>
    %630 = tpu.concatenate %628, %628 in 0 : vector<2x8x8xf32>, vector<2x8x8xf32> -> vector<4x8x8xf32>
    %631 = tpu.concatenate %629, %629 in 0 : vector<2x8x8xf32>, vector<2x8x8xf32> -> vector<4x8x8xf32>
    %632 = arith.truncf %627 : vector<4x8x8xf32> to vector<4x8x8xbf16>
    %633 = arith.truncf %630 : vector<4x8x8xf32> to vector<4x8x8xbf16>
    "tpu.trace_start"() <{level = 10 : i32, message = "bqd,bkd->bqk"}> : () -> ()
    %cst_290 = arith.constant dense<0.000000e+00> : vector<4x8x8xf32>
    %634 = tpu.matmul %632, %633, %cst_290 {dimension_numbers = #tpu.dot_dimension_numbers<[2], [2], [1], [1], [0, 0, 0, 1, 1, 1], [0], [0]>} : vector<4x8x8xbf16>, vector<4x8x8xbf16>, vector<4x8x8xf32> -> vector<4x8x8xf32>
    "tpu.trace_stop"() : () -> ()
    %635 = arith.addf %634, %544 : vector<4x8x8xf32>
    %cst_291 = arith.constant dense<0xFF800000> : vector<4x8xf32>
    %636 = vector.multi_reduction <maximumf>, %635, %cst_291 [2] : vector<4x8x8xf32> to vector<4x8xf32>
    %637 = vector.shape_cast %636 : vector<4x8xf32> to vector<4x8x1xf32>
    %638 = vector.broadcast %637 : vector<4x8x1xf32> to vector<4x8x8xf32>
    %639 = arith.subf %635, %638 : vector<4x8x8xf32>
    %640 = math.exp %639 : vector<4x8x8xf32>
    %cst_292 = arith.constant dense<0.000000e+00> : vector<4x8xf32>
    %641 = vector.multi_reduction <add>, %640, %cst_292 [2] : vector<4x8x8xf32> to vector<4x8xf32>
    %642 = vector.shape_cast %641 : vector<4x8xf32> to vector<4x8x1xf32>
    %643 = arith.truncf %640 : vector<4x8x8xf32> to vector<4x8x8xbf16>
    %644 = arith.truncf %631 : vector<4x8x8xf32> to vector<4x8x8xbf16>
    "tpu.trace_start"() <{level = 10 : i32, message = "bqk,bkd->bqd"}> : () -> ()
    %cst_293 = arith.constant dense<0.000000e+00> : vector<4x8x8xf32>
    %645 = tpu.matmul %643, %644, %cst_293 {dimension_numbers = #tpu.dot_dimension_numbers<[2], [1], [1], [2], [0, 0, 0, 1, 1, 2], [0], [0]>} : vector<4x8x8xbf16>, vector<4x8x8xbf16>, vector<4x8x8xf32> -> vector<4x8x8xf32>
    "tpu.trace_stop"() : () -> ()
    %646 = tpu.reciprocal %642 {approx = true} : vector<4x8x1xf32> -> vector<4x8x1xf32>
    %647 = vector.broadcast %646 : vector<4x8x1xf32> to vector<4x8x8xf32>
    %648 = arith.mulf %645, %647 : vector<4x8x8xf32>
    %649 = vector.shape_cast %648 : vector<4x8x8xf32> to vector<32x8xf32>
    %c9_294 = arith.constant 9 : index
    %c0_295 = arith.constant 0 : index
    %c0_296 = arith.constant 0 : index
    %650 = vector.load %arg6[%c9_294, %c0_295, %c0_296] : memref<12x8x32xf32, #tpu.memory_space<vmem>>, vector<1x8x32xf32>
    %651 = vector.shape_cast %650 : vector<1x8x32xf32> to vector<8x32xf32>
    %652 = arith.truncf %649 : vector<32x8xf32> to vector<32x8xbf16>
    %653 = arith.truncf %651 : vector<8x32xf32> to vector<8x32xbf16>
    %cst_297 = arith.constant dense<0.000000e+00> : vector<32x32xf32>
    %654 = tpu.matmul %652, %653, %cst_297 {dimension_numbers = #tpu.dot_dimension_numbers<[1], [0], [0], [1], [0, 0, 1, 1], [], []>} : vector<32x8xbf16>, vector<8x32xbf16>, vector<32x32xf32> -> vector<32x32xf32>
    %655 = arith.addf %600, %654 : vector<32x32xf32>
    %c26 = arith.constant 26 : index
    %c0_298 = arith.constant 0 : index
    %c0_299 = arith.constant 0 : index
    %656 = vector.load %arg4[%c26, %c0_298, %c0_299] : memref<36x32x8xf32, #tpu.memory_space<vmem>>, vector<1x32x8xf32>
    %657 = vector.shape_cast %656 : vector<1x32x8xf32> to vector<32x8xf32>
    %658 = arith.truncf %541 : vector<32x32xf32> to vector<32x32xbf16>
    %659 = arith.truncf %657 : vector<32x8xf32> to vector<32x8xbf16>
    %cst_300 = arith.constant dense<0.000000e+00> : vector<32x8xf32>
    %660 = tpu.matmul %658, %659, %cst_300 {dimension_numbers = #tpu.dot_dimension_numbers<[1], [0], [0], [1], [0, 0, 1, 1], [], []>} : vector<32x32xbf16>, vector<32x8xbf16>, vector<32x8xf32> -> vector<32x8xf32>
    %c26_301 = arith.constant 26 : index
    %c0_302 = arith.constant 0 : index
    %661 = vector.load %arg5[%c26_301, %c0_302] : memref<36x8xf32, #tpu.memory_space<vmem>>, vector<1x8xf32>
    %662 = vector.broadcast %661 : vector<1x8xf32> to vector<32x8xf32>
    %663 = arith.addf %660, %662 : vector<32x8xf32>
    %c30 = arith.constant 30 : index
    %c0_303 = arith.constant 0 : index
    %c0_304 = arith.constant 0 : index
    %664 = vector.load %arg4[%c30, %c0_303, %c0_304] : memref<36x32x8xf32, #tpu.memory_space<vmem>>, vector<1x32x8xf32>
    %665 = vector.shape_cast %664 : vector<1x32x8xf32> to vector<32x8xf32>
    %666 = arith.truncf %542 : vector<16x32xf32> to vector<16x32xbf16>
    %667 = arith.truncf %665 : vector<32x8xf32> to vector<32x8xbf16>
    %cst_305 = arith.constant dense<0.000000e+00> : vector<16x8xf32>
    %668 = tpu.matmul %666, %667, %cst_305 {dimension_numbers = #tpu.dot_dimension_numbers<[1], [0], [0], [1], [0, 0, 1, 1], [], []>} : vector<16x32xbf16>, vector<32x8xbf16>, vector<16x8xf32> -> vector<16x8xf32>
    %c30_306 = arith.constant 30 : index
    %c0_307 = arith.constant 0 : index
    %669 = vector.load %arg5[%c30_306, %c0_307] : memref<36x8xf32, #tpu.memory_space<vmem>>, vector<1x8xf32>
    %670 = vector.broadcast %669 : vector<1x8xf32> to vector<16x8xf32>
    %671 = arith.addf %668, %670 : vector<16x8xf32>
    %c34 = arith.constant 34 : index
    %c0_308 = arith.constant 0 : index
    %c0_309 = arith.constant 0 : index
    %672 = vector.load %arg4[%c34, %c0_308, %c0_309] : memref<36x32x8xf32, #tpu.memory_space<vmem>>, vector<1x32x8xf32>
    %673 = vector.shape_cast %672 : vector<1x32x8xf32> to vector<32x8xf32>
    %674 = arith.truncf %542 : vector<16x32xf32> to vector<16x32xbf16>
    %675 = arith.truncf %673 : vector<32x8xf32> to vector<32x8xbf16>
    %cst_310 = arith.constant dense<0.000000e+00> : vector<16x8xf32>
    %676 = tpu.matmul %674, %675, %cst_310 {dimension_numbers = #tpu.dot_dimension_numbers<[1], [0], [0], [1], [0, 0, 1, 1], [], []>} : vector<16x32xbf16>, vector<32x8xbf16>, vector<16x8xf32> -> vector<16x8xf32>
    %c34_311 = arith.constant 34 : index
    %c0_312 = arith.constant 0 : index
    %677 = vector.load %arg5[%c34_311, %c0_312] : memref<36x8xf32, #tpu.memory_space<vmem>>, vector<1x8xf32>
    %678 = vector.broadcast %677 : vector<1x8xf32> to vector<16x8xf32>
    %679 = arith.addf %676, %678 : vector<16x8xf32>
    %cst_313 = arith.constant 0.353553385 : f32
    %680 = vector.broadcast %cst_313 : f32 to vector<32x8xf32>
    %681 = arith.mulf %663, %680 : vector<32x8xf32>
    %682 = vector.shape_cast %681 : vector<32x8xf32> to vector<4x8x8xf32>
    %683 = vector.shape_cast %671 : vector<16x8xf32> to vector<2x8x8xf32>
    %684 = vector.shape_cast %679 : vector<16x8xf32> to vector<2x8x8xf32>
    %685 = tpu.concatenate %683, %683 in 0 : vector<2x8x8xf32>, vector<2x8x8xf32> -> vector<4x8x8xf32>
    %686 = tpu.concatenate %684, %684 in 0 : vector<2x8x8xf32>, vector<2x8x8xf32> -> vector<4x8x8xf32>
    %687 = arith.truncf %682 : vector<4x8x8xf32> to vector<4x8x8xbf16>
    %688 = arith.truncf %685 : vector<4x8x8xf32> to vector<4x8x8xbf16>
    "tpu.trace_start"() <{level = 10 : i32, message = "bqd,bkd->bqk"}> : () -> ()
    %cst_314 = arith.constant dense<0.000000e+00> : vector<4x8x8xf32>
    %689 = tpu.matmul %687, %688, %cst_314 {dimension_numbers = #tpu.dot_dimension_numbers<[2], [2], [1], [1], [0, 0, 0, 1, 1, 1], [0], [0]>} : vector<4x8x8xbf16>, vector<4x8x8xbf16>, vector<4x8x8xf32> -> vector<4x8x8xf32>
    "tpu.trace_stop"() : () -> ()
    %690 = arith.addf %689, %544 : vector<4x8x8xf32>
    %cst_315 = arith.constant dense<0xFF800000> : vector<4x8xf32>
    %691 = vector.multi_reduction <maximumf>, %690, %cst_315 [2] : vector<4x8x8xf32> to vector<4x8xf32>
    %692 = vector.shape_cast %691 : vector<4x8xf32> to vector<4x8x1xf32>
    %693 = vector.broadcast %692 : vector<4x8x1xf32> to vector<4x8x8xf32>
    %694 = arith.subf %690, %693 : vector<4x8x8xf32>
    %695 = math.exp %694 : vector<4x8x8xf32>
    %cst_316 = arith.constant dense<0.000000e+00> : vector<4x8xf32>
    %696 = vector.multi_reduction <add>, %695, %cst_316 [2] : vector<4x8x8xf32> to vector<4x8xf32>
    %697 = vector.shape_cast %696 : vector<4x8xf32> to vector<4x8x1xf32>
    %698 = arith.truncf %695 : vector<4x8x8xf32> to vector<4x8x8xbf16>
    %699 = arith.truncf %686 : vector<4x8x8xf32> to vector<4x8x8xbf16>
    "tpu.trace_start"() <{level = 10 : i32, message = "bqk,bkd->bqd"}> : () -> ()
    %cst_317 = arith.constant dense<0.000000e+00> : vector<4x8x8xf32>
    %700 = tpu.matmul %698, %699, %cst_317 {dimension_numbers = #tpu.dot_dimension_numbers<[2], [1], [1], [2], [0, 0, 0, 1, 1, 2], [0], [0]>} : vector<4x8x8xbf16>, vector<4x8x8xbf16>, vector<4x8x8xf32> -> vector<4x8x8xf32>
    "tpu.trace_stop"() : () -> ()
    %701 = tpu.reciprocal %697 {approx = true} : vector<4x8x1xf32> -> vector<4x8x1xf32>
    %702 = vector.broadcast %701 : vector<4x8x1xf32> to vector<4x8x8xf32>
    %703 = arith.mulf %700, %702 : vector<4x8x8xf32>
    %704 = vector.shape_cast %703 : vector<4x8x8xf32> to vector<32x8xf32>
    %c10_318 = arith.constant 10 : index
    %c0_319 = arith.constant 0 : index
    %c0_320 = arith.constant 0 : index
    %705 = vector.load %arg6[%c10_318, %c0_319, %c0_320] : memref<12x8x32xf32, #tpu.memory_space<vmem>>, vector<1x8x32xf32>
    %706 = vector.shape_cast %705 : vector<1x8x32xf32> to vector<8x32xf32>
    %707 = arith.truncf %704 : vector<32x8xf32> to vector<32x8xbf16>
    %708 = arith.truncf %706 : vector<8x32xf32> to vector<8x32xbf16>
    %cst_321 = arith.constant dense<0.000000e+00> : vector<32x32xf32>
    %709 = tpu.matmul %707, %708, %cst_321 {dimension_numbers = #tpu.dot_dimension_numbers<[1], [0], [0], [1], [0, 0, 1, 1], [], []>} : vector<32x8xbf16>, vector<8x32xbf16>, vector<32x32xf32> -> vector<32x32xf32>
    %710 = arith.addf %655, %709 : vector<32x32xf32>
    %c27 = arith.constant 27 : index
    %c0_322 = arith.constant 0 : index
    %c0_323 = arith.constant 0 : index
    %711 = vector.load %arg4[%c27, %c0_322, %c0_323] : memref<36x32x8xf32, #tpu.memory_space<vmem>>, vector<1x32x8xf32>
    %712 = vector.shape_cast %711 : vector<1x32x8xf32> to vector<32x8xf32>
    %713 = arith.truncf %541 : vector<32x32xf32> to vector<32x32xbf16>
    %714 = arith.truncf %712 : vector<32x8xf32> to vector<32x8xbf16>
    %cst_324 = arith.constant dense<0.000000e+00> : vector<32x8xf32>
    %715 = tpu.matmul %713, %714, %cst_324 {dimension_numbers = #tpu.dot_dimension_numbers<[1], [0], [0], [1], [0, 0, 1, 1], [], []>} : vector<32x32xbf16>, vector<32x8xbf16>, vector<32x8xf32> -> vector<32x8xf32>
    %c27_325 = arith.constant 27 : index
    %c0_326 = arith.constant 0 : index
    %716 = vector.load %arg5[%c27_325, %c0_326] : memref<36x8xf32, #tpu.memory_space<vmem>>, vector<1x8xf32>
    %717 = vector.broadcast %716 : vector<1x8xf32> to vector<32x8xf32>
    %718 = arith.addf %715, %717 : vector<32x8xf32>
    %c31 = arith.constant 31 : index
    %c0_327 = arith.constant 0 : index
    %c0_328 = arith.constant 0 : index
    %719 = vector.load %arg4[%c31, %c0_327, %c0_328] : memref<36x32x8xf32, #tpu.memory_space<vmem>>, vector<1x32x8xf32>
    %720 = vector.shape_cast %719 : vector<1x32x8xf32> to vector<32x8xf32>
    %721 = arith.truncf %542 : vector<16x32xf32> to vector<16x32xbf16>
    %722 = arith.truncf %720 : vector<32x8xf32> to vector<32x8xbf16>
    %cst_329 = arith.constant dense<0.000000e+00> : vector<16x8xf32>
    %723 = tpu.matmul %721, %722, %cst_329 {dimension_numbers = #tpu.dot_dimension_numbers<[1], [0], [0], [1], [0, 0, 1, 1], [], []>} : vector<16x32xbf16>, vector<32x8xbf16>, vector<16x8xf32> -> vector<16x8xf32>
    %c31_330 = arith.constant 31 : index
    %c0_331 = arith.constant 0 : index
    %724 = vector.load %arg5[%c31_330, %c0_331] : memref<36x8xf32, #tpu.memory_space<vmem>>, vector<1x8xf32>
    %725 = vector.broadcast %724 : vector<1x8xf32> to vector<16x8xf32>
    %726 = arith.addf %723, %725 : vector<16x8xf32>
    %c35 = arith.constant 35 : index
    %c0_332 = arith.constant 0 : index
    %c0_333 = arith.constant 0 : index
    %727 = vector.load %arg4[%c35, %c0_332, %c0_333] : memref<36x32x8xf32, #tpu.memory_space<vmem>>, vector<1x32x8xf32>
    %728 = vector.shape_cast %727 : vector<1x32x8xf32> to vector<32x8xf32>
    %729 = arith.truncf %542 : vector<16x32xf32> to vector<16x32xbf16>
    %730 = arith.truncf %728 : vector<32x8xf32> to vector<32x8xbf16>
    %cst_334 = arith.constant dense<0.000000e+00> : vector<16x8xf32>
    %731 = tpu.matmul %729, %730, %cst_334 {dimension_numbers = #tpu.dot_dimension_numbers<[1], [0], [0], [1], [0, 0, 1, 1], [], []>} : vector<16x32xbf16>, vector<32x8xbf16>, vector<16x8xf32> -> vector<16x8xf32>
    %c35_335 = arith.constant 35 : index
    %c0_336 = arith.constant 0 : index
    %732 = vector.load %arg5[%c35_335, %c0_336] : memref<36x8xf32, #tpu.memory_space<vmem>>, vector<1x8xf32>
    %733 = vector.broadcast %732 : vector<1x8xf32> to vector<16x8xf32>
    %734 = arith.addf %731, %733 : vector<16x8xf32>
    %cst_337 = arith.constant 0.353553385 : f32
    %735 = vector.broadcast %cst_337 : f32 to vector<32x8xf32>
    %736 = arith.mulf %718, %735 : vector<32x8xf32>
    %737 = vector.shape_cast %736 : vector<32x8xf32> to vector<4x8x8xf32>
    %738 = vector.shape_cast %726 : vector<16x8xf32> to vector<2x8x8xf32>
    %739 = vector.shape_cast %734 : vector<16x8xf32> to vector<2x8x8xf32>
    %740 = tpu.concatenate %738, %738 in 0 : vector<2x8x8xf32>, vector<2x8x8xf32> -> vector<4x8x8xf32>
    %741 = tpu.concatenate %739, %739 in 0 : vector<2x8x8xf32>, vector<2x8x8xf32> -> vector<4x8x8xf32>
    %742 = arith.truncf %737 : vector<4x8x8xf32> to vector<4x8x8xbf16>
    %743 = arith.truncf %740 : vector<4x8x8xf32> to vector<4x8x8xbf16>
    "tpu.trace_start"() <{level = 10 : i32, message = "bqd,bkd->bqk"}> : () -> ()
    %cst_338 = arith.constant dense<0.000000e+00> : vector<4x8x8xf32>
    %744 = tpu.matmul %742, %743, %cst_338 {dimension_numbers = #tpu.dot_dimension_numbers<[2], [2], [1], [1], [0, 0, 0, 1, 1, 1], [0], [0]>} : vector<4x8x8xbf16>, vector<4x8x8xbf16>, vector<4x8x8xf32> -> vector<4x8x8xf32>
    "tpu.trace_stop"() : () -> ()
    %745 = arith.addf %744, %544 : vector<4x8x8xf32>
    %cst_339 = arith.constant dense<0xFF800000> : vector<4x8xf32>
    %746 = vector.multi_reduction <maximumf>, %745, %cst_339 [2] : vector<4x8x8xf32> to vector<4x8xf32>
    %747 = vector.shape_cast %746 : vector<4x8xf32> to vector<4x8x1xf32>
    %748 = vector.broadcast %747 : vector<4x8x1xf32> to vector<4x8x8xf32>
    %749 = arith.subf %745, %748 : vector<4x8x8xf32>
    %750 = math.exp %749 : vector<4x8x8xf32>
    %cst_340 = arith.constant dense<0.000000e+00> : vector<4x8xf32>
    %751 = vector.multi_reduction <add>, %750, %cst_340 [2] : vector<4x8x8xf32> to vector<4x8xf32>
    %752 = vector.shape_cast %751 : vector<4x8xf32> to vector<4x8x1xf32>
    %753 = arith.truncf %750 : vector<4x8x8xf32> to vector<4x8x8xbf16>
    %754 = arith.truncf %741 : vector<4x8x8xf32> to vector<4x8x8xbf16>
    "tpu.trace_start"() <{level = 10 : i32, message = "bqk,bkd->bqd"}> : () -> ()
    %cst_341 = arith.constant dense<0.000000e+00> : vector<4x8x8xf32>
    %755 = tpu.matmul %753, %754, %cst_341 {dimension_numbers = #tpu.dot_dimension_numbers<[2], [1], [1], [2], [0, 0, 0, 1, 1, 2], [0], [0]>} : vector<4x8x8xbf16>, vector<4x8x8xbf16>, vector<4x8x8xf32> -> vector<4x8x8xf32>
    "tpu.trace_stop"() : () -> ()
    %756 = tpu.reciprocal %752 {approx = true} : vector<4x8x1xf32> -> vector<4x8x1xf32>
    %757 = vector.broadcast %756 : vector<4x8x1xf32> to vector<4x8x8xf32>
    %758 = arith.mulf %755, %757 : vector<4x8x8xf32>
    %759 = vector.shape_cast %758 : vector<4x8x8xf32> to vector<32x8xf32>
    %c11_342 = arith.constant 11 : index
    %c0_343 = arith.constant 0 : index
    %c0_344 = arith.constant 0 : index
    %760 = vector.load %arg6[%c11_342, %c0_343, %c0_344] : memref<12x8x32xf32, #tpu.memory_space<vmem>>, vector<1x8x32xf32>
    %761 = vector.shape_cast %760 : vector<1x8x32xf32> to vector<8x32xf32>
    %762 = arith.truncf %759 : vector<32x8xf32> to vector<32x8xbf16>
    %763 = arith.truncf %761 : vector<8x32xf32> to vector<8x32xbf16>
    %cst_345 = arith.constant dense<0.000000e+00> : vector<32x32xf32>
    %764 = tpu.matmul %762, %763, %cst_345 {dimension_numbers = #tpu.dot_dimension_numbers<[1], [0], [0], [1], [0, 0, 1, 1], [], []>} : vector<32x8xbf16>, vector<8x32xbf16>, vector<32x32xf32> -> vector<32x32xf32>
    %765 = arith.addf %710, %764 : vector<32x32xf32>
    %766 = arith.addf %539, %765 : vector<32x32xf32>
    %c2_346 = arith.constant 2 : index
    %c0_347 = arith.constant 0 : index
    %767 = vector.load %arg9[%c2_346, %c0_347] : memref<15x32xf32, #tpu.memory_space<vmem>>, vector<1x32xf32>
    %768 = vector.broadcast %767 : vector<1x32xf32> to vector<32x32xf32>
    %769 = arith.addf %766, %768 : vector<32x32xf32>
    %c11_348 = arith.constant 11 : index
    %c0_349 = arith.constant 0 : index
    %770 = vector.load %arg9[%c11_348, %c0_349] : memref<15x32xf32, #tpu.memory_space<vmem>>, vector<1x32xf32>
    %c12_350 = arith.constant 12 : index
    %c0_351 = arith.constant 0 : index
    %771 = vector.load %arg9[%c12_350, %c0_351] : memref<15x32xf32, #tpu.memory_space<vmem>>, vector<1x32xf32>
    %cst_352 = arith.constant dense<0.000000e+00> : vector<32xf32>
    %772 = vector.multi_reduction <add>, %769, %cst_352 [1] : vector<32x32xf32> to vector<32xf32>
    %773 = vector.shape_cast %772 : vector<32xf32> to vector<32x1xf32>
    %cst_353 = arith.constant 3.200000e+01 : f32
    %774 = vector.broadcast %cst_353 : f32 to vector<32x1xf32>
    %775 = arith.divf %773, %774 : vector<32x1xf32>
    %776 = vector.broadcast %775 : vector<32x1xf32> to vector<32x32xf32>
    %777 = arith.subf %769, %776 : vector<32x32xf32>
    %778 = arith.mulf %777, %777 : vector<32x32xf32>
    %cst_354 = arith.constant dense<0.000000e+00> : vector<32xf32>
    %779 = vector.multi_reduction <add>, %778, %cst_354 [1] : vector<32x32xf32> to vector<32xf32>
    %780 = vector.shape_cast %779 : vector<32xf32> to vector<32x1xf32>
    %cst_355 = arith.constant 3.200000e+01 : f32
    %781 = vector.broadcast %cst_355 : f32 to vector<32x1xf32>
    %782 = arith.divf %780, %781 : vector<32x1xf32>
    %783 = vector.broadcast %775 : vector<32x1xf32> to vector<32x32xf32>
    %784 = arith.subf %769, %783 : vector<32x32xf32>
    %cst_356 = arith.constant 9.99999974E-6 : f32
    %785 = vector.broadcast %cst_356 : f32 to vector<32x1xf32>
    %786 = arith.addf %782, %785 : vector<32x1xf32>
    %787 = math.rsqrt %786 : vector<32x1xf32>
    %788 = vector.broadcast %787 : vector<32x1xf32> to vector<32x32xf32>
    %789 = arith.mulf %784, %788 : vector<32x32xf32>
    %790 = vector.broadcast %770 : vector<1x32xf32> to vector<32x32xf32>
    %791 = arith.mulf %789, %790 : vector<32x32xf32>
    %792 = vector.broadcast %771 : vector<1x32xf32> to vector<32x32xf32>
    %793 = arith.addf %791, %792 : vector<32x32xf32>
    %c1_357 = arith.constant 1 : index
    %c0_358 = arith.constant 0 : index
    %c0_359 = arith.constant 0 : index
    %794 = vector.load %arg7[%c1_357, %c0_358, %c0_359] : memref<2x32x64xf32, #tpu.memory_space<vmem>>, vector<1x32x64xf32>
    %795 = vector.shape_cast %794 : vector<1x32x64xf32> to vector<32x64xf32>
    %796 = arith.truncf %793 : vector<32x32xf32> to vector<32x32xbf16>
    %797 = arith.truncf %795 : vector<32x64xf32> to vector<32x64xbf16>
    %cst_360 = arith.constant dense<0.000000e+00> : vector<32x64xf32>
    %798 = tpu.matmul %796, %797, %cst_360 {dimension_numbers = #tpu.dot_dimension_numbers<[1], [0], [0], [1], [0, 0, 1, 1], [], []>} : vector<32x32xbf16>, vector<32x64xbf16>, vector<32x64xf32> -> vector<32x64xf32>
    %c1_361 = arith.constant 1 : index
    %c0_362 = arith.constant 0 : index
    %799 = vector.load %arg10[%c1_361, %c0_362] : memref<2x64xf32, #tpu.memory_space<vmem>>, vector<1x64xf32>
    %800 = vector.broadcast %799 : vector<1x64xf32> to vector<32x64xf32>
    %801 = arith.addf %798, %800 : vector<32x64xf32>
    %cst_363 = arith.constant 0.000000e+00 : f32
    %802 = vector.broadcast %cst_363 : f32 to vector<32x64xf32>
    %803 = arith.maximumf %801, %802 : vector<32x64xf32>
    %c1_364 = arith.constant 1 : index
    %c0_365 = arith.constant 0 : index
    %c0_366 = arith.constant 0 : index
    %804 = vector.load %arg8[%c1_364, %c0_365, %c0_366] : memref<2x64x32xf32, #tpu.memory_space<vmem>>, vector<1x64x32xf32>
    %805 = vector.shape_cast %804 : vector<1x64x32xf32> to vector<64x32xf32>
    %806 = arith.truncf %803 : vector<32x64xf32> to vector<32x64xbf16>
    %807 = arith.truncf %805 : vector<64x32xf32> to vector<64x32xbf16>
    %cst_367 = arith.constant dense<0.000000e+00> : vector<32x32xf32>
    %808 = tpu.matmul %806, %807, %cst_367 {dimension_numbers = #tpu.dot_dimension_numbers<[1], [0], [0], [1], [0, 0, 1, 1], [], []>} : vector<32x64xbf16>, vector<64x32xbf16>, vector<32x32xf32> -> vector<32x32xf32>
    %c4_368 = arith.constant 4 : index
    %c0_369 = arith.constant 0 : index
    %809 = vector.load %arg9[%c4_368, %c0_369] : memref<15x32xf32, #tpu.memory_space<vmem>>, vector<1x32xf32>
    %810 = vector.broadcast %809 : vector<1x32xf32> to vector<32x32xf32>
    %811 = arith.addf %808, %810 : vector<32x32xf32>
    %812 = arith.addf %793, %811 : vector<32x32xf32>
    %c13_370 = arith.constant 13 : index
    %c0_371 = arith.constant 0 : index
    %813 = vector.load %arg9[%c13_370, %c0_371] : memref<15x32xf32, #tpu.memory_space<vmem>>, vector<1x32xf32>
    %c14_372 = arith.constant 14 : index
    %c0_373 = arith.constant 0 : index
    %814 = vector.load %arg9[%c14_372, %c0_373] : memref<15x32xf32, #tpu.memory_space<vmem>>, vector<1x32xf32>
    %cst_374 = arith.constant dense<0.000000e+00> : vector<32xf32>
    %815 = vector.multi_reduction <add>, %812, %cst_374 [1] : vector<32x32xf32> to vector<32xf32>
    %816 = vector.shape_cast %815 : vector<32xf32> to vector<32x1xf32>
    %cst_375 = arith.constant 3.200000e+01 : f32
    %817 = vector.broadcast %cst_375 : f32 to vector<32x1xf32>
    %818 = arith.divf %816, %817 : vector<32x1xf32>
    %819 = vector.broadcast %818 : vector<32x1xf32> to vector<32x32xf32>
    %820 = arith.subf %812, %819 : vector<32x32xf32>
    %821 = arith.mulf %820, %820 : vector<32x32xf32>
    %cst_376 = arith.constant dense<0.000000e+00> : vector<32xf32>
    %822 = vector.multi_reduction <add>, %821, %cst_376 [1] : vector<32x32xf32> to vector<32xf32>
    %823 = vector.shape_cast %822 : vector<32xf32> to vector<32x1xf32>
    %cst_377 = arith.constant 3.200000e+01 : f32
    %824 = vector.broadcast %cst_377 : f32 to vector<32x1xf32>
    %825 = arith.divf %823, %824 : vector<32x1xf32>
    %826 = vector.broadcast %818 : vector<32x1xf32> to vector<32x32xf32>
    %827 = arith.subf %812, %826 : vector<32x32xf32>
    %cst_378 = arith.constant 9.99999974E-6 : f32
    %828 = vector.broadcast %cst_378 : f32 to vector<32x1xf32>
    %829 = arith.addf %825, %828 : vector<32x1xf32>
    %830 = math.rsqrt %829 : vector<32x1xf32>
    %831 = vector.broadcast %830 : vector<32x1xf32> to vector<32x32xf32>
    %832 = arith.mulf %827, %831 : vector<32x32xf32>
    %833 = vector.broadcast %813 : vector<1x32xf32> to vector<32x32xf32>
    %834 = arith.mulf %832, %833 : vector<32x32xf32>
    %835 = vector.broadcast %814 : vector<1x32xf32> to vector<32x32xf32>
    %836 = arith.addf %834, %835 : vector<32x32xf32>
    %837 = vector.shape_cast %836 : vector<32x32xf32> to vector<4x8x32xf32>
    %c0_379 = arith.constant 0 : index
    %c0_380 = arith.constant 0 : index
    %c0_381 = arith.constant 0 : index
    %838 = vector.load %arg11[%c0_379, %c0_380, %c0_381] : memref<4x8x32xf32, #tpu.memory_space<vmem>>, vector<4x8x32xf32>
    tpu.vector_store %arg11[%c0_379, %c0_380, %c0_381], %837 {strides = array<i32>} : memref<4x8x32xf32, #tpu.memory_space<vmem>>, vector<4x8x32xf32>,
    return
  }
}

</mosaic_0001>

<bundles_post_ra>
// kernel: siamese_forward.1
= control target key start
LH: loop header
LB: loop body
LE: loop exit
PB: predicated region body
PF: predicated region fallthrough
CT: control target
= control target key end

     0   :  { %v9543_v0 = vmov 0.0   ;;  %vm9544_vm0 = vmmov 0   ;;  %vm73_vm1 = vcmask 261120   ;;  %vm230_vm2 = vcmask 64512   ;;  %s11393_s4 = inlined_call_operand.vmem [shape: f32[36,32,8], index: 4, kind: input, shape index: {}]   ;;  %s11394_s0 = inlined_call_operand.vmem [shape: f32[2,8,32], index: 0, kind: input, shape index: {}]   ;;  %s11395_s5 = inlined_call_operand.vmem [shape: f32[36,8], index: 5, kind: input, shape index: {}]   ;;  %s11396_s2 = inlined_call_operand.vmem [shape: f32[2,1,8], index: 2, kind: input, shape index: {}]   ;;  %s11397_s6 = inlined_call_operand.vmem [shape: f32[12,8,32], index: 6, kind: input, shape index: {}]   ;;  %s11398_s9 = inlined_call_operand.vmem [shape: f32[15,32], index: 9, kind: input, shape index: {}]   ;;  %s11399_s7 = inlined_call_operand.vmem [shape: f32[2,32,64], index: 7, kind: input, shape index: {}]   ;;  %s11400_s8 = inlined_call_operand.vmem [shape: f32[2,64,32], index: 8, kind: input, shape index: {}]   ;;  %s11401_s1 = inlined_call_operand.vmem [shape: f32[4,8,32], index: 1, kind: input, shape index: {}]   ;;  %s11402_s10 = inlined_call_operand.vmem [shape: f32[2,64], index: 10, kind: input, shape index: {}]   ;;  %s11403_s3 = inlined_call_operand.vmem [shape: f32[2,8,8], index: 3, kind: input, shape index: {}]   ;;  %s11404_s11 = inlined_call_operand.vmem [shape: f32[4,8,32], index: 11, kind: output, shape index: {}]  }
   0x1   :  { %8425 = vmatprep.subr.bf16.mxu1 %v9543_v0  ;;  %v61_v1 = vld [vmem:[%s11393_s4] sm:$0xff]  ;;  %v62_v2 = vld [vmem:[%s11393_s4 + $0x8] sm:$0xff]  ;;  %v63_v3 = vld [vmem:[%s11393_s4 + $0x10] sm:$0xff]  ;;  %8429 = vmatprep.mubr.msk.bf16.mxu1 %vm9544_vm0, %v9543_v0  ;;  %vm348_vm3 = vcmask 1043456   ;;  %vm1900_vm4 = vcmask 523264  }
   0x2   :  { %v66_v4 = vpack.c.bf16 %v62_v2, %v61_v1  ;;  %v64_v5 = vld [vmem:[%s11393_s4 + $0x18] sm:$0xff]  ;;  %8441 = vmatprep.subr.bf16.mxu0 %v9543_v0  ;;  %8445 = vmatprep.mubr.msk.bf16.mxu0 %vm9544_vm0, %v9543_v0  ;;  %v39_v7 = vld [vmem:[%s11394_s0] sm:$0xff]  ;;  %v40_v8 = vld [vmem:[%s11394_s0 + $0x8] sm:$0xff] }
   0x3   :  { %v67_v6 = vpack.c.bf16 %v64_v5, %v63_v3  ;;  %v7719_v9 = vld [vmem:[%s11393_s4 + $0x80] sm:$0xff]  ;;  %v7720_v10 = vld [vmem:[%s11393_s4 + $0x88] sm:$0xff]  ;;  %v9636_v11 = vpack.c.bf16 %v40_v8, %v39_v7  ;;  %v7721_v13 = vld [vmem:[%s11393_s4 + $0x90] sm:$0xff] }
   0x4   :  { %8426 = vmatpush3.bf16.msra.mxu1 %v66_v4  ;;  %v123_v12 = vpack.c.bf16 %v7720_v10, %v7719_v9  ;;  %v7722_v14 = vld [vmem:[%s11393_s4 + $0x98] sm:$0xff]  ;;  %v7725_v16 = vld [vmem:[%s11393_s4 + $0x100] sm:$0xff]  ;;  %v7726_v17 = vld [vmem:[%s11393_s4 + $0x108] sm:$0xff] }
   0x5   :  { %8427 = vmatprep.subr.bf16.mxu1 %v9543_v0  ;;  %v124_v15 = vpack.c.bf16 %v7722_v14, %v7721_v13  ;;  %v176_v18 = vpack.c.bf16 %v7726_v17, %v7725_v16  ;;  %v7727_v19 = vld [vmem:[%s11393_s4 + $0x110] sm:$0xff]  ;;  %v7728_v20 = vld [vmem:[%s11393_s4 + $0x118] sm:$0xff]  ;;  %v7723_v26 = vld [vmem:[%s11395_s5 + $0x4] ss:$0 sm:$0xff] }
   0x6   :  { %v177_v21 = vpack.c.bf16 %v7728_v20, %v7727_v19  ;;  %v7717_v27 = vld [vmem:[%s11395_s5] ss:$0 sm:$0xff]  ;;  %v7729_v44 = vld [vmem:[%s11395_s5 + $0x8] ss:$0 sm:$0xff]  ;;  %v9699_v56 = vld [vmem:[%s11396_s2 + $0x1] ss:$0 sm:$0xff] }
   0x7   :  { %8442 = vmatpush3.bf16.msra.mxu0 %v176_v18  ;;  %v9704_v58 = vld [vmem:[%s11396_s2] ss:$0 sm:$0xff]  ;;  %v7742_v14 = vld [vmem:[%s11393_s4 + $0xa8] sm:$0xff]  ;;  %v7743_v20 = vld [vmem:[%s11393_s4 + $0xb0] sm:$0xff] }
   0x8   :  { %8428 = vmatpush3.bf16.msra.mxu1 %v67_v6  ;;  %8443 = vmatprep.subr.bf16.mxu0 %v9543_v0  ;;  %v7741_v13 = vld [vmem:[%s11393_s4 + $0xa0] sm:$0xff]  ;;  %v7736_v19 = vld [vmem:[%s11393_s4 + $0x28] sm:$0xff] }
   0x9   :  { %8433 = vmatprep.subr.bf16.mxu1 %v9543_v0  ;;  %v503_v16 = vpack.c.bf16 %v7742_v14, %v7741_v13  ;;  %v7735_v17 = vld [vmem:[%s11393_s4 + $0x20] sm:$0xff] }
   0xb   :  { %8430 = vmatmul.mubr.msk.bf16.vlgmr.msra.gmra.mrb[0].mxu1 %vm73_vm1, %v9636_v11  ;;  %8444 = vmatpush3.bf16.msra.mxu0 %v177_v21  ;;  %v7744_v21 = vld [vmem:[%s11393_s4 + $0xb8] sm:$0xff] }
   0xc   :  { %8434 = vmatpush3.bf16.msra.mxu1 %v123_v12  ;;  %8437 = vmatprep.mubr.msk.bf16.mxu1 %vm9544_vm0, %v9543_v0 }
   0xd   :  { %8435 = vmatprep.subr.bf16.mxu1 %v9543_v0  ;;  %8455 = vmatprep.subr.bf16.mxu0 %v9543_v0 }
   0xe   :  { %8446 = vmatmul.mubr.msk.bf16.vlgmr.msra.gmra.mrb[0].mxu0 %vm73_vm1, %v9636_v11 }
   0xf   :  { %8457 = vmatprep.mubr.msk.bf16.mxu0 %vm9544_vm0, %v9543_v0 }
  0x10   :  { %8436 = vmatpush3.bf16.msra.mxu1 %v124_v15 }
  0x11   :  { %8449 = vmatprep.subr.bf16.mxu1 %v9543_v0 }
  0x13   :  { %8438 = vmatmul.mubr.msk.bf16.vlgmr.msra.gmra.mrb[4].mxu1 %vm73_vm1, %v9636_v11 }
  0x14   :  { %8451 = vmatprep.mubr.msk.bf16.mxu1 %vm9544_vm0, %v9543_v0 }
  0xde   :  { %v111_v22 = vpop.f32.mrb[0].mxu1 }
  0xdf   :  { %v8431_v23 = vpop.f32.mrb[1].mxu1  ;;  %v112_v32 = vadd.f32 %v7717_v27, %v111_v22 }
  0xe0   :  { %v114_v24 = vpop.f32.mrb[2].mxu1  ;;  %v450_v23 = vpack.c.bf16 %v7736_v19, %v7735_v17 }
  0xe1   :  { %v8432_v25 = vpop.f32.mrb[3].mxu1  ;;  %v115_v36 = vadd.f32 %v7717_v27, %v114_v24  ;;  %v224_v39 = vmul.f32 0.35355338, %v112_v32  ;;  %v217_v45 = vpop.f32.mrb[0].mxu0  ;;  %v504_v24 = vpack.c.bf16 %v7744_v21, %v7743_v20  ;;  %v7737_v27 = vld [vmem:[%s11393_s4 + $0x30] sm:$0xff] }
  0xe2   :  { %v8447_v46 = vpop.f32.mrb[1].mxu0  ;;  %v218_v47 = vadd.f32 %v7729_v44, %v217_v45 }
  0xe3   :  { %v225_v41 = vmul.f32 0.35355338, %v115_v36  ;;  %v226_v42 = vpack.c.bf16 %v224_v39, %v224_v39  ;;  %v220_v48 = vpop.f32.mrb[2].mxu0 }
  0xe4   :  { %v221_v49 = vadd.f32 %v7729_v44, %v220_v48  ;;  %v8448_v50 = vpop.f32.mrb[3].mxu0  ;;  %v343_v51 = vpack.c.bf16 %v218_v47, %v218_v47 }
  0xe5   :  { %v227_v43 = vpack.c.bf16 %v225_v41, %v225_v41 }
  0xe6   :  { %v164_v28 = vpop.f32.mrb[4].mxu1  ;;  %v344_v52 = vpack.c.bf16 %v221_v49, %v221_v49  ;;  %v350_v53 = vsel %vm348_vm3, %v343_v51, 0  ;;  %v7739_v49 = vld [vmem:[%s11395_s5 + $0x1] ss:$0 sm:$0xff] }
  0xe7   :  { %v165_v29 = vadd.f32 %v7723_v26, %v164_v28  ;;  %v8439_v30 = vpop.f32.mrb[5].mxu1  ;;  %v7738_v28 = vld [vmem:[%s11393_s4 + $0x38] sm:$0xff] }
  0xe8   :  { %v167_v31 = vpop.f32.mrb[6].mxu1  ;;  %v396_v54 = vsel %vm348_vm3, %v344_v52, 0  ;;  %v7747_v30 = vld [vmem:[%s11393_s4 + $0x120] sm:$0xff] }
  0xe9   :  { %v228_v33 = vpack.c.bf16 %v165_v29, %v165_v29  ;;  %v168_v34 = vadd.f32 %v7723_v26, %v167_v31  ;;  %v8440_v35 = vpop.f32.mrb[7].mxu1  ;;  %v451_v29 = vpack.c.bf16 %v7738_v28, %v7737_v27  ;;  %v7748_v31 = vld [vmem:[%s11393_s4 + $0x128] sm:$0xff] }
  0xea   :  { %v556_v32 = vpack.c.bf16 %v7748_v31, %v7747_v30 }
  0xeb   :  { %v235_v37 = vsel %vm230_vm2, %v228_v33, 0  ;;  %v229_v38 = vpack.c.bf16 %v168_v34, %v168_v34  ;;  %v7749_v33 = vld [vmem:[%s11393_s4 + $0x130] sm:$0xff]  ;;  %v7750_v34 = vld [vmem:[%s11393_s4 + $0x138] sm:$0xff] }
  0xec   :  { %8450 = vmatpush3.bf16.xpose.msra.mxu1 %v235_v37  ;;  %v557_v35 = vpack.c.bf16 %v7750_v34, %v7749_v33 }
  0xed   :  { %v281_v40 = vsel %vm230_vm2, %v229_v38, 0  ;;  %8461 = vmatprep.subr.bf16.mxu1 %v9543_v0 }
  0xee   :  { %8456 = vmatpush3.bf16.xpose.msra.mxu0 %v281_v40 }
  0xef   :  { %8467 = vmatprep.subr.bf16.mxu0 %v9543_v0 }
  0xf3   :  { %8452 = vmatmul.mubr.msk.bf16.vlgmr.msra.gmra.mrb[8].mxu1 %vm230_vm2, %v226_v42 }
  0xf4   :  { %8463 = vmatprep.mubr.msk.bf16.mxu1 %vm9544_vm0, %v9543_v0  ;;  %8462 = vmatpush3.bf16.msra.mxu1 %v350_v53 }
  0xf5   :  { %8458 = vmatmul.mubr.msk.bf16.vlgmr.msra.gmra.mrb[4].mxu0 %vm230_vm2, %v227_v43  ;;  %8473 = vmatprep.subr.bf16.mxu1 %v9543_v0  ;;  %v7745_v43 = vld [vmem:[%s11395_s5 + $0x5] ss:$0 sm:$0xff] }
  0xf6   :  { %8469 = vmatprep.mubr.msk.bf16.mxu0 %vm9544_vm0, %v9543_v0  ;;  %8468 = vmatpush3.bf16.msra.mxu0 %v396_v54 }
  0xf7   :  { %8481 = vmatprep.subr.bf16.mxu0 %v9543_v0 }
 0x1c6   :  { %v271_v55 = vpop.f32.mrb[8].mxu1 }
 0x1c7   :  { %v8453_v57 = vpop.f32.mrb[9].mxu1  ;;  %v272_v2 = vadd.f32 %v9704_v58, %v271_v55 }
 0x1c8   :  { %v274_v59 = vpop.f32.mrb[10].mxu1  ;;  %v317_v60 = vpop.f32.mrb[4].mxu0 }
 0x1c9   :  { %v8454_v61 = vpop.f32.mrb[11].mxu1  ;;  %v8459_v62 = vpop.f32.mrb[5].mxu0  ;;  %v318_v63 = vadd.f32 %v9699_v56, %v317_v60  ;;  %v323_v5 = vsel %vm230_vm2, %v272_v2, -inf }
 0x1ca   :  { %v320_v1 = vpop.f32.mrb[6].mxu0 }
 0x1cb   :  { %v8460_v3 = vpop.f32.mrb[7].mxu0  ;;  %v326_v4 = vsel %vm230_vm2, %v318_v63, -inf }
 0x1cc   :  { %327 = vmax.xlane.f32.xlu0 %v326_v4 }
 0x1d0   :  { %324 = vmax.xlane.f32.xlu0 %v323_v5  ;;  %v7751_v5 = vld [vmem:[%s11395_s5 + $0x9] ss:$0 sm:$0xff] }
 0x259   :  { %v328_v6 = vpop.xlane.xlu0 %327 }
 0x25a   :  { %v330_v7 = vsub.f32 %v318_v63, %v328_v6 }
 0x25c   :  { %v333_v8 = vmul.f32 1.442695, %v330_v7 }
 0x25d   :  { %v325_v9 = vpop.xlane.xlu0 %324 }
 0x25e   :  { %9339 = vpow2.f32 %v333_v8  ;;  %v329_v10 = vsub.f32 %v272_v2, %v325_v9 }
 0x260   :  { %v331_v12 = vmul.f32 1.442695, %v329_v10 }
 0x262   :  { %9341 = vpow2.f32 %v331_v12 }
 0x268   :  { %v9716_v15 = vpop.eup %9339 }
 0x269   :  { %v342_v18 = vpack.c.bf16 %v9716_v15, %v9716_v15  ;;  %v338_v30 = vsel %vm230_vm2, %v9716_v15, 0.0 }
 0x26b   :  { %8470 = vmatmul.mubr.msk.bf16.vlgmr.msra.gmra.mrb[8].mxu0 %vm230_vm2, %v342_v18 }
 0x26c   :  { %v9342_v22 = vpop.eup %9341  ;;  %8482 = vmatpush3.bf16.msra.mxu0 %v503_v16  ;;  %8485 = vmatprep.mubr.msk.bf16.mxu0 %vm9544_vm0, %v9543_v0 }
 0x26d   :  { %v335_v25 = vsel %vm230_vm2, %v9342_v22, 0.0  ;;  %v341_v26 = vpack.c.bf16 %v9342_v22, %v9342_v22  ;;  %8483 = vmatprep.subr.bf16.mxu0 %v9543_v0 }
 0x26e   :  { %336 = vadd.xlane.f32.xlu0 %v335_v25 }
 0x26f   :  { %8464 = vmatmul.mubr.msk.bf16.vlgmr.msra.gmra.mrb[12].mxu1 %vm230_vm2, %v341_v26 }
 0x270   :  { %8474 = vmatpush3.bf16.msra.mxu1 %v450_v23  ;;  %8484 = vmatpush3.bf16.msra.mxu0 %v504_v24 }
 0x271   :  { %8475 = vmatprep.subr.bf16.mxu1 %v9543_v0  ;;  %8477 = vmatprep.mubr.msk.bf16.mxu1 %vm9544_vm0, %v9543_v0 }
 0x272   :  { %8497 = vmatprep.subr.bf16.mxu0 %v9543_v0 }
 0x273   :  { %8486 = vmatmul.mubr.msk.bf16.vlgmr.msra.gmra.mrb[12].mxu0 %vm73_vm1, %v9636_v11 }
 0x274   :  { %8476 = vmatpush3.bf16.msra.mxu1 %v451_v29  ;;  %8499 = vmatprep.mubr.msk.bf16.mxu0 %vm9544_vm0, %v9543_v0 }
 0x275   :  { %8489 = vmatprep.subr.bf16.mxu1 %v9543_v0 }
 0x277   :  { %8478 = vmatmul.mubr.msk.bf16.vlgmr.msra.gmra.mrb[16].mxu1 %vm73_vm1, %v9636_v11 }
 0x278   :  { %8493 = vmatprep.mubr.msk.bf16.mxu1 %vm9544_vm0, %v9543_v0  ;;  %8490 = vmatpush3.bf16.msra.mxu1 %v556_v32 }
 0x279   :  { %8491 = vmatprep.subr.bf16.mxu1 %v9543_v0 }
 0x27c   :  { %8492 = vmatpush3.bf16.msra.mxu1 %v557_v35 }
 0x27d   :  { %8503 = vmatprep.subr.bf16.mxu1 %v9543_v0 }
 0x27f   :  { %8494 = vmatmul.mubr.msk.bf16.vlgmr.msra.gmra.mrb[20].mxu1 %vm73_vm1, %v9636_v11 }
 0x280   :  { %8505 = vmatprep.mubr.msk.bf16.mxu1 %vm9544_vm0, %v9543_v0 }
 0x2fb   :  { %v337_v35 = vpop.xlane.xlu0 %336 }
 0x33e   :  { %v9775_v36 = vpop.f32.mrb[8].mxu0 }
 0x33f   :  { %v8471_v37 = vpop.f32.mrb[9].mxu0 }
 0x340   :  { %v435_v38 = vpop.f32.mrb[10].mxu0 }
 0x341   :  { %v8472_v39 = vpop.f32.mrb[11].mxu0 }
 0x342   :  { %v9777_v40 = vpop.f32.mrb[12].mxu1 }
 0x343   :  { %v8465_v41 = vpop.f32.mrb[13].mxu1 }
 0x344   :  { %v389_v42 = vpop.f32.mrb[14].mxu1  ;;  %v442_v41 = vld [vmem:[%s11397_s6] sm:$0xff] }
 0x345   :  { %v8466_v44 = vpop.f32.mrb[15].mxu1 }
 0x346   :  { %v544_v45 = vpop.f32.mrb[12].mxu0  ;;  %v444_v44 = vpack.c.bf16 %v442_v41, %v442_v41 }
 0x347   :  { %v545_v46 = vadd.f32 %v7745_v43, %v544_v45  ;;  %v8487_v47 = vpop.f32.mrb[13].mxu0 }
 0x348   :  { %v547_v48 = vpop.f32.mrb[14].mxu0 }
 0x349   :  { %v608_v50 = vpack.c.bf16 %v545_v46, %v545_v46  ;;  %v548_v51 = vadd.f32 %v7745_v43, %v547_v48  ;;  %v8488_v52 = vpop.f32.mrb[15].mxu0 }
 0x34a   :  { %v491_v53 = vpop.f32.mrb[16].mxu1 }
 0x34b   :  { %v614_v54 = vsel %vm230_vm2, %v608_v50, 0  ;;  %v609_v55 = vpack.c.bf16 %v548_v51, %v548_v51  ;;  %v492_v57 = vadd.f32 %v7739_v49, %v491_v53  ;;  %v8479_v59 = vpop.f32.mrb[17].mxu1  ;;  %v875_v50 = vsel %vm348_vm3, %v444_v44, 0 }
 0x34c   :  { %v494_v60 = vpop.f32.mrb[18].mxu1  ;;  %8498 = vmatpush3.bf16.xpose.msra.mxu0 %v614_v54  ;;  %v7768_v59 = vld [vmem:[%s11393_s4 + $0xd0] sm:$0xff] }
 0x34d   :  { %v660_v61 = vsel %vm230_vm2, %v609_v55, 0  ;;  %v604_v62 = vmul.f32 0.35355338, %v492_v57  ;;  %v495_v63 = vadd.f32 %v7739_v49, %v494_v60  ;;  %v8480_v1 = vpop.f32.mrb[19].mxu1  ;;  %8509 = vmatprep.subr.bf16.mxu0 %v9543_v0  ;;  %v7757_v55 = vld [vmem:[%s11397_s6 + $0x8] sm:$0xff]  ;;  %v7769_v60 = vld [vmem:[%s11393_s4 + $0xd8] sm:$0xff] }
 0x34e   :  { %8504 = vmatpush3.bf16.xpose.msra.mxu1 %v660_v61  ;;  %v823_v57 = vpack.c.bf16 %v7757_v55, %v7757_v55  ;;  %v977_v61 = vpack.c.bf16 %v7769_v60, %v7768_v59 }
 0x34f   :  { %v606_v2 = vpack.c.bf16 %v604_v62, %v604_v62  ;;  %v605_v3 = vmul.f32 0.35355338, %v495_v63  ;;  %8515 = vmatprep.subr.bf16.mxu1 %v9543_v0 }
 0x350   :  { %v828_v62 = vsel %vm348_vm3, %v823_v57, 0 }
 0x351   :  { %v607_v4 = vpack.c.bf16 %v605_v3, %v605_v3 }
 0x352   :  { %v597_v6 = vpop.f32.mrb[20].mxu1 }
 0x353   :  { %8500 = vmatmul.mubr.msk.bf16.vlgmr.msra.gmra.mrb[16].mxu0 %vm230_vm2, %v606_v2  ;;  %v598_v7 = vadd.f32 %v7751_v5, %v597_v6  ;;  %v8495_v8 = vpop.f32.mrb[21].mxu1 }
 0x354   :  { %8511 = vmatprep.mubr.msk.bf16.mxu0 %vm9544_vm0, %v9543_v0  ;;  %v600_v9 = vpop.f32.mrb[22].mxu1  ;;  %v7761_v8 = vld [vmem:[%s11393_s4 + $0x48] sm:$0xff] }
 0x355   :  { %8506 = vmatmul.mubr.msk.bf16.vlgmr.msra.gmra.mrb[24].mxu1 %vm230_vm2, %v607_v4  ;;  %v722_v10 = vpack.c.bf16 %v598_v7, %v598_v7  ;;  %v601_v12 = vadd.f32 %v7751_v5, %v600_v9  ;;  %v8496_v13 = vpop.f32.mrb[23].mxu1  ;;  %v7760_v7 = vld [vmem:[%s11393_s4 + $0x40] sm:$0xff] }
 0x356   :  { %8517 = vmatprep.mubr.msk.bf16.mxu1 %vm9544_vm0, %v9543_v0 }
 0x357   :  { %v728_v14 = vsel %vm348_vm3, %v722_v10, 0  ;;  %v723_v16 = vpack.c.bf16 %v601_v12, %v601_v12 }
 0x358   :  { %8510 = vmatpush3.bf16.msra.mxu0 %v728_v14 }
 0x359   :  { %v774_v17 = vsel %vm348_vm3, %v723_v16, 0  ;;  %8521 = vmatprep.subr.bf16.mxu0 %v9543_v0 }
 0x35a   :  { %8516 = vmatpush3.bf16.msra.mxu1 %v774_v17  ;;  %v923_v17 = vpack.c.bf16 %v7761_v8, %v7760_v7 }
 0x35b   :  { %8527 = vmatprep.subr.bf16.mxu1 %v9543_v0 }
 0x426   :  { %v650_v18 = vpop.f32.mrb[16].mxu0 }
 0x427   :  { %v651_v19 = vadd.f32 %v9704_v58, %v650_v18  ;;  %v8501_v20 = vpop.f32.mrb[17].mxu0 }
 0x428   :  { %v653_v21 = vpop.f32.mrb[18].mxu0  ;;  %v696_v22 = vpop.f32.mrb[24].mxu1  ;;  %v7762_v20 = vld [vmem:[%s11393_s4 + $0x50] sm:$0xff] }
 0x429   :  { %v697_v23 = vadd.f32 %v9699_v56, %v696_v22  ;;  %v8502_v24 = vpop.f32.mrb[19].mxu0  ;;  %v8507_v25 = vpop.f32.mrb[25].mxu1  ;;  %v702_v26 = vsel %vm230_vm2, %v651_v19, -inf  ;;  %v7763_v21 = vld [vmem:[%s11393_s4 + $0x58] sm:$0xff] }
 0x42a   :  { %703 = vmax.xlane.f32.xlu1 %v702_v26  ;;  %v699_v27 = vpop.f32.mrb[26].mxu1  ;;  %v924_v22 = vpack.c.bf16 %v7763_v21, %v7762_v20  ;;  %v7773_v24 = vld [vmem:[%s11393_s4 + $0x148] sm:$0xff] }
 0x42b   :  { %v8508_v28 = vpop.f32.mrb[27].mxu1  ;;  %v705_v29 = vsel %vm230_vm2, %v697_v23, -inf }
 0x42e   :  { %706 = vmax.xlane.f32.xlu1 %v705_v29 }
 0x432   :  { %339 = vadd.xlane.f32.xlu1 %v338_v30  ;;  %v7774_v30 = vld [vmem:[%s11393_s4 + $0x150] sm:$0xff] }
 0x4b7   :  { %v704_v31 = vpop.xlane.xlu1 %703 }
 0x4b8   :  { %v708_v32 = vsub.f32 %v651_v19, %v704_v31  ;;  %v7775_v31 = vld [vmem:[%s11393_s4 + $0x158] sm:$0xff] }
 0x4ba   :  { %v710_v33 = vmul.f32 1.442695, %v708_v32  ;;  %v1030_v32 = vpack.c.bf16 %v7775_v31, %v7774_v30 }
 0x4bb   :  { %v707_v34 = vpop.xlane.xlu1 %706 }
 0x4bc   :  { %9343 = vpow2.f32 %v710_v33  ;;  %v709_v37 = vsub.f32 %v697_v23, %v707_v34  ;;  %v7772_v23 = vld [vmem:[%s11393_s4 + $0x140] sm:$0xff] }
 0x4bd   :  { %9345 = vrcp.f32 %v337_v35  ;;  %v1029_v28 = vpack.c.bf16 %v7773_v24, %v7772_v23  ;;  %v7770_v33 = vld [vmem:[%s11395_s5 + $0x6] ss:$0 sm:$0xff] }
 0x4be   :  { %v712_v38 = vmul.f32 1.442695, %v709_v37 }
 0x4bf   :  { %v340_v39 = vpop.xlane.xlu1 %339 }
 0x4c0   :  { %9347 = vpow2.f32 %v712_v38 }
 0x4c1   :  { %9349 = vrcp.f32 %v340_v39 }
 0x4c6   :  { %v9344_v42 = vpop.eup %9343 }
 0x4c7   :  { %v714_v15 = vsel %vm230_vm2, %v9344_v42, 0.0  ;;  %v720_v43 = vpack.c.bf16 %v9344_v42, %v9344_v42  ;;  %v9346_v45 = vpop.eup %9345 }
 0x4c8   :  { %715 = vadd.xlane.f32.xlu0 %v714_v15  ;;  %v440_v51 = vmul.f32 %v9346_v45, %v9777_v40  ;;  %v7766_v40 = vld [vmem:[%s11393_s4 + $0xc0] sm:$0xff] }
 0x4c9   :  { %8512 = vmatmul.mubr.msk.bf16.vlgmr.msra.gmra.mrb[20].mxu0 %vm230_vm2, %v720_v43 }
 0x4ca   :  { %v9348_v46 = vpop.eup %9347  ;;  %8523 = vmatprep.mubr.msk.bf16.mxu0 %vm9544_vm0, %v9543_v0  ;;  %8522 = vmatpush3.bf16.msra.mxu0 %v828_v62 }
 0x4cb   :  { %v9350_v47 = vpop.eup %9349  ;;  %v717_v48 = vsel %vm230_vm2, %v9348_v46, 0.0  ;;  %v721_v49 = vpack.c.bf16 %v9348_v46, %v9348_v46  ;;  %8533 = vmatprep.subr.bf16.mxu0 %v9543_v0 }
 0x4cc   :  { %v441_v52 = vmul.f32 %v9350_v47, %v9775_v36  ;;  %718 = vadd.xlane.f32.xlu1 %v717_v48  ;;  %v7767_v36 = vld [vmem:[%s11393_s4 + $0xc8] sm:$0xff] }
 0x4cd   :  { %8518 = vmatmul.mubr.msk.bf16.vlgmr.msra.gmra.mrb[28].mxu1 %vm230_vm2, %v721_v49  ;;  %v976_v54 = vpack.c.bf16 %v7767_v36, %v7766_v40 }
 0x4ce   :  { %8528 = vmatpush3.bf16.msra.mxu1 %v875_v50  ;;  %8529 = vmatprep.mubr.msk.bf16.mxu1 %vm9544_vm0, %v9543_v0  ;;  %v443_v53 = vpack.c.bf16 %v441_v52, %v440_v51  ;;  %v7764_v51 = vld [vmem:[%s11395_s5 + $0x2] ss:$0 sm:$0xff] }
 0x4cf   :  { %8541 = vmatprep.subr.bf16.mxu1 %v9543_v0 }
 0x4d5   :  { %8530 = vmatmul.mubr.msk.bf16.vlgmr.msra.gmra.mrb[32].mxu1 %vm230_vm2, %v443_v53 }
 0x4d6   :  { %8545 = vmatprep.mubr.msk.bf16.mxu1 %vm9544_vm0, %v9543_v0  ;;  %8542 = vmatpush3.bf16.msra.mxu1 %v976_v54 }
 0x4d7   :  { %8543 = vmatprep.subr.bf16.mxu1 %v9543_v0 }
 0x4da   :  { %8544 = vmatpush3.bf16.msra.mxu1 %v977_v61  ;;  %v7776_v61 = vld [vmem:[%s11395_s5 + $0xa] ss:$0 sm:$0xff] }
 0x4db   :  { %8557 = vmatprep.subr.bf16.mxu1 %v9543_v0 }
 0x4dd   :  { %8546 = vmatmul.mubr.msk.bf16.vlgmr.msra.gmra.mrb[36].mxu1 %vm73_vm1, %v9636_v11 }
 0x4de   :  { %8559 = vmatprep.mubr.msk.bf16.mxu1 %vm9544_vm0, %v9543_v0 }
 0x555   :  { %v716_v63 = vpop.xlane.xlu0 %715 }
 0x556   :  { %9351 = vrcp.f32 %v716_v63 }
 0x559   :  { %v719_v1 = vpop.xlane.xlu1 %718 }
 0x55a   :  { %9353 = vrcp.f32 %v719_v1 }
 0x560   :  { %v9352_v5 = vpop.eup %9351 }
 0x564   :  { %v9354_v9 = vpop.eup %9353 }
 0x59c   :  { %v764_v2 = vpop.f32.mrb[20].mxu0 }
 0x59d   :  { %v8513_v3 = vpop.f32.mrb[21].mxu0  ;;  %v818_v12 = vmul.f32 %v9352_v5, %v764_v2 }
 0x59e   :  { %v767_v4 = vpop.f32.mrb[22].mxu0 }
 0x59f   :  { %v8514_v6 = vpop.f32.mrb[23].mxu0 }
 0x5a0   :  { %v810_v10 = vpop.f32.mrb[28].mxu1 }
 0x5a1   :  { %v819_v13 = vmul.f32 %v9354_v9, %v810_v10  ;;  %v8519_v14 = vpop.f32.mrb[29].mxu1 }
 0x5a2   :  { %v813_v16 = vpop.f32.mrb[30].mxu1 }
 0x5a3   :  { %v822_v18 = vpack.c.bf16 %v819_v13, %v818_v12  ;;  %v8520_v19 = vpop.f32.mrb[31].mxu1 }
 0x5a5   :  { %8524 = vmatmul.mubr.msk.bf16.vlgmr.msra.gmra.mrb[24].mxu0 %vm230_vm2, %v822_v18 }
 0x5a6   :  { %8534 = vmatpush3.bf16.msra.mxu0 %v923_v17  ;;  %8537 = vmatprep.mubr.msk.bf16.mxu0 %vm9544_vm0, %v9543_v0 }
 0x5a7   :  { %8535 = vmatprep.subr.bf16.mxu0 %v9543_v0 }
 0x5a8   :  { %v911_v25 = vpop.f32.mrb[32].mxu1 }
 0x5a9   :  { %v8531_v26 = vpop.f32.mrb[33].mxu1 }
 0x5aa   :  { %v914_v27 = vpop.f32.mrb[34].mxu1  ;;  %8536 = vmatpush3.bf16.msra.mxu0 %v924_v22 }
 0x5ab   :  { %v8532_v29 = vpop.f32.mrb[35].mxu1  ;;  %8549 = vmatprep.subr.bf16.mxu0 %v9543_v0 }
 0x5ad   :  { %8538 = vmatmul.mubr.msk.bf16.vlgmr.msra.gmra.mrb[28].mxu0 %vm73_vm1, %v9636_v11 }
 0x5ae   :  { %8550 = vmatpush3.bf16.msra.mxu0 %v1029_v28  ;;  %8553 = vmatprep.mubr.msk.bf16.mxu0 %vm9544_vm0, %v9543_v0 }
 0x5af   :  { %8551 = vmatprep.subr.bf16.mxu0 %v9543_v0 }
 0x5b0   :  { %v1017_v34 = vpop.f32.mrb[36].mxu1 }
 0x5b1   :  { %v1018_v35 = vadd.f32 %v7770_v33, %v1017_v34  ;;  %v8547_v37 = vpop.f32.mrb[37].mxu1 }
 0x5b2   :  { %8552 = vmatpush3.bf16.msra.mxu0 %v1030_v32  ;;  %v1020_v38 = vpop.f32.mrb[38].mxu1  ;;  %v7782_v37 = vld [vmem:[%s11397_s6 + $0x10] sm:$0xff] }
 0x5b3   :  { %8563 = vmatprep.subr.bf16.mxu0 %v9543_v0  ;;  %v1081_v39 = vpack.c.bf16 %v1018_v35, %v1018_v35  ;;  %v1021_v41 = vadd.f32 %v7770_v33, %v1020_v38  ;;  %v8548_v42 = vpop.f32.mrb[39].mxu1  ;;  %v1296_v38 = vpack.c.bf16 %v7782_v37, %v7782_v37 }
 0x5b4   :  { %v7785_v42 = vld [vmem:[%s11393_s4 + $0x68] sm:$0xff] }
 0x5b5   :  { %8554 = vmatmul.mubr.msk.bf16.vlgmr.msra.gmra.mrb[32].mxu0 %vm73_vm1, %v9636_v11  ;;  %v1087_v15 = vsel %vm230_vm2, %v1081_v39, 0  ;;  %v1082_v43 = vpack.c.bf16 %v1021_v41, %v1021_v41  ;;  %v1301_v39 = vsel %vm348_vm3, %v1296_v38, 0  ;;  %v7784_v41 = vld [vmem:[%s11393_s4 + $0x60] sm:$0xff] }
 0x5b6   :  { %8565 = vmatprep.mubr.msk.bf16.mxu0 %vm9544_vm0, %v9543_v0  ;;  %8558 = vmatpush3.bf16.xpose.msra.mxu1 %v1087_v15  ;;  %v1351_v15 = vpack.c.bf16 %v7785_v42, %v7784_v41  ;;  %v7800_v41 = vld [vmem:[%s11395_s5 + $0xb] ss:$0 sm:$0xff] }
 0x5b7   :  { %v1133_v44 = vsel %vm230_vm2, %v1082_v43, 0  ;;  %8569 = vmatprep.subr.bf16.mxu1 %v9543_v0  ;;  %v7786_v43 = vld [vmem:[%s11393_s4 + $0x70] sm:$0xff] }
 0x5bb   :  { %8564 = vmatpush3.bf16.xpose.msra.mxu0 %v1133_v44  ;;  %v7787_v44 = vld [vmem:[%s11393_s4 + $0x78] sm:$0xff] }
 0x5bc   :  { %8575 = vmatprep.subr.bf16.mxu0 %v9543_v0 }
 0x678   :  { %v864_v45 = vpop.f32.mrb[24].mxu0 }
 0x679   :  { %v9895_v46 = vadd.f32 %v911_v25, %v864_v45  ;;  %v8525_v47 = vpop.f32.mrb[25].mxu0  ;;  %v1352_v45 = vpack.c.bf16 %v7787_v44, %v7786_v43 }
 0x67a   :  { %v867_v48 = vpop.f32.mrb[26].mxu0 }
 0x67b   :  { %v9897_v49 = vadd.f32 %v914_v27, %v867_v48  ;;  %v8526_v50 = vpop.f32.mrb[27].mxu0 }
 0x680   :  { %v964_v52 = vpop.f32.mrb[28].mxu0 }
 0x681   :  { %v965_v53 = vadd.f32 %v7764_v51, %v964_v52  ;;  %v8539_v40 = vpop.f32.mrb[29].mxu0 }
 0x682   :  { %v967_v36 = vpop.f32.mrb[30].mxu0  ;;  %v7791_v40 = vld [vmem:[%s11393_s4 + $0xe8] sm:$0xff] }
 0x683   :  { %v1077_v54 = vmul.f32 0.35355338, %v965_v53  ;;  %v968_v55 = vadd.f32 %v7764_v51, %v967_v36  ;;  %v8540_v57 = vpop.f32.mrb[31].mxu0  ;;  %v7790_v53 = vld [vmem:[%s11393_s4 + $0xe0] sm:$0xff] }
 0x685   :  { %v1079_v59 = vpack.c.bf16 %v1077_v54, %v1077_v54  ;;  %v1078_v60 = vmul.f32 0.35355338, %v968_v55 }
 0x687   :  { %v1080_v62 = vpack.c.bf16 %v1078_v60, %v1078_v60  ;;  %8560 = vmatmul.mubr.msk.bf16.vlgmr.msra.gmra.mrb[40].mxu1 %vm230_vm2, %v1079_v59 }
 0x688   :  { %v1070_v63 = vpop.f32.mrb[32].mxu0  ;;  %8571 = vmatprep.mubr.msk.bf16.mxu1 %vm9544_vm0, %v9543_v0 }
 0x689   :  { %8566 = vmatmul.mubr.msk.bf16.vlgmr.msra.gmra.mrb[36].mxu0 %vm230_vm2, %v1080_v62  ;;  %v1071_v1 = vadd.f32 %v7776_v61, %v1070_v63  ;;  %v8555_v2 = vpop.f32.mrb[33].mxu0  ;;  %v1404_v63 = vpack.c.bf16 %v7791_v40, %v7790_v53 }
 0x68a   :  { %v1073_v3 = vpop.f32.mrb[34].mxu0  ;;  %8577 = vmatprep.mubr.msk.bf16.mxu0 %vm9544_vm0, %v9543_v0 }
 0x68b   :  { %v1195_v4 = vpack.c.bf16 %v1071_v1, %v1071_v1  ;;  %v1074_v5 = vadd.f32 %v7776_v61, %v1073_v3  ;;  %v8556_v6 = vpop.f32.mrb[35].mxu0  ;;  %v7792_v3 = vld [vmem:[%s11393_s4 + $0xf0] sm:$0xff] }
 0x68c   :  { %v7796_v6 = vld [vmem:[%s11393_s4 + $0x160] sm:$0xff] }
 0x68d   :  { %v1201_v7 = vsel %vm348_vm3, %v1195_v4, 0  ;;  %v1196_v8 = vpack.c.bf16 %v1074_v5, %v1074_v5  ;;  %v7793_v4 = vld [vmem:[%s11393_s4 + $0xf8] sm:$0xff] }
 0x68e   :  { %8570 = vmatpush3.bf16.msra.mxu1 %v1201_v7  ;;  %v1405_v5 = vpack.c.bf16 %v7793_v4, %v7792_v3  ;;  %v7797_v7 = vld [vmem:[%s11393_s4 + $0x168] sm:$0xff] }
 0x68f   :  { %v1247_v9 = vsel %vm348_vm3, %v1196_v8, 0  ;;  %8581 = vmatprep.subr.bf16.mxu1 %v9543_v0  ;;  %v1457_v8 = vpack.c.bf16 %v7797_v7, %v7796_v6 }
 0x690   :  { %8576 = vmatpush3.bf16.msra.mxu0 %v1247_v9  ;;  %v7798_v9 = vld [vmem:[%s11393_s4 + $0x170] sm:$0xff] }
 0x691   :  { %8587 = vmatprep.subr.bf16.mxu0 %v9543_v0 }
 0x75a   :  { %v1123_v10 = vpop.f32.mrb[40].mxu1 }
 0x75b   :  { %v1124_v12 = vadd.f32 %v9704_v58, %v1123_v10  ;;  %v8561_v13 = vpop.f32.mrb[41].mxu1  ;;  %v7799_v10 = vld [vmem:[%s11393_s4 + $0x178] sm:$0xff] }
 0x75c   :  { %v1126_v14 = vpop.f32.mrb[42].mxu1  ;;  %v1169_v16 = vpop.f32.mrb[36].mxu0 }
 0x75d   :  { %v1170_v17 = vadd.f32 %v9699_v56, %v1169_v16  ;;  %v8562_v18 = vpop.f32.mrb[43].mxu1  ;;  %v8567_v19 = vpop.f32.mrb[37].mxu0  ;;  %v1175_v20 = vsel %vm230_vm2, %v1124_v12, -inf }
 0x75e   :  { %v1172_v21 = vpop.f32.mrb[38].mxu0  ;;  %1176 = vmax.xlane.f32.xlu0 %v1175_v20 }
 0x75f   :  { %v8568_v22 = vpop.f32.mrb[39].mxu0  ;;  %v1178_v23 = vsel %vm230_vm2, %v1170_v17, -inf }
 0x760   :  { %1179 = vmax.xlane.f32.xlu1 %v1178_v23 }
 0x7eb   :  { %v1177_v24 = vpop.xlane.xlu0 %1176 }
 0x7ec   :  { %v1181_v25 = vsub.f32 %v1124_v12, %v1177_v24  ;;  %v1458_v12 = vpack.c.bf16 %v7799_v10, %v7798_v9  ;;  %v7788_v24 = vld [vmem:[%s11395_s5 + $0x3] ss:$0 sm:$0xff] }
 0x7ed   :  { %v1180_v26 = vpop.xlane.xlu1 %1179 }
 0x7ee   :  { %v1183_v27 = vmul.f32 1.442695, %v1181_v25  ;;  %v1182_v28 = vsub.f32 %v1170_v17, %v1180_v26 }
 0x7f0   :  { %9355 = vpow2.f32 %v1183_v27  ;;  %v1185_v29 = vmul.f32 1.442695, %v1182_v28 }
 0x7f2   :  { %9357 = vpow2.f32 %v1185_v29 }
 0x7fa   :  { %v9356_v30 = vpop.eup %9355 }
 0x7fb   :  { %v1187_v31 = vsel %vm230_vm2, %v9356_v30, 0.0  ;;  %v1193_v32 = vpack.c.bf16 %v9356_v30, %v9356_v30 }
 0x7fc   :  { %v9358_v33 = vpop.eup %9357  ;;  %1188 = vadd.xlane.f32.xlu0 %v1187_v31 }
 0x7fd   :  { %8572 = vmatmul.mubr.msk.bf16.vlgmr.msra.gmra.mrb[44].mxu1 %vm230_vm2, %v1193_v32  ;;  %v1190_v34 = vsel %vm230_vm2, %v9358_v33, 0.0  ;;  %v1194_v35 = vpack.c.bf16 %v9358_v33, %v9358_v33 }
 0x7fe   :  { %1191 = vadd.xlane.f32.xlu1 %v1190_v34  ;;  %8583 = vmatprep.mubr.msk.bf16.mxu1 %vm9544_vm0, %v9543_v0 }
 0x7ff   :  { %8578 = vmatmul.mubr.msk.bf16.vlgmr.msra.gmra.mrb[40].mxu0 %vm230_vm2, %v1194_v35  ;;  %8582 = vmatpush3.bf16.msra.mxu1 %v1301_v39 }
 0x800   :  { %8591 = vmatprep.mubr.msk.bf16.mxu0 %vm9544_vm0, %v9543_v0  ;;  %8595 = vmatprep.subr.bf16.mxu1 %v9543_v0 }
 0x801   :  { %8588 = vmatpush3.bf16.msra.mxu0 %v1351_v15 }
 0x802   :  { %8589 = vmatprep.subr.bf16.mxu0 %v9543_v0 }
 0x805   :  { %8590 = vmatpush3.bf16.msra.mxu0 %v1352_v45 }
 0x806   :  { %8603 = vmatprep.subr.bf16.mxu0 %v9543_v0 }
 0x808   :  { %8592 = vmatmul.mubr.msk.bf16.vlgmr.msra.gmra.mrb[44].mxu0 %vm73_vm1, %v9636_v11 }
 0x809   :  { %8607 = vmatprep.mubr.msk.bf16.mxu0 %vm9544_vm0, %v9543_v0  ;;  %8604 = vmatpush3.bf16.msra.mxu0 %v1457_v8 }
 0x80a   :  { %8605 = vmatprep.subr.bf16.mxu0 %v9543_v0 }
 0x80d   :  { %8606 = vmatpush3.bf16.msra.mxu0 %v1458_v12 }
 0x80e   :  { %8617 = vmatprep.subr.bf16.mxu0 %v9543_v0 }
 0x810   :  { %8608 = vmatmul.mubr.msk.bf16.vlgmr.msra.gmra.mrb[48].mxu0 %vm73_vm1, %v9636_v11 }
 0x811   :  { %8619 = vmatprep.mubr.msk.bf16.mxu0 %vm9544_vm0, %v9543_v0 }
 0x889   :  { %v1189_v47 = vpop.xlane.xlu0 %1188 }
 0x88a   :  { %9359 = vrcp.f32 %v1189_v47 }
 0x88b   :  { %v1192_v48 = vpop.xlane.xlu1 %1191 }
 0x88c   :  { %9361 = vrcp.f32 %v1192_v48 }
 0x894   :  { %v9360_v51 = vpop.eup %9359 }
 0x896   :  { %v9362_v36 = vpop.eup %9361 }
 0x8d0   :  { %v1237_v50 = vpop.f32.mrb[44].mxu1 }
 0x8d1   :  { %v8573_v52 = vpop.f32.mrb[45].mxu1  ;;  %v1291_v57 = vmul.f32 %v9360_v51, %v1237_v50 }
 0x8d2   :  { %v1240_v54 = vpop.f32.mrb[46].mxu1  ;;  %v1283_v55 = vpop.f32.mrb[40].mxu0 }
 0x8d3   :  { %v1292_v59 = vmul.f32 %v9362_v36, %v1283_v55  ;;  %v8574_v60 = vpop.f32.mrb[47].mxu1  ;;  %v8579_v61 = vpop.f32.mrb[41].mxu0 }
 0x8d4   :  { %v1286_v62 = vpop.f32.mrb[42].mxu0 }
 0x8d5   :  { %v1295_v1 = vpack.c.bf16 %v1292_v59, %v1291_v57  ;;  %v8580_v2 = vpop.f32.mrb[43].mxu0 }
 0x8d7   :  { %8584 = vmatmul.mubr.msk.bf16.vlgmr.msra.gmra.mrb[48].mxu1 %vm230_vm2, %v1295_v1 }
 0x8d8   :  { %8596 = vmatpush3.bf16.msra.mxu1 %v1404_v63  ;;  %8599 = vmatprep.mubr.msk.bf16.mxu1 %vm9544_vm0, %v9543_v0 }
 0x8d9   :  { %8597 = vmatprep.subr.bf16.mxu1 %v9543_v0 }
 0x8db   :  { %v1392_v13 = vpop.f32.mrb[44].mxu0 }
 0x8dc   :  { %8598 = vmatpush3.bf16.msra.mxu1 %v1405_v5  ;;  %v8593_v14 = vpop.f32.mrb[45].mxu0  ;;  %v1393_v28 = vadd.f32 %v7788_v24, %v1392_v13  ;;  %v7806_v13 = vld [vmem:[%s11397_s6 + $0x18] sm:$0xff] }
 0x8dd   :  { %8611 = vmatprep.subr.bf16.mxu1 %v9543_v0  ;;  %v1395_v16 = vpop.f32.mrb[46].mxu0  ;;  %v1724_v14 = vpack.c.bf16 %v7806_v13, %v7806_v13 }
 0x8de   :  { %v8594_v17 = vpop.f32.mrb[47].mxu0  ;;  %v1505_v33 = vmul.f32 0.35355338, %v1393_v28  ;;  %v1396_v34 = vadd.f32 %v7788_v24, %v1395_v16 }
 0x8df   :  { %8600 = vmatmul.mubr.msk.bf16.vlgmr.msra.gmra.mrb[52].mxu1 %vm73_vm1, %v9636_v11  ;;  %v7794_v11 = vld [vmem:[%s11395_s5 + $0x7] ss:$0 sm:$0xff]  ;;  %v1729_v16 = vsel %vm348_vm3, %v1724_v14, 0 }
 0x8e0   :  { %8613 = vmatprep.mubr.msk.bf16.mxu1 %vm9544_vm0, %v9543_v0  ;;  %v1507_v37 = vpack.c.bf16 %v1505_v33, %v1505_v33  ;;  %v1506_v38 = vmul.f32 0.35355338, %v1396_v34 }
 0x8e2   :  { %v1508_v39 = vpack.c.bf16 %v1506_v38, %v1506_v38 }
 0x8e3   :  { %v1498_v42 = vpop.f32.mrb[48].mxu0 }
 0x8e4   :  { %v1499_v15 = vadd.f32 %v7800_v41, %v1498_v42  ;;  %v8609_v43 = vpop.f32.mrb[49].mxu0  ;;  %v9532_v42 = vld [vmem:[%s11394_s0 + $0x8] sm:$0xff] }
 0x8e5   :  { %v1501_v44 = vpop.f32.mrb[50].mxu0 }
 0x8e6   :  { %v1623_v45 = vpack.c.bf16 %v1499_v15, %v1499_v15  ;;  %v1502_v47 = vadd.f32 %v7800_v41, %v1501_v44  ;;  %v8610_v48 = vpop.f32.mrb[51].mxu0 }
 0x8e8   :  { %v1629_v50 = vsel %vm348_vm3, %v1623_v45, 0  ;;  %v1624_v51 = vpack.c.bf16 %v1502_v47, %v1502_v47 }
 0x8ea   :  { %v1675_v52 = vsel %vm348_vm3, %v1624_v51, 0 }
 0x9aa   :  { %v1337_v18 = vpop.f32.mrb[48].mxu1 }
 0x9ab   :  { %v9990_v19 = vadd.f32 %v1337_v18, %v9895_v46  ;;  %v8585_v20 = vpop.f32.mrb[49].mxu1 }
 0x9ac   :  { %v1340_v21 = vpop.f32.mrb[50].mxu1 }
 0x9ad   :  { %v9993_v22 = vadd.f32 %v1340_v21, %v9897_v49  ;;  %v8586_v23 = vpop.f32.mrb[51].mxu1 }
 0x9b2   :  { %v1445_v25 = vpop.f32.mrb[52].mxu1 }
 0x9b3   :  { %v1446_v26 = vadd.f32 %v7794_v11, %v1445_v25  ;;  %v8601_v27 = vpop.f32.mrb[53].mxu1 }
 0x9b4   :  { %v1448_v46 = vpop.f32.mrb[54].mxu1 }
 0x9b5   :  { %v1509_v29 = vpack.c.bf16 %v1446_v26, %v1446_v26  ;;  %v1449_v30 = vadd.f32 %v7794_v11, %v1448_v46  ;;  %v8602_v31 = vpop.f32.mrb[55].mxu1 }
 0x9b7   :  { %v1515_v49 = vsel %vm230_vm2, %v1509_v29, 0  ;;  %v1510_v32 = vpack.c.bf16 %v1449_v30, %v1449_v30 }
 0x9b8   :  { %8612 = vmatpush3.bf16.xpose.msra.mxu1 %v1515_v49 }
 0x9b9   :  { %v1561_v35 = vsel %vm230_vm2, %v1510_v32, 0  ;;  %8623 = vmatprep.subr.bf16.mxu1 %v9543_v0 }
 0x9ba   :  { %8618 = vmatpush3.bf16.xpose.msra.mxu0 %v1561_v35  ;;  %v7808_v35 = vld [vmem:[%s11398_s9] ss:$0 sm:$0xff] }
 0x9bb   :  { %8629 = vmatprep.subr.bf16.mxu0 %v9543_v0 }
 0x9bf   :  { %8614 = vmatmul.mubr.msk.bf16.vlgmr.msra.gmra.mrb[56].mxu1 %vm230_vm2, %v1507_v37  ;;  %v9531_v37 = vld [vmem:[%s11394_s0] sm:$0xff] }
 0x9c0   :  { %8625 = vmatprep.mubr.msk.bf16.mxu1 %vm9544_vm0, %v9543_v0  ;;  %8624 = vmatpush3.bf16.msra.mxu1 %v1629_v50 }
 0x9c1   :  { %8620 = vmatmul.mubr.msk.bf16.vlgmr.msra.gmra.mrb[52].mxu0 %vm230_vm2, %v1508_v39  ;;  %8635 = vmatprep.subr.bf16.mxu1 %v9543_v0 }
 0x9c2   :  { %8631 = vmatprep.mubr.msk.bf16.mxu0 %vm9544_vm0, %v9543_v0  ;;  %8630 = vmatpush3.bf16.msra.mxu0 %v1675_v52 }
 0x9c3   :  { %8641 = vmatprep.subr.bf16.mxu0 %v9543_v0 }
 0xa92   :  { %v1551_v53 = vpop.f32.mrb[56].mxu1 }
 0xa93   :  { %v1552_v40 = vadd.f32 %v9704_v58, %v1551_v53  ;;  %v8615_v36 = vpop.f32.mrb[57].mxu1 }
 0xa94   :  { %v1554_v54 = vpop.f32.mrb[58].mxu1  ;;  %v1597_v55 = vpop.f32.mrb[52].mxu0 }
 0xa95   :  { %v1598_v57 = vadd.f32 %v9699_v56, %v1597_v55  ;;  %v8616_v59 = vpop.f32.mrb[59].mxu1  ;;  %v8621_v60 = vpop.f32.mrb[53].mxu0  ;;  %v1603_v61 = vsel %vm230_vm2, %v1552_v40, -inf  ;;  %v1824_v55 = vld [vmem:[%s11399_s7] sm:$0xff] }
 0xa96   :  { %v1600_v62 = vpop.f32.mrb[54].mxu0  ;;  %1604 = vmax.xlane.f32.xlu0 %v1603_v61  ;;  %v1826_v60 = vld [vmem:[%s11399_s7 + $0x10] sm:$0xff]  ;;  %v1827_v61 = vld [vmem:[%s11399_s7 + $0x18] sm:$0xff] }
 0xa97   :  { %v8622_v63 = vpop.f32.mrb[55].mxu0  ;;  %v1606_v1 = vsel %vm230_vm2, %v1598_v57, -inf  ;;  %v1830_v62 = vpack.c.bf16 %v1827_v61, %v1826_v60 }
 0xa98   :  { %1607 = vmax.xlane.f32.xlu1 %v1606_v1  ;;  %v7817_v63 = vld [vmem:[%s11393_s4 + $0x180] sm:$0xff]  ;;  %v7818_v1 = vld [vmem:[%s11393_s4 + $0x188] sm:$0xff] }
 0xb23   :  { %v1605_v2 = vpop.xlane.xlu0 %1604 }
 0xb24   :  { %v1609_v3 = vsub.f32 %v1552_v40, %v1605_v2  ;;  %v1994_v2 = vpack.c.bf16 %v7818_v1, %v7817_v63 }
 0xb25   :  { %v1608_v4 = vpop.xlane.xlu1 %1607 }
 0xb26   :  { %v1611_v5 = vmul.f32 1.442695, %v1609_v3  ;;  %v1610_v58 = vsub.f32 %v1598_v57, %v1608_v4  ;;  %v1825_v57 = vld [vmem:[%s11399_s7 + $0x8] sm:$0xff]  ;;  %v1882_v3 = vld [vmem:[%s11400_s8] sm:$0xff] }
 0xb27   :  { %v1829_v59 = vpack.c.bf16 %v1825_v57, %v1824_v55  ;;  %v1883_v4 = vld [vmem:[%s11400_s8 + $0x8] sm:$0xff]  ;;  %v7833_v55 = vld [vmem:[%s11393_s4 + $0x290] sm:$0xff]  ;;  %v7834_v57 = vld [vmem:[%s11393_s4 + $0x298] sm:$0xff] }
 0xb28   :  { %9363 = vpow2.f32 %v1611_v5  ;;  %v1613_v6 = vmul.f32 1.442695, %v1610_v58  ;;  %v1884_v5 = vld [vmem:[%s11400_s8 + $0x10] sm:$0xff]  ;;  %v1891_v58 = vpack.c.bf16 %v1883_v4, %v1882_v3 }
 0xb29   :  { %v7828_v4 = vld [vmem:[%s11395_s5 + $0x10] ss:$0 sm:$0xff] }
 0xb2a   :  { %9365 = vpow2.f32 %v1613_v6  ;;  %v1885_v6 = vld [vmem:[%s11400_s8 + $0x18] sm:$0xff] }
 0xb32   :  { %v9364_v7 = vpop.eup %9363 }
 0xb33   :  { %v1615_v56 = vsel %vm230_vm2, %v9364_v7, 0.0  ;;  %v1621_v8 = vpack.c.bf16 %v9364_v7, %v9364_v7  ;;  %v1892_v7 = vpack.c.bf16 %v1885_v6, %v1884_v5 }
 0xb34   :  { %v9366_v9 = vpop.eup %9365  ;;  %1616 = vadd.xlane.f32.xlu0 %v1615_v56 }
 0xb35   :  { %8626 = vmatmul.mubr.msk.bf16.vlgmr.msra.gmra.mrb[60].mxu1 %vm230_vm2, %v1621_v8  ;;  %v1618_v10 = vsel %vm230_vm2, %v9366_v9, 0.0  ;;  %v1622_v12 = vpack.c.bf16 %v9366_v9, %v9366_v9 }
 0xb36   :  { %1619 = vadd.xlane.f32.xlu1 %v1618_v10  ;;  %8637 = vmatprep.mubr.msk.bf16.mxu1 %vm9544_vm0, %v9543_v0 }
 0xb37   :  { %8632 = vmatmul.mubr.msk.bf16.vlgmr.msra.gmra.mrb[56].mxu0 %vm230_vm2, %v1622_v12  ;;  %8636 = vmatpush3.bf16.msra.mxu1 %v1729_v16  ;;  %v7809_v16 = vld [vmem:[%s11398_s9 + $0x5] ss:$0 sm:$0xff] }
 0xb38   :  { %8645 = vmatprep.mubr.msk.bf16.mxu0 %vm9544_vm0, %v9543_v0  ;;  %8649 = vmatprep.subr.bf16.mxu1 %v9543_v0 }
 0xb39   :  { %8642 = vmatpush3.bf16.msra.mxu0 %v1829_v59 }
 0xb3a   :  { %8643 = vmatprep.subr.bf16.mxu0 %v9543_v0 }
 0xb3d   :  { %8644 = vmatpush3.bf16.msra.mxu0 %v1830_v62  ;;  %v2123_v62 = vpack.c.bf16 %v7834_v57, %v7833_v55  ;;  %v10229_v55 = vld [vmem:[%s11403_s3 + $0x8] sm:$0xff] }
 0xb3e   :  { %8661 = vmatprep.subr.bf16.mxu0 %v1994_v2 }
 0xbc1   :  { %v1617_v17 = vpop.xlane.xlu0 %1616 }
 0xbc2   :  { %9367 = vrcp.f32 %v1617_v17 }
 0xbc3   :  { %v1620_v18 = vpop.xlane.xlu1 %1619 }
 0xbc4   :  { %9369 = vrcp.f32 %v1620_v18 }
 0xbcc   :  { %v9368_v21 = vpop.eup %9367 }
 0xbce   :  { %v9370_v11 = vpop.eup %9369 }
 0xc08   :  { %v1665_v20 = vpop.f32.mrb[60].mxu1 }
 0xc09   :  { %v8627_v23 = vpop.f32.mrb[61].mxu1  ;;  %v1719_v26 = vmul.f32 %v9368_v21, %v1665_v20 }
 0xc0a   :  { %v1668_v24 = vpop.f32.mrb[62].mxu1  ;;  %v1711_v25 = vpop.f32.mrb[56].mxu0  ;;  %v7810_v23 = vld [vmem:[%s11398_s9 + $0x6] ss:$0 sm:$0xff] }
 0xc0b   :  { %v1720_v27 = vmul.f32 %v9370_v11, %v1711_v25  ;;  %v8628_v28 = vpop.f32.mrb[63].mxu1  ;;  %v8633_v46 = vpop.f32.mrb[57].mxu0  ;;  %v41_v24 = vld [vmem:[%s11401_s1] sm:$0xff]  ;;  %v42_v25 = vld [vmem:[%s11401_s1 + $0x8] sm:$0xff] }
 0xc0c   :  { %v1714_v29 = vpop.f32.mrb[58].mxu0 }
 0xc0d   :  { %v1723_v30 = vpack.c.bf16 %v1720_v27, %v1719_v26  ;;  %v8634_v31 = vpop.f32.mrb[59].mxu0  ;;  %v7819_v26 = vld [vmem:[%s11393_s4 + $0x190] sm:$0xff]  ;;  %v7820_v27 = vld [vmem:[%s11393_s4 + $0x198] sm:$0xff]  ;;  %v10108_v29 = vpack.c.bf16 %v42_v25, %v41_v24 }
 0xc0e   :  { %v1995_v31 = vpack.c.bf16 %v7820_v27, %v7819_v26 }
 0xc0f   :  { %8638 = vmatmul.mubr.msk.bf16.vlgmr.msra.gmra.mrb[64].mxu1 %vm230_vm2, %v1723_v30 }
 0xc10   :  { %8657 = vmatprep.mubr.msk.bf16.mxu1 %vm9544_vm0, %v9543_v0  ;;  %8650 = vmatpush3.bf16.msra.mxu1 %v1891_v58  ;;  %v7821_v58 = vld [vmem:[%s11395_s5 + $0xc] ss:$0 sm:$0xff] }
 0xc11   :  { %8651 = vmatprep.subr.bf16.mxu1 %v9543_v0 }
 0xc14   :  { %8652 = vmatpush3.bf16.msra.mxu1 %v1892_v7 }
 0xc15   :  { %8653 = vmatprep.subr.bf16.mxu1 %v9543_v0 }
 0xce2   :  { %v1765_v49 = vpop.f32.mrb[64].mxu1 }
 0xce3   :  { %v1772_v32 = vadd.f32 %v1765_v49, %v9990_v19  ;;  %v8639_v33 = vpop.f32.mrb[65].mxu1  ;;  %v7824_v49 = vld [vmem:[%s11393_s4 + $0x200] sm:$0xff] }
 0xce4   :  { %v1768_v34 = vpop.f32.mrb[66].mxu1  ;;  %v43_v33 = vld [vmem:[%s11401_s1 + $0x10] sm:$0xff] }
 0xce5   :  { %v1774_v38 = vadd.f32 %v9531_v37, %v1772_v32  ;;  %v1773_v39 = vadd.f32 %v1768_v34, %v9993_v22  ;;  %v8640_v41 = vpop.f32.mrb[67].mxu1  ;;  %v7825_v32 = vld [vmem:[%s11393_s4 + $0x208] sm:$0xff]  ;;  %v44_v34 = vld [vmem:[%s11401_s1 + $0x18] sm:$0xff]  ;;  %v7826_v37 = vld [vmem:[%s11393_s4 + $0x210] sm:$0xff] }
 0xce7   :  { %v1775_v15 = vadd.f32 %v9532_v42, %v1773_v39  ;;  %v1781_v19 = vadd.f32 %v7808_v35, %v1774_v38  ;;  %v7827_v38 = vld [vmem:[%s11393_s4 + $0x218] sm:$0xff]  ;;  %v10133_v39 = vpack.c.bf16 %v44_v34, %v43_v33  ;;  %v1886_v42 = vld [vmem:[%s11400_s8 + $0x20] sm:$0xff] }
 0xce8   :  { %v2062_v41 = vpack.c.bf16 %v7827_v38, %v7826_v37 }
 0xce9   :  { %v1785_v43 = vsel %vm73_vm1, %v1781_v19, 0.0  ;;  %v1782_v44 = vadd.f32 %v7808_v35, %v1775_v15  ;;  %v2061_v35 = vpack.c.bf16 %v7825_v32, %v7824_v49  ;;  %v1887_v15 = vld [vmem:[%s11400_s8 + $0x28] sm:$0xff] }
 0xcea   :  { %1786 = vadd.xlane.f32.xlu0 %v1785_v43  ;;  %v1888_v43 = vld [vmem:[%s11400_s8 + $0x30] sm:$0xff] }
 0xceb   :  { %v1788_v45 = vsel %vm73_vm1, %v1782_v44, 0.0 }
 0xcec   :  { %1789 = vadd.xlane.f32.xlu1 %v1788_v45 }
 0xd77   :  { %v1787_v47 = vpop.xlane.xlu0 %1786 }
 0xd78   :  { %v1792_v48 = vmul.f32 0.03125, %v1787_v47  ;;  %v7831_v47 = vld [vmem:[%s11393_s4 + $0x280] sm:$0xff] }
 0xd79   :  { %v1790_v50 = vpop.xlane.xlu1 %1789 }
 0xd7a   :  { %v1794_v51 = vsub.f32 %v1781_v19, %v1792_v48  ;;  %v1793_v52 = vmul.f32 0.03125, %v1790_v50  ;;  %v1893_v19 = vpack.c.bf16 %v1887_v15, %v1886_v42  ;;  %v7832_v48 = vld [vmem:[%s11393_s4 + $0x288] sm:$0xff]  ;;  %v7835_v15 = vld [vmem:[%s11395_s5 + $0x14] ss:$0 sm:$0xff] }
 0xd7b   :  { %v2122_v50 = vpack.c.bf16 %v7832_v48, %v7831_v47 }
 0xd7c   :  { %v1795_v22 = vsub.f32 %v1782_v44, %v1793_v52  ;;  %v1796_v53 = vmul.f32 %v1794_v51, %v1794_v51  ;;  %8654 = vmatpush3.bf16.msra.mxu1 %v1893_v19  ;;  %v1889_v44 = vld [vmem:[%s11400_s8 + $0x38] sm:$0xff] }
 0xd7d   :  { %8655 = vmatprep.subr.bf16.mxu1 %v9543_v0  ;;  %v1894_v45 = vpack.c.bf16 %v1889_v44, %v1888_v43 }
 0xd7e   :  { %v1798_v40 = vsel %vm73_vm1, %v1796_v53, 0.0  ;;  %v1797_v36 = vmul.f32 %v1795_v22, %v1795_v22 }
 0xd7f   :  { %1799 = vadd.xlane.f32.xlu0 %v1798_v40 }
 0xd80   :  { %v1801_v54 = vsel %vm73_vm1, %v1797_v36, 0.0  ;;  %8656 = vmatpush3.bf16.msra.mxu1 %v1894_v45 }
 0xd81   :  { %1802 = vadd.xlane.f32.xlu1 %v1801_v54  ;;  %8677 = vmatprep.subr.bf16.mxu1 %v2122_v50 }
 0xe0c   :  { %v1800_v56 = vpop.xlane.xlu0 %1799 }
 0xe0d   :  { %v1804_v8 = vmul.f32 0.03125, %v1800_v56 }
 0xe0e   :  { %v1803_v9 = vpop.xlane.xlu1 %1802 }
 0xe0f   :  { %v1806_v10 = vadd.f32 1e-05, %v1804_v8  ;;  %v1805_v12 = vmul.f32 0.03125, %v1803_v9 }
 0xe11   :  { %9371 = vrsqrt.f32 %v1806_v10  ;;  %v1807_v13 = vadd.f32 1e-05, %v1805_v12 }
 0xe13   :  { %9373 = vrsqrt.f32 %v1807_v13 }
 0xe1b   :  { %v9372_v14 = vpop.eup %9371 }
 0xe1c   :  { %v1810_v17 = vmul.f32 %v9372_v14, %v1794_v51  ;;  %v7811_v51 = vld [vmem:[%s11402_s10] ss:$0 sm:$0xff] }
 0xe1d   :  { %v9374_v18 = vpop.eup %9373 }
 0xe1e   :  { %v1816_v20 = vmul.f32 %v7809_v16, %v1810_v17  ;;  %v1811_v21 = vmul.f32 %v9374_v18, %v1795_v22 }
 0xe20   :  { %v1817_v11 = vmul.f32 %v7809_v16, %v1811_v21  ;;  %v10104_v28 = vadd.f32 %v7810_v23, %v1816_v20 }
 0xe22   :  { %v10106_v46 = vadd.f32 %v7810_v23, %v1817_v11 }
 0xe24   :  { %v1828_v30 = vpack.c.bf16 %v10106_v46, %v10104_v28 }
 0xe26   :  { %8646 = vmatmul.mubr.msk.bf16.vlgmr.msra.gmra.mrb[60].mxu0 %vm73_vm1, %v1828_v30 }
 0xe27   :  { %8662 = vmatpush3.bf16.msra.mxu0 %v1994_v2  ;;  %8665 = vmatprep.mubr.msk.bf16.mxu0 %vm73_vm1, %v10108_v29 }
 0xe28   :  { %8663 = vmatprep.subr.bf16.mxu0 %v1995_v31 }
 0xe2b   :  { %8664 = vmatpush3.bf16.msra.mxu0 %v1995_v31 }
 0xe2c   :  { %8669 = vmatprep.subr.bf16.mxu0 %v2061_v35 }
 0xe2e   :  { %8666 = vmatmul.mubr.msk.bf16.vlgmr.msra.gmra.mrb[64].mxu0 %vm73_vm1, %v10133_v39 }
 0xe2f   :  { %8670 = vmatpush3.bf16.msra.mxu0 %v2061_v35  ;;  %8673 = vmatprep.mubr.msk.bf16.mxu0 %vm73_vm1, %v10108_v29 }
 0xe30   :  { %8671 = vmatprep.subr.bf16.mxu0 %v2062_v41 }
 0xe33   :  { %8672 = vmatpush3.bf16.msra.mxu0 %v2062_v41 }
 0xe34   :  { %8685 = vmatprep.subr.bf16.mxu0 %v9543_v0 }
 0xe36   :  { %8674 = vmatmul.mubr.msk.bf16.vlgmr.msra.gmra.mrb[68].mxu0 %vm73_vm1, %v10133_v39 }
 0xe37   :  { %8687 = vmatprep.mubr.msk.bf16.mxu0 %vm9544_vm0, %v9543_v0 }
 0xef9   :  { %v1873_v52 = vpop.f32.mrb[60].mxu0 }
 0xefa   :  { %v1874_v22 = vadd.f32 %v7811_v51, %v1873_v52  ;;  %v8647_v53 = vpop.f32.mrb[61].mxu0 }
 0xefb   :  { %v1876_v40 = vpop.f32.mrb[62].mxu0 }
 0xefc   :  { %v1877_v36 = vadd.f32 %v7811_v51, %v1876_v40  ;;  %v8648_v54 = vpop.f32.mrb[63].mxu0  ;;  %v1880_v59 = vmax.f32 %v1874_v22, 0.0 }
 0xefe   :  { %v1881_v60 = vmax.f32 %v1877_v36, 0.0  ;;  %v10224_v36 = vld [vmem:[%s11403_s3] sm:$0xff] }
 0xf00   :  { %v1890_v61 = vpack.c.bf16 %v1881_v60, %v1880_v59 }
 0xf01   :  { %v8667_v63 = vpop.f32.mrb[64].mxu0 }
 0xf02   :  { %8658 = vmatmul.mubr.msk.bf16.vlgmr.msra.gmra.mrb[68].mxu1 %vm1900_vm4, %v1890_v61  ;;  %v2041_v1 = vpop.f32.mrb[65].mxu0  ;;  %v2050_v24 = vadd.f32 %v8667_v63, %v7821_v58 }
 0xf03   :  { %v8668_v2 = vpop.f32.mrb[66].mxu0  ;;  %8678 = vmatpush3.bf16.msra.mxu1 %v2122_v50  ;;  %8681 = vmatprep.mubr.msk.bf16.mxu1 %vm73_vm1, %v10108_v29  ;;  %v2042_v9 = vadd.f32 %v7821_v58, %v2041_v1 }
 0xf04   :  { %v2044_v3 = vpop.f32.mrb[67].mxu0  ;;  %8679 = vmatprep.subr.bf16.mxu1 %v2123_v62  ;;  %v2053_v27 = vadd.f32 %v8668_v2, %v7821_v58  ;;  %v2180_v49 = vmul.f32 0.35355338, %v2050_v24 }
 0xf05   :  { %v2045_v13 = vadd.f32 %v7821_v58, %v2044_v3  ;;  %v2178_v18 = vmul.f32 0.35355338, %v2042_v9 }
 0xf06   :  { %v2181_v33 = vmul.f32 0.35355338, %v2053_v27  ;;  %v2184_v34 = vpack.c.bf16 %v2180_v49, %v2180_v49 }
 0xf07   :  { %8680 = vmatpush3.bf16.msra.mxu1 %v2123_v62  ;;  %v2179_v23 = vmul.f32 0.35355338, %v2045_v13  ;;  %v2182_v25 = vpack.c.bf16 %v2178_v18, %v2178_v18 }
 0xf08   :  { %8691 = vmatprep.subr.bf16.mxu1 %v9543_v0  ;;  %v2185_v35 = vpack.c.bf16 %v2181_v33, %v2181_v33  ;;  %v7848_v33 = vld [vmem:[%s11393_s4 + $0x1a8] sm:$0xff] }
 0xf09   :  { %v8675_v5 = vpop.f32.mrb[68].mxu0  ;;  %v2183_v30 = vpack.c.bf16 %v2179_v23, %v2179_v23 }
 0xf0a   :  { %v2102_v6 = vpop.f32.mrb[69].mxu0  ;;  %8682 = vmatmul.mubr.msk.bf16.vlgmr.msra.gmra.mrb[72].mxu1 %vm73_vm1, %v10133_v39  ;;  %v2111_v14 = vadd.f32 %v8675_v5, %v7828_v4 }
 0xf0b   :  { %v2103_v7 = vadd.f32 %v7828_v4, %v2102_v6  ;;  %v8676_v56 = vpop.f32.mrb[70].mxu0  ;;  %8693 = vmatprep.mubr.msk.bf16.mxu1 %vm9544_vm0, %v9543_v0 }
 0xf0c   :  { %v2105_v8 = vpop.f32.mrb[71].mxu0  ;;  %v2114_v20 = vadd.f32 %v8676_v56, %v7828_v4  ;;  %v2188_v11 = vpack.c.bf16 %v2111_v14, %v2111_v14 }
 0xf0d   :  { %v2186_v10 = vpack.c.bf16 %v2103_v7, %v2103_v7  ;;  %v2106_v12 = vadd.f32 %v7828_v4, %v2105_v8 }
 0xf0e   :  { %v2189_v26 = vpack.c.bf16 %v2114_v20, %v2114_v20  ;;  %v2286_v31 = vsel %vm230_vm2, %v2188_v11, 0 }
 0xf0f   :  { %v2194_v16 = vsel %vm230_vm2, %v2186_v10, 0  ;;  %v2187_v17 = vpack.c.bf16 %v2106_v12, %v2106_v12 }
 0xf10   :  { %8686 = vmatpush3.bf16.xpose.msra.mxu0 %v2194_v16  ;;  %v2332_v32 = vsel %vm230_vm2, %v2189_v26, 0 }
 0xf11   :  { %v2240_v21 = vsel %vm230_vm2, %v2187_v17, 0  ;;  %8697 = vmatprep.subr.bf16.mxu0 %v9543_v0 }
 0xf12   :  { %8692 = vmatpush3.bf16.xpose.msra.mxu1 %v2240_v21 }
 0xf13   :  { %8703 = vmatprep.subr.bf16.mxu1 %v9543_v0 }
 0xf17   :  { %8688 = vmatmul.mubr.msk.bf16.vlgmr.msra.gmra.mrb[72].mxu0 %vm230_vm2, %v2182_v25 }
 0xf18   :  { %8698 = vmatpush3.bf16.xpose.msra.mxu0 %v2286_v31  ;;  %8699 = vmatprep.mubr.msk.bf16.mxu0 %vm9544_vm0, %v9543_v0 }
 0xf19   :  { %8694 = vmatmul.mubr.msk.bf16.vlgmr.msra.gmra.mrb[76].mxu1 %vm230_vm2, %v2183_v30  ;;  %8709 = vmatprep.subr.bf16.mxu0 %v9543_v0 }
 0xf1a   :  { %8704 = vmatpush3.bf16.xpose.msra.mxu1 %v2332_v32  ;;  %8705 = vmatprep.mubr.msk.bf16.mxu1 %vm9544_vm0, %v9543_v0  ;;  %v7847_v32 = vld [vmem:[%s11393_s4 + $0x1a0] sm:$0xff] }
 0xf1b   :  { %8715 = vmatprep.subr.bf16.mxu1 %v9543_v0 }
 0xf1f   :  { %8700 = vmatmul.mubr.msk.bf16.vlgmr.msra.gmra.mrb[76].mxu0 %vm230_vm2, %v2184_v34 }
 0xf20   :  { %8711 = vmatprep.mubr.msk.bf16.mxu0 %vm9544_vm0, %v9543_v0 }
 0xf21   :  { %8706 = vmatmul.mubr.msk.bf16.vlgmr.msra.gmra.mrb[80].mxu1 %vm230_vm2, %v2185_v35 }
 0xf22   :  { %8717 = vmatprep.mubr.msk.bf16.mxu1 %vm9544_vm0, %v9543_v0 }
 0xfd5   :  { %v10206_v37 = vpop.f32.mrb[68].mxu1 }
 0xfd6   :  { %v8659_v38 = vpop.f32.mrb[69].mxu1 }
 0xfd7   :  { %v10208_v41 = vpop.f32.mrb[70].mxu1  ;;  %v7854_v38 = vld [vmem:[%s11393_s4 + $0x220] sm:$0xff] }
 0xfd8   :  { %v8660_v42 = vpop.f32.mrb[71].mxu1 }
 0xfd9   :  { %v7855_v42 = vld [vmem:[%s11393_s4 + $0x228] sm:$0xff] }
 0xfdd   :  { %v8683_v19 = vpop.f32.mrb[72].mxu1 }
 0xfde   :  { %v10213_v43 = vadd.f32 %v8683_v19, %v7835_v15  ;;  %v2163_v44 = vpop.f32.mrb[73].mxu1 }
 0xfdf   :  { %v2164_v45 = vadd.f32 %v7835_v15, %v2163_v44  ;;  %v8684_v47 = vpop.f32.mrb[74].mxu1  ;;  %v2620_v44 = vpack.c.bf16 %v7848_v33, %v7847_v32 }
 0xfe0   :  { %v10215_v48 = vadd.f32 %v8684_v47, %v7835_v15  ;;  %v2166_v50 = vpop.f32.mrb[75].mxu1  ;;  %v2416_v34 = vpack.c.bf16 %v10213_v43, %v10213_v43 }
 0xfe1   :  { %v2414_v51 = vpack.c.bf16 %v2164_v45, %v2164_v45  ;;  %v2167_v52 = vadd.f32 %v7835_v15, %v2166_v50  ;;  %v2681_v50 = vpack.c.bf16 %v7855_v42, %v7854_v38 }
 0xfe2   :  { %v2417_v15 = vpack.c.bf16 %v10215_v48, %v10215_v48  ;;  %v2514_v43 = vsel %vm348_vm3, %v2416_v34, 0 }
 0xfe3   :  { %v2422_v22 = vsel %vm348_vm3, %v2414_v51, 0  ;;  %v2415_v53 = vpack.c.bf16 %v2167_v52, %v2167_v52  ;;  %v7849_v51 = vld [vmem:[%s11393_s4 + $0x1b0] sm:$0xff]  ;;  %v7850_v52 = vld [vmem:[%s11393_s4 + $0x1b8] sm:$0xff] }
 0xfe4   :  { %8710 = vmatpush3.bf16.msra.mxu0 %v2422_v22  ;;  %v2560_v48 = vsel %vm348_vm3, %v2417_v15, 0 }
 0xfe5   :  { %v2468_v40 = vsel %vm348_vm3, %v2415_v53, 0  ;;  %8721 = vmatprep.subr.bf16.mxu0 %v9543_v0  ;;  %v7856_v53 = vld [vmem:[%s11393_s4 + $0x230] sm:$0xff] }
 0xfe6   :  { %8716 = vmatpush3.bf16.msra.mxu1 %v2468_v40  ;;  %v7857_v40 = vld [vmem:[%s11393_s4 + $0x238] sm:$0xff] }
 0xfe7   :  { %8727 = vmatprep.subr.bf16.mxu1 %v9543_v0 }
 0xfea   :  { %v2230_v54 = vpop.f32.mrb[72].mxu0 }
 0xfeb   :  { %v2231_v57 = vadd.f32 %v2230_v54, %v10224_v36  ;;  %v8689_v59 = vpop.f32.mrb[73].mxu0 }
 0xfec   :  { %v2233_v60 = vpop.f32.mrb[74].mxu0  ;;  %v2276_v61 = vpop.f32.mrb[76].mxu1 }
 0xfed   :  { %v2277_v62 = vadd.f32 %v2276_v61, %v10229_v55  ;;  %v8690_v63 = vpop.f32.mrb[75].mxu0  ;;  %v8695_v1 = vpop.f32.mrb[77].mxu1  ;;  %v2374_v2 = vsel %vm230_vm2, %v2231_v57, -inf  ;;  %v2682_v61 = vpack.c.bf16 %v7857_v40, %v7856_v53 }
 0xfee   :  { %2375 = vmax.xlane.f32.xlu1 %v2374_v2  ;;  %v2279_v3 = vpop.f32.mrb[78].mxu1  ;;  %v7862_v63 = vld [vmem:[%s11393_s4 + $0x2a8] sm:$0xff]  ;;  %v7863_v2 = vld [vmem:[%s11393_s4 + $0x2b0] sm:$0xff] }
 0xfef   :  { %v8696_v4 = vpop.f32.mrb[79].mxu1  ;;  %v2377_v5 = vsel %vm230_vm2, %v2277_v62, -inf  ;;  %v7864_v3 = vld [vmem:[%s11393_s4 + $0x2b8] sm:$0xff] }
 0xff0   :  { %2378 = vmax.xlane.f32.xlu0 %v2377_v5  ;;  %v2743_v4 = vpack.c.bf16 %v7864_v3, %v7863_v2 }
 0xff2   :  { %v2322_v58 = vpop.f32.mrb[76].mxu0 }
 0xff3   :  { %v2323_v6 = vadd.f32 %v2322_v58, %v10224_v36  ;;  %v8701_v7 = vpop.f32.mrb[77].mxu0 }
 0xff4   :  { %v2325_v56 = vpop.f32.mrb[78].mxu0  ;;  %v2368_v8 = vpop.f32.mrb[80].mxu1 }
 0xff5   :  { %v2369_v9 = vadd.f32 %v2368_v8, %v10229_v55  ;;  %v8702_v10 = vpop.f32.mrb[79].mxu0  ;;  %v8707_v12 = vpop.f32.mrb[81].mxu1  ;;  %v2380_v13 = vsel %vm230_vm2, %v2323_v6, -inf }
 0xff6   :  { %2381 = vmax.xlane.f32.xlu1 %v2380_v13  ;;  %v2371_v14 = vpop.f32.mrb[82].mxu1 }
 0xff7   :  { %v8708_v16 = vpop.f32.mrb[83].mxu1  ;;  %v2383_v17 = vsel %vm230_vm2, %v2369_v9, -inf }
 0xff8   :  { %2384 = vmax.xlane.f32.xlu0 %v2383_v17 }
0x107b   :  { %v2376_v18 = vpop.xlane.xlu1 %2375 }
0x107c   :  { %v2386_v20 = vsub.f32 %v2231_v57, %v2376_v18  ;;  %v2621_v57 = vpack.c.bf16 %v7850_v52, %v7849_v51 }
0x107d   :  { %v2379_v21 = vpop.xlane.xlu0 %2378 }
0x107e   :  { %v2390_v23 = vmul.f32 1.442695, %v2386_v20  ;;  %v2387_v11 = vsub.f32 %v2277_v62, %v2379_v21  ;;  %v7861_v62 = vld [vmem:[%s11393_s4 + $0x2a0] sm:$0xff] }
0x107f   :  { %v2742_v1 = vpack.c.bf16 %v7862_v63, %v7861_v62 }
0x1080   :  { %9375 = vpow2.f32 %v2390_v23  ;;  %v2392_v24 = vmul.f32 1.442695, %v2387_v11  ;;  %v7858_v11 = vld [vmem:[%s11395_s5 + $0x11] ss:$0 sm:$0xff] }
0x1082   :  { %9377 = vpow2.f32 %v2392_v24  ;;  %v7851_v24 = vld [vmem:[%s11395_s5 + $0xd] ss:$0 sm:$0xff] }
0x1083   :  { %v2382_v25 = vpop.xlane.xlu1 %2381 }
0x1084   :  { %v2388_v26 = vsub.f32 %v2323_v6, %v2382_v25 }
0x1085   :  { %v2385_v27 = vpop.xlane.xlu0 %2384 }
0x1086   :  { %v2394_v30 = vmul.f32 1.442695, %v2388_v26  ;;  %v2389_v31 = vsub.f32 %v2369_v9, %v2385_v27 }
0x1088   :  { %9379 = vpow2.f32 %v2394_v30  ;;  %v2396_v49 = vmul.f32 1.442695, %v2389_v31 }
0x108a   :  { %v10247_v35 = vpop.eup %9375  ;;  %9381 = vpow2.f32 %v2396_v49 }
0x108b   :  { %v2410_v19 = vpack.c.bf16 %v10247_v35, %v10247_v35 }
0x108c   :  { %v10259_v45 = vpop.eup %9377 }
0x108d   :  { %8712 = vmatmul.mubr.msk.bf16.vlgmr.msra.gmra.mrb[80].mxu0 %vm230_vm2, %v2410_v19  ;;  %v2411_v47 = vpack.c.bf16 %v10259_v45, %v10259_v45 }
0x108e   :  { %8722 = vmatpush3.bf16.msra.mxu0 %v2514_v43  ;;  %8723 = vmatprep.mubr.msk.bf16.mxu0 %vm9544_vm0, %v9543_v0 }
0x108f   :  { %8718 = vmatmul.mubr.msk.bf16.vlgmr.msra.gmra.mrb[84].mxu1 %vm230_vm2, %v2411_v47  ;;  %8733 = vmatprep.subr.bf16.mxu0 %v2620_v44 }
0x1090   :  { %8728 = vmatpush3.bf16.msra.mxu1 %v2560_v48  ;;  %8729 = vmatprep.mubr.msk.bf16.mxu1 %vm9544_vm0, %v9543_v0 }
0x1091   :  { %8741 = vmatprep.subr.bf16.mxu1 %v2681_v50 }
0x1092   :  { %v10277_v22 = vpop.eup %9379 }
0x1093   :  { %v2412_v54 = vpack.c.bf16 %v10277_v22, %v10277_v22 }
0x1094   :  { %v10287_v59 = vpop.eup %9381 }
0x1095   :  { %8724 = vmatmul.mubr.msk.bf16.vlgmr.msra.gmra.mrb[84].mxu0 %vm230_vm2, %v2412_v54  ;;  %v2413_v60 = vpack.c.bf16 %v10287_v59, %v10287_v59 }
0x1096   :  { %8734 = vmatpush3.bf16.msra.mxu0 %v2620_v44  ;;  %8737 = vmatprep.mubr.msk.bf16.mxu0 %vm73_vm1, %v10108_v29 }
0x1097   :  { %8730 = vmatmul.mubr.msk.bf16.vlgmr.msra.gmra.mrb[88].mxu1 %vm230_vm2, %v2413_v60  ;;  %8735 = vmatprep.subr.bf16.mxu0 %v2621_v57 }
0x1098   :  { %8742 = vmatpush3.bf16.msra.mxu1 %v2681_v50  ;;  %8745 = vmatprep.mubr.msk.bf16.mxu1 %vm73_vm1, %v10108_v29 }
0x1099   :  { %8743 = vmatprep.subr.bf16.mxu1 %v2682_v61 }
0x109a   :  { %8736 = vmatpush3.bf16.msra.mxu0 %v2621_v57 }
0x109b   :  { %8749 = vmatprep.subr.bf16.mxu0 %v2742_v1 }
0x109c   :  { %8744 = vmatpush3.bf16.msra.mxu1 %v2682_v61 }
0x109d   :  { %8738 = vmatmul.mubr.msk.bf16.vlgmr.msra.gmra.mrb[88].mxu0 %vm73_vm1, %v10133_v39  ;;  %8757 = vmatprep.subr.bf16.mxu1 %v9543_v0 }
0x109e   :  { %8753 = vmatprep.mubr.msk.bf16.mxu0 %vm73_vm1, %v10108_v29  ;;  %8750 = vmatpush3.bf16.msra.mxu0 %v2742_v1 }
0x109f   :  { %8746 = vmatmul.mubr.msk.bf16.vlgmr.msra.gmra.mrb[92].mxu1 %vm73_vm1, %v10133_v39  ;;  %8751 = vmatprep.subr.bf16.mxu0 %v2743_v4 }
0x10a0   :  { %8759 = vmatprep.mubr.msk.bf16.mxu1 %vm9544_vm0, %v9543_v0 }
0x10a2   :  { %8752 = vmatpush3.bf16.msra.mxu0 %v2743_v4  ;;  %v7865_v4 = vld [vmem:[%s11395_s5 + $0x15] ss:$0 sm:$0xff] }
0x10a3   :  { %8763 = vmatprep.subr.bf16.mxu0 %v9543_v0 }
0x10a5   :  { %8754 = vmatmul.mubr.msk.bf16.vlgmr.msra.gmra.mrb[92].mxu0 %vm73_vm1, %v10133_v39 }
0x10a6   :  { %8765 = vmatprep.mubr.msk.bf16.mxu0 %vm9544_vm0, %v9543_v0 }
0x1160   :  { %v10323_v5 = vpop.f32.mrb[80].mxu0 }
0x1161   :  { %v8713_v58 = vpop.f32.mrb[81].mxu0 }
0x1162   :  { %v2461_v6 = vpop.f32.mrb[82].mxu0  ;;  %v10325_v7 = vpop.f32.mrb[84].mxu1 }
0x1163   :  { %v8714_v56 = vpop.f32.mrb[83].mxu0  ;;  %v8719_v8 = vpop.f32.mrb[85].mxu1 }
0x1164   :  { %v2507_v9 = vpop.f32.mrb[86].mxu1 }
0x1165   :  { %v8720_v10 = vpop.f32.mrb[87].mxu1 }
0x1168   :  { %v10327_v12 = vpop.f32.mrb[84].mxu0 }
0x1169   :  { %v8725_v13 = vpop.f32.mrb[85].mxu0 }
0x116a   :  { %v2553_v14 = vpop.f32.mrb[86].mxu0  ;;  %v10329_v16 = vpop.f32.mrb[88].mxu1 }
0x116b   :  { %v8726_v17 = vpop.f32.mrb[87].mxu0  ;;  %v8731_v18 = vpop.f32.mrb[89].mxu1 }
0x116c   :  { %v2599_v20 = vpop.f32.mrb[90].mxu1 }
0x116d   :  { %v8732_v21 = vpop.f32.mrb[91].mxu1 }
0x1170   :  { %v8739_v23 = vpop.f32.mrb[88].mxu0 }
0x1171   :  { %v2661_v25 = vpop.f32.mrb[89].mxu0  ;;  %v2670_v54 = vadd.f32 %v8739_v23, %v7851_v24 }
0x1172   :  { %v8747_v26 = vpop.f32.mrb[92].mxu1  ;;  %v8740_v27 = vpop.f32.mrb[90].mxu0  ;;  %v2662_v33 = vadd.f32 %v7851_v24, %v2661_v25 }
0x1173   :  { %v2722_v30 = vpop.f32.mrb[93].mxu1  ;;  %v2664_v31 = vpop.f32.mrb[91].mxu0  ;;  %v2731_v15 = vadd.f32 %v8747_v26, %v7858_v11  ;;  %v2673_v60 = vadd.f32 %v8740_v27, %v7851_v24  ;;  %v2800_v63 = vmul.f32 0.35355338, %v2670_v54 }
0x1174   :  { %v2723_v49 = vadd.f32 %v7858_v11, %v2722_v30  ;;  %v8748_v32 = vpop.f32.mrb[94].mxu1  ;;  %v2798_v43 = vmul.f32 0.35355338, %v2662_v33  ;;  %v2665_v47 = vadd.f32 %v7851_v24, %v2664_v31 }
0x1175   :  { %v2725_v34 = vpop.f32.mrb[95].mxu1  ;;  %v2734_v50 = vadd.f32 %v8748_v32, %v7858_v11  ;;  %v2808_v51 = vpack.c.bf16 %v2731_v15, %v2731_v15  ;;  %v2801_v1 = vmul.f32 0.35355338, %v2673_v60  ;;  %v2804_v2 = vpack.c.bf16 %v2800_v63, %v2800_v63 }
0x1176   :  { %v2806_v38 = vpack.c.bf16 %v2723_v49, %v2723_v49  ;;  %v2726_v42 = vadd.f32 %v7858_v11, %v2725_v34  ;;  %v2802_v52 = vpack.c.bf16 %v2798_v43, %v2798_v43  ;;  %v2799_v53 = vmul.f32 0.35355338, %v2665_v47 }
0x1177   :  { %v2809_v40 = vpack.c.bf16 %v2734_v50, %v2734_v50  ;;  %v2906_v57 = vsel %vm230_vm2, %v2808_v51, 0  ;;  %v2805_v3 = vpack.c.bf16 %v2801_v1, %v2801_v1 }
0x1178   :  { %v2814_v19 = vsel %vm230_vm2, %v2806_v38, 0  ;;  %v2807_v44 = vpack.c.bf16 %v2726_v42, %v2726_v42  ;;  %v2803_v61 = vpack.c.bf16 %v2799_v53, %v2799_v53  ;;  %v8755_v58 = vpop.f32.mrb[92].mxu0 }
0x1179   :  { %8758 = vmatpush3.bf16.xpose.msra.mxu1 %v2814_v19  ;;  %v2952_v62 = vsel %vm230_vm2, %v2809_v40, 0  ;;  %v10360_v6 = vadd.f32 %v8755_v58, %v7865_v4  ;;  %v2783_v56 = vpop.f32.mrb[93].mxu0 }
0x117a   :  { %v2860_v48 = vsel %vm230_vm2, %v2807_v44, 0  ;;  %8769 = vmatprep.subr.bf16.mxu1 %v9543_v0  ;;  %v2784_v8 = vadd.f32 %v7865_v4, %v2783_v56  ;;  %v8756_v9 = vpop.f32.mrb[94].mxu0 }
0x117b   :  { %8764 = vmatpush3.bf16.xpose.msra.mxu0 %v2860_v48  ;;  %v10362_v10 = vadd.f32 %v8756_v9, %v7865_v4  ;;  %v2786_v13 = vpop.f32.mrb[95].mxu0  ;;  %v3036_v56 = vpack.c.bf16 %v10360_v6, %v10360_v6  ;;  %v7881_v9 = vld [vmem:[%s11393_s4 + $0x1c0] sm:$0xff] }
0x117c   :  { %8775 = vmatprep.subr.bf16.mxu0 %v9543_v0  ;;  %v3034_v14 = vpack.c.bf16 %v2784_v8, %v2784_v8  ;;  %v2787_v17 = vadd.f32 %v7865_v4, %v2786_v13  ;;  %v7882_v13 = vld [vmem:[%s11393_s4 + $0x1c8] sm:$0xff] }
0x117d   :  { %v3134_v6 = vsel %vm348_vm3, %v3036_v56, 0 }
0x117e   :  { %v3042_v18 = vsel %vm348_vm3, %v3034_v14, 0  ;;  %v3035_v20 = vpack.c.bf16 %v2787_v17, %v2787_v17  ;;  %v3037_v14 = vpack.c.bf16 %v10362_v10, %v10362_v10 }
0x1180   :  { %8760 = vmatmul.mubr.msk.bf16.vlgmr.msra.gmra.mrb[96].mxu1 %vm230_vm2, %v2802_v52  ;;  %v3088_v21 = vsel %vm348_vm3, %v3035_v20, 0 }
0x1181   :  { %8770 = vmatpush3.bf16.xpose.msra.mxu1 %v2906_v57  ;;  %8771 = vmatprep.mubr.msk.bf16.mxu1 %vm9544_vm0, %v9543_v0 }
0x1182   :  { %8766 = vmatmul.mubr.msk.bf16.vlgmr.msra.gmra.mrb[96].mxu0 %vm230_vm2, %v2803_v61  ;;  %8781 = vmatprep.subr.bf16.mxu1 %v9543_v0 }
0x1183   :  { %8776 = vmatpush3.bf16.xpose.msra.mxu0 %v2952_v62  ;;  %8777 = vmatprep.mubr.msk.bf16.mxu0 %vm9544_vm0, %v9543_v0 }
0x1184   :  { %8787 = vmatprep.subr.bf16.mxu0 %v9543_v0 }
0x1188   :  { %8772 = vmatmul.mubr.msk.bf16.vlgmr.msra.gmra.mrb[100].mxu1 %vm230_vm2, %v2804_v2 }
0x1189   :  { %8783 = vmatprep.mubr.msk.bf16.mxu1 %vm9544_vm0, %v9543_v0  ;;  %8782 = vmatpush3.bf16.msra.mxu1 %v3042_v18 }
0x118a   :  { %8778 = vmatmul.mubr.msk.bf16.vlgmr.msra.gmra.mrb[100].mxu0 %vm230_vm2, %v2805_v3  ;;  %8793 = vmatprep.subr.bf16.mxu1 %v9543_v0 }
0x118b   :  { %8789 = vmatprep.mubr.msk.bf16.mxu0 %vm9544_vm0, %v9543_v0  ;;  %8788 = vmatpush3.bf16.msra.mxu0 %v3088_v21 }
0x118c   :  { %8799 = vmatprep.subr.bf16.mxu0 %v9543_v0 }
0x1253   :  { %v2850_v23 = vpop.f32.mrb[96].mxu1 }
0x1254   :  { %v2851_v11 = vadd.f32 %v2850_v23, %v10224_v36  ;;  %v8761_v24 = vpop.f32.mrb[97].mxu1 }
0x1255   :  { %v2853_v25 = vpop.f32.mrb[98].mxu1  ;;  %v2896_v26 = vpop.f32.mrb[96].mxu0  ;;  %v3180_v24 = vsel %vm348_vm3, %v3037_v14, 0 }
0x1256   :  { %v2897_v27 = vadd.f32 %v2896_v26, %v10229_v55  ;;  %v8762_v30 = vpop.f32.mrb[99].mxu1  ;;  %v8767_v31 = vpop.f32.mrb[97].mxu0  ;;  %v2994_v49 = vsel %vm230_vm2, %v2851_v11, -inf  ;;  %v7883_v25 = vld [vmem:[%s11393_s4 + $0x1d0] sm:$0xff]  ;;  %v7884_v26 = vld [vmem:[%s11393_s4 + $0x1d8] sm:$0xff] }
0x1257   :  { %v2899_v32 = vpop.f32.mrb[98].mxu0  ;;  %2995 = vmax.xlane.f32.xlu0 %v2994_v49 }
0x1258   :  { %v8768_v33 = vpop.f32.mrb[99].mxu0  ;;  %v2997_v34 = vsel %vm230_vm2, %v2897_v27, -inf }
0x1259   :  { %2998 = vmax.xlane.f32.xlu1 %v2997_v34  ;;  %v3357_v33 = vpack.c.bf16 %v7884_v26, %v7883_v25  ;;  %v7888_v34 = vld [vmem:[%s11393_s4 + $0x240] sm:$0xff] }
0x125b   :  { %v2942_v38 = vpop.f32.mrb[100].mxu1 }
0x125c   :  { %v2943_v42 = vadd.f32 %v2942_v38, %v10224_v36  ;;  %v8773_v15 = vpop.f32.mrb[101].mxu1  ;;  %v7889_v38 = vld [vmem:[%s11393_s4 + $0x248] sm:$0xff] }
0x125d   :  { %v2945_v19 = vpop.f32.mrb[102].mxu1  ;;  %v2988_v44 = vpop.f32.mrb[100].mxu0  ;;  %v2401_v15 = vsel %vm230_vm2, %v10259_v45, 0.0  ;;  %v2407_v45 = vsel %vm230_vm2, %v10287_v59, 0.0 }
0x125e   :  { %v2989_v43 = vadd.f32 %v2988_v44, %v10229_v55  ;;  %v8774_v47 = vpop.f32.mrb[103].mxu1  ;;  %v8779_v50 = vpop.f32.mrb[101].mxu0  ;;  %v3000_v48 = vsel %vm230_vm2, %v2943_v42, -inf  ;;  %v3417_v19 = vpack.c.bf16 %v7889_v38, %v7888_v34  ;;  %v7890_v44 = vld [vmem:[%s11393_s4 + $0x250] sm:$0xff] }
0x125f   :  { %v2991_v51 = vpop.f32.mrb[102].mxu0  ;;  %3001 = vmax.xlane.f32.xlu0 %v3000_v48  ;;  %v7846_v48 = vld [vmem:[%s11397_s6 + $0x20] sm:$0xff] }
0x1260   :  { %v8780_v52 = vpop.f32.mrb[103].mxu0  ;;  %v3003_v53 = vsel %vm230_vm2, %v2989_v43, -inf  ;;  %v2614_v51 = vpack.c.bf16 %v7846_v48, %v7846_v48  ;;  %v7898_v48 = vld [vmem:[%s11393_s4 + $0x2d8] sm:$0xff] }
0x1261   :  { %3004 = vmax.xlane.f32.xlu1 %v3003_v53 }
0x12e4   :  { %v2996_v40 = vpop.xlane.xlu0 %2995 }
0x12e5   :  { %v3006_v54 = vsub.f32 %v2851_v11, %v2996_v40  ;;  %v3356_v11 = vpack.c.bf16 %v7882_v13, %v7881_v9 }
0x12e6   :  { %v2999_v57 = vpop.xlane.xlu1 %2998 }
0x12e7   :  { %v3010_v60 = vmul.f32 1.442695, %v3006_v54  ;;  %v3007_v61 = vsub.f32 %v2897_v27, %v2999_v57 }
0x12e9   :  { %9383 = vpow2.f32 %v3010_v60  ;;  %v3012_v62 = vmul.f32 1.442695, %v3007_v61 }
0x12eb   :  { %9385 = vpow2.f32 %v3012_v62 }
0x12ec   :  { %v3002_v63 = vpop.xlane.xlu0 %3001 }
0x12ed   :  { %v3008_v1 = vsub.f32 %v2943_v42, %v3002_v63  ;;  %v2398_v42 = vsel %vm230_vm2, %v10247_v35, 0.0  ;;  %v2404_v35 = vsel %vm230_vm2, %v10277_v22, 0.0  ;;  %v7876_v22 = vld [vmem:[%s11397_s6 + $0x28] sm:$0xff] }
0x12ee   :  { %v3005_v2 = vpop.xlane.xlu1 %3004  ;;  %v3234_v59 = vpack.c.bf16 %v7876_v22, %v7876_v22 }
0x12ef   :  { %v3014_v3 = vmul.f32 1.442695, %v3008_v1  ;;  %v3009_v4 = vsub.f32 %v2989_v43, %v3005_v2  ;;  %v7891_v43 = vld [vmem:[%s11393_s4 + $0x258] sm:$0xff] }
0x12f0   :  { %v3418_v47 = vpack.c.bf16 %v7891_v43, %v7890_v44  ;;  %v3242_v50 = vsel %vm348_vm3, %v3234_v59, 0  ;;  %v3300_v43 = vsel %vm348_vm3, %v2614_v51, 0 }
0x12f1   :  { %9387 = vpow2.f32 %v3014_v3  ;;  %v3016_v58 = vmul.f32 1.442695, %v3009_v4 }
0x12f3   :  { %v9384_v8 = vpop.eup %9383  ;;  %9389 = vpow2.f32 %v3016_v58 }
0x12f4   :  { %v3018_v17 = vsel %vm230_vm2, %v9384_v8, 0.0  ;;  %v3030_v18 = vpack.c.bf16 %v9384_v8, %v9384_v8 }
0x12f5   :  { %v9386_v20 = vpop.eup %9385  ;;  %3019 = vadd.xlane.f32.xlu0 %v3018_v17 }
0x12f6   :  { %8784 = vmatmul.mubr.msk.bf16.vlgmr.msra.gmra.mrb[104].mxu1 %vm230_vm2, %v3030_v18  ;;  %v3021_v21 = vsel %vm230_vm2, %v9386_v20, 0.0  ;;  %v3031_v23 = vpack.c.bf16 %v9386_v20, %v9386_v20 }
0x12f7   :  { %8794 = vmatpush3.bf16.msra.mxu1 %v3134_v6  ;;  %3022 = vadd.xlane.f32.xlu1 %v3021_v21 }
0x12f8   :  { %8790 = vmatmul.mubr.msk.bf16.vlgmr.msra.gmra.mrb[104].mxu0 %vm230_vm2, %v3031_v23  ;;  %8795 = vmatprep.mubr.msk.bf16.mxu1 %vm9544_vm0, %v9543_v0 }
0x12f9   :  { %8800 = vmatpush3.bf16.msra.mxu0 %v3180_v24  ;;  %8801 = vmatprep.mubr.msk.bf16.mxu0 %vm9544_vm0, %v9543_v0 }
0x12fa   :  { %8817 = vmatprep.subr.bf16.mxu0 %v3356_v11  ;;  %9329 = vmatprep.subr.msk.bf16.mxu1 %vm348_vm3, %v3234_v59 }
0x12fb   :  { %v9388_v10 = vpop.eup %9387 }
0x12fc   :  { %v3024_v27 = vsel %vm230_vm2, %v9388_v10, 0.0  ;;  %v3032_v30 = vpack.c.bf16 %v9388_v10, %v9388_v10 }
0x12fd   :  { %v9390_v31 = vpop.eup %9389  ;;  %3025 = vadd.xlane.f32.xlu0 %v3024_v27 }
0x12fe   :  { %8796 = vmatmul.mubr.msk.bf16.vlgmr.msra.gmra.mrb[108].mxu1 %vm230_vm2, %v3032_v30  ;;  %v3027_v49 = vsel %vm230_vm2, %v9390_v31, 0.0  ;;  %v3033_v32 = vpack.c.bf16 %v9390_v31, %v9390_v31 }
0x12ff   :  { %3028 = vadd.xlane.f32.xlu1 %v3027_v49  ;;  %8806 = vmatpush3.bf16.msra.mxu1 %v3242_v50  ;;  %v7895_v49 = vld [vmem:[%s11393_s4 + $0x2c0] sm:$0xff]  ;;  %v7897_v50 = vld [vmem:[%s11393_s4 + $0x2d0] sm:$0xff] }
0x1300   :  { %8802 = vmatmul.mubr.msk.bf16.vlgmr.msra.gmra.mrb[108].mxu0 %vm230_vm2, %v3033_v32  ;;  %9330 = vmatprep.subr.msk.bf16.mxu1 %vm348_vm3, %v2614_v51  ;;  %v7896_v32 = vld [vmem:[%s11393_s4 + $0x2c8] sm:$0xff]  ;;  %v7892_v51 = vld [vmem:[%s11395_s5 + $0x12] ss:$0 sm:$0xff] }
0x1301   :  { %8818 = vmatpush3.bf16.msra.mxu0 %v3356_v11  ;;  %2399 = vadd.xlane.f32.xlu0 %v2398_v42 }
0x1302   :  { %8819 = vmatprep.subr.bf16.mxu0 %v3357_v33  ;;  %8821 = vmatprep.mubr.msk.bf16.mxu0 %vm73_vm1, %v10108_v29 }
0x1303   :  { %2402 = vadd.xlane.f32.xlu1 %v2401_v15 }
0x1305   :  { %8820 = vmatpush3.bf16.msra.mxu0 %v3357_v33  ;;  %2405 = vadd.xlane.f32.xlu0 %v2404_v35  ;;  %v3478_v35 = vpack.c.bf16 %v7896_v32, %v7895_v49 }
0x1306   :  { %8825 = vmatprep.subr.bf16.mxu0 %v3417_v19 }
0x1307   :  { %2408 = vadd.xlane.f32.xlu1 %v2407_v45 }
0x1308   :  { %8822 = vmatmul.mubr.msk.bf16.vlgmr.msra.gmra.mrb[112].mxu0 %vm73_vm1, %v10133_v39 }
0x1309   :  { %8826 = vmatpush3.bf16.msra.mxu0 %v3417_v19  ;;  %8829 = vmatprep.mubr.msk.bf16.mxu0 %vm73_vm1, %v10108_v29 }
0x130a   :  { %8827 = vmatprep.subr.bf16.mxu0 %v3418_v47 }
0x130d   :  { %8828 = vmatpush3.bf16.msra.mxu0 %v3418_v47 }
0x130e   :  { %8841 = vmatprep.subr.bf16.mxu0 %v9543_v0 }
0x1310   :  { %8830 = vmatmul.mubr.msk.bf16.vlgmr.msra.gmra.mrb[116].mxu0 %vm73_vm1, %v10133_v39 }
0x1311   :  { %8843 = vmatprep.mubr.msk.bf16.mxu0 %vm9544_vm0, %v9543_v0 }
0x1382   :  { %v3020_v52 = vpop.xlane.xlu0 %3019 }
0x1384   :  { %v3023_v53 = vpop.xlane.xlu1 %3022 }
0x138a   :  { %v3026_v40 = vpop.xlane.xlu0 %3025 }
0x138c   :  { %v3029_v54 = vpop.xlane.xlu1 %3028 }
0x138e   :  { %v2400_v57 = vpop.xlane.xlu0 %2399 }
0x138f   :  { %9391 = vrcp.f32 %v2400_v57 }
0x1390   :  { %v2403_v60 = vpop.xlane.xlu1 %2402 }
0x1391   :  { %9393 = vrcp.f32 %v2403_v60 }
0x1392   :  { %v2406_v61 = vpop.xlane.xlu0 %2405 }
0x1393   :  { %9395 = vrcp.f32 %v2406_v61 }
0x1394   :  { %v2409_v62 = vpop.xlane.xlu1 %2408 }
0x1395   :  { %9397 = vrcp.f32 %v2409_v62 }
0x1396   :  { %9399 = vrcp.f32 %v3020_v52  ;;  %v3479_v52 = vpack.c.bf16 %v7898_v48, %v7897_v50 }
0x1397   :  { %9401 = vrcp.f32 %v3023_v53 }
0x1398   :  { %9403 = vrcp.f32 %v3026_v40  ;;  %v7885_v40 = vld [vmem:[%s11395_s5 + $0xe] ss:$0 sm:$0xff] }
0x1399   :  { %v9392_v63 = vpop.eup %9391  ;;  %9405 = vrcp.f32 %v3029_v54 }
0x139a   :  { %v2606_v2 = vmul.f32 %v9392_v63, %v10323_v5 }
0x139b   :  { %v9394_v1 = vpop.eup %9393 }
0x139c   :  { %v2607_v3 = vmul.f32 %v9394_v1, %v10325_v7 }
0x139d   :  { %v9396_v4 = vpop.eup %9395 }
0x139e   :  { %v2612_v58 = vpack.c.bf16 %v2607_v3, %v2606_v2  ;;  %v2608_v8 = vmul.f32 %v9396_v4, %v10327_v12 }
0x139f   :  { %v9398_v56 = vpop.eup %9397 }
0x13a0   :  { %v2609_v9 = vmul.f32 %v9398_v56, %v10329_v16  ;;  %v9400_v17 = vpop.eup %9399 }
0x13a1   :  { %v9402_v20 = vpop.eup %9401 }
0x13a2   :  { %v2613_v13 = vpack.c.bf16 %v2609_v9, %v2608_v8  ;;  %v9404_v25 = vpop.eup %9403 }
0x13a3   :  { %v9406_v27 = vpop.eup %9405 }
0x13c9   :  { %v3078_v14 = vpop.f32.mrb[104].mxu1 }
0x13ca   :  { %v8785_v18 = vpop.f32.mrb[105].mxu1  ;;  %v3226_v21 = vmul.f32 %v9400_v17, %v3078_v14 }
0x13cb   :  { %v3081_v6 = vpop.f32.mrb[106].mxu1  ;;  %v3124_v5 = vpop.f32.mrb[104].mxu0 }
0x13cc   :  { %v3227_v7 = vmul.f32 %v9402_v20, %v3124_v5  ;;  %v8786_v23 = vpop.f32.mrb[107].mxu1  ;;  %v8791_v11 = vpop.f32.mrb[105].mxu0 }
0x13cd   :  { %v3127_v24 = vpop.f32.mrb[106].mxu0 }
0x13ce   :  { %v3232_v10 = vpack.c.bf16 %v3227_v7, %v3226_v21  ;;  %v8792_v12 = vpop.f32.mrb[107].mxu0 }
0x13cf   :  { %v7899_v12 = vld [vmem:[%s11395_s5 + $0x16] ss:$0 sm:$0xff] }
0x13d0   :  { %8807 = vmatprep.mubr.msk.bf16.mxu1 %vm230_vm2, %v3232_v10 }
0x13d1   :  { %v3170_v16 = vpop.f32.mrb[108].mxu1 }
0x13d2   :  { %v8797_v26 = vpop.f32.mrb[109].mxu1  ;;  %v3228_v33 = vmul.f32 %v9404_v25, %v3170_v16 }
0x13d3   :  { %v3173_v30 = vpop.f32.mrb[110].mxu1  ;;  %v3216_v31 = vpop.f32.mrb[108].mxu0 }
0x13d4   :  { %v3229_v34 = vmul.f32 %v9406_v27, %v3216_v31  ;;  %v8798_v38 = vpop.f32.mrb[111].mxu1  ;;  %v8803_v42 = vpop.f32.mrb[109].mxu0 }
0x13d5   :  { %v3219_v15 = vpop.f32.mrb[110].mxu0 }
0x13d6   :  { %v3233_v19 = vpack.c.bf16 %v3229_v34, %v3228_v33  ;;  %v8804_v44 = vpop.f32.mrb[111].mxu0 }
0x13d8   :  { %8808 = vmatmul.mubr.msk.bf16.vlgmr.msra.gmra.mrb[112].mxu1 %vm230_vm2, %v3233_v19 }
0x13d9   :  { %8812 = vmatpush3.bf16.msra.mxu1 %v3300_v43  ;;  %8813 = vmatprep.mubr.msk.bf16.mxu1 %vm230_vm2, %v2612_v58 }
0x13da   :  { %8833 = vmatprep.subr.bf16.mxu1 %v3478_v35 }
0x13db   :  { %v8823_v45 = vpop.f32.mrb[112].mxu0 }
0x13dc   :  { %v3397_v47 = vpop.f32.mrb[113].mxu0  ;;  %v3406_v8 = vadd.f32 %v8823_v45, %v7885_v40 }
0x13dd   :  { %v8824_v22 = vpop.f32.mrb[114].mxu0  ;;  %v3398_v62 = vadd.f32 %v7885_v40, %v3397_v47 }
0x13de   :  { %v3400_v59 = vpop.f32.mrb[115].mxu0  ;;  %v3536_v20 = vmul.f32 0.35355338, %v3406_v8  ;;  %v3409_v7 = vadd.f32 %v8824_v22, %v7885_v40 }
0x13df   :  { %v3534_v4 = vmul.f32 0.35355338, %v3398_v62 }
0x13e0   :  { %v3540_v21 = vpack.c.bf16 %v3536_v20, %v3536_v20  ;;  %v3537_v24 = vmul.f32 0.35355338, %v3409_v7 }
0x13e1   :  { %v3538_v9 = vpack.c.bf16 %v3534_v4, %v3534_v4 }
0x13e2   :  { %v3541_v10 = vpack.c.bf16 %v3537_v24, %v3537_v24 }
0x13e3   :  { %v8831_v53 = vpop.f32.mrb[116].mxu0 }
0x13e4   :  { %8814 = vmatmul.mubr.msk.bf16.vlgmr.msra.gmra.mrb[112].mxu1 %vm230_vm2, %v2613_v13  ;;  %v3458_v54 = vpop.f32.mrb[117].mxu0  ;;  %v3467_v1 = vadd.f32 %v8831_v53, %v7892_v51  ;;  %v3401_v13 = vadd.f32 %v7885_v40, %v3400_v59 }
0x13e5   :  { %v3459_v57 = vadd.f32 %v7892_v51, %v3458_v54  ;;  %8834 = vmatpush3.bf16.msra.mxu1 %v3478_v35  ;;  %v8832_v60 = vpop.f32.mrb[118].mxu0  ;;  %8837 = vmatprep.mubr.msk.bf16.mxu1 %vm73_vm1, %v10108_v29 }
0x13e6   :  { %v3461_v61 = vpop.f32.mrb[119].mxu0  ;;  %8835 = vmatprep.subr.bf16.mxu1 %v3479_v52  ;;  %v3544_v58 = vpack.c.bf16 %v3467_v1, %v3467_v1  ;;  %v3470_v17 = vadd.f32 %v8832_v60, %v7892_v51  ;;  %v3535_v6 = vmul.f32 0.35355338, %v3401_v13 }
0x13e7   :  { %v3542_v63 = vpack.c.bf16 %v3459_v57, %v3459_v57  ;;  %v3462_v3 = vadd.f32 %v7892_v51, %v3461_v61 }
0x13e8   :  { %v3642_v14 = vsel %vm230_vm2, %v3544_v58, 0  ;;  %v3545_v5 = vpack.c.bf16 %v3470_v17, %v3470_v17  ;;  %v3539_v23 = vpack.c.bf16 %v3535_v6, %v3535_v6 }
0x13e9   :  { %v3550_v2 = vsel %vm230_vm2, %v3542_v63, 0  ;;  %8836 = vmatpush3.bf16.msra.mxu1 %v3479_v52  ;;  %v3543_v56 = vpack.c.bf16 %v3462_v3, %v3462_v3 }
0x13ea   :  { %8842 = vmatpush3.bf16.xpose.msra.mxu0 %v3550_v2  ;;  %8847 = vmatprep.subr.bf16.mxu1 %v9543_v0  ;;  %v3688_v11 = vsel %vm230_vm2, %v3545_v5, 0 }
0x13eb   :  { %8853 = vmatprep.subr.bf16.mxu0 %v9543_v0  ;;  %v3596_v18 = vsel %vm230_vm2, %v3543_v56, 0 }
0x13ec   :  { %8838 = vmatmul.mubr.msk.bf16.vlgmr.msra.gmra.mrb[116].mxu1 %vm73_vm1, %v10133_v39 }
0x13ed   :  { %8849 = vmatprep.mubr.msk.bf16.mxu1 %vm9544_vm0, %v9543_v0 }
0x13f1   :  { %8844 = vmatmul.mubr.msk.bf16.vlgmr.msra.gmra.mrb[120].mxu0 %vm230_vm2, %v3538_v9 }
0x13f2   :  { %8848 = vmatpush3.bf16.xpose.msra.mxu1 %v3596_v18  ;;  %8854 = vmatpush3.bf16.xpose.msra.mxu0 %v3642_v14  ;;  %v7914_v18 = vld [vmem:[%s11393_s4 + $0x1e8] sm:$0xff] }
0x13f3   :  { %8855 = vmatprep.mubr.msk.bf16.mxu0 %vm9544_vm0, %v9543_v0  ;;  %8859 = vmatprep.subr.bf16.mxu1 %v9543_v0 }
0x13f4   :  { %8865 = vmatprep.subr.bf16.mxu0 %v9543_v0 }
0x13f9   :  { %8850 = vmatmul.mubr.msk.bf16.vlgmr.msra.gmra.mrb[120].mxu1 %vm230_vm2, %v3539_v23  ;;  %8856 = vmatmul.mubr.msk.bf16.vlgmr.msra.gmra.mrb[124].mxu0 %vm230_vm2, %v3540_v21 }
0x13fa   :  { %8860 = vmatpush3.bf16.xpose.msra.mxu1 %v3688_v11  ;;  %8861 = vmatprep.mubr.msk.bf16.mxu1 %vm9544_vm0, %v9543_v0 }
0x13fb   :  { %8871 = vmatprep.subr.bf16.mxu1 %v9543_v0  ;;  %8867 = vmatprep.mubr.msk.bf16.mxu0 %vm9544_vm0, %v9543_v0 }
0x1401   :  { %8862 = vmatmul.mubr.msk.bf16.vlgmr.msra.gmra.mrb[124].mxu1 %vm230_vm2, %v3541_v10 }
0x1402   :  { %8873 = vmatprep.mubr.msk.bf16.mxu1 %vm9544_vm0, %v9543_v0 }
0x14bf   :  { %v8839_v16 = vpop.f32.mrb[116].mxu1 }
0x14c0   :  { %v10503_v25 = vadd.f32 %v8839_v16, %v7899_v12  ;;  %v3519_v26 = vpop.f32.mrb[117].mxu1  ;;  %v7915_v16 = vld [vmem:[%s11393_s4 + $0x1f0] sm:$0xff] }
0x14c1   :  { %v3520_v27 = vadd.f32 %v7899_v12, %v3519_v26  ;;  %v8840_v30 = vpop.f32.mrb[118].mxu1 }
0x14c2   :  { %v10505_v31 = vadd.f32 %v8840_v30, %v7899_v12  ;;  %v3522_v49 = vpop.f32.mrb[119].mxu1  ;;  %v3772_v20 = vpack.c.bf16 %v10503_v25, %v10503_v25  ;;  %v7916_v25 = vld [vmem:[%s11393_s4 + $0x1f8] sm:$0xff] }
0x14c3   :  { %v3770_v32 = vpack.c.bf16 %v3520_v27, %v3520_v27  ;;  %v3523_v33 = vadd.f32 %v7899_v12, %v3522_v49 }
0x14c4   :  { %v3586_v34 = vpop.f32.mrb[120].mxu0  ;;  %v3870_v24 = vsel %vm348_vm3, %v3772_v20, 0  ;;  %v3773_v12 = vpack.c.bf16 %v10505_v31, %v10505_v31 }
0x14c5   :  { %v3778_v38 = vsel %vm348_vm3, %v3770_v32, 0  ;;  %v3771_v42 = vpack.c.bf16 %v3523_v33, %v3523_v33  ;;  %v3587_v15 = vadd.f32 %v3586_v34, %v10224_v36  ;;  %v8845_v19 = vpop.f32.mrb[121].mxu0  ;;  %v4039_v34 = vpack.c.bf16 %v7916_v25, %v7915_v16 }
0x14c6   :  { %v3589_v44 = vpop.f32.mrb[122].mxu0  ;;  %8866 = vmatpush3.bf16.msra.mxu0 %v3778_v38  ;;  %v3916_v31 = vsel %vm348_vm3, %v3773_v12, 0  ;;  %v7920_v38 = vld [vmem:[%s11393_s4 + $0x260] sm:$0xff]  ;;  %v7922_v19 = vld [vmem:[%s11393_s4 + $0x270] sm:$0xff] }
0x14c7   :  { %v3824_v43 = vsel %vm348_vm3, %v3771_v42, 0  ;;  %v8846_v35 = vpop.f32.mrb[123].mxu0  ;;  %v3730_v45 = vsel %vm230_vm2, %v3587_v15, -inf  ;;  %8877 = vmatprep.subr.bf16.mxu0 %v9543_v0  ;;  %v7921_v42 = vld [vmem:[%s11393_s4 + $0x268] sm:$0xff]  ;;  %v7923_v44 = vld [vmem:[%s11393_s4 + $0x278] sm:$0xff] }
0x14c8   :  { %3731 = vmax.xlane.f32.xlu0 %v3730_v45  ;;  %8872 = vmatpush3.bf16.msra.mxu1 %v3824_v43 }
0x14c9   :  { %8883 = vmatprep.subr.bf16.mxu1 %v9543_v0 }
0x14cc   :  { %v3632_v47 = vpop.f32.mrb[120].mxu1  ;;  %v3678_v22 = vpop.f32.mrb[124].mxu0 }
0x14cd   :  { %v3633_v59 = vadd.f32 %v3632_v47, %v10229_v55  ;;  %v8851_v50 = vpop.f32.mrb[121].mxu1  ;;  %v3679_v48 = vadd.f32 %v3678_v22, %v10224_v36  ;;  %v8857_v51 = vpop.f32.mrb[125].mxu0  ;;  %v4100_v47 = vpack.c.bf16 %v7923_v44, %v7922_v19  ;;  %v7910_v22 = vld [vmem:[%s11397_s6 + $0x30] sm:$0xff] }
0x14ce   :  { %v3635_v52 = vpop.f32.mrb[122].mxu1  ;;  %v3681_v53 = vpop.f32.mrb[126].mxu0  ;;  %v7928_v51 = vld [vmem:[%s11393_s4 + $0x2e8] sm:$0xff] }
0x14cf   :  { %v8852_v40 = vpop.f32.mrb[123].mxu1  ;;  %v8858_v54 = vpop.f32.mrb[127].mxu0  ;;  %v3733_v57 = vsel %vm230_vm2, %v3633_v59, -inf  ;;  %v3736_v60 = vsel %vm230_vm2, %v3679_v48, -inf }
0x14d0   :  { %3734 = vmax.xlane.f32.xlu1 %v3733_v57  ;;  %3737 = vmax.xlane.f32.xlu0 %v3736_v60 }
0x14d4   :  { %v3724_v61 = vpop.f32.mrb[124].mxu1 }
0x14d5   :  { %v3725_v62 = vadd.f32 %v3724_v61, %v10229_v55  ;;  %v8863_v63 = vpop.f32.mrb[125].mxu1  ;;  %v7913_v55 = vld [vmem:[%s11393_s4 + $0x1e0] sm:$0xff] }
0x14d6   :  { %v3727_v1 = vpop.f32.mrb[126].mxu1  ;;  %v4038_v23 = vpack.c.bf16 %v7914_v18, %v7913_v55 }
0x14d7   :  { %v8864_v2 = vpop.f32.mrb[127].mxu1  ;;  %v3739_v3 = vsel %vm230_vm2, %v3725_v62, -inf }
0x14d8   :  { %3740 = vmax.xlane.f32.xlu1 %v3739_v3 }
0x1555   :  { %v3732_v36 = vpop.xlane.xlu0 %3731 }
0x1556   :  { %v3742_v4 = vsub.f32 %v3587_v15, %v3732_v36  ;;  %v4099_v15 = vpack.c.bf16 %v7921_v42, %v7920_v38 }
0x1558   :  { %v3746_v58 = vmul.f32 1.442695, %v3742_v4 }
0x155a   :  { %9407 = vpow2.f32 %v3746_v58 }
0x155d   :  { %v3735_v56 = vpop.xlane.xlu1 %3734  ;;  %v3738_v8 = vpop.xlane.xlu0 %3737 }
0x155e   :  { %v3743_v9 = vsub.f32 %v3633_v59, %v3735_v56  ;;  %v3744_v13 = vsub.f32 %v3679_v48, %v3738_v8  ;;  %v3970_v59 = vpack.c.bf16 %v7910_v22, %v7910_v22  ;;  %v7927_v48 = vld [vmem:[%s11393_s4 + $0x2e0] sm:$0xff] }
0x155f   :  { %v4160_v52 = vpack.c.bf16 %v7928_v51, %v7927_v48 }
0x1560   :  { %v3748_v14 = vmul.f32 1.442695, %v3743_v9  ;;  %v3750_v17 = vmul.f32 1.442695, %v3744_v13  ;;  %v3978_v50 = vsel %vm348_vm3, %v3970_v59, 0 }
0x1562   :  { %9409 = vpow2.f32 %v3748_v14 }
0x1563   :  { %9411 = vpow2.f32 %v3750_v17 }
0x1564   :  { %v9408_v6 = vpop.eup %9407 }
0x1565   :  { %v3741_v5 = vpop.xlane.xlu1 %3740  ;;  %v3754_v21 = vsel %vm230_vm2, %v9408_v6, 0.0  ;;  %v3766_v7 = vpack.c.bf16 %v9408_v6, %v9408_v6 }
0x1566   :  { %v3745_v11 = vsub.f32 %v3725_v62, %v3741_v5  ;;  %3755 = vadd.xlane.f32.xlu0 %v3754_v21  ;;  %v7929_v5 = vld [vmem:[%s11393_s4 + $0x2f0] sm:$0xff]  ;;  %v7930_v21 = vld [vmem:[%s11393_s4 + $0x2f8] sm:$0xff] }
0x1567   :  { %8868 = vmatmul.mubr.msk.bf16.vlgmr.msra.gmra.mrb[128].mxu0 %vm230_vm2, %v3766_v7 }
0x1568   :  { %v3752_v10 = vmul.f32 1.442695, %v3745_v11  ;;  %8878 = vmatpush3.bf16.msra.mxu0 %v3870_v24  ;;  %8879 = vmatprep.mubr.msk.bf16.mxu0 %vm9544_vm0, %v9543_v0 }
0x1569   :  { %8895 = vmatprep.subr.bf16.mxu0 %v4038_v23 }
0x156a   :  { %9413 = vpow2.f32 %v3752_v10 }
0x156c   :  { %v9410_v26 = vpop.eup %9409 }
0x156d   :  { %v9412_v27 = vpop.eup %9411  ;;  %v3757_v30 = vsel %vm230_vm2, %v9410_v26, 0.0  ;;  %v3767_v49 = vpack.c.bf16 %v9410_v26, %v9410_v26 }
0x156e   :  { %3758 = vadd.xlane.f32.xlu1 %v3757_v30  ;;  %v3760_v32 = vsel %vm230_vm2, %v9412_v27, 0.0  ;;  %v3768_v33 = vpack.c.bf16 %v9412_v27, %v9412_v27  ;;  %v4161_v27 = vpack.c.bf16 %v7930_v21, %v7929_v5 }
0x156f   :  { %3761 = vadd.xlane.f32.xlu0 %v3760_v32  ;;  %8874 = vmatmul.mubr.msk.bf16.vlgmr.msra.gmra.mrb[128].mxu1 %vm230_vm2, %v3767_v49  ;;  %v7924_v49 = vld [vmem:[%s11395_s5 + $0x13] ss:$0 sm:$0xff] }
0x1570   :  { %8884 = vmatpush3.bf16.msra.mxu1 %v3916_v31  ;;  %8880 = vmatmul.mubr.msk.bf16.vlgmr.msra.gmra.mrb[132].mxu0 %vm230_vm2, %v3768_v33  ;;  %v7917_v33 = vld [vmem:[%s11395_s5 + $0xf] ss:$0 sm:$0xff] }
0x1571   :  { %8896 = vmatpush3.bf16.msra.mxu0 %v4038_v23  ;;  %8885 = vmatprep.mubr.msk.bf16.mxu1 %vm9544_vm0, %v9543_v0 }
0x1572   :  { %8897 = vmatprep.subr.bf16.mxu0 %v4039_v34  ;;  %8899 = vmatprep.mubr.msk.bf16.mxu0 %vm73_vm1, %v10108_v29 }
0x1573   :  { %9331 = vmatprep.subr.msk.bf16.mxu1 %vm348_vm3, %v3970_v59 }
0x1574   :  { %v9414_v43 = vpop.eup %9413 }
0x1575   :  { %8898 = vmatpush3.bf16.msra.mxu0 %v4039_v34  ;;  %v3763_v35 = vsel %vm230_vm2, %v9414_v43, 0.0  ;;  %v3769_v45 = vpack.c.bf16 %v9414_v43, %v9414_v43 }
0x1576   :  { %3764 = vadd.xlane.f32.xlu1 %v3763_v35  ;;  %8903 = vmatprep.subr.bf16.mxu0 %v4099_v15 }
0x1577   :  { %8886 = vmatmul.mubr.msk.bf16.vlgmr.msra.gmra.mrb[132].mxu1 %vm230_vm2, %v3769_v45 }
0x1578   :  { %8900 = vmatmul.mubr.msk.bf16.vlgmr.msra.gmra.mrb[136].mxu0 %vm73_vm1, %v10133_v39  ;;  %8890 = vmatpush3.bf16.msra.mxu1 %v3978_v50 }
0x1579   :  { %8904 = vmatpush3.bf16.msra.mxu0 %v4099_v15  ;;  %8907 = vmatprep.mubr.msk.bf16.mxu0 %vm73_vm1, %v10108_v29 }
0x157a   :  { %8905 = vmatprep.subr.bf16.mxu0 %v4100_v47  ;;  %8911 = vmatprep.subr.bf16.mxu1 %v4160_v52 }
0x157d   :  { %8906 = vmatpush3.bf16.msra.mxu0 %v4100_v47 }
0x157e   :  { %8919 = vmatprep.subr.bf16.mxu0 %v9543_v0 }
0x1580   :  { %8908 = vmatmul.mubr.msk.bf16.vlgmr.msra.gmra.mrb[140].mxu0 %vm73_vm1, %v10133_v39 }
0x1581   :  { %8921 = vmatprep.mubr.msk.bf16.mxu0 %vm9544_vm0, %v9543_v0 }
0x15f3   :  { %v3756_v53 = vpop.xlane.xlu0 %3755 }
0x15f4   :  { %9415 = vrcp.f32 %v3756_v53 }
0x15fb   :  { %v3759_v40 = vpop.xlane.xlu1 %3758 }
0x15fc   :  { %9417 = vrcp.f32 %v3759_v40  ;;  %v3762_v60 = vpop.xlane.xlu0 %3761 }
0x15fd   :  { %9419 = vrcp.f32 %v3762_v60 }
0x15fe   :  { %v9416_v1 = vpop.eup %9415 }
0x1603   :  { %v3765_v62 = vpop.xlane.xlu1 %3764 }
0x1604   :  { %9421 = vrcp.f32 %v3765_v62 }
0x1606   :  { %v9418_v2 = vpop.eup %9417 }
0x1607   :  { %v9420_v18 = vpop.eup %9419 }
0x160e   :  { %v9422_v20 = vpop.eup %9421 }
0x163a   :  { %v3814_v54 = vpop.f32.mrb[128].mxu0 }
0x163b   :  { %v8869_v57 = vpop.f32.mrb[129].mxu0  ;;  %v3962_v36 = vmul.f32 %v9416_v1, %v3814_v54  ;;  %v7931_v1 = vld [vmem:[%s11395_s5 + $0x17] ss:$0 sm:$0xff] }
0x163c   :  { %v3817_v61 = vpop.f32.mrb[130].mxu0 }
0x163d   :  { %v8870_v63 = vpop.f32.mrb[131].mxu0 }
0x1642   :  { %v3860_v3 = vpop.f32.mrb[128].mxu1 }
0x1643   :  { %v3963_v4 = vmul.f32 %v9418_v2, %v3860_v3  ;;  %v8875_v58 = vpop.f32.mrb[129].mxu1  ;;  %v3906_v56 = vpop.f32.mrb[132].mxu0 }
0x1644   :  { %v3863_v8 = vpop.f32.mrb[130].mxu1  ;;  %v8881_v9 = vpop.f32.mrb[133].mxu0  ;;  %v3964_v7 = vmul.f32 %v9420_v18, %v3906_v56 }
0x1645   :  { %v3968_v13 = vpack.c.bf16 %v3963_v4, %v3962_v36  ;;  %v8876_v14 = vpop.f32.mrb[131].mxu1  ;;  %v3909_v17 = vpop.f32.mrb[134].mxu0 }
0x1646   :  { %v8882_v55 = vpop.f32.mrb[135].mxu0 }
0x1647   :  { %8891 = vmatprep.mubr.msk.bf16.mxu1 %vm230_vm2, %v3968_v13 }
0x164a   :  { %v3952_v6 = vpop.f32.mrb[132].mxu1 }
0x164b   :  { %v3965_v23 = vmul.f32 %v9422_v20, %v3952_v6  ;;  %v8887_v11 = vpop.f32.mrb[133].mxu1  ;;  %v8901_v24 = vpop.f32.mrb[136].mxu0  ;;  %v9533_v20 = vld [vmem:[%s11403_s3] sm:$0xff] }
0x164c   :  { %v3955_v10 = vpop.f32.mrb[134].mxu1  ;;  %v4079_v12 = vpop.f32.mrb[137].mxu0 }
0x164d   :  { %v3969_v16 = vpack.c.bf16 %v3965_v23, %v3964_v7  ;;  %v8888_v25 = vpop.f32.mrb[135].mxu1  ;;  %v8902_v26 = vpop.f32.mrb[138].mxu0  ;;  %v4080_v15 = vadd.f32 %v7917_v33, %v4079_v12 }
0x164e   :  { %v4082_v30 = vpop.f32.mrb[139].mxu0  ;;  %v4091_v40 = vadd.f32 %v8902_v26, %v7917_v33 }
0x164f   :  { %8892 = vmatmul.mubr.msk.bf16.vlgmr.msra.gmra.mrb[112].mxu1 %vm230_vm2, %v3969_v16  ;;  %v4083_v45 = vadd.f32 %v7917_v33, %v4082_v30  ;;  %v4216_v47 = vmul.f32 0.35355338, %v4080_v15 }
0x1650   :  { %8912 = vmatpush3.bf16.msra.mxu1 %v4160_v52  ;;  %8915 = vmatprep.mubr.msk.bf16.mxu1 %vm73_vm1, %v10108_v29  ;;  %v4219_v61 = vmul.f32 0.35355338, %v4091_v40 }
0x1651   :  { %8913 = vmatprep.subr.bf16.mxu1 %v4161_v27  ;;  %v4217_v48 = vmul.f32 0.35355338, %v4083_v45  ;;  %v4220_v51 = vpack.c.bf16 %v4216_v47, %v4216_v47 }
0x1652   :  { %v4223_v63 = vpack.c.bf16 %v4219_v61, %v4219_v61 }
0x1653   :  { %v8909_v32 = vpop.f32.mrb[140].mxu0  ;;  %v4221_v54 = vpack.c.bf16 %v4217_v48, %v4217_v48 }
0x1654   :  { %8914 = vmatpush3.bf16.msra.mxu1 %v4161_v27  ;;  %v4140_v34 = vpop.f32.mrb[141].mxu0  ;;  %v4149_v44 = vadd.f32 %v8909_v32, %v7924_v49 }
0x1655   :  { %v4141_v31 = vadd.f32 %v7924_v49, %v4140_v34  ;;  %v8910_v38 = vpop.f32.mrb[142].mxu0  ;;  %8925 = vmatprep.subr.bf16.mxu1 %v9543_v0 }
0x1656   :  { %v4143_v42 = vpop.f32.mrb[143].mxu0  ;;  %v4152_v59 = vadd.f32 %v8910_v38, %v7924_v49  ;;  %v4226_v50 = vpack.c.bf16 %v4149_v44, %v4149_v44 }
0x1657   :  { %v4224_v19 = vpack.c.bf16 %v4141_v31, %v4141_v31  ;;  %v4144_v29 = vadd.f32 %v7924_v49, %v4143_v42  ;;  %8916 = vmatmul.mubr.msk.bf16.vlgmr.msra.gmra.mrb[136].mxu1 %vm73_vm1, %v10133_v39  ;;  %v4088_v39 = vadd.f32 %v8901_v24, %v7917_v33  ;;  %v9534_v24 = vld [vmem:[%s11403_s3 + $0x8] sm:$0xff] }
0x1658   :  { %8927 = vmatprep.mubr.msk.bf16.mxu1 %vm9544_vm0, %v9543_v0  ;;  %v4227_v52 = vpack.c.bf16 %v4152_v59, %v4152_v59  ;;  %v4324_v53 = vsel %vm230_vm2, %v4226_v50, 0 }
0x1659   :  { %v4232_v43 = vsel %vm230_vm2, %v4224_v19, 0  ;;  %v4225_v35 = vpack.c.bf16 %v4144_v29, %v4144_v29  ;;  %v4218_v57 = vmul.f32 0.35355338, %v4088_v39 }
0x165a   :  { %8920 = vmatpush3.bf16.xpose.msra.mxu0 %v4232_v43  ;;  %v4370_v60 = vsel %vm230_vm2, %v4227_v52, 0 }
0x165b   :  { %v4278_v22 = vsel %vm230_vm2, %v4225_v35, 0  ;;  %8931 = vmatprep.subr.bf16.mxu0 %v9543_v0  ;;  %v4222_v62 = vpack.c.bf16 %v4218_v57, %v4218_v57 }
0x165d   :  { %8926 = vmatpush3.bf16.xpose.msra.mxu1 %v4278_v22 }
0x165e   :  { %8937 = vmatprep.subr.bf16.mxu1 %v9543_v0 }
0x1661   :  { %8922 = vmatmul.mubr.msk.bf16.vlgmr.msra.gmra.mrb[144].mxu0 %vm230_vm2, %v4220_v51 }
0x1662   :  { %8932 = vmatpush3.bf16.xpose.msra.mxu0 %v4324_v53  ;;  %8933 = vmatprep.mubr.msk.bf16.mxu0 %vm9544_vm0, %v9543_v0 }
0x1663   :  { %8943 = vmatprep.subr.bf16.mxu0 %v9543_v0 }
0x1664   :  { %8928 = vmatmul.mubr.msk.bf16.vlgmr.msra.gmra.mrb[140].mxu1 %vm230_vm2, %v4221_v54 }
0x1665   :  { %8938 = vmatpush3.bf16.xpose.msra.mxu1 %v4370_v60  ;;  %8939 = vmatprep.mubr.msk.bf16.mxu1 %vm9544_vm0, %v9543_v0 }
0x1666   :  { %8949 = vmatprep.subr.bf16.mxu1 %v9543_v0 }
0x1669   :  { %8934 = vmatmul.mubr.msk.bf16.vlgmr.msra.gmra.mrb[148].mxu0 %vm230_vm2, %v4222_v62 }
0x166a   :  { %8945 = vmatprep.mubr.msk.bf16.mxu0 %vm9544_vm0, %v9543_v0 }
0x166c   :  { %8940 = vmatmul.mubr.msk.bf16.vlgmr.msra.gmra.mrb[144].mxu1 %vm230_vm2, %v4223_v63 }
0x166d   :  { %8951 = vmatprep.mubr.msk.bf16.mxu1 %vm9544_vm0, %v9543_v0 }
0x172a   :  { %v8917_v2 = vpop.f32.mrb[136].mxu1 }
0x172b   :  { %v10627_v3 = vadd.f32 %v8917_v2, %v7931_v1  ;;  %v4201_v36 = vpop.f32.mrb[137].mxu1 }
0x172c   :  { %v4202_v4 = vadd.f32 %v7931_v1, %v4201_v36  ;;  %v8918_v58 = vpop.f32.mrb[138].mxu1 }
0x172d   :  { %v10629_v56 = vadd.f32 %v8918_v58, %v7931_v1  ;;  %v4204_v8 = vpop.f32.mrb[139].mxu1  ;;  %v4454_v52 = vpack.c.bf16 %v10627_v3, %v10627_v3 }
0x172e   :  { %v4452_v9 = vpack.c.bf16 %v4202_v4, %v4202_v4  ;;  %v4205_v13 = vadd.f32 %v7931_v1, %v4204_v8 }
0x172f   :  { %v4455_v60 = vpack.c.bf16 %v10629_v56, %v10629_v56  ;;  %v4552_v62 = vsel %vm348_vm3, %v4454_v52, 0 }
0x1730   :  { %v4460_v14 = vsel %vm348_vm3, %v4452_v9, 0  ;;  %v4453_v17 = vpack.c.bf16 %v4205_v13, %v4205_v13  ;;  %v7942_v9 = vld [vmem:[%s11397_s6 + $0x38] sm:$0xff] }
0x1731   :  { %8944 = vmatpush3.bf16.msra.mxu0 %v4460_v14  ;;  %v4598_v2 = vsel %vm348_vm3, %v4455_v60, 0  ;;  %v4652_v13 = vpack.c.bf16 %v7942_v9, %v7942_v9 }
0x1732   :  { %v4506_v55 = vsel %vm348_vm3, %v4453_v17, 0  ;;  %8955 = vmatprep.subr.bf16.mxu0 %v9543_v0 }
0x1733   :  { %8950 = vmatpush3.bf16.msra.mxu1 %v4506_v55  ;;  %v4660_v14 = vsel %vm348_vm3, %v4652_v13, 0 }
0x1734   :  { %v4268_v18 = vpop.f32.mrb[144].mxu0  ;;  %8961 = vmatprep.subr.bf16.mxu1 %v9543_v0 }
0x1735   :  { %v4269_v6 = vadd.f32 %v9533_v20, %v4268_v18  ;;  %v8923_v5 = vpop.f32.mrb[145].mxu0 }
0x1736   :  { %v4271_v21 = vpop.f32.mrb[146].mxu0 }
0x1737   :  { %v4314_v7 = vpop.f32.mrb[140].mxu1  ;;  %v8924_v23 = vpop.f32.mrb[147].mxu0  ;;  %v4412_v11 = vsel %vm230_vm2, %v4269_v6, -inf }
0x1738   :  { %v4315_v10 = vadd.f32 %v9534_v24, %v4314_v7  ;;  %v8929_v12 = vpop.f32.mrb[141].mxu1  ;;  %4413 = vmax.xlane.f32.xlu0 %v4412_v11 }
0x1739   :  { %v4317_v16 = vpop.f32.mrb[142].mxu1 }
0x173a   :  { %v8930_v25 = vpop.f32.mrb[143].mxu1  ;;  %v4415_v26 = vsel %vm230_vm2, %v4315_v10, -inf }
0x173b   :  { %4416 = vmax.xlane.f32.xlu1 %v4415_v26 }
0x173c   :  { %v4360_v27 = vpop.f32.mrb[148].mxu0 }
0x173d   :  { %v4361_v30 = vadd.f32 %v9533_v20, %v4360_v27  ;;  %v8935_v49 = vpop.f32.mrb[149].mxu0 }
0x173e   :  { %v4363_v32 = vpop.f32.mrb[150].mxu0 }
0x173f   :  { %v4406_v33 = vpop.f32.mrb[144].mxu1  ;;  %v8936_v34 = vpop.f32.mrb[151].mxu0  ;;  %v4418_v31 = vsel %vm230_vm2, %v4361_v30, -inf }
0x1740   :  { %v4407_v38 = vadd.f32 %v9534_v24, %v4406_v33  ;;  %v8941_v42 = vpop.f32.mrb[145].mxu1  ;;  %4419 = vmax.xlane.f32.xlu0 %v4418_v31 }
0x1741   :  { %v4409_v15 = vpop.f32.mrb[146].mxu1 }
0x1742   :  { %v8942_v19 = vpop.f32.mrb[147].mxu1  ;;  %v4421_v29 = vsel %vm230_vm2, %v4407_v38, -inf }
0x1743   :  { %4422 = vmax.xlane.f32.xlu1 %v4421_v29 }
0x17c5   :  { %v4414_v44 = vpop.xlane.xlu0 %4413 }
0x17c6   :  { %v4424_v43 = vsub.f32 %v4269_v6, %v4414_v44 }
0x17c8   :  { %v4428_v35 = vmul.f32 1.442695, %v4424_v43  ;;  %v4417_v45 = vpop.xlane.xlu1 %4416 }
0x17c9   :  { %v4425_v47 = vsub.f32 %v4315_v10, %v4417_v45 }
0x17ca   :  { %9423 = vpow2.f32 %v4428_v35 }
0x17cb   :  { %v4430_v22 = vmul.f32 1.442695, %v4425_v47  ;;  %v7945_v47 = vld [vmem:[%s11398_s9 + $0x1] ss:$0 sm:$0xff] }
0x17cd   :  { %9425 = vpow2.f32 %v4430_v22  ;;  %v4420_v59 = vpop.xlane.xlu0 %4419  ;;  %v9535_v22 = vld [vmem:[%s11401_s1 + $0x10] sm:$0xff] }
0x17ce   :  { %v4426_v50 = vsub.f32 %v4361_v30, %v4420_v59 }
0x17d0   :  { %v4432_v48 = vmul.f32 1.442695, %v4426_v50  ;;  %v4423_v39 = vpop.xlane.xlu1 %4422  ;;  %v9536_v50 = vld [vmem:[%s11401_s1] sm:$0xff] }
0x17d1   :  { %v4427_v51 = vsub.f32 %v4407_v38, %v4423_v39 }
0x17d2   :  { %9427 = vpow2.f32 %v4432_v48 }
0x17d3   :  { %v4434_v53 = vmul.f32 1.442695, %v4427_v51  ;;  %v7813_v51 = vld [vmem:[%s11398_s9 + $0x3] ss:$0 sm:$0xff] }
0x17d4   :  { %v9424_v40 = vpop.eup %9423 }
0x17d5   :  { %9429 = vpow2.f32 %v4434_v53  ;;  %v4436_v54 = vsel %vm230_vm2, %v9424_v40, 0.0  ;;  %v4448_v57 = vpack.c.bf16 %v9424_v40, %v9424_v40  ;;  %v9537_v53 = vld [vmem:[%s11401_s1 + $0x18] sm:$0xff] }
0x17d6   :  { %4437 = vadd.xlane.f32.xlu0 %v4436_v54  ;;  %v9538_v54 = vld [vmem:[%s11401_s1 + $0x8] sm:$0xff] }
0x17d7   :  { %v9426_v61 = vpop.eup %9425  ;;  %8946 = vmatmul.mubr.msk.bf16.vlgmr.msra.gmra.mrb[152].mxu0 %vm230_vm2, %v4448_v57 }
0x17d8   :  { %8956 = vmatpush3.bf16.msra.mxu0 %v4552_v62  ;;  %v4439_v63 = vsel %vm230_vm2, %v9426_v61, 0.0  ;;  %v4449_v1 = vpack.c.bf16 %v9426_v61, %v9426_v61  ;;  %8957 = vmatprep.mubr.msk.bf16.mxu0 %vm9544_vm0, %v9543_v0  ;;  %v1939_v61 = vadd.f32 %v7813_v51, %v10206_v37 }
0x17d9   :  { %4440 = vadd.xlane.f32.xlu1 %v4439_v63 }
0x17da   :  { %8952 = vmatmul.mubr.msk.bf16.vlgmr.msra.gmra.mrb[148].mxu1 %vm230_vm2, %v4449_v1 }
0x17db   :  { %8962 = vmatpush3.bf16.msra.mxu1 %v4598_v2  ;;  %8963 = vmatprep.mubr.msk.bf16.mxu1 %vm9544_vm0, %v9543_v0  ;;  %v1942_v2 = vadd.f32 %v7813_v51, %v10208_v41 }
0x17dc   :  { %v9428_v3 = vpop.eup %9427  ;;  %9332 = vmatprep.subr.msk.bf16.mxu1 %vm348_vm3, %v4652_v13 }
0x17dd   :  { %v4442_v36 = vsel %vm230_vm2, %v9428_v3, 0.0  ;;  %v4450_v4 = vpack.c.bf16 %v9428_v3, %v9428_v3  ;;  %v1946_v37 = vadd.f32 %v1942_v2, %v10106_v46 }
0x17de   :  { %4443 = vadd.xlane.f32.xlu0 %v4442_v36 }
0x17df   :  { %v9430_v58 = vpop.eup %9429  ;;  %8958 = vmatmul.mubr.msk.bf16.vlgmr.msra.gmra.mrb[156].mxu0 %vm230_vm2, %v4450_v4  ;;  %v1952_v9 = vsel %vm73_vm1, %v1946_v37, 0.0 }
0x17e0   :  { %v4445_v56 = vsel %vm230_vm2, %v9430_v58, 0.0  ;;  %v4451_v8 = vpack.c.bf16 %v9430_v58, %v9430_v58  ;;  %v1945_v58 = vadd.f32 %v1939_v61, %v10104_v28 }
0x17e1   :  { %4446 = vadd.xlane.f32.xlu1 %v4445_v56 }
0x17e2   :  { %8964 = vmatmul.mubr.msk.bf16.vlgmr.msra.gmra.mrb[152].mxu1 %vm230_vm2, %v4451_v8  ;;  %v1949_v8 = vsel %vm73_vm1, %v1945_v58, 0.0 }
0x17e3   :  { %8968 = vmatpush3.bf16.msra.mxu1 %v4660_v14 }
0x17e4   :  { %8989 = vmatprep.subr.bf16.mxu1 %v9543_v0 }
0x1863   :  { %v4438_v17 = vpop.xlane.xlu0 %4437 }
0x1864   :  { %9431 = vrcp.f32 %v4438_v17 }
0x1866   :  { %v4441_v55 = vpop.xlane.xlu1 %4440 }
0x1867   :  { %9433 = vrcp.f32 %v4441_v55 }
0x186b   :  { %v4444_v18 = vpop.xlane.xlu0 %4443 }
0x186c   :  { %9435 = vrcp.f32 %v4444_v18 }
0x186e   :  { %v4447_v20 = vpop.xlane.xlu1 %4446  ;;  %v9432_v21 = vpop.eup %9431 }
0x186f   :  { %9437 = vrcp.f32 %v4447_v20 }
0x1871   :  { %v9434_v23 = vpop.eup %9433 }
0x1876   :  { %v9436_v32 = vpop.eup %9435 }
0x1879   :  { %v9438_v34 = vpop.eup %9437 }
0x18aa   :  { %v4496_v6 = vpop.f32.mrb[152].mxu0 }
0x18ab   :  { %v8947_v5 = vpop.f32.mrb[153].mxu0  ;;  %v4644_v10 = vmul.f32 %v9432_v21, %v4496_v6 }
0x18ac   :  { %v4499_v7 = vpop.f32.mrb[154].mxu0 }
0x18ad   :  { %v4542_v11 = vpop.f32.mrb[148].mxu1  ;;  %v8948_v24 = vpop.f32.mrb[155].mxu0 }
0x18ae   :  { %v4645_v12 = vmul.f32 %v9434_v23, %v4542_v11  ;;  %v8953_v16 = vpop.f32.mrb[149].mxu1 }
0x18af   :  { %v4545_v25 = vpop.f32.mrb[150].mxu1 }
0x18b0   :  { %v4650_v26 = vpack.c.bf16 %v4645_v12, %v4644_v10  ;;  %v8954_v27 = vpop.f32.mrb[151].mxu1 }
0x18b2   :  { %8969 = vmatprep.mubr.msk.bf16.mxu1 %vm230_vm2, %v4650_v26  ;;  %v4588_v30 = vpop.f32.mrb[156].mxu0 }
0x18b3   :  { %v8959_v49 = vpop.f32.mrb[157].mxu0  ;;  %v4646_v42 = vmul.f32 %v9436_v32, %v4588_v30 }
0x18b4   :  { %v4591_v33 = vpop.f32.mrb[158].mxu0 }
0x18b5   :  { %v4634_v31 = vpop.f32.mrb[152].mxu1  ;;  %v8960_v38 = vpop.f32.mrb[159].mxu0 }
0x18b6   :  { %v4647_v15 = vmul.f32 %v9438_v34, %v4634_v31  ;;  %v8965_v19 = vpop.f32.mrb[153].mxu1 }
0x18b7   :  { %v4637_v29 = vpop.f32.mrb[154].mxu1  ;;  %v7949_v19 = vld [vmem:[%s11393_s4 + $0x308] sm:$0xff] }
0x18b8   :  { %v4651_v44 = vpack.c.bf16 %v4647_v15, %v4646_v42  ;;  %v8966_v43 = vpop.f32.mrb[155].mxu1  ;;  %v7948_v15 = vld [vmem:[%s11393_s4 + $0x300] sm:$0xff] }
0x18b9   :  { %v4805_v29 = vpack.c.bf16 %v7949_v19, %v7948_v15  ;;  %v7951_v43 = vld [vmem:[%s11393_s4 + $0x318] sm:$0xff] }
0x18ba   :  { %8970 = vmatmul.mubr.msk.bf16.vlgmr.msra.gmra.mrb[112].mxu1 %vm230_vm2, %v4651_v44  ;;  %v7950_v44 = vld [vmem:[%s11393_s4 + $0x310] sm:$0xff] }
0x18bb   :  { %8993 = vmatprep.mubr.msk.bf16.mxu1 %vm9544_vm0, %v9543_v0  ;;  %8973 = vmatprep.subr.bf16.mxu0 %v4805_v29 }
0x18bc   :  { %8974 = vmatpush3.bf16.msra.mxu0 %v4805_v29 }
0x198d   :  { %v8971_v35 = vpop.f32.mrb[112].mxu1 }
0x198e   :  { %v4696_v45 = vpop.f32.mrb[113].mxu1  ;;  %v4717_v59 = vadd.f32 %v9535_v22, %v8971_v35  ;;  %v7961_v35 = vld [vmem:[%s11393_s4 + $0x400] sm:$0xff] }
0x198f   :  { %v4715_v48 = vadd.f32 %v9536_v50, %v4696_v45  ;;  %v8972_v39 = vpop.f32.mrb[114].mxu1  ;;  %v7962_v45 = vld [vmem:[%s11393_s4 + $0x408] sm:$0xff]  ;;  %v7964_v50 = vld [vmem:[%s11393_s4 + $0x418] sm:$0xff] }
0x1990   :  { %v4699_v52 = vpop.f32.mrb[115].mxu1  ;;  %v4718_v40 = vadd.f32 %v9537_v53, %v8972_v39  ;;  %v4726_v1 = vadd.f32 %v7945_v47, %v4717_v59  ;;  %v4929_v22 = vpack.c.bf16 %v7962_v45, %v7961_v35  ;;  %v7963_v59 = vld [vmem:[%s11393_s4 + $0x410] sm:$0xff] }
0x1991   :  { %v4716_v57 = vadd.f32 %v9538_v54, %v4699_v52  ;;  %v4724_v60 = vadd.f32 %v7945_v47, %v4715_v48  ;;  %v4930_v48 = vpack.c.bf16 %v7964_v50, %v7963_v59 }
0x1992   :  { %v4727_v36 = vadd.f32 %v7945_v47, %v4718_v40  ;;  %v4736_v4 = vsel %vm73_vm1, %v4726_v1, 0.0  ;;  %8990 = vmatpush3.bf16.msra.mxu1 %v4929_v22 }
0x1993   :  { %v4730_v62 = vsel %vm73_vm1, %v4724_v60, 0.0  ;;  %v4725_v63 = vadd.f32 %v7945_v47, %v4716_v57  ;;  %v4806_v47 = vpack.c.bf16 %v7951_v43, %v7950_v44  ;;  %8991 = vmatprep.subr.bf16.mxu1 %v9543_v0 }
0x1994   :  { %4731 = vadd.xlane.f32.xlu0 %v4730_v62  ;;  %v4739_v56 = vsel %vm73_vm1, %v4727_v36, 0.0 }
0x1995   :  { %v4733_v3 = vsel %vm73_vm1, %v4725_v63, 0.0  ;;  %8975 = vmatprep.subr.bf16.mxu0 %v4806_v47 }
0x1996   :  { %4734 = vadd.xlane.f32.xlu1 %v4733_v3  ;;  %8976 = vmatpush3.bf16.msra.mxu0 %v4806_v47 }
0x1997   :  { %8981 = vmatprep.subr.bf16.mxu0 %v9543_v0  ;;  %8992 = vmatpush3.bf16.msra.mxu1 %v4930_v48  ;;  %v7959_v48 = vld [vmem:[%s11395_s5 + $0x1c] ss:$0 sm:$0xff] }
0x1998   :  { %4737 = vadd.xlane.f32.xlu0 %v4736_v4  ;;  %9003 = vmatprep.subr.bf16.mxu1 %v9543_v0 }
0x199a   :  { %4740 = vadd.xlane.f32.xlu1 %v4739_v56 }
0x199c   :  { %1950 = vadd.xlane.f32.xlu0 %v1949_v8  ;;  %v7946_v8 = vld [vmem:[%s11398_s9 + $0x9] ss:$0 sm:$0xff] }
0x199e   :  { %1953 = vadd.xlane.f32.xlu1 %v1952_v9 }
0x1a21   :  { %v4732_v41 = vpop.xlane.xlu0 %4731 }
0x1a22   :  { %v4742_v13 = vmul.f32 0.03125, %v4732_v41 }
0x1a23   :  { %v4735_v14 = vpop.xlane.xlu1 %4734 }
0x1a24   :  { %v10701_v17 = vsub.f32 %v4724_v60, %v4742_v13  ;;  %v4743_v55 = vmul.f32 0.03125, %v4735_v14 }
0x1a25   :  { %v4738_v18 = vpop.xlane.xlu0 %4737 }
0x1a26   :  { %v10703_v28 = vsub.f32 %v4725_v63, %v4743_v55  ;;  %v4744_v20 = vmul.f32 0.03125, %v4738_v18  ;;  %v4750_v46 = vmul.f32 %v10701_v17, %v10701_v17  ;;  %v7947_v18 = vld [vmem:[%s11398_s9 + $0xa] ss:$0 sm:$0xff] }
0x1a27   :  { %v4741_v6 = vpop.xlane.xlu1 %4740 }
0x1a28   :  { %v10707_v5 = vsub.f32 %v4726_v1, %v4744_v20  ;;  %v4745_v21 = vmul.f32 0.03125, %v4741_v6  ;;  %v4754_v7 = vsel %vm73_vm1, %v4750_v46, 0.0  ;;  %v4751_v23 = vmul.f32 %v10703_v28, %v10703_v28 }
0x1a29   :  { %4755 = vadd.xlane.f32.xlu0 %v4754_v7  ;;  %v1951_v11 = vpop.xlane.xlu0 %1950 }
0x1a2a   :  { %v10712_v24 = vsub.f32 %v4727_v36, %v4745_v21  ;;  %v1955_v10 = vmul.f32 0.03125, %v1951_v11  ;;  %v4757_v12 = vsel %vm73_vm1, %v4751_v23, 0.0  ;;  %v4752_v16 = vmul.f32 %v10707_v5, %v10707_v5 }
0x1a2b   :  { %4758 = vadd.xlane.f32.xlu1 %v4757_v12  ;;  %v1954_v25 = vpop.xlane.xlu1 %1953 }
0x1a2c   :  { %v10717_v26 = vsub.f32 %v1945_v58, %v1955_v10  ;;  %v1956_v27 = vmul.f32 0.03125, %v1954_v25  ;;  %v4760_v30 = vsel %vm73_vm1, %v4752_v16, 0.0  ;;  %v4753_v49 = vmul.f32 %v10712_v24, %v10712_v24  ;;  %v7956_v16 = vld [vmem:[%s11393_s4 + $0x388] sm:$0xff] }
0x1a2d   :  { %4761 = vadd.xlane.f32.xlu0 %v4760_v30 }
0x1a2e   :  { %v10722_v32 = vsub.f32 %v1946_v37, %v1956_v27  ;;  %v4763_v33 = vsel %vm73_vm1, %v4753_v49, 0.0  ;;  %v1959_v34 = vmul.f32 %v10717_v26, %v10717_v26 }
0x1a2f   :  { %4764 = vadd.xlane.f32.xlu1 %v4763_v33  ;;  %v7816_v33 = vld [vmem:[%s11398_s9 + $0x8] ss:$0 sm:$0xff] }
0x1a30   :  { %v1961_v31 = vsel %vm73_vm1, %v1959_v34, 0.0  ;;  %v1960_v38 = vmul.f32 %v10722_v32, %v10722_v32 }
0x1a31   :  { %1962 = vadd.xlane.f32.xlu0 %v1961_v31 }
0x1a32   :  { %v1964_v42 = vsel %vm73_vm1, %v1960_v38, 0.0 }
0x1a33   :  { %1965 = vadd.xlane.f32.xlu1 %v1964_v42  ;;  %v7958_v42 = vld [vmem:[%s11393_s4 + $0x398] sm:$0xff] }
0x1ab6   :  { %v4756_v39 = vpop.xlane.xlu0 %4755 }
0x1ab7   :  { %v4766_v51 = vmul.f32 0.03125, %v4756_v39 }
0x1ab8   :  { %v4759_v52 = vpop.xlane.xlu1 %4758 }
0x1ab9   :  { %v4770_v53 = vadd.f32 1e-05, %v4766_v51  ;;  %v4767_v40 = vmul.f32 0.03125, %v4759_v52  ;;  %v7952_v51 = vld [vmem:[%s11395_s5 + $0x18] ss:$0 sm:$0xff] }
0x1aba   :  { %v4762_v54 = vpop.xlane.xlu0 %4761 }
0x1abb   :  { %9439 = vrsqrt.f32 %v4770_v53  ;;  %v4771_v57 = vadd.f32 1e-05, %v4767_v40  ;;  %v4768_v60 = vmul.f32 0.03125, %v4762_v54 }
0x1abc   :  { %v4765_v61 = vpop.xlane.xlu1 %4764 }
0x1abd   :  { %9441 = vrsqrt.f32 %v4771_v57  ;;  %v4772_v62 = vadd.f32 1e-05, %v4768_v60  ;;  %v4769_v63 = vmul.f32 0.03125, %v4765_v61 }
0x1abe   :  { %v1963_v1 = vpop.xlane.xlu0 %1962 }
0x1abf   :  { %9443 = vrsqrt.f32 %v4772_v62  ;;  %v4773_v2 = vadd.f32 1e-05, %v4769_v63  ;;  %v1967_v3 = vmul.f32 0.03125, %v1963_v1 }
0x1ac0   :  { %v1966_v36 = vpop.xlane.xlu1 %1965 }
0x1ac1   :  { %9445 = vrsqrt.f32 %v4773_v2  ;;  %v1969_v4 = vadd.f32 1e-05, %v1967_v3  ;;  %v1968_v58 = vmul.f32 0.03125, %v1966_v36 }
0x1ac3   :  { %9447 = vrsqrt.f32 %v1969_v4  ;;  %v1970_v56 = vadd.f32 1e-05, %v1968_v58  ;;  %v7965_v58 = vld [vmem:[%s11395_s5 + $0x20] ss:$0 sm:$0xff] }
0x1ac5   :  { %v9440_v37 = vpop.eup %9439  ;;  %9449 = vrsqrt.f32 %v1970_v56 }
0x1ac6   :  { %v4778_v9 = vmul.f32 %v9440_v37, %v10701_v17 }
0x1ac7   :  { %v9442_v41 = vpop.eup %9441 }
0x1ac8   :  { %v4779_v13 = vmul.f32 %v9442_v41, %v10703_v28  ;;  %v4786_v14 = vmul.f32 %v7946_v8, %v4778_v9  ;;  %v7815_v28 = vld [vmem:[%s11398_s9 + $0x7] ss:$0 sm:$0xff] }
0x1ac9   :  { %v9444_v55 = vpop.eup %9443 }
0x1aca   :  { %v4780_v20 = vmul.f32 %v9444_v55, %v10707_v5  ;;  %v4787_v46 = vmul.f32 %v7946_v8, %v4779_v13  ;;  %v10768_v23 = vadd.f32 %v7947_v18, %v4786_v14 }
0x1acb   :  { %v9446_v6 = vpop.eup %9445 }
0x1acc   :  { %v4788_v21 = vmul.f32 %v7946_v8, %v4780_v20  ;;  %v4781_v7 = vmul.f32 %v9446_v6, %v10712_v24  ;;  %v10770_v11 = vadd.f32 %v7947_v18, %v4787_v46  ;;  %v7955_v24 = vld [vmem:[%s11393_s4 + $0x380] sm:$0xff] }
0x1acd   :  { %v9448_v17 = vpop.eup %9447  ;;  %v4873_v34 = vpack.c.bf16 %v7956_v16, %v7955_v24 }
0x1ace   :  { %v4789_v10 = vmul.f32 %v7946_v8, %v4781_v7  ;;  %v1973_v12 = vmul.f32 %v9448_v17, %v10717_v26  ;;  %v10778_v5 = vpack.c.bf16 %v10770_v11, %v10768_v23  ;;  %v10789_v26 = vadd.f32 %v7947_v18, %v4788_v21 }
0x1acf   :  { %v9450_v25 = vpop.eup %9449 }
0x1ad0   :  { %v1979_v27 = vmul.f32 %v7815_v28, %v1973_v12  ;;  %v1974_v30 = vmul.f32 %v9450_v25, %v10722_v32  ;;  %8977 = vmatprep.mubr.msk.bf16.mxu0 %vm73_vm1, %v10778_v5  ;;  %v10791_v49 = vadd.f32 %v7947_v18, %v4789_v10  ;;  %v7957_v32 = vld [vmem:[%s11393_s4 + $0x390] sm:$0xff]  ;;  %v10868_v25 = vld [vmem:[%s11396_s2 + $0x1] ss:$0 sm:$0xff] }
0x1ad1   :  { %v4874_v29 = vpack.c.bf16 %v7958_v42, %v7957_v32 }
0x1ad2   :  { %v1980_v31 = vmul.f32 %v7815_v28, %v1974_v30  ;;  %v10798_v38 = vpack.c.bf16 %v10791_v49, %v10789_v26  ;;  %v1985_v15 = vadd.f32 %v7816_v33, %v1979_v27  ;;  %v10862_v28 = vld [vmem:[%s11396_s2] ss:$0 sm:$0xff] }
0x1ad4   :  { %v1986_v19 = vadd.f32 %v7816_v33, %v1980_v31  ;;  %8978 = vmatmul.mubr.msk.bf16.vlgmr.msra.gmra.mrb[160].mxu0 %vm73_vm1, %v10798_v38 }
0x1ad5   :  { %8982 = vmatpush3.bf16.msra.mxu0 %v4873_v34  ;;  %8985 = vmatprep.mubr.msk.bf16.mxu0 %vm9544_vm0, %v9543_v0 }
0x1ad6   :  { %v10810_v44 = vpack.c.bf16 %v1986_v19, %v1985_v15  ;;  %8983 = vmatprep.subr.bf16.mxu0 %v9543_v0 }
0x1ad8   :  { %8994 = vmatmul.mubr.msk.bf16.vlgmr.msra.gmra.mrb[156].mxu1 %vm73_vm1, %v10810_v44 }
0x1ad9   :  { %8984 = vmatpush3.bf16.msra.mxu0 %v4874_v29  ;;  %9005 = vmatprep.mubr.msk.bf16.mxu1 %vm9544_vm0, %v9543_v0 }
0x1ada   :  { %8997 = vmatprep.subr.bf16.mxu0 %v9543_v0 }
0x1adc   :  { %8986 = vmatmul.mubr.msk.bf16.vlgmr.msra.gmra.mrb[164].mxu0 %vm73_vm1, %v10810_v44 }
0x1add   :  { %8999 = vmatprep.mubr.msk.bf16.mxu0 %vm9544_vm0, %v9543_v0 }
0x1ba7   :  { %v8979_v43 = vpop.f32.mrb[160].mxu0 }
0x1ba8   :  { %v4852_v35 = vpop.f32.mrb[161].mxu0  ;;  %v4861_v56 = vadd.f32 %v8979_v43, %v7952_v51 }
0x1ba9   :  { %v8980_v45 = vpop.f32.mrb[162].mxu0  ;;  %v4853_v57 = vadd.f32 %v7952_v51, %v4852_v35 }
0x1baa   :  { %v4855_v47 = vpop.f32.mrb[163].mxu0  ;;  %v4864_v8 = vadd.f32 %v8980_v45, %v7952_v51  ;;  %v4979_v13 = vmul.f32 0.35355338, %v4861_v56 }
0x1bab   :  { %v4970_v22 = vpop.f32.mrb[156].mxu1  ;;  %v4856_v63 = vadd.f32 %v7952_v51, %v4855_v47  ;;  %v4977_v3 = vmul.f32 0.35355338, %v4853_v57 }
0x1bac   :  { %v8995_v59 = vpop.f32.mrb[157].mxu1  ;;  %v4971_v41 = vadd.f32 %v7965_v58, %v4970_v22  ;;  %v4980_v55 = vmul.f32 0.35355338, %v4864_v8  ;;  %v4983_v20 = vpack.c.bf16 %v4979_v13, %v4979_v13  ;;  %v7983_v13 = vld [vmem:[%s11393_s4 + $0x3a0] sm:$0xff] }
0x1bad   :  { %v4973_v50 = vpop.f32.mrb[158].mxu1  ;;  %v4978_v4 = vmul.f32 0.35355338, %v4856_v63  ;;  %v4981_v37 = vpack.c.bf16 %v4977_v3, %v4977_v3  ;;  %v7976_v3 = vld [vmem:[%s11393_s4 + $0x320] sm:$0xff] }
0x1bae   :  { %v8996_v39 = vpop.f32.mrb[159].mxu1  ;;  %v4974_v14 = vadd.f32 %v7965_v58, %v4973_v50  ;;  %v5205_v18 = vpack.c.bf16 %v4971_v41, %v4971_v41  ;;  %v4984_v6 = vpack.c.bf16 %v4980_v55, %v4980_v55  ;;  %v7979_v41 = vld [vmem:[%s11393_s4 + $0x338] sm:$0xff] }
0x1baf   :  { %v4917_v52 = vpop.f32.mrb[164].mxu0  ;;  %v4982_v9 = vpack.c.bf16 %v4978_v4, %v4978_v4 }
0x1bb0   :  { %v4918_v53 = vadd.f32 %v7959_v48, %v4917_v52  ;;  %v8987_v40 = vpop.f32.mrb[165].mxu0  ;;  %v5206_v46 = vpack.c.bf16 %v4974_v14, %v4974_v14  ;;  %v10844_v21 = vsel %vm348_vm3, %v5205_v18, 0  ;;  %v7984_v14 = vld [vmem:[%s11393_s4 + $0x3a8] sm:$0xff] }
0x1bb1   :  { %v4920_v54 = vpop.f32.mrb[166].mxu0 }
0x1bb2   :  { %v4985_v60 = vpack.c.bf16 %v4918_v53, %v4918_v53  ;;  %v4921_v61 = vadd.f32 %v7959_v48, %v4920_v54  ;;  %v8988_v62 = vpop.f32.mrb[167].mxu0  ;;  %v10851_v7 = vsel %vm348_vm3, %v5206_v46, 0 }
0x1bb4   :  { %v4991_v1 = vsel %vm230_vm2, %v4985_v60, 0  ;;  %v4986_v2 = vpack.c.bf16 %v4921_v61, %v4921_v61 }
0x1bb5   :  { %8998 = vmatpush3.bf16.xpose.msra.mxu0 %v4991_v1 }
0x1bb6   :  { %v5037_v36 = vsel %vm230_vm2, %v4986_v2, 0  ;;  %9009 = vmatprep.subr.bf16.mxu0 %v9543_v0 }
0x1bb7   :  { %9004 = vmatpush3.bf16.xpose.msra.mxu1 %v5037_v36 }
0x1bb8   :  { %9015 = vmatprep.subr.bf16.mxu1 %v9543_v0 }
0x1bbc   :  { %9000 = vmatmul.mubr.msk.bf16.vlgmr.msra.gmra.mrb[168].mxu0 %vm230_vm2, %v4981_v37 }
0x1bbd   :  { %9010 = vmatpush3.bf16.xpose.msra.mxu0 %v4991_v1  ;;  %9011 = vmatprep.mubr.msk.bf16.mxu0 %vm9544_vm0, %v9543_v0 }
0x1bbe   :  { %9006 = vmatmul.mubr.msk.bf16.vlgmr.msra.gmra.mrb[160].mxu1 %vm230_vm2, %v4982_v9  ;;  %9021 = vmatprep.subr.bf16.mxu0 %v9543_v0  ;;  %v7978_v9 = vld [vmem:[%s11393_s4 + $0x330] sm:$0xff] }
0x1bbf   :  { %9016 = vmatpush3.bf16.xpose.msra.mxu1 %v5037_v36  ;;  %9017 = vmatprep.mubr.msk.bf16.mxu1 %vm9544_vm0, %v9543_v0  ;;  %v7977_v36 = vld [vmem:[%s11393_s4 + $0x328] sm:$0xff] }
0x1bc0   :  { %9027 = vmatprep.subr.bf16.mxu1 %v9543_v0  ;;  %v5403_v56 = vpack.c.bf16 %v7977_v36, %v7976_v3 }
0x1bc4   :  { %9012 = vmatmul.mubr.msk.bf16.vlgmr.msra.gmra.mrb[172].mxu0 %vm230_vm2, %v4983_v20  ;;  %v5404_v20 = vpack.c.bf16 %v7979_v41, %v7978_v9 }
0x1bc5   :  { %9022 = vmatpush3.bf16.msra.mxu0 %v10844_v21  ;;  %9023 = vmatprep.mubr.msk.bf16.mxu0 %vm9544_vm0, %v9543_v0 }
0x1bc6   :  { %9018 = vmatmul.mubr.msk.bf16.vlgmr.msra.gmra.mrb[164].mxu1 %vm230_vm2, %v4984_v6  ;;  %9033 = vmatprep.subr.bf16.mxu0 %v9543_v0  ;;  %v5464_v6 = vpack.c.bf16 %v7984_v14, %v7983_v13 }
0x1bc7   :  { %9028 = vmatpush3.bf16.msra.mxu1 %v10851_v7  ;;  %9029 = vmatprep.mubr.msk.bf16.mxu1 %vm9544_vm0, %v9543_v0 }
0x1bc8   :  { %9039 = vmatprep.subr.bf16.mxu1 %v9543_v0 }
0x1c8f   :  { %v5027_v17 = vpop.f32.mrb[168].mxu0 }
0x1c90   :  { %v5028_v10 = vadd.f32 %v10862_v28, %v5027_v17  ;;  %v9001_v12 = vpop.f32.mrb[169].mxu0  ;;  %v7986_v17 = vld [vmem:[%s11393_s4 + $0x3b8] sm:$0xff] }
0x1c91   :  { %v5030_v24 = vpop.f32.mrb[170].mxu0  ;;  %v5073_v16 = vpop.f32.mrb[160].mxu1  ;;  %v7990_v12 = vld [vmem:[%s11393_s4 + $0x428] sm:$0xff] }
0x1c92   :  { %v5074_v27 = vadd.f32 %v10868_v25, %v5073_v16  ;;  %v9002_v30 = vpop.f32.mrb[171].mxu0  ;;  %v9007_v33 = vpop.f32.mrb[161].mxu1  ;;  %v5165_v34 = vsel %vm230_vm2, %v5028_v10, -inf }
0x1c93   :  { %v5076_v31 = vpop.f32.mrb[162].mxu1  ;;  %5166 = vmax.xlane.f32.xlu1 %v5165_v34  ;;  %v7992_v30 = vld [vmem:[%s11393_s4 + $0x438] sm:$0xff] }
0x1c94   :  { %v9008_v32 = vpop.f32.mrb[163].mxu1  ;;  %v5168_v42 = vsel %vm230_vm2, %v5074_v27, -inf }
0x1c95   :  { %5169 = vmax.xlane.f32.xlu0 %v5168_v42 }
0x1c97   :  { %v5116_v15 = vpop.f32.mrb[172].mxu0 }
0x1c98   :  { %v5117_v19 = vadd.f32 %v10862_v28, %v5116_v15  ;;  %v9013_v29 = vpop.f32.mrb[173].mxu0 }
0x1c99   :  { %v5119_v43 = vpop.f32.mrb[174].mxu0  ;;  %v5159_v35 = vpop.f32.mrb[164].mxu1 }
0x1c9a   :  { %v5160_v45 = vadd.f32 %v10868_v25, %v5159_v35  ;;  %v9014_v47 = vpop.f32.mrb[175].mxu0  ;;  %v9019_v22 = vpop.f32.mrb[165].mxu1  ;;  %v5171_v59 = vsel %vm230_vm2, %v5117_v19, -inf }
0x1c9b   :  { %v5162_v50 = vpop.f32.mrb[166].mxu1  ;;  %5172 = vmax.xlane.f32.xlu1 %v5171_v59 }
0x1c9c   :  { %v9020_v48 = vpop.f32.mrb[167].mxu1  ;;  %v5174_v39 = vsel %vm230_vm2, %v5160_v45, -inf }
0x1c9d   :  { %5175 = vmax.xlane.f32.xlu0 %v5174_v39 }
0x1d20   :  { %v5167_v51 = vpop.xlane.xlu1 %5166 }
0x1d21   :  { %v5177_v52 = vsub.f32 %v5028_v10, %v5167_v51  ;;  %v7989_v10 = vld [vmem:[%s11393_s4 + $0x420] sm:$0xff] }
0x1d22   :  { %v5170_v53 = vpop.xlane.xlu0 %5169  ;;  %v5517_v16 = vpack.c.bf16 %v7990_v12, %v7989_v10 }
0x1d23   :  { %v5181_v40 = vmul.f32 1.442695, %v5177_v52  ;;  %v5178_v54 = vsub.f32 %v5074_v27, %v5170_v53  ;;  %v7991_v27 = vld [vmem:[%s11393_s4 + $0x430] sm:$0xff]  ;;  %v7987_v52 = vld [vmem:[%s11395_s5 + $0x1d] ss:$0 sm:$0xff] }
0x1d24   :  { %v5518_v33 = vpack.c.bf16 %v7992_v30, %v7991_v27 }
0x1d25   :  { %9451 = vpow2.f32 %v5181_v40  ;;  %v5183_v57 = vmul.f32 1.442695, %v5178_v54  ;;  %v7980_v40 = vld [vmem:[%s11395_s5 + $0x19] ss:$0 sm:$0xff] }
0x1d27   :  { %9453 = vpow2.f32 %v5183_v57 }
0x1d28   :  { %v5173_v60 = vpop.xlane.xlu1 %5172 }
0x1d29   :  { %v5179_v61 = vsub.f32 %v5117_v19, %v5173_v60 }
0x1d2a   :  { %v5176_v62 = vpop.xlane.xlu0 %5175 }
0x1d2b   :  { %v5185_v63 = vmul.f32 1.442695, %v5179_v61  ;;  %v5180_v1 = vsub.f32 %v5160_v45, %v5176_v62 }
0x1d2d   :  { %9455 = vpow2.f32 %v5185_v63  ;;  %v5187_v2 = vmul.f32 1.442695, %v5180_v1 }
0x1d2f   :  { %v10883_v4 = vpop.eup %9451  ;;  %9457 = vpow2.f32 %v5187_v2 }
0x1d30   :  { %v5201_v58 = vpack.c.bf16 %v10883_v4, %v10883_v4 }
0x1d31   :  { %v10887_v37 = vpop.eup %9453 }
0x1d32   :  { %9024 = vmatmul.mubr.msk.bf16.vlgmr.msra.gmra.mrb[176].mxu0 %vm230_vm2, %v5201_v58  ;;  %v5202_v8 = vpack.c.bf16 %v10887_v37, %v10887_v37 }
0x1d33   :  { %9034 = vmatpush3.bf16.msra.mxu0 %v10844_v21  ;;  %9035 = vmatprep.mubr.msk.bf16.mxu0 %vm9544_vm0, %v9543_v0 }
0x1d34   :  { %9030 = vmatmul.mubr.msk.bf16.vlgmr.msra.gmra.mrb[168].mxu1 %vm230_vm2, %v5202_v8  ;;  %9045 = vmatprep.subr.bf16.mxu0 %v5403_v56 }
0x1d35   :  { %9040 = vmatpush3.bf16.msra.mxu1 %v10851_v7  ;;  %9041 = vmatprep.mubr.msk.bf16.mxu1 %vm9544_vm0, %v9543_v0  ;;  %v7985_v7 = vld [vmem:[%s11393_s4 + $0x3b0] sm:$0xff] }
0x1d36   :  { %9053 = vmatprep.subr.bf16.mxu1 %v9543_v0  ;;  %v5465_v24 = vpack.c.bf16 %v7986_v17, %v7985_v7 }
0x1d37   :  { %v10912_v55 = vpop.eup %9455 }
0x1d38   :  { %v5203_v18 = vpack.c.bf16 %v10912_v55, %v10912_v55 }
0x1d39   :  { %v10916_v46 = vpop.eup %9457 }
0x1d3a   :  { %9036 = vmatmul.mubr.msk.bf16.vlgmr.msra.gmra.mrb[180].mxu0 %vm230_vm2, %v5203_v18  ;;  %v5204_v21 = vpack.c.bf16 %v10916_v46, %v10916_v46 }
0x1d3b   :  { %9046 = vmatpush3.bf16.msra.mxu0 %v5403_v56  ;;  %9049 = vmatprep.mubr.msk.bf16.mxu0 %vm73_vm1, %v10778_v5 }
0x1d3c   :  { %9042 = vmatmul.mubr.msk.bf16.vlgmr.msra.gmra.mrb[172].mxu1 %vm230_vm2, %v5204_v21  ;;  %9047 = vmatprep.subr.bf16.mxu0 %v5404_v20  ;;  %v7993_v21 = vld [vmem:[%s11395_s5 + $0x21] ss:$0 sm:$0xff] }
0x1d3d   :  { %9054 = vmatpush3.bf16.msra.mxu1 %v5464_v6  ;;  %9057 = vmatprep.mubr.msk.bf16.mxu1 %vm9544_vm0, %v9543_v0 }
0x1d3e   :  { %9055 = vmatprep.subr.bf16.mxu1 %v9543_v0 }
0x1d3f   :  { %9048 = vmatpush3.bf16.msra.mxu0 %v5404_v20 }
0x1d40   :  { %9061 = vmatprep.subr.bf16.mxu0 %v9543_v0 }
0x1d41   :  { %9056 = vmatpush3.bf16.msra.mxu1 %v5465_v24 }
0x1d42   :  { %9050 = vmatmul.mubr.msk.bf16.vlgmr.msra.gmra.mrb[184].mxu0 %vm73_vm1, %v10798_v38  ;;  %9069 = vmatprep.subr.bf16.mxu1 %v9543_v0 }
0x1d43   :  { %9062 = vmatpush3.bf16.msra.mxu0 %v5517_v16  ;;  %9065 = vmatprep.mubr.msk.bf16.mxu0 %vm9544_vm0, %v9543_v0 }
0x1d44   :  { %9058 = vmatmul.mubr.msk.bf16.vlgmr.msra.gmra.mrb[176].mxu1 %vm73_vm1, %v10810_v44  ;;  %9063 = vmatprep.subr.bf16.mxu0 %v9543_v0 }
0x1d45   :  { %9071 = vmatprep.mubr.msk.bf16.mxu1 %vm9544_vm0, %v9543_v0 }
0x1d47   :  { %9064 = vmatpush3.bf16.msra.mxu0 %v5518_v33 }
0x1d48   :  { %9075 = vmatprep.subr.bf16.mxu0 %v9543_v0 }
0x1d4a   :  { %9066 = vmatmul.mubr.msk.bf16.vlgmr.msra.gmra.mrb[188].mxu0 %vm73_vm1, %v10810_v44 }
0x1d4b   :  { %9077 = vmatprep.mubr.msk.bf16.mxu0 %vm9544_vm0, %v9543_v0 }
0x1e05   :  { %v10961_v34 = vpop.f32.mrb[176].mxu0 }
0x1e06   :  { %v9025_v31 = vpop.f32.mrb[177].mxu0 }
0x1e07   :  { %v5250_v32 = vpop.f32.mrb[178].mxu0  ;;  %v10963_v42 = vpop.f32.mrb[168].mxu1 }
0x1e08   :  { %v9026_v15 = vpop.f32.mrb[179].mxu0  ;;  %v9031_v19 = vpop.f32.mrb[169].mxu1 }
0x1e09   :  { %v5296_v29 = vpop.f32.mrb[170].mxu1 }
0x1e0a   :  { %v9032_v43 = vpop.f32.mrb[171].mxu1 }
0x1e0d   :  { %v10965_v35 = vpop.f32.mrb[180].mxu0 }
0x1e0e   :  { %v9037_v45 = vpop.f32.mrb[181].mxu0 }
0x1e0f   :  { %v5339_v47 = vpop.f32.mrb[182].mxu0  ;;  %v10967_v22 = vpop.f32.mrb[172].mxu1 }
0x1e10   :  { %v9038_v59 = vpop.f32.mrb[183].mxu0  ;;  %v9043_v50 = vpop.f32.mrb[173].mxu1 }
0x1e11   :  { %v5382_v48 = vpop.f32.mrb[174].mxu1 }
0x1e12   :  { %v9044_v39 = vpop.f32.mrb[175].mxu1 }
0x1e15   :  { %v9051_v51 = vpop.f32.mrb[184].mxu0 }
0x1e16   :  { %v5444_v53 = vpop.f32.mrb[185].mxu0  ;;  %v5453_v7 = vadd.f32 %v9051_v51, %v7980_v40 }
0x1e17   :  { %v9052_v54 = vpop.f32.mrb[186].mxu0  ;;  %v5505_v57 = vpop.f32.mrb[176].mxu1  ;;  %v5445_v1 = vadd.f32 %v7980_v40, %v5444_v53 }
0x1e18   :  { %v5506_v60 = vadd.f32 %v7987_v52, %v5505_v57  ;;  %v5447_v61 = vpop.f32.mrb[187].mxu0  ;;  %v9059_v62 = vpop.f32.mrb[177].mxu1  ;;  %v5456_v10 = vadd.f32 %v9052_v54, %v7980_v40  ;;  %v5567_v16 = vmul.f32 0.35355338, %v5453_v7 }
0x1e19   :  { %v5508_v63 = vpop.f32.mrb[178].mxu1  ;;  %v5448_v56 = vadd.f32 %v7980_v40, %v5447_v61  ;;  %v5565_v41 = vmul.f32 0.35355338, %v5445_v1 }
0x1e1a   :  { %v5573_v2 = vpack.c.bf16 %v5506_v60, %v5506_v60  ;;  %v5509_v3 = vadd.f32 %v7987_v52, %v5508_v63  ;;  %v9060_v36 = vpop.f32.mrb[179].mxu1  ;;  %v5568_v30 = vmul.f32 0.35355338, %v5456_v10  ;;  %v5571_v31 = vpack.c.bf16 %v5567_v16, %v5567_v16  ;;  %v8008_v16 = vld [vmem:[%s11393_s4 + $0x340] sm:$0xff] }
0x1e1b   :  { %v5566_v20 = vmul.f32 0.35355338, %v5448_v56  ;;  %v5569_v17 = vpack.c.bf16 %v5565_v41, %v5565_v41 }
0x1e1c   :  { %v5579_v58 = vsel %vm230_vm2, %v5573_v2, 0  ;;  %v5574_v8 = vpack.c.bf16 %v5509_v3, %v5509_v3  ;;  %v5572_v15 = vpack.c.bf16 %v5568_v30, %v5568_v30 }
0x1e1d   :  { %v5558_v9 = vpop.f32.mrb[188].mxu0  ;;  %9070 = vmatpush3.bf16.xpose.msra.mxu1 %v5579_v58  ;;  %v5570_v12 = vpack.c.bf16 %v5566_v20, %v5566_v20 }
0x1e1e   :  { %v5625_v13 = vsel %vm230_vm2, %v5574_v8, 0  ;;  %v9067_v14 = vpop.f32.mrb[189].mxu0  ;;  %9081 = vmatprep.subr.bf16.mxu1 %v9543_v0  ;;  %v5559_v24 = vadd.f32 %v7993_v21, %v5558_v9 }
0x1e1f   :  { %v5561_v18 = vpop.f32.mrb[190].mxu0  ;;  %9076 = vmatpush3.bf16.xpose.msra.mxu0 %v5625_v13 }
0x1e20   :  { %v9068_v6 = vpop.f32.mrb[191].mxu0  ;;  %9087 = vmatprep.subr.bf16.mxu0 %v9543_v0  ;;  %v5562_v27 = vadd.f32 %v7993_v21, %v5561_v18  ;;  %v5793_v33 = vpack.c.bf16 %v5559_v24, %v5559_v24 }
0x1e22   :  { %v5794_v32 = vpack.c.bf16 %v5562_v27, %v5562_v27  ;;  %v10991_v19 = vsel %vm348_vm3, %v5793_v33, 0  ;;  %v8009_v27 = vld [vmem:[%s11393_s4 + $0x348] sm:$0xff] }
0x1e24   :  { %9072 = vmatmul.mubr.msk.bf16.vlgmr.msra.gmra.mrb[180].mxu1 %vm230_vm2, %v5569_v17  ;;  %v10998_v29 = vsel %vm348_vm3, %v5794_v32, 0 }
0x1e25   :  { %9082 = vmatpush3.bf16.xpose.msra.mxu1 %v5579_v58  ;;  %9083 = vmatprep.mubr.msk.bf16.mxu1 %vm9544_vm0, %v9543_v0 }
0x1e26   :  { %9078 = vmatmul.mubr.msk.bf16.vlgmr.msra.gmra.mrb[192].mxu0 %vm230_vm2, %v5570_v12  ;;  %9093 = vmatprep.subr.bf16.mxu1 %v9543_v0 }
0x1e27   :  { %9088 = vmatpush3.bf16.xpose.msra.mxu0 %v5625_v13  ;;  %9089 = vmatprep.mubr.msk.bf16.mxu0 %vm9544_vm0, %v9543_v0 }
0x1e28   :  { %9099 = vmatprep.subr.bf16.mxu0 %v9543_v0 }
0x1e2c   :  { %9084 = vmatmul.mubr.msk.bf16.vlgmr.msra.gmra.mrb[184].mxu1 %vm230_vm2, %v5571_v31 }
0x1e2d   :  { %9094 = vmatpush3.bf16.msra.mxu1 %v10991_v19  ;;  %9095 = vmatprep.mubr.msk.bf16.mxu1 %vm9544_vm0, %v9543_v0 }
0x1e2e   :  { %9090 = vmatmul.mubr.msk.bf16.vlgmr.msra.gmra.mrb[196].mxu0 %vm230_vm2, %v5572_v15  ;;  %9105 = vmatprep.subr.bf16.mxu1 %v9543_v0 }
0x1e2f   :  { %9100 = vmatpush3.bf16.msra.mxu0 %v10998_v29  ;;  %9101 = vmatprep.mubr.msk.bf16.mxu0 %vm9544_vm0, %v9543_v0 }
0x1e30   :  { %9111 = vmatprep.subr.bf16.mxu0 %v9543_v0 }
0x1ef7   :  { %v5615_v43 = vpop.f32.mrb[180].mxu1 }
0x1ef8   :  { %v5616_v45 = vadd.f32 %v10862_v28, %v5615_v43  ;;  %v9073_v47 = vpop.f32.mrb[181].mxu1  ;;  %v6107_v43 = vpack.c.bf16 %v8009_v27, %v8008_v16 }
0x1ef9   :  { %v5618_v59 = vpop.f32.mrb[182].mxu1  ;;  %v5661_v50 = vpop.f32.mrb[192].mxu0  ;;  %v8010_v47 = vld [vmem:[%s11393_s4 + $0x350] sm:$0xff] }
0x1efa   :  { %v5662_v48 = vadd.f32 %v10868_v25, %v5661_v50  ;;  %v9074_v39 = vpop.f32.mrb[183].mxu1  ;;  %v9079_v51 = vpop.f32.mrb[193].mxu0  ;;  %v5753_v52 = vsel %vm230_vm2, %v5616_v45, -inf }
0x1efb   :  { %v5664_v53 = vpop.f32.mrb[194].mxu0  ;;  %5754 = vmax.xlane.f32.xlu0 %v5753_v52  ;;  %v5189_v52 = vsel %vm230_vm2, %v10883_v4, 0.0  ;;  %v5198_v4 = vsel %vm230_vm2, %v10916_v46, 0.0  ;;  %v8003_v46 = vld [vmem:[%s11397_s6 + $0x48] sm:$0xff] }
0x1efc   :  { %v9080_v40 = vpop.f32.mrb[195].mxu0  ;;  %v5756_v54 = vsel %vm230_vm2, %v5662_v48, -inf  ;;  %v5192_v53 = vsel %vm230_vm2, %v10887_v37, 0.0  ;;  %v8017_v37 = vld [vmem:[%s11393_s4 + $0x3d0] sm:$0xff] }
0x1efd   :  { %5757 = vmax.xlane.f32.xlu1 %v5756_v54  ;;  %v8015_v40 = vld [vmem:[%s11393_s4 + $0x3c0] sm:$0xff]  ;;  %v8016_v54 = vld [vmem:[%s11393_s4 + $0x3c8] sm:$0xff] }
0x1eff   :  { %v5704_v57 = vpop.f32.mrb[184].mxu1 }
0x1f00   :  { %v5705_v60 = vadd.f32 %v10862_v28, %v5704_v57  ;;  %v9085_v61 = vpop.f32.mrb[185].mxu1  ;;  %v5195_v57 = vsel %vm230_vm2, %v10912_v55, 0.0 }
0x1f01   :  { %v5707_v62 = vpop.f32.mrb[186].mxu1  ;;  %v5747_v63 = vpop.f32.mrb[196].mxu0  ;;  %v8018_v61 = vld [vmem:[%s11393_s4 + $0x3d8] sm:$0xff] }
0x1f02   :  { %v5748_v1 = vadd.f32 %v10868_v25, %v5747_v63  ;;  %v9086_v2 = vpop.f32.mrb[187].mxu1  ;;  %v9091_v3 = vpop.f32.mrb[197].mxu0  ;;  %v5759_v36 = vsel %vm230_vm2, %v5705_v60, -inf  ;;  %v6169_v55 = vpack.c.bf16 %v8018_v61, %v8017_v37  ;;  %v5985_v62 = vpack.c.bf16 %v8003_v46, %v8003_v46  ;;  %v8021_v46 = vld [vmem:[%s11393_s4 + $0x440] sm:$0xff] }
0x1f03   :  { %v5750_v58 = vpop.f32.mrb[198].mxu0  ;;  %5760 = vmax.xlane.f32.xlu0 %v5759_v36 }
0x1f04   :  { %v9092_v56 = vpop.f32.mrb[199].mxu0  ;;  %v5762_v8 = vsel %vm230_vm2, %v5748_v1, -inf  ;;  %v5993_v63 = vsel %vm348_vm3, %v5985_v62, 0 }
0x1f05   :  { %5763 = vmax.xlane.f32.xlu1 %v5762_v8 }
0x1f88   :  { %v5755_v9 = vpop.xlane.xlu0 %5754 }
0x1f89   :  { %v5765_v41 = vsub.f32 %v5616_v45, %v5755_v9 }
0x1f8a   :  { %v5758_v13 = vpop.xlane.xlu1 %5757 }
0x1f8b   :  { %v5769_v14 = vmul.f32 1.442695, %v5765_v41  ;;  %v5766_v18 = vsub.f32 %v5662_v48, %v5758_v13 }
0x1f8d   :  { %9459 = vpow2.f32 %v5769_v14  ;;  %v5771_v20 = vmul.f32 1.442695, %v5766_v18 }
0x1f8f   :  { %9461 = vpow2.f32 %v5771_v20 }
0x1f90   :  { %v5761_v6 = vpop.xlane.xlu0 %5760 }
0x1f91   :  { %v5767_v21 = vsub.f32 %v5705_v60, %v5761_v6  ;;  %v6168_v60 = vpack.c.bf16 %v8016_v54, %v8015_v40 }
0x1f92   :  { %v5764_v7 = vpop.xlane.xlu1 %5763 }
0x1f93   :  { %v5773_v17 = vmul.f32 1.442695, %v5767_v21  ;;  %v5768_v10 = vsub.f32 %v5748_v1, %v5764_v7  ;;  %v7975_v1 = vld [vmem:[%s11397_s6 + $0x40] sm:$0xff] }
0x1f94   :  { %v5397_v2 = vpack.c.bf16 %v7975_v1, %v7975_v1 }
0x1f95   :  { %9463 = vpow2.f32 %v5773_v17  ;;  %v5775_v12 = vmul.f32 1.442695, %v5768_v10 }
0x1f97   :  { %v9460_v24 = vpop.eup %9459  ;;  %9465 = vpow2.f32 %v5775_v12 }
0x1f98   :  { %v5777_v30 = vsel %vm230_vm2, %v9460_v24, 0.0  ;;  %v5789_v33 = vpack.c.bf16 %v9460_v24, %v9460_v24 }
0x1f99   :  { %v9462_v31 = vpop.eup %9461  ;;  %5778 = vadd.xlane.f32.xlu0 %v5777_v30 }
0x1f9a   :  { %9096 = vmatmul.mubr.msk.bf16.vlgmr.msra.gmra.mrb[188].mxu1 %vm230_vm2, %v5789_v33  ;;  %v5780_v32 = vsel %vm230_vm2, %v9462_v31, 0.0  ;;  %v5790_v15 = vpack.c.bf16 %v9462_v31, %v9462_v31 }
0x1f9b   :  { %9106 = vmatpush3.bf16.msra.mxu1 %v10991_v19  ;;  %5781 = vadd.xlane.f32.xlu1 %v5780_v32  ;;  %v8011_v19 = vld [vmem:[%s11393_s4 + $0x358] sm:$0xff] }
0x1f9c   :  { %9102 = vmatmul.mubr.msk.bf16.vlgmr.msra.gmra.mrb[200].mxu0 %vm230_vm2, %v5790_v15  ;;  %9107 = vmatprep.mubr.msk.bf16.mxu1 %vm9544_vm0, %v9543_v0  ;;  %v6108_v51 = vpack.c.bf16 %v8011_v19, %v8010_v47 }
0x1f9d   :  { %9112 = vmatpush3.bf16.msra.mxu0 %v10998_v29  ;;  %9113 = vmatprep.mubr.msk.bf16.mxu0 %vm9544_vm0, %v9543_v0 }
0x1f9e   :  { %9129 = vmatprep.subr.bf16.mxu0 %v6107_v43  ;;  %9333 = vmatprep.subr.msk.bf16.mxu1 %vm348_vm3, %v5985_v62  ;;  %v8022_v62 = vld [vmem:[%s11393_s4 + $0x448] sm:$0xff] }
0x1f9f   :  { %v9464_v45 = vpop.eup %9463  ;;  %v6221_v1 = vpack.c.bf16 %v8022_v62, %v8021_v46 }
0x1fa0   :  { %v5783_v59 = vsel %vm230_vm2, %v9464_v45, 0.0  ;;  %v5791_v50 = vpack.c.bf16 %v9464_v45, %v9464_v45 }
0x1fa1   :  { %v9466_v48 = vpop.eup %9465  ;;  %5784 = vadd.xlane.f32.xlu0 %v5783_v59 }
0x1fa2   :  { %9108 = vmatmul.mubr.msk.bf16.vlgmr.msra.gmra.mrb[192].mxu1 %vm230_vm2, %v5791_v50  ;;  %v5786_v29 = vsel %vm230_vm2, %v9466_v48, 0.0  ;;  %v5792_v39 = vpack.c.bf16 %v9466_v48, %v9466_v48 }
0x1fa3   :  { %5787 = vadd.xlane.f32.xlu1 %v5786_v29  ;;  %9118 = vmatpush3.bf16.msra.mxu1 %v5993_v63  ;;  %v8019_v63 = vld [vmem:[%s11395_s5 + $0x1e] ss:$0 sm:$0xff] }
0x1fa4   :  { %9114 = vmatmul.mubr.msk.bf16.vlgmr.msra.gmra.mrb[204].mxu0 %vm230_vm2, %v5792_v39  ;;  %9334 = vmatprep.subr.msk.bf16.mxu1 %vm348_vm3, %v5397_v2 }
0x1fa5   :  { %9130 = vmatpush3.bf16.msra.mxu0 %v6107_v43  ;;  %9133 = vmatprep.mubr.msk.bf16.mxu0 %vm73_vm1, %v10778_v5 }
0x1fa6   :  { %5190 = vadd.xlane.f32.xlu0 %v5189_v52  ;;  %9131 = vmatprep.subr.bf16.mxu0 %v6108_v51 }
0x1fa7   :  { %5193 = vadd.xlane.f32.xlu1 %v5192_v53 }
0x1fa9   :  { %9132 = vmatpush3.bf16.msra.mxu0 %v6108_v51 }
0x1faa   :  { %5196 = vadd.xlane.f32.xlu0 %v5195_v57  ;;  %9137 = vmatprep.subr.bf16.mxu0 %v9543_v0 }
0x1fab   :  { %5199 = vadd.xlane.f32.xlu1 %v5198_v4 }
0x1fac   :  { %9134 = vmatmul.mubr.msk.bf16.vlgmr.msra.gmra.mrb[208].mxu0 %vm73_vm1, %v10798_v38 }
0x1fad   :  { %9138 = vmatpush3.bf16.msra.mxu0 %v6168_v60  ;;  %9141 = vmatprep.mubr.msk.bf16.mxu0 %vm9544_vm0, %v9543_v0  ;;  %v6051_v60 = vsel %vm348_vm3, %v5397_v2, 0  ;;  %v8023_v2 = vld [vmem:[%s11393_s4 + $0x450] sm:$0xff] }
0x1fae   :  { %9139 = vmatprep.subr.bf16.mxu0 %v9543_v0 }
0x1fb1   :  { %9140 = vmatpush3.bf16.msra.mxu0 %v6169_v55 }
0x1fb2   :  { %9153 = vmatprep.subr.bf16.mxu0 %v9543_v0 }
0x1fb4   :  { %9142 = vmatmul.mubr.msk.bf16.vlgmr.msra.gmra.mrb[212].mxu0 %vm73_vm1, %v10810_v44 }
0x1fb5   :  { %9155 = vmatprep.mubr.msk.bf16.mxu0 %vm9544_vm0, %v9543_v0 }
0x2026   :  { %v5779_v3 = vpop.xlane.xlu0 %5778 }
0x2028   :  { %v5782_v36 = vpop.xlane.xlu1 %5781 }
0x202e   :  { %v5785_v58 = vpop.xlane.xlu0 %5784 }
0x2030   :  { %v5788_v56 = vpop.xlane.xlu1 %5787 }
0x2033   :  { %v5191_v8 = vpop.xlane.xlu0 %5190 }
0x2034   :  { %9467 = vrcp.f32 %v5191_v8  ;;  %v5194_v9 = vpop.xlane.xlu1 %5193 }
0x2035   :  { %9469 = vrcp.f32 %v5194_v9 }
0x2037   :  { %v5197_v41 = vpop.xlane.xlu0 %5196 }
0x2038   :  { %9471 = vrcp.f32 %v5197_v41  ;;  %v5200_v13 = vpop.xlane.xlu1 %5199 }
0x2039   :  { %9473 = vrcp.f32 %v5200_v13 }
0x203a   :  { %9475 = vrcp.f32 %v5779_v3  ;;  %v8024_v3 = vld [vmem:[%s11393_s4 + $0x458] sm:$0xff] }
0x203b   :  { %9477 = vrcp.f32 %v5782_v36  ;;  %v8012_v36 = vld [vmem:[%s11395_s5 + $0x1a] ss:$0 sm:$0xff]  ;;  %v6222_v41 = vpack.c.bf16 %v8024_v3, %v8023_v2 }
0x203c   :  { %9479 = vrcp.f32 %v5785_v58 }
0x203d   :  { %9481 = vrcp.f32 %v5788_v56 }
0x203e   :  { %v9468_v14 = vpop.eup %9467 }
0x203f   :  { %v9470_v18 = vpop.eup %9469  ;;  %v5389_v20 = vmul.f32 %v9468_v14, %v10961_v34 }
0x2040   :  { %v5390_v6 = vmul.f32 %v9470_v18, %v10963_v42 }
0x2042   :  { %v9472_v21 = vpop.eup %9471  ;;  %v5395_v7 = vpack.c.bf16 %v5390_v6, %v5389_v20 }
0x2043   :  { %v9474_v17 = vpop.eup %9473  ;;  %v5391_v10 = vmul.f32 %v9472_v21, %v10965_v35 }
0x2044   :  { %v5392_v12 = vmul.f32 %v9474_v17, %v10967_v22  ;;  %v9476_v27 = vpop.eup %9475 }
0x2045   :  { %v9478_v33 = vpop.eup %9477 }
0x2046   :  { %v5396_v24 = vpack.c.bf16 %v5392_v12, %v5391_v10  ;;  %v9480_v19 = vpop.eup %9479 }
0x2047   :  { %v9482_v50 = vpop.eup %9481 }
0x206d   :  { %v5835_v16 = vpop.f32.mrb[188].mxu1 }
0x206e   :  { %v9097_v30 = vpop.f32.mrb[189].mxu1  ;;  %v5977_v32 = vmul.f32 %v9476_v27, %v5835_v16 }
0x206f   :  { %v5838_v31 = vpop.f32.mrb[190].mxu1  ;;  %v5881_v34 = vpop.f32.mrb[200].mxu0 }
0x2070   :  { %v5978_v42 = vmul.f32 %v9478_v33, %v5881_v34  ;;  %v9098_v15 = vpop.f32.mrb[191].mxu1  ;;  %v9103_v43 = vpop.f32.mrb[201].mxu0 }
0x2071   :  { %v5884_v45 = vpop.f32.mrb[202].mxu0 }
0x2072   :  { %v5983_v47 = vpack.c.bf16 %v5978_v42, %v5977_v32  ;;  %v9104_v35 = vpop.f32.mrb[203].mxu0  ;;  %v8025_v42 = vld [vmem:[%s11395_s5 + $0x22] ss:$0 sm:$0xff] }
0x2074   :  { %9119 = vmatprep.mubr.msk.bf16.mxu1 %vm230_vm2, %v5983_v47 }
0x2075   :  { %v5924_v22 = vpop.f32.mrb[192].mxu1 }
0x2076   :  { %v9109_v59 = vpop.f32.mrb[193].mxu1  ;;  %v5979_v39 = vmul.f32 %v9480_v19, %v5924_v22 }
0x2077   :  { %v5927_v48 = vpop.f32.mrb[194].mxu1  ;;  %v5967_v29 = vpop.f32.mrb[204].mxu0 }
0x2078   :  { %v5980_v51 = vmul.f32 %v9482_v50, %v5967_v29  ;;  %v9110_v52 = vpop.f32.mrb[195].mxu1  ;;  %v9115_v53 = vpop.f32.mrb[205].mxu0 }
0x2079   :  { %v5970_v40 = vpop.f32.mrb[206].mxu0 }
0x207a   :  { %v5984_v54 = vpack.c.bf16 %v5980_v51, %v5979_v39  ;;  %v9116_v57 = vpop.f32.mrb[207].mxu0 }
0x207c   :  { %9120 = vmatmul.mubr.msk.bf16.vlgmr.msra.gmra.mrb[196].mxu1 %vm230_vm2, %v5984_v54 }
0x207d   :  { %9124 = vmatpush3.bf16.msra.mxu1 %v6051_v60  ;;  %9125 = vmatprep.mubr.msk.bf16.mxu1 %vm230_vm2, %v5395_v7 }
0x207e   :  { %9145 = vmatprep.subr.bf16.mxu1 %v9543_v0 }
0x207f   :  { %v9135_v4 = vpop.f32.mrb[208].mxu0 }
0x2080   :  { %v6148_v37 = vpop.f32.mrb[209].mxu0  ;;  %v6157_v17 = vadd.f32 %v9135_v4, %v8012_v36 }
0x2081   :  { %v9136_v61 = vpop.f32.mrb[210].mxu0  ;;  %v6149_v13 = vadd.f32 %v8012_v36, %v6148_v37 }
0x2082   :  { %v6151_v55 = vpop.f32.mrb[211].mxu0  ;;  %v6271_v16 = vmul.f32 0.35355338, %v6157_v17  ;;  %v6160_v33 = vadd.f32 %v9136_v61, %v8012_v36  ;;  %v8039_v17 = vld [vmem:[%s11393_s4 + $0x368] sm:$0xff] }
0x2083   :  { %v6269_v21 = vmul.f32 0.35355338, %v6149_v13  ;;  %v6152_v12 = vadd.f32 %v8012_v36, %v6151_v55 }
0x2084   :  { %v6275_v30 = vpack.c.bf16 %v6271_v16, %v6271_v16  ;;  %v6272_v34 = vmul.f32 0.35355338, %v6160_v33 }
0x2085   :  { %v6273_v10 = vpack.c.bf16 %v6269_v21, %v6269_v21  ;;  %v6270_v27 = vmul.f32 0.35355338, %v6152_v12 }
0x2086   :  { %v6276_v32 = vpack.c.bf16 %v6272_v34, %v6272_v34  ;;  %v8041_v34 = vld [vmem:[%s11393_s4 + $0x378] sm:$0xff] }
0x2087   :  { %v6209_v58 = vpop.f32.mrb[212].mxu0  ;;  %v6274_v31 = vpack.c.bf16 %v6270_v27, %v6270_v27 }
0x2088   :  { %v6210_v56 = vadd.f32 %v8019_v63, %v6209_v58  ;;  %9126 = vmatmul.mubr.msk.bf16.vlgmr.msra.gmra.mrb[196].mxu1 %vm230_vm2, %v5396_v24  ;;  %v9143_v8 = vpop.f32.mrb[213].mxu0 }
0x2089   :  { %9146 = vmatpush3.bf16.msra.mxu1 %v6221_v1  ;;  %v6212_v9 = vpop.f32.mrb[214].mxu0  ;;  %9149 = vmatprep.mubr.msk.bf16.mxu1 %vm9544_vm0, %v9543_v0 }
0x208a   :  { %v6277_v14 = vpack.c.bf16 %v6210_v56, %v6210_v56  ;;  %v9144_v18 = vpop.f32.mrb[215].mxu0  ;;  %9147 = vmatprep.subr.bf16.mxu1 %v9543_v0  ;;  %v6213_v6 = vadd.f32 %v8019_v63, %v6212_v9 }
0x208c   :  { %v6283_v20 = vsel %vm230_vm2, %v6277_v14, 0  ;;  %v6278_v7 = vpack.c.bf16 %v6213_v6, %v6213_v6 }
0x208d   :  { %9148 = vmatpush3.bf16.msra.mxu1 %v6222_v41  ;;  %9154 = vmatpush3.bf16.xpose.msra.mxu0 %v6283_v20 }
0x208e   :  { %9159 = vmatprep.subr.bf16.mxu1 %v9543_v0  ;;  %9165 = vmatprep.subr.bf16.mxu0 %v9543_v0  ;;  %v6329_v24 = vsel %vm230_vm2, %v6278_v7, 0 }
0x2090   :  { %9150 = vmatmul.mubr.msk.bf16.vlgmr.msra.gmra.mrb[200].mxu1 %vm73_vm1, %v10810_v44 }
0x2091   :  { %9161 = vmatprep.mubr.msk.bf16.mxu1 %vm9544_vm0, %v9543_v0 }
0x2094   :  { %9156 = vmatmul.mubr.msk.bf16.vlgmr.msra.gmra.mrb[216].mxu0 %vm230_vm2, %v6273_v10 }
0x2095   :  { %9166 = vmatpush3.bf16.xpose.msra.mxu0 %v6283_v20  ;;  %9167 = vmatprep.mubr.msk.bf16.mxu0 %vm9544_vm0, %v9543_v0 }
0x2096   :  { %9160 = vmatpush3.bf16.xpose.msra.mxu1 %v6329_v24  ;;  %9177 = vmatprep.subr.bf16.mxu0 %v9543_v0 }
0x2097   :  { %9171 = vmatprep.subr.bf16.mxu1 %v9543_v0 }
0x209c   :  { %9168 = vmatmul.mubr.msk.bf16.vlgmr.msra.gmra.mrb[220].mxu0 %vm230_vm2, %v6275_v30 }
0x209d   :  { %9162 = vmatmul.mubr.msk.bf16.vlgmr.msra.gmra.mrb[204].mxu1 %vm230_vm2, %v6274_v31  ;;  %9179 = vmatprep.mubr.msk.bf16.mxu0 %vm9544_vm0, %v9543_v0  ;;  %v8040_v31 = vld [vmem:[%s11393_s4 + $0x370] sm:$0xff] }
0x209e   :  { %9172 = vmatpush3.bf16.xpose.msra.mxu1 %v6329_v24  ;;  %9173 = vmatprep.mubr.msk.bf16.mxu1 %vm9544_vm0, %v9543_v0 }
0x209f   :  { %9183 = vmatprep.subr.bf16.mxu1 %v9543_v0 }
0x20a5   :  { %9174 = vmatmul.mubr.msk.bf16.vlgmr.msra.gmra.mrb[208].mxu1 %vm230_vm2, %v6276_v32 }
0x20a6   :  { %9185 = vmatprep.mubr.msk.bf16.mxu1 %vm9544_vm0, %v9543_v0 }
0x2163   :  { %v6262_v15 = vpop.f32.mrb[200].mxu1 }
0x2164   :  { %v6263_v43 = vadd.f32 %v8025_v42, %v6262_v15  ;;  %v9151_v45 = vpop.f32.mrb[201].mxu1 }
0x2165   :  { %v6265_v47 = vpop.f32.mrb[202].mxu1 }
0x2166   :  { %v6497_v35 = vpack.c.bf16 %v6263_v43, %v6263_v43  ;;  %v6266_v22 = vadd.f32 %v8025_v42, %v6265_v47  ;;  %v9152_v19 = vpop.f32.mrb[203].mxu1 }
0x2167   :  { %v6319_v59 = vpop.f32.mrb[216].mxu0  ;;  %v8046_v19 = vld [vmem:[%s11393_s4 + $0x3e8] sm:$0xff] }
0x2168   :  { %v6503_v50 = vsel %vm348_vm3, %v6497_v35, 0  ;;  %v6498_v48 = vpack.c.bf16 %v6266_v22, %v6266_v22  ;;  %v6320_v29 = vadd.f32 %v10862_v28, %v6319_v59  ;;  %v9157_v39 = vpop.f32.mrb[217].mxu0  ;;  %v6758_v35 = vpack.c.bf16 %v8041_v34, %v8040_v31  ;;  %v8045_v22 = vld [vmem:[%s11393_s4 + $0x3e0] sm:$0xff]  ;;  %v8053_v31 = vld [vmem:[%s11393_s4 + $0x470] sm:$0xff]  ;;  %v8054_v34 = vld [vmem:[%s11393_s4 + $0x478] sm:$0xff] }
0x2169   :  { %v6322_v51 = vpop.f32.mrb[218].mxu0  ;;  %9178 = vmatpush3.bf16.msra.mxu0 %v6503_v50  ;;  %v6818_v59 = vpack.c.bf16 %v8046_v19, %v8045_v22 }
0x216a   :  { %v11142_v52 = vsel %vm348_vm3, %v6498_v48, 0  ;;  %v9158_v53 = vpop.f32.mrb[219].mxu0  ;;  %v6457_v40 = vsel %vm230_vm2, %v6320_v29, -inf  ;;  %9189 = vmatprep.subr.bf16.mxu0 %v9543_v0  ;;  %v8048_v48 = vld [vmem:[%s11393_s4 + $0x3f8] sm:$0xff] }
0x216b   :  { %6458 = vmax.xlane.f32.xlu0 %v6457_v40  ;;  %9184 = vmatpush3.bf16.msra.mxu1 %v11142_v52 }
0x216c   :  { %9195 = vmatprep.subr.bf16.mxu1 %v9543_v0 }
0x216f   :  { %v6408_v54 = vpop.f32.mrb[220].mxu0 }
0x2170   :  { %v6365_v57 = vpop.f32.mrb[204].mxu1  ;;  %v6409_v60 = vadd.f32 %v10862_v28, %v6408_v54  ;;  %v9169_v4 = vpop.f32.mrb[221].mxu0 }
0x2171   :  { %v6366_v37 = vadd.f32 %v10868_v25, %v6365_v57  ;;  %v9163_v61 = vpop.f32.mrb[205].mxu1  ;;  %v6411_v55 = vpop.f32.mrb[222].mxu0 }
0x2172   :  { %v6368_v46 = vpop.f32.mrb[206].mxu1  ;;  %v9170_v62 = vpop.f32.mrb[223].mxu0  ;;  %v6463_v63 = vsel %vm230_vm2, %v6409_v60, -inf }
0x2173   :  { %v9164_v1 = vpop.f32.mrb[207].mxu1  ;;  %6464 = vmax.xlane.f32.xlu0 %v6463_v63  ;;  %v6460_v2 = vsel %vm230_vm2, %v6366_v37, -inf }
0x2174   :  { %6461 = vmax.xlane.f32.xlu1 %v6460_v2 }
0x2178   :  { %v6451_v3 = vpop.f32.mrb[208].mxu1 }
0x2179   :  { %v6452_v36 = vadd.f32 %v10868_v25, %v6451_v3  ;;  %v9175_v58 = vpop.f32.mrb[209].mxu1  ;;  %v8038_v25 = vld [vmem:[%s11393_s4 + $0x360] sm:$0xff] }
0x217a   :  { %v6454_v56 = vpop.f32.mrb[210].mxu1  ;;  %v6757_v16 = vpack.c.bf16 %v8039_v17, %v8038_v25 }
0x217b   :  { %v9176_v28 = vpop.f32.mrb[211].mxu1  ;;  %v6466_v8 = vsel %vm230_vm2, %v6452_v36, -inf }
0x217c   :  { %6467 = vmax.xlane.f32.xlu1 %v6466_v8 }
0x21f8   :  { %v6459_v9 = vpop.xlane.xlu0 %6458 }
0x21f9   :  { %v6469_v41 = vsub.f32 %v6320_v29, %v6459_v9 }
0x21fb   :  { %v6473_v13 = vmul.f32 1.442695, %v6469_v41 }
0x21fd   :  { %9483 = vpow2.f32 %v6473_v13 }
0x2200   :  { %v6465_v14 = vpop.xlane.xlu0 %6464 }
0x2201   :  { %v6471_v18 = vsub.f32 %v6409_v60, %v6465_v14  ;;  %v6462_v20 = vpop.xlane.xlu1 %6461 }
0x2202   :  { %v6470_v6 = vsub.f32 %v6366_v37, %v6462_v20  ;;  %v8052_v20 = vld [vmem:[%s11393_s4 + $0x468] sm:$0xff] }
0x2203   :  { %v6477_v21 = vmul.f32 1.442695, %v6471_v18  ;;  %v8051_v18 = vld [vmem:[%s11393_s4 + $0x460] sm:$0xff] }
0x2204   :  { %v6475_v7 = vmul.f32 1.442695, %v6470_v6 }
0x2205   :  { %9485 = vpow2.f32 %v6477_v21 }
0x2206   :  { %9487 = vpow2.f32 %v6475_v7 }
0x2207   :  { %v9484_v10 = vpop.eup %9483 }
0x2208   :  { %v6481_v12 = vsel %vm230_vm2, %v9484_v10, 0.0  ;;  %v6493_v24 = vpack.c.bf16 %v9484_v10, %v9484_v10 }
0x2209   :  { %v6468_v27 = vpop.xlane.xlu1 %6467  ;;  %6482 = vadd.xlane.f32.xlu0 %v6481_v12 }
0x220a   :  { %v6472_v30 = vsub.f32 %v6452_v36, %v6468_v27  ;;  %9180 = vmatmul.mubr.msk.bf16.vlgmr.msra.gmra.mrb[224].mxu0 %vm230_vm2, %v6493_v24  ;;  %v6871_v27 = vpack.c.bf16 %v8052_v20, %v8051_v18  ;;  %v9542_v20 = vld [vmem:[%s11396_s2 + $0x1] ss:$0 sm:$0xff] }
0x220b   :  { %9190 = vmatpush3.bf16.msra.mxu0 %v6503_v50  ;;  %9191 = vmatprep.mubr.msk.bf16.mxu0 %vm9544_vm0, %v9543_v0 }
0x220c   :  { %v6479_v33 = vmul.f32 1.442695, %v6472_v30  ;;  %9207 = vmatprep.subr.bf16.mxu0 %v6757_v16 }
0x220e   :  { %9489 = vpow2.f32 %v6479_v33 }
0x220f   :  { %v9486_v32 = vpop.eup %9485 }
0x2210   :  { %v9488_v42 = vpop.eup %9487  ;;  %v6487_v15 = vsel %vm230_vm2, %v9486_v32, 0.0  ;;  %v6495_v43 = vpack.c.bf16 %v9486_v32, %v9486_v32  ;;  %v8049_v32 = vld [vmem:[%s11395_s5 + $0x1f] ss:$0 sm:$0xff] }
0x2211   :  { %6488 = vadd.xlane.f32.xlu0 %v6487_v15  ;;  %v6484_v45 = vsel %vm230_vm2, %v9488_v42, 0.0  ;;  %v6494_v47 = vpack.c.bf16 %v9488_v42, %v9488_v42  ;;  %v6872_v42 = vpack.c.bf16 %v8054_v34, %v8053_v31  ;;  %v8042_v15 = vld [vmem:[%s11395_s5 + $0x1b] ss:$0 sm:$0xff] }
0x2212   :  { %6485 = vadd.xlane.f32.xlu1 %v6484_v45  ;;  %9192 = vmatmul.mubr.msk.bf16.vlgmr.msra.gmra.mrb[228].mxu0 %vm230_vm2, %v6495_v43 }
0x2213   :  { %9186 = vmatmul.mubr.msk.bf16.vlgmr.msra.gmra.mrb[212].mxu1 %vm230_vm2, %v6494_v47  ;;  %9208 = vmatpush3.bf16.msra.mxu0 %v6757_v16 }
0x2214   :  { %9196 = vmatpush3.bf16.msra.mxu1 %v11142_v52  ;;  %9211 = vmatprep.mubr.msk.bf16.mxu0 %vm73_vm1, %v10778_v5  ;;  %v8047_v5 = vld [vmem:[%s11393_s4 + $0x3f0] sm:$0xff] }
0x2215   :  { %9209 = vmatprep.subr.bf16.mxu0 %v6758_v35  ;;  %9197 = vmatprep.mubr.msk.bf16.mxu1 %vm9544_vm0, %v9543_v0  ;;  %v6819_v51 = vpack.c.bf16 %v8048_v48, %v8047_v5 }
0x2217   :  { %9210 = vmatpush3.bf16.msra.mxu0 %v6758_v35 }
0x2218   :  { %v9490_v50 = vpop.eup %9489  ;;  %9215 = vmatprep.subr.bf16.mxu0 %v9543_v0 }
0x2219   :  { %v6490_v29 = vsel %vm230_vm2, %v9490_v50, 0.0  ;;  %v6496_v39 = vpack.c.bf16 %v9490_v50, %v9490_v50 }
0x221a   :  { %6491 = vadd.xlane.f32.xlu1 %v6490_v29  ;;  %9212 = vmatmul.mubr.msk.bf16.vlgmr.msra.gmra.mrb[232].mxu0 %vm73_vm1, %v10798_v38  ;;  %v8035_v38 = vld [vmem:[%s11397_s6 + $0x50] sm:$0xff] }
0x221b   :  { %9198 = vmatmul.mubr.msk.bf16.vlgmr.msra.gmra.mrb[216].mxu1 %vm230_vm2, %v6496_v39  ;;  %9216 = vmatpush3.bf16.msra.mxu0 %v6818_v59  ;;  %v6689_v52 = vpack.c.bf16 %v8035_v38, %v8035_v38 }
0x221c   :  { %9217 = vmatprep.subr.bf16.mxu0 %v9543_v0  ;;  %9219 = vmatprep.mubr.msk.bf16.mxu0 %vm9544_vm0, %v9543_v0 }
0x221d   :  { %9335 = vmatprep.subr.msk.bf16.mxu1 %vm348_vm3, %v6689_v52  ;;  %v6697_v53 = vsel %vm348_vm3, %v6689_v52, 0 }
0x221e   :  { %9202 = vmatpush3.bf16.msra.mxu1 %v6697_v53 }
0x221f   :  { %9218 = vmatpush3.bf16.msra.mxu0 %v6819_v51  ;;  %9223 = vmatprep.subr.bf16.mxu1 %v9543_v0 }
0x2220   :  { %9231 = vmatprep.subr.bf16.mxu0 %v9543_v0 }
0x2222   :  { %9220 = vmatmul.mubr.msk.bf16.vlgmr.msra.gmra.mrb[236].mxu0 %vm73_vm1, %v10810_v44 }
0x2223   :  { %9233 = vmatprep.mubr.msk.bf16.mxu0 %vm9544_vm0, %v9543_v0 }
0x2296   :  { %v6483_v40 = vpop.xlane.xlu0 %6482 }
0x2297   :  { %9491 = vrcp.f32 %v6483_v40 }
0x229e   :  { %v6489_v37 = vpop.xlane.xlu0 %6488 }
0x229f   :  { %v6486_v54 = vpop.xlane.xlu1 %6485 }
0x22a0   :  { %9493 = vrcp.f32 %v6486_v54 }
0x22a1   :  { %9495 = vrcp.f32 %v6489_v37  ;;  %v9492_v46 = vpop.eup %9491  ;;  %v8055_v37 = vld [vmem:[%s11395_s5 + $0x23] ss:$0 sm:$0xff] }
0x22a7   :  { %v6492_v55 = vpop.xlane.xlu1 %6491 }
0x22a8   :  { %9497 = vrcp.f32 %v6492_v55 }
0x22aa   :  { %v9494_v63 = vpop.eup %9493 }
0x22ab   :  { %v9496_v13 = vpop.eup %9495 }
0x22b2   :  { %v9498_v6 = vpop.eup %9497 }
0x22dd   :  { %v6539_v57 = vpop.f32.mrb[224].mxu0 }
0x22de   :  { %v9181_v60 = vpop.f32.mrb[225].mxu0  ;;  %v6681_v3 = vmul.f32 %v9492_v46, %v6539_v57 }
0x22df   :  { %v6542_v4 = vpop.f32.mrb[226].mxu0 }
0x22e0   :  { %v9182_v61 = vpop.f32.mrb[227].mxu0 }
0x22e5   :  { %v6628_v62 = vpop.f32.mrb[228].mxu0 }
0x22e6   :  { %v6585_v1 = vpop.f32.mrb[212].mxu1  ;;  %v9193_v2 = vpop.f32.mrb[229].mxu0  ;;  %v6683_v25 = vmul.f32 %v9496_v13, %v6628_v62 }
0x22e7   :  { %v6682_v36 = vmul.f32 %v9494_v63, %v6585_v1  ;;  %v9187_v58 = vpop.f32.mrb[213].mxu1  ;;  %v6631_v56 = vpop.f32.mrb[230].mxu0 }
0x22e8   :  { %v6588_v28 = vpop.f32.mrb[214].mxu1  ;;  %v9194_v8 = vpop.f32.mrb[231].mxu0 }
0x22e9   :  { %v6687_v9 = vpack.c.bf16 %v6682_v36, %v6681_v3  ;;  %v9188_v41 = vpop.f32.mrb[215].mxu1  ;;  %v9541_v28 = vld [vmem:[%s11396_s2] ss:$0 sm:$0xff] }
0x22eb   :  { %9203 = vmatprep.mubr.msk.bf16.mxu1 %vm230_vm2, %v6687_v9 }
0x22ed   :  { %v9213_v14 = vpop.f32.mrb[232].mxu0 }
0x22ee   :  { %v6671_v21 = vpop.f32.mrb[216].mxu1  ;;  %v6798_v7 = vpop.f32.mrb[233].mxu0  ;;  %v6807_v51 = vadd.f32 %v9213_v14, %v8042_v15 }
0x22ef   :  { %v6684_v17 = vmul.f32 %v9498_v6, %v6671_v21  ;;  %v9199_v10 = vpop.f32.mrb[217].mxu1  ;;  %v9214_v12 = vpop.f32.mrb[234].mxu0  ;;  %v6799_v22 = vadd.f32 %v8042_v15, %v6798_v7 }
0x22f0   :  { %v6674_v24 = vpop.f32.mrb[218].mxu1  ;;  %v6801_v16 = vpop.f32.mrb[235].mxu0  ;;  %v6810_v40 = vadd.f32 %v9214_v12, %v8042_v15 }
0x22f1   :  { %v6688_v30 = vpack.c.bf16 %v6684_v17, %v6683_v25  ;;  %v9200_v33 = vpop.f32.mrb[219].mxu1  ;;  %v6919_v48 = vmul.f32 0.35355338, %v6799_v22  ;;  %v6802_v39 = vadd.f32 %v8042_v15, %v6801_v16 }
0x22f2   :  { %v6922_v60 = vmul.f32 0.35355338, %v6810_v40 }
0x22f3   :  { %9204 = vmatmul.mubr.msk.bf16.vlgmr.msra.gmra.mrb[196].mxu1 %vm230_vm2, %v6688_v30  ;;  %v6923_v38 = vpack.c.bf16 %v6919_v48, %v6919_v48  ;;  %v6920_v53 = vmul.f32 0.35355338, %v6802_v39 }
0x22f4   :  { %9224 = vmatpush3.bf16.msra.mxu1 %v6871_v27  ;;  %9227 = vmatprep.mubr.msk.bf16.mxu1 %vm9544_vm0, %v9543_v0  ;;  %v6926_v4 = vpack.c.bf16 %v6922_v60, %v6922_v60 }
0x22f5   :  { %v6859_v43 = vpop.f32.mrb[236].mxu0  ;;  %9225 = vmatprep.subr.bf16.mxu1 %v9543_v0  ;;  %v6924_v54 = vpack.c.bf16 %v6920_v53, %v6920_v53 }
0x22f6   :  { %v6860_v45 = vadd.f32 %v8049_v32, %v6859_v43  ;;  %v9221_v47 = vpop.f32.mrb[237].mxu0 }
0x22f7   :  { %v6862_v35 = vpop.f32.mrb[238].mxu0 }
0x22f8   :  { %v6927_v19 = vpack.c.bf16 %v6860_v45, %v6860_v45  ;;  %9226 = vmatpush3.bf16.msra.mxu1 %v6872_v42  ;;  %v6863_v59 = vadd.f32 %v8049_v32, %v6862_v35  ;;  %v9222_v50 = vpop.f32.mrb[239].mxu0 }
0x22f9   :  { %9237 = vmatprep.subr.bf16.mxu1 %v9543_v0 }
0x22fa   :  { %v6933_v5 = vsel %vm230_vm2, %v6927_v19, 0  ;;  %v6928_v29 = vpack.c.bf16 %v6863_v59, %v6863_v59 }
0x22fb   :  { %9228 = vmatmul.mubr.msk.bf16.vlgmr.msra.gmra.mrb[220].mxu1 %vm73_vm1, %v10810_v44  ;;  %9232 = vmatpush3.bf16.xpose.msra.mxu0 %v6933_v5  ;;  %v6921_v44 = vmul.f32 0.35355338, %v6807_v51 }
0x22fc   :  { %9243 = vmatprep.subr.bf16.mxu0 %v9543_v0  ;;  %9239 = vmatprep.mubr.msk.bf16.mxu1 %vm9544_vm0, %v9543_v0  ;;  %v6979_v52 = vsel %vm230_vm2, %v6928_v29, 0 }
0x22fd   :  { %v6925_v57 = vpack.c.bf16 %v6921_v44, %v6921_v44 }
0x2301   :  { %9238 = vmatpush3.bf16.xpose.msra.mxu1 %v6979_v52 }
0x2302   :  { %9234 = vmatmul.mubr.msk.bf16.vlgmr.msra.gmra.mrb[240].mxu0 %vm230_vm2, %v6923_v38  ;;  %9249 = vmatprep.subr.bf16.mxu1 %v9543_v0 }
0x2303   :  { %9244 = vmatpush3.bf16.xpose.msra.mxu0 %v6933_v5  ;;  %9245 = vmatprep.mubr.msk.bf16.mxu0 %vm9544_vm0, %v9543_v0 }
0x2304   :  { %9255 = vmatprep.subr.bf16.mxu0 %v9543_v0 }
0x2308   :  { %9240 = vmatmul.mubr.msk.bf16.vlgmr.msra.gmra.mrb[224].mxu1 %vm230_vm2, %v6924_v54 }
0x2309   :  { %9250 = vmatpush3.bf16.xpose.msra.mxu1 %v6979_v52  ;;  %9251 = vmatprep.mubr.msk.bf16.mxu1 %vm9544_vm0, %v9543_v0 }
0x230a   :  { %9246 = vmatmul.mubr.msk.bf16.vlgmr.msra.gmra.mrb[244].mxu0 %vm230_vm2, %v6925_v57  ;;  %9261 = vmatprep.subr.bf16.mxu1 %v9543_v0 }
0x230b   :  { %9257 = vmatprep.mubr.msk.bf16.mxu0 %vm9544_vm0, %v9543_v0 }
0x2310   :  { %9252 = vmatmul.mubr.msk.bf16.vlgmr.msra.gmra.mrb[228].mxu1 %vm230_vm2, %v6926_v4 }
0x2311   :  { %9263 = vmatprep.mubr.msk.bf16.mxu1 %vm9544_vm0, %v9543_v0 }
0x23ce   :  { %v6912_v61 = vpop.f32.mrb[220].mxu1 }
0x23cf   :  { %v6913_v55 = vadd.f32 %v8055_v37, %v6912_v61  ;;  %v9229_v46 = vpop.f32.mrb[221].mxu1 }
0x23d0   :  { %v6915_v62 = vpop.f32.mrb[222].mxu1 }
0x23d1   :  { %v7147_v63 = vpack.c.bf16 %v6913_v55, %v6913_v55  ;;  %v6916_v1 = vadd.f32 %v8055_v37, %v6915_v62  ;;  %v9230_v2 = vpop.f32.mrb[223].mxu1  ;;  %v8065_v55 = vld [vmem:[%s11397_s6 + $0x58] sm:$0xff] }
0x23d2   :  { %v7339_v46 = vpack.c.bf16 %v8065_v55, %v8065_v55 }
0x23d3   :  { %v7153_v3 = vsel %vm348_vm3, %v7147_v63, 0  ;;  %v7148_v36 = vpack.c.bf16 %v6916_v1, %v6916_v1 }
0x23d4   :  { %9256 = vmatpush3.bf16.msra.mxu0 %v7153_v3  ;;  %v7347_v62 = vsel %vm348_vm3, %v7339_v46, 0 }
0x23d5   :  { %v11261_v58 = vsel %vm348_vm3, %v7148_v36, 0  ;;  %v6969_v56 = vpop.f32.mrb[240].mxu0  ;;  %9267 = vmatprep.subr.bf16.mxu0 %v9543_v0 }
0x23d6   :  { %v6970_v8 = vadd.f32 %v9541_v28, %v6969_v56  ;;  %9262 = vmatpush3.bf16.msra.mxu1 %v11261_v58  ;;  %v9235_v9 = vpop.f32.mrb[241].mxu0 }
0x23d7   :  { %v6972_v41 = vpop.f32.mrb[242].mxu0  ;;  %9273 = vmatprep.subr.bf16.mxu1 %v9543_v0 }
0x23d8   :  { %v9236_v13 = vpop.f32.mrb[243].mxu0  ;;  %v7107_v14 = vsel %vm230_vm2, %v6970_v8, -inf }
0x23d9   :  { %7108 = vmax.xlane.f32.xlu0 %v7107_v14 }
0x23db   :  { %v7015_v18 = vpop.f32.mrb[224].mxu1 }
0x23dc   :  { %v7016_v6 = vadd.f32 %v9542_v20, %v7015_v18  ;;  %v9241_v21 = vpop.f32.mrb[225].mxu1 }
0x23dd   :  { %v7018_v7 = vpop.f32.mrb[226].mxu1  ;;  %v7058_v25 = vpop.f32.mrb[244].mxu0 }
0x23de   :  { %v9242_v17 = vpop.f32.mrb[227].mxu1  ;;  %v7059_v10 = vadd.f32 %v9541_v28, %v7058_v25  ;;  %v7110_v12 = vsel %vm230_vm2, %v7016_v6, -inf  ;;  %v9247_v24 = vpop.f32.mrb[245].mxu0 }
0x23df   :  { %7111 = vmax.xlane.f32.xlu1 %v7110_v12  ;;  %v7061_v16 = vpop.f32.mrb[246].mxu0 }
0x23e0   :  { %v9248_v27 = vpop.f32.mrb[247].mxu0  ;;  %v7113_v30 = vsel %vm230_vm2, %v7059_v10, -inf }
0x23e1   :  { %7114 = vmax.xlane.f32.xlu0 %v7113_v30 }
0x23e3   :  { %v7101_v33 = vpop.f32.mrb[228].mxu1 }
0x23e4   :  { %v7102_v31 = vadd.f32 %v9542_v20, %v7101_v33  ;;  %v9253_v34 = vpop.f32.mrb[229].mxu1 }
0x23e5   :  { %v7104_v32 = vpop.f32.mrb[230].mxu1 }
0x23e6   :  { %v9254_v42 = vpop.f32.mrb[231].mxu1  ;;  %v7116_v15 = vsel %vm230_vm2, %v7102_v31, -inf }
0x23e7   :  { %7117 = vmax.xlane.f32.xlu1 %v7116_v15  ;;  %v8068_v42 = vld [vmem:[%s11398_s9 + $0x2] ss:$0 sm:$0xff] }
0x2466   :  { %v7109_v43 = vpop.xlane.xlu0 %7108 }
0x2467   :  { %v7119_v45 = vsub.f32 %v6970_v8, %v7109_v43 }
0x2469   :  { %v7123_v47 = vmul.f32 1.442695, %v7119_v45 }
0x246b   :  { %9499 = vpow2.f32 %v7123_v47 }
0x246c   :  { %v7112_v35 = vpop.xlane.xlu1 %7111 }
0x246d   :  { %v7120_v22 = vsub.f32 %v7016_v6, %v7112_v35 }
0x246e   :  { %v7115_v19 = vpop.xlane.xlu0 %7114 }
0x246f   :  { %v7125_v59 = vmul.f32 1.442695, %v7120_v22  ;;  %v7121_v50 = vsub.f32 %v7059_v10, %v7115_v19 }
0x2471   :  { %9501 = vpow2.f32 %v7125_v59  ;;  %v7127_v5 = vmul.f32 1.442695, %v7121_v50 }
0x2473   :  { %9503 = vpow2.f32 %v7127_v5 }
0x2474   :  { %v7118_v48 = vpop.xlane.xlu1 %7117 }
0x2475   :  { %v9500_v29 = vpop.eup %9499  ;;  %v7122_v39 = vsub.f32 %v7102_v31, %v7118_v48 }
0x2476   :  { %v7131_v51 = vsel %vm230_vm2, %v9500_v29, 0.0  ;;  %v7143_v38 = vpack.c.bf16 %v9500_v29, %v9500_v29 }
0x2477   :  { %v7129_v52 = vmul.f32 1.442695, %v7122_v39  ;;  %7132 = vadd.xlane.f32.xlu0 %v7131_v51 }
0x2478   :  { %9258 = vmatmul.mubr.msk.bf16.vlgmr.msra.gmra.mrb[248].mxu0 %vm230_vm2, %v7143_v38 }
0x2479   :  { %9505 = vpow2.f32 %v7129_v52  ;;  %9268 = vmatpush3.bf16.msra.mxu0 %v7153_v3  ;;  %9269 = vmatprep.mubr.msk.bf16.mxu0 %vm9544_vm0, %v9543_v0 }
0x247b   :  { %v9502_v53 = vpop.eup %9501 }
0x247c   :  { %v7134_v44 = vsel %vm230_vm2, %v9502_v53, 0.0  ;;  %v7144_v40 = vpack.c.bf16 %v9502_v53, %v9502_v53 }
0x247d   :  { %v9504_v54 = vpop.eup %9503  ;;  %7135 = vadd.xlane.f32.xlu1 %v7134_v44 }
0x247e   :  { %9264 = vmatmul.mubr.msk.bf16.vlgmr.msra.gmra.mrb[232].mxu1 %vm230_vm2, %v7144_v40  ;;  %v7137_v57 = vsel %vm230_vm2, %v9504_v54, 0.0  ;;  %v7145_v60 = vpack.c.bf16 %v9504_v54, %v9504_v54 }
0x247f   :  { %9274 = vmatpush3.bf16.msra.mxu1 %v11261_v58  ;;  %7138 = vadd.xlane.f32.xlu0 %v7137_v57 }
0x2480   :  { %9270 = vmatmul.mubr.msk.bf16.vlgmr.msra.gmra.mrb[252].mxu0 %vm230_vm2, %v7145_v60  ;;  %9275 = vmatprep.mubr.msk.bf16.mxu1 %vm9544_vm0, %v9543_v0 }
0x2481   :  { %9336 = vmatprep.subr.msk.bf16.mxu1 %vm348_vm3, %v7339_v46 }
0x2483   :  { %v9506_v4 = vpop.eup %9505 }
0x2484   :  { %v7140_v37 = vsel %vm230_vm2, %v9506_v4, 0.0  ;;  %v7146_v61 = vpack.c.bf16 %v9506_v4, %v9506_v4 }
0x2485   :  { %7141 = vadd.xlane.f32.xlu1 %v7140_v37 }
0x2486   :  { %9276 = vmatmul.mubr.msk.bf16.vlgmr.msra.gmra.mrb[236].mxu1 %vm230_vm2, %v7146_v61 }
0x2487   :  { %9280 = vmatpush3.bf16.msra.mxu1 %v7347_v62 }
0x2504   :  { %v7133_v63 = vpop.xlane.xlu0 %7132 }
0x2505   :  { %9507 = vrcp.f32 %v7133_v63 }
0x250a   :  { %v7136_v1 = vpop.xlane.xlu1 %7135 }
0x250b   :  { %9509 = vrcp.f32 %v7136_v1 }
0x250c   :  { %v7139_v0 = vpop.xlane.xlu0 %7138 }
0x250d   :  { %9511 = vrcp.f32 %v7139_v0 }
0x250f   :  { %v9508_v28 = vpop.eup %9507 }
0x2512   :  { %v7142_v3 = vpop.xlane.xlu1 %7141 }
0x2513   :  { %9513 = vrcp.f32 %v7142_v3  ;;  %v8072_v3 = vld [vmem:[%s11399_s7 + $0x28] sm:$0xff] }
0x2515   :  { %v9510_v8 = vpop.eup %9509 }
0x2517   :  { %v9512_v10 = vpop.eup %9511 }
0x251d   :  { %v9514_v12 = vpop.eup %9513 }
0x254b   :  { %v7189_v2 = vpop.f32.mrb[248].mxu0 }
0x254c   :  { %v9259_v36 = vpop.f32.mrb[249].mxu0  ;;  %v7331_v41 = vmul.f32 %v9508_v28, %v7189_v2  ;;  %v8071_v2 = vld [vmem:[%s11399_s7 + $0x20] sm:$0xff] }
0x254d   :  { %v7192_v58 = vpop.f32.mrb[250].mxu0  ;;  %v7492_v36 = vpack.c.bf16 %v8072_v3, %v8071_v2  ;;  %v8086_v3 = vld [vmem:[%s11398_s9 + $0x4] ss:$0 sm:$0xff] }
0x254e   :  { %v9260_v56 = vpop.f32.mrb[251].mxu0  ;;  %v8073_v58 = vld [vmem:[%s11399_s7 + $0x30] sm:$0xff] }
0x254f   :  { %9285 = vmatprep.subr.bf16.mxu0 %v7492_v36  ;;  %v8074_v56 = vld [vmem:[%s11399_s7 + $0x38] sm:$0xff] }
0x2550   :  { %9286 = vmatpush3.bf16.msra.mxu0 %v7492_v36  ;;  %v7493_v28 = vpack.c.bf16 %v8074_v56, %v8073_v58 }
0x2551   :  { %v7235_v9 = vpop.f32.mrb[232].mxu1 }
0x2552   :  { %v7332_v13 = vmul.f32 %v9510_v8, %v7235_v9  ;;  %v9265_v14 = vpop.f32.mrb[233].mxu1  ;;  %9287 = vmatprep.subr.bf16.mxu0 %v7493_v28  ;;  %v8078_v8 = vld [vmem:[%s11400_s8 + $0x40] sm:$0xff]  ;;  %v8079_v9 = vld [vmem:[%s11400_s8 + $0x48] sm:$0xff] }
0x2553   :  { %v7238_v18 = vpop.f32.mrb[234].mxu1  ;;  %v7278_v20 = vpop.f32.mrb[252].mxu0 }
0x2554   :  { %v7337_v6 = vpack.c.bf16 %v7332_v13, %v7331_v41  ;;  %v9266_v21 = vpop.f32.mrb[235].mxu1  ;;  %v9271_v7 = vpop.f32.mrb[253].mxu0  ;;  %v7333_v16 = vmul.f32 %v9512_v10, %v7278_v20  ;;  %9288 = vmatpush3.bf16.msra.mxu0 %v7493_v28  ;;  %v7569_v41 = vpack.c.bf16 %v8079_v9, %v8078_v8 }
0x2555   :  { %v7281_v25 = vpop.f32.mrb[254].mxu0 }
0x2556   :  { %9281 = vmatprep.mubr.msk.bf16.mxu1 %vm230_vm2, %v7337_v6  ;;  %v9272_v17 = vpop.f32.mrb[255].mxu0  ;;  %9293 = vmatprep.subr.bf16.mxu0 %v7569_v41 }
0x2559   :  { %v7321_v24 = vpop.f32.mrb[236].mxu1 }
0x255a   :  { %v7334_v27 = vmul.f32 %v9514_v12, %v7321_v24  ;;  %v9277_v30 = vpop.f32.mrb[237].mxu1 }
0x255b   :  { %v7324_v33 = vpop.f32.mrb[238].mxu1 }
0x255c   :  { %v7338_v31 = vpack.c.bf16 %v7334_v27, %v7333_v16  ;;  %v9278_v34 = vpop.f32.mrb[239].mxu1  ;;  %v8069_v27 = vld [vmem:[%s11398_s9 + $0xb] ss:$0 sm:$0xff] }
0x255e   :  { %9282 = vmatmul.mubr.msk.bf16.vlgmr.msra.gmra.mrb[196].mxu1 %vm230_vm2, %v7338_v31 }
0x2631   :  { %v9283_v32 = vpop.f32.mrb[196].mxu1 }
0x2632   :  { %v7383_v15 = vpop.f32.mrb[197].mxu1  ;;  %v7404_v43 = vadd.f32 %v9283_v32, %v10789_v26 }
0x2633   :  { %v7402_v45 = vadd.f32 %v7383_v15, %v10768_v23  ;;  %v9284_v47 = vpop.f32.mrb[198].mxu1 }
0x2634   :  { %v7386_v35 = vpop.f32.mrb[199].mxu1  ;;  %v7405_v22 = vadd.f32 %v9284_v47, %v10791_v49  ;;  %v7413_v50 = vadd.f32 %v8068_v42, %v7404_v43 }
0x2635   :  { %v7403_v19 = vadd.f32 %v7386_v35, %v10770_v11  ;;  %v7411_v59 = vadd.f32 %v8068_v42, %v7402_v45 }
0x2636   :  { %v7414_v29 = vadd.f32 %v8068_v42, %v7405_v22  ;;  %v7423_v26 = vsel %vm73_vm1, %v7413_v50, 0.0 }
0x2637   :  { %v7417_v5 = vsel %vm73_vm1, %v7411_v59, 0.0  ;;  %v7412_v48 = vadd.f32 %v8068_v42, %v7403_v19  ;;  %v8070_v42 = vld [vmem:[%s11398_s9 + $0xc] ss:$0 sm:$0xff] }
0x2638   :  { %7418 = vadd.xlane.f32.xlu0 %v7417_v5  ;;  %v7426_v23 = vsel %vm73_vm1, %v7414_v29, 0.0  ;;  %v8080_v5 = vld [vmem:[%s11400_s8 + $0x50] sm:$0xff] }
0x2639   :  { %v7420_v39 = vsel %vm73_vm1, %v7412_v48, 0.0 }
0x263a   :  { %7421 = vadd.xlane.f32.xlu1 %v7420_v39 }
0x263c   :  { %7424 = vadd.xlane.f32.xlu0 %v7423_v26 }
0x263e   :  { %7427 = vadd.xlane.f32.xlu1 %v7426_v23 }
0x26c5   :  { %v7419_v51 = vpop.xlane.xlu0 %7418 }
0x26c6   :  { %v7429_v49 = vmul.f32 0.03125, %v7419_v51  ;;  %v8082_v51 = vld [vmem:[%s11400_s8 + $0x60] sm:$0xff] }
0x26c7   :  { %v7422_v38 = vpop.xlane.xlu1 %7421 }
0x26c8   :  { %v7433_v11 = vsub.f32 %v7411_v59, %v7429_v49  ;;  %v7430_v52 = vmul.f32 0.03125, %v7422_v38  ;;  %v8083_v49 = vld [vmem:[%s11400_s8 + $0x68] sm:$0xff] }
0x26c9   :  { %v7425_v53 = vpop.xlane.xlu0 %7424  ;;  %v7571_v38 = vpack.c.bf16 %v8083_v49, %v8082_v51 }
0x26ca   :  { %v7434_v44 = vsub.f32 %v7412_v48, %v7430_v52  ;;  %v7431_v40 = vmul.f32 0.03125, %v7425_v53  ;;  %v7437_v54 = vmul.f32 %v7433_v11, %v7433_v11  ;;  %v8081_v48 = vld [vmem:[%s11400_s8 + $0x58] sm:$0xff] }
0x26cb   :  { %v7428_v57 = vpop.xlane.xlu1 %7427  ;;  %v7570_v23 = vpack.c.bf16 %v8081_v48, %v8080_v5  ;;  %v8085_v52 = vld [vmem:[%s11400_s8 + $0x78] sm:$0xff] }
0x26cc   :  { %v7435_v60 = vsub.f32 %v7413_v50, %v7431_v40  ;;  %v7432_v4 = vmul.f32 0.03125, %v7428_v57  ;;  %v7441_v37 = vsel %vm73_vm1, %v7437_v54, 0.0  ;;  %v7438_v61 = vmul.f32 %v7434_v44, %v7434_v44 }
0x26cd   :  { %7442 = vadd.xlane.f32.xlu0 %v7441_v37 }
0x26ce   :  { %v7436_v55 = vsub.f32 %v7414_v29, %v7432_v4  ;;  %v7444_v46 = vsel %vm73_vm1, %v7438_v61, 0.0  ;;  %v7439_v62 = vmul.f32 %v7435_v60, %v7435_v60 }
0x26cf   :  { %7445 = vadd.xlane.f32.xlu1 %v7444_v46 }
0x26d0   :  { %v7447_v63 = vsel %vm73_vm1, %v7439_v62, 0.0  ;;  %v7440_v1 = vmul.f32 %v7436_v55, %v7436_v55 }
0x26d1   :  { %7448 = vadd.xlane.f32.xlu0 %v7447_v63 }
0x26d2   :  { %v7450_v0 = vsel %vm73_vm1, %v7440_v1, 0.0 }
0x26d3   :  { %7451 = vadd.xlane.f32.xlu1 %v7450_v0 }
0x275a   :  { %v7443_v13 = vpop.xlane.xlu0 %7442 }
0x275b   :  { %v7453_v14 = vmul.f32 0.03125, %v7443_v13 }
0x275c   :  { %v7446_v18 = vpop.xlane.xlu1 %7445 }
0x275d   :  { %v7457_v20 = vadd.f32 1e-05, %v7453_v14  ;;  %v7454_v6 = vmul.f32 0.03125, %v7446_v18 }
0x275e   :  { %v7449_v21 = vpop.xlane.xlu0 %7448 }
0x275f   :  { %9515 = vrsqrt.f32 %v7457_v20  ;;  %v7458_v7 = vadd.f32 1e-05, %v7454_v6  ;;  %v7455_v25 = vmul.f32 0.03125, %v7449_v21 }
0x2760   :  { %v7452_v17 = vpop.xlane.xlu1 %7451 }
0x2761   :  { %9517 = vrsqrt.f32 %v7458_v7  ;;  %v7459_v10 = vadd.f32 1e-05, %v7455_v25  ;;  %v7456_v12 = vmul.f32 0.03125, %v7452_v17 }
0x2763   :  { %9519 = vrsqrt.f32 %v7459_v10  ;;  %v7460_v24 = vadd.f32 1e-05, %v7456_v12 }
0x2765   :  { %9521 = vrsqrt.f32 %v7460_v24 }
0x2769   :  { %v9516_v16 = vpop.eup %9515 }
0x276a   :  { %v7465_v30 = vmul.f32 %v9516_v16, %v7433_v11  ;;  %v8084_v11 = vld [vmem:[%s11400_s8 + $0x70] sm:$0xff] }
0x276b   :  { %v9518_v33 = vpop.eup %9517  ;;  %v7572_v53 = vpack.c.bf16 %v8085_v52, %v8084_v11 }
0x276c   :  { %v7466_v31 = vmul.f32 %v9518_v33, %v7434_v44  ;;  %v7473_v34 = vmul.f32 %v8069_v27, %v7465_v30  ;;  %v8075_v44 = vld [vmem:[%s11402_s10 + $0x1] ss:$0 sm:$0xff] }
0x276d   :  { %v9520_v32 = vpop.eup %9519 }
0x276e   :  { %v7467_v15 = vmul.f32 %v9520_v32, %v7435_v60  ;;  %v7474_v43 = vmul.f32 %v8069_v27, %v7466_v31  ;;  %v7481_v22 = vadd.f32 %v8070_v42, %v7473_v34 }
0x276f   :  { %v9522_v45 = vpop.eup %9521 }
0x2770   :  { %v7475_v47 = vmul.f32 %v8069_v27, %v7467_v15  ;;  %v7468_v35 = vmul.f32 %v9522_v45, %v7436_v55  ;;  %v7482_v19 = vadd.f32 %v8070_v42, %v7474_v43 }
0x2772   :  { %v7476_v59 = vmul.f32 %v8069_v27, %v7468_v35  ;;  %v7490_v50 = vpack.c.bf16 %v7482_v19, %v7481_v22  ;;  %v7483_v29 = vadd.f32 %v8070_v42, %v7475_v47 }
0x2774   :  { %v7484_v39 = vadd.f32 %v8070_v42, %v7476_v59  ;;  %9289 = vmatprep.mubr.msk.bf16.mxu0 %vm73_vm1, %v7490_v50 }
0x2776   :  { %v7491_v26 = vpack.c.bf16 %v7484_v39, %v7483_v29 }
0x2778   :  { %9290 = vmatmul.mubr.msk.bf16.vlgmr.msra.gmra.mrb[0].mxu0 %vm73_vm1, %v7491_v26 }
0x2779   :  { %9294 = vmatpush3.bf16.msra.mxu0 %v7569_v41 }
0x277a   :  { %9295 = vmatprep.subr.bf16.mxu0 %v7570_v23 }
0x277d   :  { %9296 = vmatpush3.bf16.msra.mxu0 %v7570_v23 }
0x277e   :  { %9297 = vmatprep.subr.bf16.mxu0 %v7571_v38 }
0x2781   :  { %9298 = vmatpush3.bf16.msra.mxu0 %v7571_v38 }
0x2782   :  { %9299 = vmatprep.subr.bf16.mxu0 %v7572_v53 }
0x2785   :  { %9300 = vmatpush3.bf16.msra.mxu0 %v7572_v53 }
0x284b   :  { %v9291_v40 = vpop.f32.mrb[0].mxu0 }
0x284c   :  { %v7548_v54 = vadd.f32 %v9291_v40, %v8075_v44  ;;  %v7539_v57 = vpop.f32.mrb[1].mxu0  ;;  %v8089_v40 = vld [vmem:[%s11398_s9 + $0xd] ss:$0 sm:$0xff] }
0x284d   :  { %v7540_v60 = vadd.f32 %v8075_v44, %v7539_v57  ;;  %v9292_v4 = vpop.f32.mrb[2].mxu0 }
0x284e   :  { %v7551_v37 = vadd.f32 %v9292_v4, %v8075_v44  ;;  %v7542_v61 = vpop.f32.mrb[3].mxu0  ;;  %v7556_v46 = vmax.f32 %v7548_v54, 0.0 }
0x284f   :  { %v7543_v55 = vadd.f32 %v8075_v44, %v7542_v61  ;;  %v7554_v63 = vmax.f32 %v7540_v60, 0.0  ;;  %v8090_v60 = vld [vmem:[%s11398_s9 + $0xe] ss:$0 sm:$0xff] }
0x2850   :  { %v7557_v62 = vmax.f32 %v7551_v37, 0.0 }
0x2851   :  { %v7555_v1 = vmax.f32 %v7543_v55, 0.0 }
0x2852   :  { %v7568_v0 = vpack.c.bf16 %v7557_v62, %v7556_v46 }
0x2853   :  { %v7567_v2 = vpack.c.bf16 %v7555_v1, %v7554_v63 }
0x2855   :  { %9301 = vmatprep.mubr.msk.bf16.mxu0 %vm1900_vm4, %v7567_v2 }
0x2856   :  { %9302 = vmatmul.mubr.msk.bf16.vlgmr.msra.gmra.mrb[4].mxu0 %vm1900_vm4, %v7568_v0 }
0x2929   :  { %v9303_v36 = vpop.f32.mrb[4].mxu0 }
0x292a   :  { %v7618_v58 = vpop.f32.mrb[5].mxu0  ;;  %v7627_v56 = vadd.f32 %v9303_v36, %v8086_v3 }
0x292b   :  { %v7619_v28 = vadd.f32 %v8086_v3, %v7618_v58  ;;  %v9304_v8 = vpop.f32.mrb[6].mxu0 }
0x292c   :  { %v7621_v9 = vpop.f32.mrb[7].mxu0  ;;  %v7630_v13 = vadd.f32 %v9304_v8, %v8086_v3  ;;  %v7635_v18 = vadd.f32 %v7627_v56, %v7483_v29 }
0x292d   :  { %v7633_v41 = vadd.f32 %v7619_v28, %v7481_v22  ;;  %v7622_v14 = vadd.f32 %v8086_v3, %v7621_v9 }
0x292e   :  { %v7636_v21 = vadd.f32 %v7630_v13, %v7484_v39  ;;  %v7645_v25 = vsel %vm73_vm1, %v7635_v18, 0.0 }
0x292f   :  { %v7634_v20 = vadd.f32 %v7622_v14, %v7482_v19  ;;  %v7639_v6 = vsel %vm73_vm1, %v7633_v41, 0.0 }
0x2930   :  { %7640 = vadd.xlane.f32.xlu0 %v7639_v6  ;;  %v7648_v17 = vsel %vm73_vm1, %v7636_v21, 0.0 }
0x2931   :  { %v7642_v7 = vsel %vm73_vm1, %v7634_v20, 0.0 }
0x2932   :  { %7643 = vadd.xlane.f32.xlu1 %v7642_v7 }
0x2934   :  { %7646 = vadd.xlane.f32.xlu0 %v7645_v25 }
0x2936   :  { %7649 = vadd.xlane.f32.xlu1 %v7648_v17 }
0x29bd   :  { %v7641_v10 = vpop.xlane.xlu0 %7640 }
0x29be   :  { %v7651_v12 = vmul.f32 0.03125, %v7641_v10 }
0x29bf   :  { %v7644_v24 = vpop.xlane.xlu1 %7643 }
0x29c0   :  { %v7655_v16 = vsub.f32 %v7633_v41, %v7651_v12  ;;  %v7652_v27 = vmul.f32 0.03125, %v7644_v24 }
0x29c1   :  { %v7647_v30 = vpop.xlane.xlu0 %7646 }
0x29c2   :  { %v7656_v33 = vsub.f32 %v7634_v20, %v7652_v27  ;;  %v7653_v31 = vmul.f32 0.03125, %v7647_v30  ;;  %v7659_v34 = vmul.f32 %v7655_v16, %v7655_v16 }
0x29c3   :  { %v7650_v32 = vpop.xlane.xlu1 %7649 }
0x29c4   :  { %v7657_v42 = vsub.f32 %v7635_v18, %v7653_v31  ;;  %v7654_v15 = vmul.f32 0.03125, %v7650_v32  ;;  %v7663_v43 = vsel %vm73_vm1, %v7659_v34, 0.0  ;;  %v7660_v45 = vmul.f32 %v7656_v33, %v7656_v33 }
0x29c5   :  { %7664 = vadd.xlane.f32.xlu0 %v7663_v43 }
0x29c6   :  { %v7658_v47 = vsub.f32 %v7636_v21, %v7654_v15  ;;  %v7666_v35 = vsel %vm73_vm1, %v7660_v45, 0.0  ;;  %v7661_v22 = vmul.f32 %v7657_v42, %v7657_v42 }
0x29c7   :  { %7667 = vadd.xlane.f32.xlu1 %v7666_v35 }
0x29c8   :  { %v7669_v19 = vsel %vm73_vm1, %v7661_v22, 0.0  ;;  %v7662_v59 = vmul.f32 %v7658_v47, %v7658_v47 }
0x29c9   :  { %7670 = vadd.xlane.f32.xlu0 %v7669_v19 }
0x29ca   :  { %v7672_v50 = vsel %vm73_vm1, %v7662_v59, 0.0 }
0x29cb   :  { %7673 = vadd.xlane.f32.xlu1 %v7672_v50 }
0x2a52   :  { %v7665_v5 = vpop.xlane.xlu0 %7664 }
0x2a53   :  { %v7675_v48 = vmul.f32 0.03125, %v7665_v5 }
0x2a54   :  { %v7668_v29 = vpop.xlane.xlu1 %7667 }
0x2a55   :  { %v7679_v39 = vadd.f32 1e-05, %v7675_v48  ;;  %v7676_v26 = vmul.f32 0.03125, %v7668_v29 }
0x2a56   :  { %v7671_v23 = vpop.xlane.xlu0 %7670 }
0x2a57   :  { %9523 = vrsqrt.f32 %v7679_v39  ;;  %v7680_v51 = vadd.f32 1e-05, %v7676_v26  ;;  %v7677_v49 = vmul.f32 0.03125, %v7671_v23 }
0x2a58   :  { %v7674_v38 = vpop.xlane.xlu1 %7673 }
0x2a59   :  { %9525 = vrsqrt.f32 %v7680_v51  ;;  %v7681_v11 = vadd.f32 1e-05, %v7677_v49  ;;  %v7678_v52 = vmul.f32 0.03125, %v7674_v38 }
0x2a5b   :  { %9527 = vrsqrt.f32 %v7681_v11  ;;  %v7682_v53 = vadd.f32 1e-05, %v7678_v52 }
0x2a5d   :  { %9529 = vrsqrt.f32 %v7682_v53 }
0x2a61   :  { %v9524_v44 = vpop.eup %9523 }
0x2a62   :  { %v7687_v54 = vmul.f32 %v9524_v44, %v7655_v16 }
0x2a63   :  { %v9526_v57 = vpop.eup %9525 }
0x2a64   :  { %v7695_v4 = vmul.f32 %v8089_v40, %v7687_v54  ;;  %v7688_v37 = vmul.f32 %v9526_v57, %v7656_v33 }
0x2a65   :  { %v9528_v61 = vpop.eup %9527 }
0x2a66   :  { %v7703_v55 = vadd.f32 %v8090_v60, %v7695_v4  ;;  %v7696_v46 = vmul.f32 %v8089_v40, %v7688_v37  ;;  %v7689_v62 = vmul.f32 %v9528_v61, %v7657_v42 }
0x2a67   :  { %v9530_v63 = vpop.eup %9529 }
0x2a68   :  { %7707 = vst.msk [vmem:[%s11404_s11] sm:$0xff] %vm73_vm1, %v7703_v55  ;;  %v7704_v1 = vadd.f32 %v8090_v60, %v7696_v46  ;;  %v7697_v0 = vmul.f32 %v8089_v40, %v7689_v62  ;;  %v7690_v2 = vmul.f32 %v9530_v63, %v7658_v47 }
0x2a6a   :  { %7708 = vst.msk [vmem:[%s11404_s11 + $0x8] sm:$0xff] %vm73_vm1, %v7704_v1  ;;  %v7705_v3 = vadd.f32 %v8090_v60, %v7697_v0  ;;  %v7698_v36 = vmul.f32 %v8089_v40, %v7690_v2 }
0x2a6c   :  { %7709 = vst.msk [vmem:[%s11404_s11 + $0x10] sm:$0xff] %vm73_vm1, %v7705_v3  ;;  %v7706_v58 = vadd.f32 %v8090_v60, %v7698_v36 }
0x2a6e   :  { %7710 = vst.msk [vmem:[%s11404_s11 + $0x18] sm:$0xff] %vm73_vm1, %v7706_v58 }

</bundles_post_ra>
